<compile_context>
chip_gen: v7x
topology: tpu7x:2x2x1
jax: 0.10.0
libtpu: 0.0.40
codegen_flags: <defaults>
</compile_context>

<pallas_src>
import jax
import jax.numpy as jnp
from jax.experimental import pallas as pl
from jax.experimental.pallas import tpu as pltpu

INPUT_SIZE = 512       # layer_to_input_size['layer_final']
LAYER_WIDTH = 1024     # module default
BN_EPS = 1e-5


def _num_final_col_tiles():
    """2 final-layer column tiles (one per TensorCore) on dual-TC v7x; 1 elsewhere."""
    try:
        kind = jax.devices()[0].device_kind.lower()
    except Exception:
        return 1
    return 2 if "7" in kind else 1


def _bn_relu(h, gamma, beta):
    """BatchNorm1d (training mode, biased variance) + ReLU, all in f32."""
    mean = jnp.mean(h, axis=0, keepdims=True)
    centered = h - mean
    var = jnp.mean(centered * centered, axis=0, keepdims=True)
    hn = centered * jax.lax.rsqrt(var + BN_EPS)
    return jnp.maximum(hn * gamma + beta, 0.0)


def clip_mlp_kernel(x_ref, w1_ref, w2_ref, bn_ref, w3_ref, b3_ref, o_ref):
    # x arrives f32 (16 KiB, negligible DMA); cast to bf16 in-kernel so the
    # wrapper has no per-call convert ops.  Weights are already bf16 in HBM.
    x = x_ref[...].astype(jnp.bfloat16)

    # Linear(512 -> 1024) + BN + ReLU  (b1 folded: cancelled by batch-stat BN)
    h = jnp.dot(x, w1_ref[...], preferred_element_type=jnp.float32)
    h = _bn_relu(h, bn_ref[0:1, :], bn_ref[1:2, :])

    # Linear(1024 -> 1024) + BN + ReLU (b2 folded)
    h = jnp.dot(h.astype(jnp.bfloat16), w2_ref[...],
                preferred_element_type=jnp.float32)
    h = _bn_relu(h, bn_ref[2:3, :], bn_ref[3:4, :])

    # Final Linear(1024 -> 1024): only this layer's columns are tiled by the grid.
    o_ref[...] = (jnp.dot(h.astype(jnp.bfloat16), w3_ref[...],
                          preferred_element_type=jnp.float32)
                  + b3_ref[...])


def clip_mlp_forward(x, params):
    B = x.shape[0]
    n_tiles = _num_final_col_tiles()
    col_tile = LAYER_WIDTH // n_tiles

    bn_vec = params["bn_vec"]          # (4, 1024) f32: g1, be1, g2, be2
    args = (x, params["w1"], params["w2"], bn_vec, params["w3"], params["b3"])

    full = lambda j: (0, 0)   # constant block index -> DMA'd once per core
    col = lambda j: (0, j)    # tiled along the final feature axis

    in_specs = [
        pl.BlockSpec((B, INPUT_SIZE), full),             # x (f32)
        pl.BlockSpec((INPUT_SIZE, LAYER_WIDTH), full),   # w1 (bf16)
        pl.BlockSpec((LAYER_WIDTH, LAYER_WIDTH), full),  # w2 (bf16)
        pl.BlockSpec((4, LAYER_WIDTH), full),            # packed BN vectors (f32)
        pl.BlockSpec((LAYER_WIDTH, col_tile), col),      # w3 column tile (bf16)
        pl.BlockSpec((1, col_tile), col),                # b3 column tile (f32)
    ]
    out_spec = pl.BlockSpec((B, col_tile), col)

    return pl.pallas_call(
        clip_mlp_kernel,
        out_shape=jax.ShapeDtypeStruct((B, LAYER_WIDTH), jnp.float32),
        grid=(n_tiles,),
        in_specs=in_specs,
        out_specs=out_spec,
        compiler_params=pltpu.CompilerParams(
            dimension_semantics=("parallel",),
            vmem_limit_bytes=32 << 20,
        ),
    )(*args)


clip_mlp_forward_jit = jax.jit(clip_mlp_forward)


def init_params(key):
    """Deterministic init mimicking nn.Linear default (uniform +/- 1/sqrt(fan_in))
    and nn.BatchNorm1d default (gamma=1, beta=0). Weights stored as [in, out]
    and cast to bf16 ONCE here (outside the hot path) so the forward pass does
    no per-call converts.  b1/b2 are omitted: they are exactly cancelled by the
    train-mode BatchNorm immediately following each of the first two Linears."""
    ks = jax.random.split(key, 4)

    def linear_w(kw, fan_in, fan_out):
        bound = 1.0 / jnp.sqrt(fan_in)
        w = jax.random.uniform(kw, (fan_in, fan_out), jnp.float32, -bound, bound)
        return w.astype(jnp.bfloat16)

    w1 = linear_w(ks[0], INPUT_SIZE, LAYER_WIDTH)
    w2 = linear_w(ks[1], LAYER_WIDTH, LAYER_WIDTH)
    w3 = linear_w(ks[2], LAYER_WIDTH, LAYER_WIDTH)
    b3 = jax.random.uniform(ks[3], (1, LAYER_WIDTH), jnp.float32,
                            -1.0 / jnp.sqrt(LAYER_WIDTH), 1.0 / jnp.sqrt(LAYER_WIDTH))
    # Packed per-feature BN vectors: rows = [gamma1, beta1, gamma2, beta2]
    bn_vec = jnp.stack([
        jnp.ones((LAYER_WIDTH,), jnp.float32),
        jnp.zeros((LAYER_WIDTH,), jnp.float32),
        jnp.ones((LAYER_WIDTH,), jnp.float32),
        jnp.zeros((LAYER_WIDTH,), jnp.float32),
    ], axis=0)
    return {"w1": w1, "w2": w2, "w3": w3, "b3": b3, "bn_vec": bn_vec}


def reference_forward(x, p):
    """Pure-JAX reference mirroring the kernel numerics (bf16 matmul operands,
    f32 accumulation and f32 BN/ReLU)."""
    bn = p["bn_vec"]
    h = jnp.dot(x.astype(jnp.bfloat16), p["w1"],
                preferred_element_type=jnp.float32)
    h = _bn_relu(h, bn[0:1, :], bn[1:2, :])
    h = jnp.dot(h.astype(jnp.bfloat16), p["w2"],
                preferred_element_type=jnp.float32)
    h = _bn_relu(h, bn[2:3, :], bn[3:4, :])
    return jnp.dot(h.astype(jnp.bfloat16), p["w3"],
                   preferred_element_type=jnp.float32) + p["b3"]


if __name__ == "__main__":
    key = jax.random.PRNGKey(0)
    k_x, k_p = jax.random.split(key)

    B = 8  # small batch (>1 required for train-mode BatchNorm semantics)
    x = jax.random.normal(k_x, (B, INPUT_SIZE), jnp.float32)
    params = init_params(k_p)

    out = clip_mlp_forward_jit(x, params)
    jax.block_until_ready(out)

    ref = reference_forward(x, params)
    assert out.shape == (B, LAYER_WIDTH)
    assert jnp.allclose(out, ref, atol=2e-2, rtol=2e-2), float(
        jnp.max(jnp.abs(out - ref)))

    print("KERNEL_OK")
</pallas_src>

<mosaic_0001>
module attributes {stable_mosaic.version = 11 : i64} {
  func.func @clip_mlp_kernel(%arg0: i32, %arg1: memref<8x512xf32, #tpu.memory_space<vmem>>, %arg2: memref<512x1024xbf16, #tpu.memory_space<vmem>>, %arg3: memref<1024x1024xbf16, #tpu.memory_space<vmem>>, %arg4: memref<4x1024xf32, #tpu.memory_space<vmem>>, %arg5: memref<1024x1024xbf16, #tpu.memory_space<vmem>>, %arg6: memref<1x1024xf32, #tpu.memory_space<vmem>>, %arg7: memref<8x1024xf32, #tpu.memory_space<vmem>>) attributes {dimension_semantics = [#tpu.dimension_semantics<parallel>], iteration_bounds = array<i64: 1>, scalar_prefetch = 0 : i64, scratch_operands = 0 : i64, tpu.core_type = #tpu.core_type<tc>, window_params = [{pipeline_mode = #tpu.pipeline_mode<synchronous>, transform_indices = @transform_0, window_bounds = array<i64: 8, 512>}, {pipeline_mode = #tpu.pipeline_mode<synchronous>, transform_indices = @transform_1, window_bounds = array<i64: 512, 1024>}, {pipeline_mode = #tpu.pipeline_mode<synchronous>, transform_indices = @transform_2, window_bounds = array<i64: 1024, 1024>}, {pipeline_mode = #tpu.pipeline_mode<synchronous>, transform_indices = @transform_3, window_bounds = array<i64: 4, 1024>}, {transform_indices = @transform_4, window_bounds = array<i64: 1024, 1024>}, {transform_indices = @transform_5, window_bounds = array<i64: 1, 1024>}, {transform_indices = @transform_6, window_bounds = array<i64: 8, 1024>}]} {
    %c0 = arith.constant 0 : index
    %c0_0 = arith.constant 0 : index
    %0 = vector.load %arg1[%c0, %c0_0] : memref<8x512xf32, #tpu.memory_space<vmem>>, vector<8x512xf32>
    %1 = arith.truncf %0 : vector<8x512xf32> to vector<8x512xbf16>
    %c0_1 = arith.constant 0 : index
    %c0_2 = arith.constant 0 : index
    %2 = vector.load %arg2[%c0_1, %c0_2] : memref<512x1024xbf16, #tpu.memory_space<vmem>>, vector<512x1024xbf16>
    %cst = arith.constant dense<0.000000e+00> : vector<8x1024xf32>
    %3 = tpu.matmul %1, %2, %cst {dimension_numbers = #tpu.dot_dimension_numbers<[1], [0], [0], [1], [0, 0, 1, 1], [], []>} : vector<8x512xbf16>, vector<512x1024xbf16>, vector<8x1024xf32> -> vector<8x1024xf32>
    %c0_3 = arith.constant 0 : index
    %c0_4 = arith.constant 0 : index
    %4 = vector.load %arg4[%c0_3, %c0_4] : memref<4x1024xf32, #tpu.memory_space<vmem>>, vector<1x1024xf32>
    %c1 = arith.constant 1 : index
    %c0_5 = arith.constant 0 : index
    %5 = vector.load %arg4[%c1, %c0_5] : memref<4x1024xf32, #tpu.memory_space<vmem>>, vector<1x1024xf32>
    %cst_6 = arith.constant dense<0.000000e+00> : vector<1024xf32>
    %6 = vector.multi_reduction <add>, %3, %cst_6 [0] : vector<8x1024xf32> to vector<1024xf32>
    %7 = vector.shape_cast %6 : vector<1024xf32> to vector<1x1024xf32>
    %cst_7 = arith.constant 8.000000e+00 : f32
    %8 = vector.broadcast %cst_7 : f32 to vector<1x1024xf32>
    %9 = arith.divf %7, %8 : vector<1x1024xf32>
    %10 = vector.broadcast %9 : vector<1x1024xf32> to vector<8x1024xf32>
    %11 = arith.subf %3, %10 : vector<8x1024xf32>
    %12 = arith.mulf %11, %11 : vector<8x1024xf32>
    %cst_8 = arith.constant dense<0.000000e+00> : vector<1024xf32>
    %13 = vector.multi_reduction <add>, %12, %cst_8 [0] : vector<8x1024xf32> to vector<1024xf32>
    %14 = vector.shape_cast %13 : vector<1024xf32> to vector<1x1024xf32>
    %cst_9 = arith.constant 8.000000e+00 : f32
    %15 = vector.broadcast %cst_9 : f32 to vector<1x1024xf32>
    %16 = arith.divf %14, %15 : vector<1x1024xf32>
    %cst_10 = arith.constant 9.99999974E-6 : f32
    %17 = vector.broadcast %cst_10 : f32 to vector<1x1024xf32>
    %18 = arith.addf %16, %17 : vector<1x1024xf32>
    %19 = math.rsqrt %18 : vector<1x1024xf32>
    %20 = vector.broadcast %19 : vector<1x1024xf32> to vector<8x1024xf32>
    %21 = arith.mulf %11, %20 : vector<8x1024xf32>
    %22 = vector.broadcast %4 : vector<1x1024xf32> to vector<8x1024xf32>
    %23 = arith.mulf %21, %22 : vector<8x1024xf32>
    %24 = vector.broadcast %5 : vector<1x1024xf32> to vector<8x1024xf32>
    %25 = arith.addf %23, %24 : vector<8x1024xf32>
    %cst_11 = arith.constant 0.000000e+00 : f32
    %26 = vector.broadcast %cst_11 : f32 to vector<8x1024xf32>
    %27 = arith.maximumf %25, %26 : vector<8x1024xf32>
    %28 = arith.truncf %27 : vector<8x1024xf32> to vector<8x1024xbf16>
    %c0_12 = arith.constant 0 : index
    %c0_13 = arith.constant 0 : index
    %29 = vector.load %arg3[%c0_12, %c0_13] : memref<1024x1024xbf16, #tpu.memory_space<vmem>>, vector<1024x1024xbf16>
    %cst_14 = arith.constant dense<0.000000e+00> : vector<8x1024xf32>
    %30 = tpu.matmul %28, %29, %cst_14 {dimension_numbers = #tpu.dot_dimension_numbers<[1], [0], [0], [1], [0, 0, 1, 1], [], []>} : vector<8x1024xbf16>, vector<1024x1024xbf16>, vector<8x1024xf32> -> vector<8x1024xf32>
    %c2 = arith.constant 2 : index
    %c0_15 = arith.constant 0 : index
    %31 = vector.load %arg4[%c2, %c0_15] : memref<4x1024xf32, #tpu.memory_space<vmem>>, vector<1x1024xf32>
    %c3 = arith.constant 3 : index
    %c0_16 = arith.constant 0 : index
    %32 = vector.load %arg4[%c3, %c0_16] : memref<4x1024xf32, #tpu.memory_space<vmem>>, vector<1x1024xf32>
    %cst_17 = arith.constant dense<0.000000e+00> : vector<1024xf32>
    %33 = vector.multi_reduction <add>, %30, %cst_17 [0] : vector<8x1024xf32> to vector<1024xf32>
    %34 = vector.shape_cast %33 : vector<1024xf32> to vector<1x1024xf32>
    %cst_18 = arith.constant 8.000000e+00 : f32
    %35 = vector.broadcast %cst_18 : f32 to vector<1x1024xf32>
    %36 = arith.divf %34, %35 : vector<1x1024xf32>
    %37 = vector.broadcast %36 : vector<1x1024xf32> to vector<8x1024xf32>
    %38 = arith.subf %30, %37 : vector<8x1024xf32>
    %39 = arith.mulf %38, %38 : vector<8x1024xf32>
    %cst_19 = arith.constant dense<0.000000e+00> : vector<1024xf32>
    %40 = vector.multi_reduction <add>, %39, %cst_19 [0] : vector<8x1024xf32> to vector<1024xf32>
    %41 = vector.shape_cast %40 : vector<1024xf32> to vector<1x1024xf32>
    %cst_20 = arith.constant 8.000000e+00 : f32
    %42 = vector.broadcast %cst_20 : f32 to vector<1x1024xf32>
    %43 = arith.divf %41, %42 : vector<1x1024xf32>
    %cst_21 = arith.constant 9.99999974E-6 : f32
    %44 = vector.broadcast %cst_21 : f32 to vector<1x1024xf32>
    %45 = arith.addf %43, %44 : vector<1x1024xf32>
    %46 = math.rsqrt %45 : vector<1x1024xf32>
    %47 = vector.broadcast %46 : vector<1x1024xf32> to vector<8x1024xf32>
    %48 = arith.mulf %38, %47 : vector<8x1024xf32>
    %49 = vector.broadcast %31 : vector<1x1024xf32> to vector<8x1024xf32>
    %50 = arith.mulf %48, %49 : vector<8x1024xf32>
    %51 = vector.broadcast %32 : vector<1x1024xf32> to vector<8x1024xf32>
    %52 = arith.addf %50, %51 : vector<8x1024xf32>
    %cst_22 = arith.constant 0.000000e+00 : f32
    %53 = vector.broadcast %cst_22 : f32 to vector<8x1024xf32>
    %54 = arith.maximumf %52, %53 : vector<8x1024xf32>
    %55 = arith.truncf %54 : vector<8x1024xf32> to vector<8x1024xbf16>
    %c0_23 = arith.constant 0 : index
    %c0_24 = arith.constant 0 : index
    %56 = vector.load %arg5[%c0_23, %c0_24] : memref<1024x1024xbf16, #tpu.memory_space<vmem>>, vector<1024x1024xbf16>
    %cst_25 = arith.constant dense<0.000000e+00> : vector<8x1024xf32>
    %57 = tpu.matmul %55, %56, %cst_25 {dimension_numbers = #tpu.dot_dimension_numbers<[1], [0], [0], [1], [0, 0, 1, 1], [], []>} : vector<8x1024xbf16>, vector<1024x1024xbf16>, vector<8x1024xf32> -> vector<8x1024xf32>
    %c0_26 = arith.constant 0 : index
    %c0_27 = arith.constant 0 : index
    %58 = vector.load %arg6[%c0_26, %c0_27] : memref<1x1024xf32, #tpu.memory_space<vmem>>, vector<1x1024xf32>
    %59 = vector.broadcast %58 : vector<1x1024xf32> to vector<8x1024xf32>
    %60 = arith.addf %57, %59 : vector<8x1024xf32>
    %c0_28 = arith.constant 0 : index
    %c0_29 = arith.constant 0 : index
    %61 = vector.load %arg7[%c0_28, %c0_29] : memref<8x1024xf32, #tpu.memory_space<vmem>>, vector<8x1024xf32>
    tpu.vector_store %arg7[%c0_28, %c0_29], %60 {strides = array<i32>} : memref<8x1024xf32, #tpu.memory_space<vmem>>, vector<8x1024xf32>,
    return
  }
  func.func @transform_0(%arg0: i32) -> (i32, i32) {
    %c0_i32 = arith.constant 0 : i32
    %c0_i32_0 = arith.constant 0 : i32
    %c0_i32_1 = arith.constant 0 : i32
    return %c0_i32, %c0_i32_0 : i32, i32
  }
  func.func @transform_1(%arg0: i32) -> (i32, i32) {
    %c0_i32 = arith.constant 0 : i32
    %c0_i32_0 = arith.constant 0 : i32
    %c0_i32_1 = arith.constant 0 : i32
    return %c0_i32, %c0_i32_0 : i32, i32
  }
  func.func @transform_2(%arg0: i32) -> (i32, i32) {
    %c0_i32 = arith.constant 0 : i32
    %c0_i32_0 = arith.constant 0 : i32
    %c0_i32_1 = arith.constant 0 : i32
    return %c0_i32, %c0_i32_0 : i32, i32
  }
  func.func @transform_3(%arg0: i32) -> (i32, i32) {
    %c0_i32 = arith.constant 0 : i32
    %c0_i32_0 = arith.constant 0 : i32
    %c0_i32_1 = arith.constant 0 : i32
    return %c0_i32, %c0_i32_0 : i32, i32
  }
  func.func @transform_4(%arg0: i32) -> (i32, i32) {
    %c0_i32 = arith.constant 0 : i32
    %c0_i32_0 = arith.constant 0 : i32
    return %c0_i32, %arg0 : i32, i32
  }
  func.func @transform_5(%arg0: i32) -> (i32, i32) {
    %c0_i32 = arith.constant 0 : i32
    %c0_i32_0 = arith.constant 0 : i32
    return %c0_i32, %arg0 : i32, i32
  }
  func.func @transform_6(%arg0: i32) -> (i32, i32) {
    %c0_i32 = arith.constant 0 : i32
    %c0_i32_0 = arith.constant 0 : i32
    return %c0_i32, %arg0 : i32, i32
  }
}

</mosaic_0001>

<bundles_post_ra>
// kernel: clip_mlp_forward.1
= control target key start
LH: loop header
LB: loop body
LE: loop exit
PB: predicated region body
PF: predicated region fallthrough
CT: control target
= control target key end

     0   :  { %11 = vsyncpa [#allocation3], 0  ;;  %s12159_s0 = inlined_call_operand.hbm [shape: f32[8,512], index: 0, kind: input, shape index: {}]   ;;  %s12160_s1 = inlined_call_operand.hbm [shape: bf16[512,1024], index: 1, kind: input, shape index: {}]   ;;  %s12161_s2 = inlined_call_operand.hbm [shape: bf16[1024,1024], index: 2, kind: input, shape index: {}]   ;;  %s12162_s3 = inlined_call_operand.hbm [shape: f32[4,1024], index: 3, kind: input, shape index: {}]   ;;  %s12163_s4 = inlined_call_operand.hbm [shape: bf16[1024,1024], index: 4, kind: input, shape index: {}]   ;;  %s12164_s5 = inlined_call_operand.hbm [shape: f32[1,1024], index: 5, kind: input, shape index: {}]   ;;  %s12165_s6 = inlined_call_operand.hbm [shape: f32[8,1024], index: 6, kind: output, shape index: {}]  }
   0x1   :  { %12 = vsyncpa [#allocation6], 0 }
   0x2   :  { %13 = vsyncpa [#allocation9], 0 }
   0x3   :  { %14 = vsyncpa [#allocation12], 0 }
   0x4   :  { %15 = vsyncpa [#allocation4], 0  ;;  %s11645_s21 = smov [#allocation5]   ;;  %s11481_s25 = scalar_lea.hbm %s12160_s1, 32768 }
   0x5   :  { %s31_s22 = sshll.u32 %s11645_s21, 4  ;;  %p11482_p0 = scmp.ne.s32.totalorder %s12160_s1, %s11481_s25  ;;  %s32_s22 = int_to_ptr.vmem [resolvable:$true] %s31_s22 }
   0x6   :  { %p11485_p1 = scmp.lt.u32.totalorder %s11481_s25, %s12160_s1 }
   0x8   :  { %p11487_p2 = pnand %p11485_p1, %p11482_p0 }
   0xa   :  { %11490 = shalt.err (!%p11487_p2)
}
   0xb   :  { %s11491_s30 = scalar_lea.vmem %s32_s22, 32768  ;;  %p11496_p4 = scmp.lt.s32.totalorder %s32_s22, %s32_s22 }
   0xc   :  { %p11492_p3 = scmp.ne.s32.totalorder %s32_s22, %s11491_s30  ;;  %p11497_p5 = scmp.lt.s32.totalorder %s11491_s30, %s11491_s30 }
   0xe   :  { %p11498_p6 = por %p11497_p5, %p11496_p4 }
  0x10   :  { %p11499_p7 = pnand %p11498_p6, %p11492_p3 }
  0x12   :  { %11502 = shalt.err (!%p11499_p7)
}
  0x13   :  { %s11646_s7 = smov 512   ;;  %s11647_s8 = smov 32  }
  0x14   :  { %37 = dma.hbm_to_vmem [thread:$0]  %s12160_s1, 32768, %s32_s22, [#allocation6], %s11646_s7, %s11646_s7, %s11647_s8  }
  0x15   :  { %s11648_s11 = smov [#allocation8]   ;;  %s11649_s13 = smov [#allocation2]  }
  0x16   :  { %s56_s12 = sshll.u32 %s11648_s11, 4  ;;  %s22_s14 = sshll.u32 %s11649_s13, 4  ;;  %s57_s12 = int_to_ptr.vmem [resolvable:$true] %s56_s12  ;;  %s23_s14 = int_to_ptr.vmem [resolvable:$true] %s22_s14 }
  0x17   :  { %s11503_s17 = scalar_lea.hbm %s12162_s3, 512 }
  0x18   :  { %p11504_p8 = scmp.ne.s32.totalorder %s12162_s3, %s11503_s17  ;;  %p11507_p9 = scmp.lt.u32.totalorder %s11503_s17, %s12162_s3 }
  0x1a   :  { %p11509_p10 = pnand %p11507_p9, %p11504_p8 }
  0x1c   :  { %11512 = shalt.err (!%p11509_p10)
}
  0x1d   :  { %s11513_s1 = scalar_lea.vmem %s57_s12, 512  ;;  %p11518_p12 = scmp.lt.s32.totalorder %s57_s12, %s57_s12 }
  0x1e   :  { %p11514_p11 = scmp.ne.s32.totalorder %s57_s12, %s11513_s1  ;;  %p11519_p13 = scmp.lt.s32.totalorder %s11513_s1, %s11513_s1 }
  0x20   :  { %p11520_p0 = por %p11519_p13, %p11518_p12 }
  0x22   :  { %p11521_p1 = pnand %p11520_p0, %p11514_p11 }
  0x24   :  { %11524 = shalt.err (!%p11521_p1)
}
  0x25   :  { %59 = dma.hbm_to_vmem [thread:$0]  %s12162_s3, 512, %s57_s12, [#allocation9]  }
  0x26   :  { %s11525_s26 = scalar_lea.hbm %s12159_s0, 512 }
  0x27   :  { %p11526_p2 = scmp.ne.s32.totalorder %s12159_s0, %s11525_s26  ;;  %p11529_p3 = scmp.lt.u32.totalorder %s11525_s26, %s12159_s0 }
  0x29   :  { %p11531_p4 = pnand %p11529_p3, %p11526_p2 }
  0x2b   :  { %11534 = shalt.err (!%p11531_p4)
}
  0x2c   :  { %s11535_s9 = scalar_lea.vmem %s23_s14, 512  ;;  %p11540_p6 = scmp.lt.s32.totalorder %s23_s14, %s23_s14 }
  0x2d   :  { %p11536_p5 = scmp.ne.s32.totalorder %s23_s14, %s11535_s9  ;;  %p11541_p7 = scmp.lt.s32.totalorder %s11535_s9, %s11535_s9 }
  0x2f   :  { %p11542_p8 = por %p11541_p7, %p11540_p6 }
  0x31   :  { %p11543_p9 = pnand %p11542_p8, %p11536_p5 }
  0x33   :  { %11546 = shalt.err (!%p11543_p9)
}
  0x34   :  { %25 = dma.hbm_to_vmem [thread:$0]  %s12159_s0, 512, %s23_s14, [#allocation3]  }
  0x35   :  { %s11650_s11 = smov [#allocation7]   ;;  %s11651_s13 = smov [#allocation10]  }
  0x36   :  { %s43_s12 = sshll.u32 %s11650_s11, 4  ;;  %s65_s15 = sshll.u32 %s11651_s13, 4  ;;  %s44_s12 = int_to_ptr.vmem [resolvable:$true] %s43_s12  ;;  %s66_s15 = int_to_ptr.vmem [resolvable:$true] %s65_s15 }
  0x37   :  { %s11547_s18 = scalar_lea.hbm %s12161_s2, 65536 }
  0x38   :  { %p11548_p10 = scmp.ne.s32.totalorder %s12161_s2, %s11547_s18  ;;  %p11551_p11 = scmp.lt.u32.totalorder %s11547_s18, %s12161_s2 }
  0x3a   :  { %p11553_p12 = pnand %p11551_p11, %p11548_p10 }
  0x3c   :  { %11556 = shalt.err (!%p11553_p12)
}
  0x3d   :  { %s11557_s0 = scalar_lea.vmem %s44_s12, 65536  ;;  %p11562_p0 = scmp.lt.s32.totalorder %s44_s12, %s44_s12 }
  0x3e   :  { %p11558_p13 = scmp.ne.s32.totalorder %s44_s12, %s11557_s0  ;;  %p11563_p1 = scmp.lt.s32.totalorder %s11557_s0, %s11557_s0 }
  0x40   :  { %p11564_p2 = por %p11563_p1, %p11562_p0 }
  0x42   :  { %p11565_p3 = pnand %p11564_p2, %p11558_p13 }
  0x44   :  { %11568 = shalt.err (!%p11565_p3)
}
  0x45   :  { %49 = dma.hbm_to_vmem [thread:$0]  %s12161_s2, 65536, %s44_s12, [#allocation6], %s11646_s7, %s11646_s7, %s11647_s8  }
  0x46   :  { %s11569_s25 = scalar_lea.hbm %s12163_s4, 65536 }
  0x47   :  { %p11570_p4 = scmp.ne.s32.totalorder %s12163_s4, %s11569_s25  ;;  %p11573_p5 = scmp.lt.u32.totalorder %s11569_s25, %s12163_s4 }
  0x49   :  { %p11575_p6 = pnand %p11573_p5, %p11570_p4 }
  0x4b   :  { %11578 = shalt.err (!%p11575_p6)
}
  0x4c   :  { %s11579_s30 = scalar_lea.vmem %s66_s15, 65536  ;;  %p11584_p8 = scmp.lt.s32.totalorder %s66_s15, %s66_s15 }
  0x4d   :  { %p11580_p7 = scmp.ne.s32.totalorder %s66_s15, %s11579_s30  ;;  %p11585_p9 = scmp.lt.s32.totalorder %s11579_s30, %s11579_s30 }
  0x4f   :  { %p11586_p10 = por %p11585_p9, %p11584_p8 }
  0x51   :  { %p11587_p11 = pnand %p11586_p10, %p11580_p7 }
  0x53   :  { %11590 = shalt.err (!%p11587_p11)
}
  0x54   :  { %71 = dma.hbm_to_vmem [thread:$0]  %s12163_s4, 65536, %s66_s15, [#allocation9], %s11646_s7, %s11646_s7, %s11647_s8  }
  0x55   :  { %s11652_s3 = smov [#allocation11]   ;;  %s11591_s13 = scalar_lea.hbm %s12164_s5, 128 }
  0x56   :  { %s78_s10 = sshll.u32 %s11652_s3, 4  ;;  %p11592_p12 = scmp.ne.s32.totalorder %s12164_s5, %s11591_s13  ;;  %s79_s10 = int_to_ptr.vmem [resolvable:$true] %s78_s10 }
  0x57   :  { %p11595_p13 = scmp.lt.u32.totalorder %s11591_s13, %s12164_s5 }
  0x59   :  { %p11597_p0 = pnand %p11595_p13, %p11592_p12 }
  0x5b   :  { %11600 = shalt.err (!%p11597_p0)
}
  0x5c   :  { %s11601_s20 = scalar_lea.vmem %s79_s10, 128  ;;  %p11606_p2 = scmp.lt.s32.totalorder %s79_s10, %s79_s10 }
  0x5d   :  { %p11602_p1 = scmp.ne.s32.totalorder %s79_s10, %s11601_s20  ;;  %p11607_p3 = scmp.lt.s32.totalorder %s11601_s20, %s11601_s20 }
  0x5f   :  { %p11608_p4 = por %p11607_p3, %p11606_p2 }
  0x61   :  { %p11609_p5 = pnand %p11608_p4, %p11602_p1 }
  0x63   :  { %11612 = shalt.err (!%p11609_p5)
}
  0x64   :  { %81 = dma.hbm_to_vmem [thread:$0]  %s12164_s5, 128, %s79_s10, [#allocation12]  }
  0x65   :  { %11635 = dma.done.wait [#allocation3], 512  }
  0x66   :  { %11636 = vsyncadd [#allocation3], 4294966784 }
  0x67   :  { %11637 = dma.done.wait [#allocation6], 98304  }
  0x68   :  { %11638 = vsyncadd [#allocation6], 4294868992 }
  0x69   :  { %11639 = dma.done.wait [#allocation9], 66048  }
  0x6a   :  { %11640 = vsyncadd [#allocation9], 4294901248 }
  0x6b   :  { %11641 = dma.done.wait [#allocation12], 128  }
  0x6c   :  { %11642 = vsyncadd [#allocation12], 4294967168  ;;  %v108_v0 = vld [vmem:[#allocation5] sm:$0xff]  ;;  %v109_v2 = vld [vmem:[#allocation5 + $0x8] sm:$0xff]  ;;  %s11653_s5 = smov [#allocation13]  }
  0x6d   :  { %v112_v1 = vld [vmem:[#allocation5 + $0x20] sm:$0xff]  ;;  %v113_v4 = vld [vmem:[#allocation5 + $0x28] sm:$0xff]  ;;  %s10024_s8 = sshll.u32 %s11653_s5, 4  ;;  %s10025_s8 = int_to_ptr.vmem [resolvable:$true] %s10024_s8 }
  0x6e   :  { %v10037_v3 = vcombine.high %v108_v0, %v112_v1  ;;  %v10036_v5 = vcombine.low %v108_v0, %v112_v1  ;;  %v116_v6 = vld [vmem:[#allocation5 + $0x40] sm:$0xff]  ;;  %v10039_v8 = vcombine.high %v109_v2, %v113_v4  ;;  %v10038_v9 = vcombine.low %v109_v2, %v113_v4  ;;  %v117_v11 = vld [vmem:[#allocation5 + $0x48] sm:$0xff]  ;;  %s11613_s15 = scalar_lea.vmem %s10025_s8, 1024  ;;  %p11618_p7 = scmp.lt.s32.totalorder %s10025_s8, %s10025_s8 }
  0x6f   :  { %v120_v7 = vld [vmem:[#allocation5 + $0x60] sm:$0xff]  ;;  %v121_v12 = vld [vmem:[#allocation5 + $0x68] sm:$0xff]  ;;  %p11614_p6 = scmp.ne.s32.totalorder %s10025_s8, %s11613_s15  ;;  %p11619_p8 = scmp.lt.s32.totalorder %s11613_s15, %s11613_s15 }
  0x70   :  { %v10045_v10 = vcombine.high %v116_v6, %v120_v7  ;;  %v124_v13 = vld [vmem:[#allocation5 + $0x80] sm:$0xff]  ;;  %1644 = vmatprep.subr.bf16.mxu0 %v10037_v3  ;;  %v10047_v14 = vcombine.high %v117_v11, %v121_v12  ;;  %v125_v16 = vld [vmem:[#allocation5 + $0x88] sm:$0xff]  ;;  %1726 = vmatprep.subr.bf16.mxu1 %v10039_v8  ;;  %v10044_v18 = vcombine.low %v116_v6, %v120_v7 }
  0x71   :  { %v128_v15 = vld [vmem:[#allocation5 + $0xa0] sm:$0xff]  ;;  %v129_v17 = vld [vmem:[#allocation5 + $0xa8] sm:$0xff]  ;;  %1645 = vmatpush1.bf16.msra.mxu0 %v10036_v5  ;;  %1727 = vmatpush1.bf16.msra.mxu1 %v10038_v9  ;;  %v10046_v19 = vcombine.low %v117_v11, %v121_v12  ;;  %p11620_p9 = por %p11619_p8, %p11618_p7 }
  0x72   :  { %1646 = vmatprep.subr.bf16.mxu0 %v10045_v10  ;;  %v10053_v20 = vcombine.high %v124_v13, %v128_v15  ;;  %1728 = vmatprep.subr.bf16.mxu1 %v10047_v14  ;;  %v10055_v21 = vcombine.high %v125_v16, %v129_v17  ;;  %v132_v22 = vld [vmem:[#allocation5 + $0xc0] sm:$0xff]  ;;  %v133_v24 = vld [vmem:[#allocation5 + $0xc8] sm:$0xff]  ;;  %v10052_v26 = vcombine.low %v124_v13, %v128_v15 }
  0x73   :  { %v136_v23 = vld [vmem:[#allocation5 + $0xe0] sm:$0xff]  ;;  %v137_v25 = vld [vmem:[#allocation5 + $0xe8] sm:$0xff]  ;;  %v10054_v27 = vcombine.low %v125_v16, %v129_v17  ;;  %p11621_p10 = pnand %p11620_p9, %p11614_p6 }
  0x74   :  { %v10061_v28 = vcombine.high %v132_v22, %v136_v23  ;;  %v10063_v29 = vcombine.high %v133_v24, %v137_v25  ;;  %v140_v30 = vld [vmem:[#allocation5 + $0x100] sm:$0xff]  ;;  %v141_v32 = vld [vmem:[#allocation5 + $0x108] sm:$0xff]  ;;  %v10060_v34 = vcombine.low %v132_v22, %v136_v23  ;;  %v10062_v35 = vcombine.low %v133_v24, %v137_v25 }
  0x75   :  { %1647 = vmatpush1.bf16.msra.mxu0 %v10044_v18  ;;  %1729 = vmatpush1.bf16.msra.mxu1 %v10046_v19  ;;  %v144_v31 = vld [vmem:[#allocation5 + $0x120] sm:$0xff]  ;;  %v145_v33 = vld [vmem:[#allocation5 + $0x128] sm:$0xff] }
  0x76   :  { %1648 = vmatprep.subr.bf16.mxu0 %v10053_v20  ;;  %1730 = vmatprep.subr.bf16.mxu1 %v10055_v21  ;;  %v10069_v36 = vcombine.high %v140_v30, %v144_v31  ;;  %v10071_v37 = vcombine.high %v141_v32, %v145_v33  ;;  %v148_v38 = vld [vmem:[#allocation5 + $0x140] sm:$0xff]  ;;  %v149_v40 = vld [vmem:[#allocation5 + $0x148] sm:$0xff]  ;;  %v10068_v42 = vcombine.low %v140_v30, %v144_v31 }
  0x77   :  { %v152_v39 = vld [vmem:[#allocation5 + $0x160] sm:$0xff]  ;;  %v153_v41 = vld [vmem:[#allocation5 + $0x168] sm:$0xff]  ;;  %v10070_v43 = vcombine.low %v141_v32, %v145_v33 }
  0x78   :  { %v10077_v44 = vcombine.high %v148_v38, %v152_v39  ;;  %v10079_v45 = vcombine.high %v149_v40, %v153_v41  ;;  %v156_v46 = vld [vmem:[#allocation5 + $0x180] sm:$0xff]  ;;  %v157_v48 = vld [vmem:[#allocation5 + $0x188] sm:$0xff]  ;;  %v10076_v50 = vcombine.low %v148_v38, %v152_v39  ;;  %v10078_v51 = vcombine.low %v149_v40, %v153_v41 }
  0x79   :  { %1649 = vmatpush1.bf16.msra.mxu0 %v10052_v26  ;;  %1731 = vmatpush1.bf16.msra.mxu1 %v10054_v27  ;;  %v160_v47 = vld [vmem:[#allocation5 + $0x1a0] sm:$0xff]  ;;  %v161_v49 = vld [vmem:[#allocation5 + $0x1a8] sm:$0xff] }
  0x7a   :  { %1650 = vmatprep.subr.bf16.mxu0 %v10061_v28  ;;  %1732 = vmatprep.subr.bf16.mxu1 %v10063_v29  ;;  %v10085_v52 = vcombine.high %v156_v46, %v160_v47  ;;  %v101_v53 = vld [vmem:[#allocation2 + $0x8] sm:$0xff]  ;;  %v10087_v54 = vcombine.high %v157_v48, %v161_v49  ;;  %v164_v55 = vld [vmem:[#allocation5 + $0x1c0] sm:$0xff]  ;;  %v10084_v60 = vcombine.low %v156_v46, %v160_v47 }
  0x7b   :  { %v168_v56 = vld [vmem:[#allocation5 + $0x1e0] sm:$0xff]  ;;  %v11770_v57 = vpack.c.bf16 %v101_v53, %v101_v53  ;;  %v165_v58 = vld [vmem:[#allocation5 + $0x1c8] sm:$0xff]  ;;  %v10086_v61 = vcombine.low %v157_v48, %v161_v49 }
  0x7c   :  { %v169_v59 = vld [vmem:[#allocation5 + $0x1e8] sm:$0xff]  ;;  %v10093_v62 = vcombine.high %v164_v55, %v168_v56  ;;  %v172_v0 = vld [vmem:[#allocation5 + $0x200] sm:$0xff]  ;;  %v10092_v4 = vcombine.low %v164_v55, %v168_v56 }
  0x7d   :  { %1651 = vmatpush1.bf16.msra.mxu0 %v10060_v34  ;;  %1733 = vmatpush1.bf16.msra.mxu1 %v10062_v35  ;;  %v10095_v63 = vcombine.high %v165_v58, %v169_v59  ;;  %v176_v1 = vld [vmem:[#allocation5 + $0x220] sm:$0xff]  ;;  %v173_v2 = vld [vmem:[#allocation5 + $0x208] sm:$0xff]  ;;  %v10094_v5 = vcombine.low %v165_v58, %v169_v59 }
  0x7e   :  { %1652 = vmatprep.subr.bf16.mxu0 %v10069_v36  ;;  %1734 = vmatprep.subr.bf16.mxu1 %v10071_v37  ;;  %v177_v3 = vld [vmem:[#allocation5 + $0x228] sm:$0xff]  ;;  %v10101_v6 = vcombine.high %v172_v0, %v176_v1  ;;  %v180_v8 = vld [vmem:[#allocation5 + $0x240] sm:$0xff]  ;;  %v10100_v12 = vcombine.low %v172_v0, %v176_v1 }
  0x7f   :  { %1676 = vmatprep.mubr.bf16.mxu0 %v11770_v57  ;;  %1758 = vmatprep.mubr.bf16.mxu1 %v11770_v57  ;;  %v10103_v7 = vcombine.high %v173_v2, %v177_v3  ;;  %v184_v9 = vld [vmem:[#allocation5 + $0x260] sm:$0xff]  ;;  %v181_v10 = vld [vmem:[#allocation5 + $0x248] sm:$0xff]  ;;  %v10102_v13 = vcombine.low %v173_v2, %v177_v3 }
  0x80   :  { %v185_v11 = vld [vmem:[#allocation5 + $0x268] sm:$0xff]  ;;  %v10109_v14 = vcombine.high %v180_v8, %v184_v9  ;;  %v188_v16 = vld [vmem:[#allocation5 + $0x280] sm:$0xff]  ;;  %v10108_v20 = vcombine.low %v180_v8, %v184_v9 }
  0x81   :  { %1653 = vmatpush1.bf16.msra.mxu0 %v10068_v42  ;;  %1735 = vmatpush1.bf16.msra.mxu1 %v10070_v43  ;;  %v10111_v15 = vcombine.high %v181_v10, %v185_v11  ;;  %v192_v17 = vld [vmem:[#allocation5 + $0x2a0] sm:$0xff]  ;;  %v189_v18 = vld [vmem:[#allocation5 + $0x288] sm:$0xff]  ;;  %v10110_v21 = vcombine.low %v181_v10, %v185_v11 }
  0x82   :  { %1654 = vmatprep.subr.bf16.mxu0 %v10077_v44  ;;  %1736 = vmatprep.subr.bf16.mxu1 %v10079_v45  ;;  %v193_v19 = vld [vmem:[#allocation5 + $0x2a8] sm:$0xff]  ;;  %v10117_v22 = vcombine.high %v188_v16, %v192_v17  ;;  %v196_v24 = vld [vmem:[#allocation5 + $0x2c0] sm:$0xff]  ;;  %v10116_v28 = vcombine.low %v188_v16, %v192_v17 }
  0x83   :  { %v10119_v23 = vcombine.high %v189_v18, %v193_v19  ;;  %v200_v25 = vld [vmem:[#allocation5 + $0x2e0] sm:$0xff]  ;;  %v197_v26 = vld [vmem:[#allocation5 + $0x2c8] sm:$0xff]  ;;  %v10118_v29 = vcombine.low %v189_v18, %v193_v19 }
  0x84   :  { %v201_v27 = vld [vmem:[#allocation5 + $0x2e8] sm:$0xff]  ;;  %v10125_v30 = vcombine.high %v196_v24, %v200_v25  ;;  %v204_v32 = vld [vmem:[#allocation5 + $0x300] sm:$0xff]  ;;  %v10124_v36 = vcombine.low %v196_v24, %v200_v25 }
  0x85   :  { %1655 = vmatpush1.bf16.msra.mxu0 %v10076_v50  ;;  %1737 = vmatpush1.bf16.msra.mxu1 %v10078_v51  ;;  %v10127_v31 = vcombine.high %v197_v26, %v201_v27  ;;  %v208_v33 = vld [vmem:[#allocation5 + $0x320] sm:$0xff]  ;;  %v205_v34 = vld [vmem:[#allocation5 + $0x308] sm:$0xff]  ;;  %v10126_v37 = vcombine.low %v197_v26, %v201_v27 }
  0x86   :  { %1656 = vmatprep.subr.bf16.mxu0 %v10085_v52  ;;  %1738 = vmatprep.subr.bf16.mxu1 %v10087_v54  ;;  %v209_v35 = vld [vmem:[#allocation5 + $0x328] sm:$0xff]  ;;  %v10133_v38 = vcombine.high %v204_v32, %v208_v33  ;;  %v212_v40 = vld [vmem:[#allocation5 + $0x340] sm:$0xff]  ;;  %v10132_v44 = vcombine.low %v204_v32, %v208_v33 }
  0x87   :  { %v10135_v39 = vcombine.high %v205_v34, %v209_v35  ;;  %v216_v41 = vld [vmem:[#allocation5 + $0x360] sm:$0xff]  ;;  %v213_v42 = vld [vmem:[#allocation5 + $0x348] sm:$0xff]  ;;  %v10134_v45 = vcombine.low %v205_v34, %v209_v35 }
  0x88   :  { %v217_v43 = vld [vmem:[#allocation5 + $0x368] sm:$0xff]  ;;  %v10141_v46 = vcombine.high %v212_v40, %v216_v41  ;;  %v220_v48 = vld [vmem:[#allocation5 + $0x380] sm:$0xff]  ;;  %v10140_v52 = vcombine.low %v212_v40, %v216_v41 }
  0x89   :  { %1657 = vmatpush1.bf16.msra.mxu0 %v10084_v60  ;;  %1739 = vmatpush1.bf16.msra.mxu1 %v10086_v61  ;;  %v10143_v47 = vcombine.high %v213_v42, %v217_v43  ;;  %v224_v49 = vld [vmem:[#allocation5 + $0x3a0] sm:$0xff]  ;;  %v221_v50 = vld [vmem:[#allocation5 + $0x388] sm:$0xff]  ;;  %v10142_v53 = vcombine.low %v213_v42, %v217_v43 }
  0x8a   :  { %1658 = vmatprep.subr.bf16.mxu0 %v10093_v62  ;;  %1740 = vmatprep.subr.bf16.mxu1 %v10095_v63  ;;  %v225_v51 = vld [vmem:[#allocation5 + $0x3a8] sm:$0xff]  ;;  %v10149_v54 = vcombine.high %v220_v48, %v224_v49  ;;  %v228_v56 = vld [vmem:[#allocation5 + $0x3c0] sm:$0xff]  ;;  %v10148_v61 = vcombine.low %v220_v48, %v224_v49 }
  0x8b   :  { %v10151_v55 = vcombine.high %v221_v50, %v225_v51  ;;  %v232_v58 = vld [vmem:[#allocation5 + $0x3e0] sm:$0xff]  ;;  %v229_v59 = vld [vmem:[#allocation5 + $0x3c8] sm:$0xff]  ;;  %v10150_v62 = vcombine.low %v221_v50, %v225_v51 }
  0x8c   :  { %v233_v60 = vld [vmem:[#allocation5 + $0x3e8] sm:$0xff]  ;;  %v10157_v63 = vcombine.high %v228_v56, %v232_v58  ;;  %v236_v1 = vld [vmem:[#allocation5 + $0x400] sm:$0xff] }
  0x8d   :  { %1659 = vmatpush1.bf16.msra.mxu0 %v10092_v4  ;;  %1741 = vmatpush1.bf16.msra.mxu1 %v10094_v5  ;;  %v10159_v0 = vcombine.high %v229_v59, %v233_v60  ;;  %v240_v2 = vld [vmem:[#allocation5 + $0x420] sm:$0xff]  ;;  %v237_v3 = vld [vmem:[#allocation5 + $0x408] sm:$0xff]  ;;  %v10156_v5 = vcombine.low %v228_v56, %v232_v58 }
  0x8e   :  { %1660 = vmatprep.subr.bf16.mxu0 %v10101_v6  ;;  %1742 = vmatprep.subr.bf16.mxu1 %v10103_v7  ;;  %v241_v4 = vld [vmem:[#allocation5 + $0x428] sm:$0xff]  ;;  %v100_v6 = vld [vmem:[#allocation2] sm:$0xff]  ;;  %v10158_v7 = vcombine.low %v229_v59, %v233_v60  ;;  %v10165_v8 = vcombine.high %v236_v1, %v240_v2  ;;  %v10164_v16 = vcombine.low %v236_v1, %v240_v2 }
  0x8f   :  { %v10167_v9 = vcombine.high %v237_v3, %v241_v4  ;;  %v244_v10 = vld [vmem:[#allocation5 + $0x440] sm:$0xff]  ;;  %v10166_v17 = vcombine.low %v237_v3, %v241_v4  ;;  %v257_v24 = vld [vmem:[#allocation5 + $0x4a8] sm:$0xff] }
  0x90   :  { %v248_v11 = vld [vmem:[#allocation5 + $0x460] sm:$0xff]  ;;  %v265_v32 = vld [vmem:[#allocation5 + $0x4e8] sm:$0xff] }
  0x91   :  { %1661 = vmatpush1.bf16.msra.mxu0 %v10100_v12  ;;  %1743 = vmatpush1.bf16.msra.mxu1 %v10102_v13  ;;  %v11774_v12 = vpack.c.bf16 %v100_v6, %v100_v6  ;;  %v245_v13 = vld [vmem:[#allocation5 + $0x448] sm:$0xff]  ;;  %v10173_v18 = vcombine.high %v244_v10, %v248_v11  ;;  %v10172_v25 = vcombine.low %v244_v10, %v248_v11  ;;  %v300_v6 = vld [vmem:[#allocation5 + $0x600] sm:$0xff] }
  0x92   :  { %1662 = vmatprep.subr.bf16.mxu0 %v10109_v14  ;;  %1744 = vmatprep.subr.bf16.mxu1 %v10111_v15  ;;  %v249_v14 = vld [vmem:[#allocation5 + $0x468] sm:$0xff]  ;;  %v103_v15 = vld [vmem:[#allocation2 + $0x18] sm:$0xff] }
  0x93   :  { %v10175_v19 = vcombine.high %v245_v13, %v249_v14  ;;  %v10174_v26 = vcombine.low %v245_v13, %v249_v14  ;;  %v273_v40 = vld [vmem:[#allocation5 + $0x528] sm:$0xff] }
  0x94   :  { %v281_v48 = vld [vmem:[#allocation5 + $0x568] sm:$0xff] }
  0x95   :  { %1663 = vmatpush1.bf16.msra.mxu0 %v10108_v20  ;;  %1745 = vmatpush1.bf16.msra.mxu1 %v10110_v21  ;;  %v252_v20 = vld [vmem:[#allocation5 + $0x480] sm:$0xff]  ;;  %v289_v56 = vld [vmem:[#allocation5 + $0x5a8] sm:$0xff] }
  0x96   :  { %1664 = vmatprep.subr.bf16.mxu0 %v10117_v22  ;;  %1746 = vmatprep.subr.bf16.mxu1 %v10119_v23  ;;  %v256_v21 = vld [vmem:[#allocation5 + $0x4a0] sm:$0xff]  ;;  %v11776_v22 = vpack.c.bf16 %v103_v15, %v103_v15  ;;  %v253_v23 = vld [vmem:[#allocation5 + $0x488] sm:$0xff] }
  0x97   :  { %v10181_v27 = vcombine.high %v252_v20, %v256_v21  ;;  %v10180_v33 = vcombine.low %v252_v20, %v256_v21  ;;  %v10182_v34 = vcombine.low %v253_v23, %v257_v24  ;;  %v297_v1 = vld [vmem:[#allocation5 + $0x5e8] sm:$0xff]  ;;  %v308_v15 = vld [vmem:[#allocation5 + $0x640] sm:$0xff] }
  0x99   :  { %1665 = vmatpush1.bf16.msra.mxu0 %v10116_v28  ;;  %1747 = vmatpush1.bf16.msra.mxu1 %v10118_v29  ;;  %v10183_v28 = vcombine.high %v253_v23, %v257_v24  ;;  %v260_v29 = vld [vmem:[#allocation5 + $0x4c0] sm:$0xff] }
  0x9a   :  { %1666 = vmatprep.subr.bf16.mxu0 %v10125_v30  ;;  %1748 = vmatprep.subr.bf16.mxu1 %v10127_v31  ;;  %v264_v30 = vld [vmem:[#allocation5 + $0x4e0] sm:$0xff]  ;;  %v261_v31 = vld [vmem:[#allocation5 + $0x4c8] sm:$0xff] }
  0x9b   :  { %v10189_v35 = vcombine.high %v260_v29, %v264_v30  ;;  %v10188_v41 = vcombine.low %v260_v29, %v264_v30  ;;  %v10190_v42 = vcombine.low %v261_v31, %v265_v32  ;;  %v316_v24 = vld [vmem:[#allocation5 + $0x680] sm:$0xff] }
  0x9d   :  { %1667 = vmatpush1.bf16.msra.mxu0 %v10124_v36  ;;  %1749 = vmatpush1.bf16.msra.mxu1 %v10126_v37  ;;  %v10191_v36 = vcombine.high %v261_v31, %v265_v32  ;;  %v268_v37 = vld [vmem:[#allocation5 + $0x500] sm:$0xff] }
  0x9e   :  { %1668 = vmatprep.subr.bf16.mxu0 %v10133_v38  ;;  %1750 = vmatprep.subr.bf16.mxu1 %v10135_v39  ;;  %v272_v38 = vld [vmem:[#allocation5 + $0x520] sm:$0xff]  ;;  %v269_v39 = vld [vmem:[#allocation5 + $0x508] sm:$0xff] }
  0x9f   :  { %v10197_v43 = vcombine.high %v268_v37, %v272_v38  ;;  %v10196_v49 = vcombine.low %v268_v37, %v272_v38  ;;  %v10198_v50 = vcombine.low %v269_v39, %v273_v40  ;;  %v324_v32 = vld [vmem:[#allocation5 + $0x6c0] sm:$0xff] }
  0xa1   :  { %1669 = vmatpush1.bf16.msra.mxu0 %v10132_v44  ;;  %1751 = vmatpush1.bf16.msra.mxu1 %v10134_v45  ;;  %v10199_v44 = vcombine.high %v269_v39, %v273_v40  ;;  %v276_v45 = vld [vmem:[#allocation5 + $0x540] sm:$0xff] }
  0xa2   :  { %1670 = vmatprep.subr.bf16.mxu0 %v10141_v46  ;;  %1752 = vmatprep.subr.bf16.mxu1 %v10143_v47  ;;  %v280_v46 = vld [vmem:[#allocation5 + $0x560] sm:$0xff]  ;;  %v277_v47 = vld [vmem:[#allocation5 + $0x548] sm:$0xff] }
  0xa3   :  { %v10205_v51 = vcombine.high %v276_v45, %v280_v46  ;;  %v10204_v58 = vcombine.low %v276_v45, %v280_v46  ;;  %v10206_v59 = vcombine.low %v277_v47, %v281_v48  ;;  %v332_v40 = vld [vmem:[#allocation5 + $0x700] sm:$0xff] }
  0xa5   :  { %1671 = vmatpush1.bf16.msra.mxu0 %v10140_v52  ;;  %1753 = vmatpush1.bf16.msra.mxu1 %v10142_v53  ;;  %v10207_v52 = vcombine.high %v277_v47, %v281_v48  ;;  %v284_v53 = vld [vmem:[#allocation5 + $0x580] sm:$0xff] }
  0xa6   :  { %1672 = vmatprep.subr.bf16.mxu0 %v10149_v54  ;;  %1754 = vmatprep.subr.bf16.mxu1 %v10151_v55  ;;  %v288_v54 = vld [vmem:[#allocation5 + $0x5a0] sm:$0xff]  ;;  %v285_v55 = vld [vmem:[#allocation5 + $0x588] sm:$0xff] }
  0xa7   :  { %v10213_v60 = vcombine.high %v284_v53, %v288_v54  ;;  %v10212_v2 = vcombine.low %v284_v53, %v288_v54  ;;  %v10214_v3 = vcombine.low %v285_v55, %v289_v56  ;;  %v340_v48 = vld [vmem:[#allocation5 + $0x740] sm:$0xff] }
  0xa9   :  { %1673 = vmatpush1.bf16.msra.mxu0 %v10148_v61  ;;  %1755 = vmatpush1.bf16.msra.mxu1 %v10150_v62  ;;  %v10215_v61 = vcombine.high %v285_v55, %v289_v56  ;;  %v292_v62 = vld [vmem:[#allocation5 + $0x5c0] sm:$0xff] }
  0xaa   :  { %1674 = vmatprep.subr.bf16.mxu0 %v10157_v63  ;;  %1756 = vmatprep.subr.bf16.mxu1 %v10159_v0  ;;  %v296_v63 = vld [vmem:[#allocation5 + $0x5e0] sm:$0xff]  ;;  %v293_v0 = vld [vmem:[#allocation5 + $0x5c8] sm:$0xff] }
  0xab   :  { %v10221_v4 = vcombine.high %v292_v62, %v296_v63  ;;  %v10220_v10 = vcombine.low %v292_v62, %v296_v63  ;;  %v10222_v11 = vcombine.low %v293_v0, %v297_v1  ;;  %v348_v56 = vld [vmem:[#allocation5 + $0x780] sm:$0xff] }
  0xad   :  { %1675 = vmatpush1.bf16.msra.mxu0 %v10156_v5  ;;  %1757 = vmatpush1.bf16.msra.mxu1 %v10158_v7  ;;  %v10223_v5 = vcombine.high %v293_v0, %v297_v1  ;;  %v304_v7 = vld [vmem:[#allocation5 + $0x620] sm:$0xff] }
  0xae   :  { %1685 = vmatprep.subr.bf16.mxu0 %v10165_v8  ;;  %1767 = vmatprep.subr.bf16.mxu1 %v10167_v9  ;;  %v301_v8 = vld [vmem:[#allocation5 + $0x608] sm:$0xff]  ;;  %v10229_v13 = vcombine.high %v300_v6, %v304_v7  ;;  %v356_v1 = vld [vmem:[#allocation5 + $0x7c0] sm:$0xff] }
  0xaf   :  { %v305_v9 = vld [vmem:[#allocation5 + $0x628] sm:$0xff] }
  0xb0   :  { %1677 = vmatmul.mubr.bf16.vlgmr.msra.gmra.mrb[0].mxu0 %v11774_v12  ;;  %1759 = vmatmul.mubr.bf16.vlgmr.msra.gmra.mrb[0].mxu1 %v11774_v12  ;;  %v10231_v14 = vcombine.high %v301_v8, %v305_v9  ;;  %v10230_v20 = vcombine.low %v301_v8, %v305_v9  ;;  %v110_v9 = vld [vmem:[#allocation5 + $0x10] sm:$0xff] }
  0xb1   :  { %1686 = vmatpush1.bf16.msra.mxu0 %v10164_v16  ;;  %1768 = vmatpush1.bf16.msra.mxu1 %v10166_v17  ;;  %v312_v16 = vld [vmem:[#allocation5 + $0x660] sm:$0xff]  ;;  %v309_v17 = vld [vmem:[#allocation5 + $0x648] sm:$0xff] }
  0xb2   :  { %1687 = vmatprep.subr.bf16.mxu0 %v10173_v18  ;;  %1769 = vmatprep.subr.bf16.mxu1 %v10175_v19  ;;  %v313_v18 = vld [vmem:[#allocation5 + $0x668] sm:$0xff]  ;;  %v10228_v19 = vcombine.low %v300_v6, %v304_v7  ;;  %v10237_v21 = vcombine.high %v308_v15, %v312_v16 }
  0xb3   :  { %1717 = vmatprep.mubr.bf16.mxu0 %v11776_v22  ;;  %1799 = vmatprep.mubr.bf16.mxu1 %v11776_v22  ;;  %v10239_v23 = vcombine.high %v309_v17, %v313_v18  ;;  %v10238_v29 = vcombine.low %v309_v17, %v313_v18 }
  0xb5   :  { %1688 = vmatpush1.bf16.msra.mxu0 %v10172_v25  ;;  %1770 = vmatpush1.bf16.msra.mxu1 %v10174_v26  ;;  %v320_v25 = vld [vmem:[#allocation5 + $0x6a0] sm:$0xff]  ;;  %v317_v26 = vld [vmem:[#allocation5 + $0x688] sm:$0xff] }
  0xb6   :  { %1689 = vmatprep.subr.bf16.mxu0 %v10181_v27  ;;  %1771 = vmatprep.subr.bf16.mxu1 %v10183_v28  ;;  %v321_v27 = vld [vmem:[#allocation5 + $0x6a8] sm:$0xff]  ;;  %v10236_v28 = vcombine.low %v308_v15, %v312_v16  ;;  %v10245_v30 = vcombine.high %v316_v24, %v320_v25  ;;  %v102_v15 = vld [vmem:[#allocation2 + $0x10] sm:$0xff] }
  0xb7   :  { %v10247_v31 = vcombine.high %v317_v26, %v321_v27  ;;  %v10246_v37 = vcombine.low %v317_v26, %v321_v27 }
  0xb9   :  { %1690 = vmatpush1.bf16.msra.mxu0 %v10180_v33  ;;  %1772 = vmatpush1.bf16.msra.mxu1 %v10182_v34  ;;  %v328_v33 = vld [vmem:[#allocation5 + $0x6e0] sm:$0xff]  ;;  %v325_v34 = vld [vmem:[#allocation5 + $0x6c8] sm:$0xff] }
  0xba   :  { %1691 = vmatprep.subr.bf16.mxu0 %v10189_v35  ;;  %1773 = vmatprep.subr.bf16.mxu1 %v10191_v36  ;;  %v329_v35 = vld [vmem:[#allocation5 + $0x6e8] sm:$0xff]  ;;  %v10244_v36 = vcombine.low %v316_v24, %v320_v25  ;;  %v10253_v38 = vcombine.high %v324_v32, %v328_v33  ;;  %v123_v24 = vld [vmem:[#allocation5 + $0x78] sm:$0xff] }
  0xbb   :  { %v10255_v39 = vcombine.high %v325_v34, %v329_v35  ;;  %v10254_v45 = vcombine.low %v325_v34, %v329_v35 }
  0xbd   :  { %1692 = vmatpush1.bf16.msra.mxu0 %v10188_v41  ;;  %1774 = vmatpush1.bf16.msra.mxu1 %v10190_v42  ;;  %v336_v41 = vld [vmem:[#allocation5 + $0x720] sm:$0xff]  ;;  %v333_v42 = vld [vmem:[#allocation5 + $0x708] sm:$0xff] }
  0xbe   :  { %1693 = vmatprep.subr.bf16.mxu0 %v10197_v43  ;;  %1775 = vmatprep.subr.bf16.mxu1 %v10199_v44  ;;  %v337_v43 = vld [vmem:[#allocation5 + $0x728] sm:$0xff]  ;;  %v10252_v44 = vcombine.low %v324_v32, %v328_v33  ;;  %v10261_v46 = vcombine.high %v332_v40, %v336_v41  ;;  %v131_v32 = vld [vmem:[#allocation5 + $0xb8] sm:$0xff] }
  0xbf   :  { %v10263_v47 = vcombine.high %v333_v42, %v337_v43  ;;  %v10262_v53 = vcombine.low %v333_v42, %v337_v43 }
  0xc1   :  { %1694 = vmatpush1.bf16.msra.mxu0 %v10196_v49  ;;  %1776 = vmatpush1.bf16.msra.mxu1 %v10198_v50  ;;  %v344_v49 = vld [vmem:[#allocation5 + $0x760] sm:$0xff]  ;;  %v341_v50 = vld [vmem:[#allocation5 + $0x748] sm:$0xff] }
  0xc2   :  { %1695 = vmatprep.subr.bf16.mxu0 %v10205_v51  ;;  %1777 = vmatprep.subr.bf16.mxu1 %v10207_v52  ;;  %v345_v51 = vld [vmem:[#allocation5 + $0x768] sm:$0xff]  ;;  %v10260_v52 = vcombine.low %v332_v40, %v336_v41  ;;  %v10269_v54 = vcombine.high %v340_v48, %v344_v49  ;;  %v139_v40 = vld [vmem:[#allocation5 + $0xf8] sm:$0xff] }
  0xc3   :  { %v10271_v55 = vcombine.high %v341_v50, %v345_v51  ;;  %v10270_v62 = vcombine.low %v341_v50, %v345_v51 }
  0xc5   :  { %1696 = vmatpush1.bf16.msra.mxu0 %v10204_v58  ;;  %1778 = vmatpush1.bf16.msra.mxu1 %v10206_v59  ;;  %v352_v58 = vld [vmem:[#allocation5 + $0x7a0] sm:$0xff]  ;;  %v349_v59 = vld [vmem:[#allocation5 + $0x788] sm:$0xff] }
  0xc6   :  { %1697 = vmatprep.subr.bf16.mxu0 %v10213_v60  ;;  %1779 = vmatprep.subr.bf16.mxu1 %v10215_v61  ;;  %v353_v60 = vld [vmem:[#allocation5 + $0x7a8] sm:$0xff]  ;;  %v10268_v61 = vcombine.low %v340_v48, %v344_v49  ;;  %v10277_v63 = vcombine.high %v348_v56, %v352_v58  ;;  %v147_v48 = vld [vmem:[#allocation5 + $0x138] sm:$0xff] }
  0xc7   :  { %v10279_v0 = vcombine.high %v349_v59, %v353_v60  ;;  %v10278_v6 = vcombine.low %v349_v59, %v353_v60 }
  0xc9   :  { %1698 = vmatpush1.bf16.msra.mxu0 %v10212_v2  ;;  %1780 = vmatpush1.bf16.msra.mxu1 %v10214_v3  ;;  %v360_v2 = vld [vmem:[#allocation5 + $0x7e0] sm:$0xff]  ;;  %v357_v3 = vld [vmem:[#allocation5 + $0x7c8] sm:$0xff] }
  0xca   :  { %1699 = vmatprep.subr.bf16.mxu0 %v10221_v4  ;;  %1781 = vmatprep.subr.bf16.mxu1 %v10223_v5  ;;  %v361_v4 = vld [vmem:[#allocation5 + $0x7e8] sm:$0xff]  ;;  %v10276_v5 = vcombine.low %v348_v56, %v352_v58  ;;  %v10285_v7 = vcombine.high %v356_v1, %v360_v2 }
  0xcb   :  { %v10287_v8 = vcombine.high %v357_v3, %v361_v4  ;;  %v10286_v16 = vcombine.low %v357_v3, %v361_v4 }
  0xcd   :  { %1700 = vmatpush1.bf16.msra.mxu0 %v10220_v10  ;;  %1782 = vmatpush1.bf16.msra.mxu1 %v10222_v11  ;;  %v114_v10 = vld [vmem:[#allocation5 + $0x30] sm:$0xff]  ;;  %v111_v11 = vld [vmem:[#allocation5 + $0x18] sm:$0xff] }
  0xce   :  { %1701 = vmatprep.subr.bf16.mxu0 %v10229_v13  ;;  %1783 = vmatprep.subr.bf16.mxu1 %v10231_v14  ;;  %v115_v13 = vld [vmem:[#allocation5 + $0x38] sm:$0xff]  ;;  %v10284_v14 = vcombine.low %v356_v1, %v360_v2  ;;  %v10041_v17 = vcombine.high %v110_v9, %v114_v10  ;;  %v10040_v25 = vcombine.low %v110_v9, %v114_v10 }
  0xcf   :  { %v10043_v18 = vcombine.high %v111_v11, %v115_v13  ;;  %v10042_v26 = vcombine.low %v111_v11, %v115_v13 }
  0xd1   :  { %1702 = vmatpush1.bf16.msra.mxu0 %v10228_v19  ;;  %1784 = vmatpush1.bf16.msra.mxu1 %v10230_v20  ;;  %v118_v19 = vld [vmem:[#allocation5 + $0x50] sm:$0xff] }
  0xd2   :  { %1703 = vmatprep.subr.bf16.mxu0 %v10237_v21  ;;  %1785 = vmatprep.subr.bf16.mxu1 %v10239_v23  ;;  %v122_v20 = vld [vmem:[#allocation5 + $0x70] sm:$0xff]  ;;  %v11782_v21 = vpack.c.bf16 %v102_v15, %v102_v15  ;;  %v119_v23 = vld [vmem:[#allocation5 + $0x58] sm:$0xff] }
  0xd3   :  { %v10049_v27 = vcombine.high %v118_v19, %v122_v20  ;;  %v10048_v33 = vcombine.low %v118_v19, %v122_v20  ;;  %v10050_v34 = vcombine.low %v119_v23, %v123_v24  ;;  %v178_v15 = vld [vmem:[#allocation5 + $0x230] sm:$0xff] }
  0xd5   :  { %1704 = vmatpush1.bf16.msra.mxu0 %v10236_v28  ;;  %1786 = vmatpush1.bf16.msra.mxu1 %v10238_v29  ;;  %v10051_v28 = vcombine.high %v119_v23, %v123_v24  ;;  %v126_v29 = vld [vmem:[#allocation5 + $0x90] sm:$0xff] }
  0xd6   :  { %1705 = vmatprep.subr.bf16.mxu0 %v10245_v30  ;;  %1787 = vmatprep.subr.bf16.mxu1 %v10247_v31  ;;  %v130_v30 = vld [vmem:[#allocation5 + $0xb0] sm:$0xff]  ;;  %v127_v31 = vld [vmem:[#allocation5 + $0x98] sm:$0xff] }
  0xd7   :  { %v10057_v35 = vcombine.high %v126_v29, %v130_v30  ;;  %v10056_v41 = vcombine.low %v126_v29, %v130_v30  ;;  %v10058_v42 = vcombine.low %v127_v31, %v131_v32  ;;  %v182_v24 = vld [vmem:[#allocation5 + $0x250] sm:$0xff] }
  0xd9   :  { %1706 = vmatpush1.bf16.msra.mxu0 %v10244_v36  ;;  %1788 = vmatpush1.bf16.msra.mxu1 %v10246_v37  ;;  %v10059_v36 = vcombine.high %v127_v31, %v131_v32  ;;  %v134_v37 = vld [vmem:[#allocation5 + $0xd0] sm:$0xff] }
  0xda   :  { %1707 = vmatprep.subr.bf16.mxu0 %v10253_v38  ;;  %1789 = vmatprep.subr.bf16.mxu1 %v10255_v39  ;;  %v138_v38 = vld [vmem:[#allocation5 + $0xf0] sm:$0xff]  ;;  %v135_v39 = vld [vmem:[#allocation5 + $0xd8] sm:$0xff] }
  0xdb   :  { %v10065_v43 = vcombine.high %v134_v37, %v138_v38  ;;  %v10064_v49 = vcombine.low %v134_v37, %v138_v38  ;;  %v10066_v50 = vcombine.low %v135_v39, %v139_v40  ;;  %v190_v32 = vld [vmem:[#allocation5 + $0x290] sm:$0xff] }
  0xdd   :  { %1708 = vmatpush1.bf16.msra.mxu0 %v10252_v44  ;;  %1790 = vmatpush1.bf16.msra.mxu1 %v10254_v45  ;;  %v10067_v44 = vcombine.high %v135_v39, %v139_v40  ;;  %v142_v45 = vld [vmem:[#allocation5 + $0x110] sm:$0xff] }
  0xde   :  { %1709 = vmatprep.subr.bf16.mxu0 %v10261_v46  ;;  %1791 = vmatprep.subr.bf16.mxu1 %v10263_v47  ;;  %v146_v46 = vld [vmem:[#allocation5 + $0x130] sm:$0xff]  ;;  %v143_v47 = vld [vmem:[#allocation5 + $0x118] sm:$0xff] }
  0xdf   :  { %v10073_v51 = vcombine.high %v142_v45, %v146_v46  ;;  %v10072_v56 = vcombine.low %v142_v45, %v146_v46  ;;  %v10074_v58 = vcombine.low %v143_v47, %v147_v48  ;;  %v198_v40 = vld [vmem:[#allocation5 + $0x2d0] sm:$0xff] }
  0xe1   :  { %1710 = vmatpush1.bf16.msra.mxu0 %v10260_v52  ;;  %1792 = vmatpush1.bf16.msra.mxu1 %v10262_v53  ;;  %v150_v52 = vld [vmem:[#allocation5 + $0x150] sm:$0xff] }
  0xe2   :  { %1711 = vmatprep.subr.bf16.mxu0 %v10269_v54  ;;  %1793 = vmatprep.subr.bf16.mxu1 %v10271_v55  ;;  %v154_v53 = vld [vmem:[#allocation5 + $0x170] sm:$0xff]  ;;  %v151_v54 = vld [vmem:[#allocation5 + $0x158] sm:$0xff] }
  0xe3   :  { %v155_v55 = vld [vmem:[#allocation5 + $0x178] sm:$0xff]  ;;  %v10081_v59 = vcombine.high %v150_v52, %v154_v53  ;;  %v10080_v1 = vcombine.low %v150_v52, %v154_v53 }
  0xe4   :  { %v10083_v60 = vcombine.high %v151_v54, %v155_v55  ;;  %v10082_v2 = vcombine.low %v151_v54, %v155_v55  ;;  %v214_v55 = vld [vmem:[#allocation5 + $0x350] sm:$0xff] }
  0xe5   :  { %1712 = vmatpush1.bf16.msra.mxu0 %v10268_v61  ;;  %1794 = vmatpush1.bf16.msra.mxu1 %v10270_v62  ;;  %v158_v61 = vld [vmem:[#allocation5 + $0x190] sm:$0xff] }
  0xe6   :  { %1713 = vmatprep.subr.bf16.mxu0 %v10277_v63  ;;  %1795 = vmatprep.subr.bf16.mxu1 %v10279_v0  ;;  %v162_v62 = vld [vmem:[#allocation5 + $0x1b0] sm:$0xff]  ;;  %v159_v63 = vld [vmem:[#allocation5 + $0x198] sm:$0xff] }
  0xe7   :  { %v163_v0 = vld [vmem:[#allocation5 + $0x1b8] sm:$0xff]  ;;  %v10089_v3 = vcombine.high %v158_v61, %v162_v62  ;;  %v10088_v9 = vcombine.low %v158_v61, %v162_v62 }
  0xe8   :  { %v10091_v4 = vcombine.high %v159_v63, %v163_v0  ;;  %v10090_v10 = vcombine.low %v159_v63, %v163_v0  ;;  %v222_v0 = vld [vmem:[#allocation5 + $0x390] sm:$0xff] }
  0xe9   :  { %1714 = vmatpush1.bf16.msra.mxu0 %v10276_v5  ;;  %1796 = vmatpush1.bf16.msra.mxu1 %v10278_v6  ;;  %v166_v5 = vld [vmem:[#allocation5 + $0x1d0] sm:$0xff] }
  0xea   :  { %1715 = vmatprep.subr.bf16.mxu0 %v10285_v7  ;;  %1797 = vmatprep.subr.bf16.mxu1 %v10287_v8  ;;  %v170_v6 = vld [vmem:[#allocation5 + $0x1f0] sm:$0xff]  ;;  %v167_v7 = vld [vmem:[#allocation5 + $0x1d8] sm:$0xff] }
  0xeb   :  { %v171_v8 = vld [vmem:[#allocation5 + $0x1f8] sm:$0xff]  ;;  %v10097_v11 = vcombine.high %v166_v5, %v170_v6 }
  0xec   :  { %v10099_v13 = vcombine.high %v167_v7, %v171_v8  ;;  %v10098_v19 = vcombine.low %v167_v7, %v171_v8  ;;  %v230_v8 = vld [vmem:[#allocation5 + $0x3d0] sm:$0xff] }
  0xed   :  { %1716 = vmatpush1.bf16.msra.mxu0 %v10284_v14  ;;  %1798 = vmatpush1.bf16.msra.mxu1 %v10286_v16  ;;  %v174_v14 = vld [vmem:[#allocation5 + $0x210] sm:$0xff]  ;;  %v175_v16 = vld [vmem:[#allocation5 + $0x218] sm:$0xff] }
  0xee   :  { %1808 = vmatprep.subr.bf16.mxu0 %v10041_v17  ;;  %1890 = vmatprep.subr.bf16.mxu1 %v10043_v18  ;;  %v179_v17 = vld [vmem:[#allocation5 + $0x238] sm:$0xff]  ;;  %v10096_v18 = vcombine.low %v166_v5, %v170_v6  ;;  %v10105_v20 = vcombine.high %v174_v14, %v178_v15 }
  0xef   :  { %v10107_v23 = vcombine.high %v175_v16, %v179_v17  ;;  %v10106_v29 = vcombine.low %v175_v16, %v179_v17  ;;  %v238_v17 = vld [vmem:[#allocation5 + $0x410] sm:$0xff] }
  0xf0   :  { %1718 = vmatmul.mubr.bf16.vlgmr.msra.gmra.mrb[0].mxu0 %v11782_v21  ;;  %1800 = vmatmul.mubr.bf16.vlgmr.msra.gmra.mrb[0].mxu1 %v11782_v21 }
  0xf1   :  { %1809 = vmatpush1.bf16.msra.mxu0 %v10040_v25  ;;  %1891 = vmatpush1.bf16.msra.mxu1 %v10042_v26  ;;  %v186_v25 = vld [vmem:[#allocation5 + $0x270] sm:$0xff]  ;;  %v183_v26 = vld [vmem:[#allocation5 + $0x258] sm:$0xff] }
  0xf2   :  { %1810 = vmatprep.subr.bf16.mxu0 %v10049_v27  ;;  %1892 = vmatprep.subr.bf16.mxu1 %v10051_v28  ;;  %v187_v27 = vld [vmem:[#allocation5 + $0x278] sm:$0xff]  ;;  %v10104_v28 = vcombine.low %v174_v14, %v178_v15  ;;  %v10113_v30 = vcombine.high %v182_v24, %v186_v25 }
  0xf3   :  { %1840 = vmatprep.mubr.bf16.mxu0 %v11770_v57  ;;  %1922 = vmatprep.mubr.bf16.mxu1 %v11770_v57  ;;  %v10075_v57 = vcombine.high %v143_v47, %v147_v48  ;;  %v10115_v31 = vcombine.high %v183_v26, %v187_v27  ;;  %v10114_v37 = vcombine.low %v183_v26, %v187_v27  ;;  %v206_v48 = vld [vmem:[#allocation5 + $0x310] sm:$0xff] }
  0xf4   :  { %v246_v27 = vld [vmem:[#allocation5 + $0x450] sm:$0xff] }
  0xf5   :  { %1811 = vmatpush1.bf16.msra.mxu0 %v10048_v33  ;;  %1893 = vmatpush1.bf16.msra.mxu1 %v10050_v34  ;;  %v194_v33 = vld [vmem:[#allocation5 + $0x2b0] sm:$0xff]  ;;  %v191_v34 = vld [vmem:[#allocation5 + $0x298] sm:$0xff] }
  0xf6   :  { %1812 = vmatprep.subr.bf16.mxu0 %v10057_v35  ;;  %1894 = vmatprep.subr.bf16.mxu1 %v10059_v36  ;;  %v195_v35 = vld [vmem:[#allocation5 + $0x2b8] sm:$0xff]  ;;  %v10112_v36 = vcombine.low %v182_v24, %v186_v25  ;;  %v10121_v38 = vcombine.high %v190_v32, %v194_v33 }
  0xf7   :  { %v10123_v39 = vcombine.high %v191_v34, %v195_v35  ;;  %v10122_v45 = vcombine.low %v191_v34, %v195_v35  ;;  %v254_v35 = vld [vmem:[#allocation5 + $0x490] sm:$0xff] }
  0xf9   :  { %1813 = vmatpush1.bf16.msra.mxu0 %v10056_v41  ;;  %1895 = vmatpush1.bf16.msra.mxu1 %v10058_v42  ;;  %v202_v41 = vld [vmem:[#allocation5 + $0x2f0] sm:$0xff]  ;;  %v199_v42 = vld [vmem:[#allocation5 + $0x2d8] sm:$0xff] }
  0xfa   :  { %1814 = vmatprep.subr.bf16.mxu0 %v10065_v43  ;;  %1896 = vmatprep.subr.bf16.mxu1 %v10067_v44  ;;  %v203_v43 = vld [vmem:[#allocation5 + $0x2f8] sm:$0xff]  ;;  %v10120_v44 = vcombine.low %v190_v32, %v194_v33  ;;  %v10129_v46 = vcombine.high %v198_v40, %v202_v41 }
  0xfb   :  { %v10131_v47 = vcombine.high %v199_v42, %v203_v43  ;;  %v10130_v52 = vcombine.low %v199_v42, %v203_v43  ;;  %v262_v43 = vld [vmem:[#allocation5 + $0x4d0] sm:$0xff] }
  0xfd   :  { %1815 = vmatpush1.bf16.msra.mxu0 %v10064_v49  ;;  %1897 = vmatpush1.bf16.msra.mxu1 %v10066_v50  ;;  %v210_v49 = vld [vmem:[#allocation5 + $0x330] sm:$0xff]  ;;  %v207_v50 = vld [vmem:[#allocation5 + $0x318] sm:$0xff] }
  0xfe   :  { %1816 = vmatprep.subr.bf16.mxu0 %v10073_v51  ;;  %1898 = vmatprep.subr.bf16.mxu1 %v10075_v57  ;;  %v211_v51 = vld [vmem:[#allocation5 + $0x338] sm:$0xff]  ;;  %v10128_v57 = vcombine.low %v198_v40, %v202_v41  ;;  %v10137_v53 = vcombine.high %v206_v48, %v210_v49 }
  0xff   :  { %v10139_v54 = vcombine.high %v207_v50, %v211_v51  ;;  %v10138_v61 = vcombine.low %v207_v50, %v211_v51  ;;  %v270_v50 = vld [vmem:[#allocation5 + $0x510] sm:$0xff] }
 0x100   :  { %v274_v51 = vld [vmem:[#allocation5 + $0x530] sm:$0xff] }
 0x101   :  { %1817 = vmatpush1.bf16.msra.mxu0 %v10072_v56  ;;  %1899 = vmatpush1.bf16.msra.mxu1 %v10074_v58  ;;  %v218_v56 = vld [vmem:[#allocation5 + $0x370] sm:$0xff]  ;;  %v215_v58 = vld [vmem:[#allocation5 + $0x358] sm:$0xff] }
 0x102   :  { %1818 = vmatprep.subr.bf16.mxu0 %v10081_v59  ;;  %1900 = vmatprep.subr.bf16.mxu1 %v10083_v60  ;;  %v219_v59 = vld [vmem:[#allocation5 + $0x378] sm:$0xff]  ;;  %v10136_v60 = vcombine.low %v206_v48, %v210_v49  ;;  %v10145_v62 = vcombine.high %v214_v55, %v218_v56 }
 0x103   :  { %v10147_v63 = vcombine.high %v215_v58, %v219_v59  ;;  %v10146_v5 = vcombine.low %v215_v58, %v219_v59  ;;  %v282_v58 = vld [vmem:[#allocation5 + $0x570] sm:$0xff]  ;;  %v279_v59 = vld [vmem:[#allocation5 + $0x558] sm:$0xff] }
 0x105   :  { %1819 = vmatpush1.bf16.msra.mxu0 %v10080_v1  ;;  %1901 = vmatpush1.bf16.msra.mxu1 %v10082_v2  ;;  %v226_v1 = vld [vmem:[#allocation5 + $0x3b0] sm:$0xff]  ;;  %v223_v2 = vld [vmem:[#allocation5 + $0x398] sm:$0xff] }
 0x106   :  { %1820 = vmatprep.subr.bf16.mxu0 %v10089_v3  ;;  %1902 = vmatprep.subr.bf16.mxu1 %v10091_v4  ;;  %v227_v3 = vld [vmem:[#allocation5 + $0x3b8] sm:$0xff]  ;;  %v10144_v4 = vcombine.low %v214_v55, %v218_v56  ;;  %v10153_v6 = vcombine.high %v222_v0, %v226_v1  ;;  %v10201_v55 = vcombine.high %v270_v50, %v274_v51  ;;  %v278_v56 = vld [vmem:[#allocation5 + $0x550] sm:$0xff] }
 0x107   :  { %v10155_v7 = vcombine.high %v223_v2, %v227_v3  ;;  %v10154_v14 = vcombine.low %v223_v2, %v227_v3  ;;  %v290_v2 = vld [vmem:[#allocation5 + $0x5b0] sm:$0xff]  ;;  %v287_v3 = vld [vmem:[#allocation5 + $0x598] sm:$0xff] }
 0x109   :  { %1821 = vmatpush1.bf16.msra.mxu0 %v10088_v9  ;;  %1903 = vmatpush1.bf16.msra.mxu1 %v10090_v10  ;;  %v234_v9 = vld [vmem:[#allocation5 + $0x3f0] sm:$0xff]  ;;  %v231_v10 = vld [vmem:[#allocation5 + $0x3d8] sm:$0xff] }
 0x10a   :  { %1822 = vmatprep.subr.bf16.mxu0 %v10097_v11  ;;  %1904 = vmatprep.subr.bf16.mxu1 %v10099_v13  ;;  %v235_v11 = vld [vmem:[#allocation5 + $0x3f8] sm:$0xff]  ;;  %v10152_v13 = vcombine.low %v222_v0, %v226_v1  ;;  %v10161_v15 = vcombine.high %v230_v8, %v234_v9  ;;  %v286_v1 = vld [vmem:[#allocation5 + $0x590] sm:$0xff] }
 0x10b   :  { %v10163_v16 = vcombine.high %v231_v10, %v235_v11  ;;  %v10162_v24 = vcombine.low %v231_v10, %v235_v11  ;;  %v298_v10 = vld [vmem:[#allocation5 + $0x5f0] sm:$0xff]  ;;  %v295_v11 = vld [vmem:[#allocation5 + $0x5d8] sm:$0xff] }
 0x10d   :  { %1823 = vmatpush1.bf16.msra.mxu0 %v10096_v18  ;;  %1905 = vmatpush1.bf16.msra.mxu1 %v10098_v19  ;;  %v242_v18 = vld [vmem:[#allocation5 + $0x430] sm:$0xff]  ;;  %v239_v19 = vld [vmem:[#allocation5 + $0x418] sm:$0xff] }
 0x10e   :  { %1824 = vmatprep.subr.bf16.mxu0 %v10105_v20  ;;  %1906 = vmatprep.subr.bf16.mxu1 %v10107_v23  ;;  %v243_v20 = vld [vmem:[#allocation5 + $0x438] sm:$0xff]  ;;  %v10160_v23 = vcombine.low %v230_v8, %v234_v9  ;;  %v10169_v25 = vcombine.high %v238_v17, %v242_v18  ;;  %v294_v9 = vld [vmem:[#allocation5 + $0x5d0] sm:$0xff] }
 0x10f   :  { %v10171_v26 = vcombine.high %v239_v19, %v243_v20  ;;  %v10170_v32 = vcombine.low %v239_v19, %v243_v20  ;;  %v306_v19 = vld [vmem:[#allocation5 + $0x630] sm:$0xff]  ;;  %v303_v20 = vld [vmem:[#allocation5 + $0x618] sm:$0xff] }
 0x111   :  { %1825 = vmatpush1.bf16.msra.mxu0 %v10104_v28  ;;  %1907 = vmatpush1.bf16.msra.mxu1 %v10106_v29  ;;  %v250_v28 = vld [vmem:[#allocation5 + $0x470] sm:$0xff]  ;;  %v247_v29 = vld [vmem:[#allocation5 + $0x458] sm:$0xff] }
 0x112   :  { %1826 = vmatprep.subr.bf16.mxu0 %v10113_v30  ;;  %1908 = vmatprep.subr.bf16.mxu1 %v10115_v31  ;;  %v251_v30 = vld [vmem:[#allocation5 + $0x478] sm:$0xff]  ;;  %v10168_v31 = vcombine.low %v238_v17, %v242_v18  ;;  %v10177_v33 = vcombine.high %v246_v27, %v250_v28  ;;  %v302_v18 = vld [vmem:[#allocation5 + $0x610] sm:$0xff] }
 0x113   :  { %v10179_v34 = vcombine.high %v247_v29, %v251_v30  ;;  %v10178_v40 = vcombine.low %v247_v29, %v251_v30  ;;  %v314_v29 = vld [vmem:[#allocation5 + $0x670] sm:$0xff]  ;;  %v311_v30 = vld [vmem:[#allocation5 + $0x658] sm:$0xff] }
 0x115   :  { %1827 = vmatpush1.bf16.msra.mxu0 %v10112_v36  ;;  %1909 = vmatpush1.bf16.msra.mxu1 %v10114_v37  ;;  %v258_v36 = vld [vmem:[#allocation5 + $0x4b0] sm:$0xff]  ;;  %v255_v37 = vld [vmem:[#allocation5 + $0x498] sm:$0xff] }
 0x116   :  { %1828 = vmatprep.subr.bf16.mxu0 %v10121_v38  ;;  %1910 = vmatprep.subr.bf16.mxu1 %v10123_v39  ;;  %v259_v38 = vld [vmem:[#allocation5 + $0x4b8] sm:$0xff]  ;;  %v10176_v39 = vcombine.low %v246_v27, %v250_v28  ;;  %v10185_v41 = vcombine.high %v254_v35, %v258_v36  ;;  %v310_v28 = vld [vmem:[#allocation5 + $0x650] sm:$0xff] }
 0x117   :  { %v10187_v42 = vcombine.high %v255_v37, %v259_v38 }
 0x119   :  { %1829 = vmatpush1.bf16.msra.mxu0 %v10120_v44  ;;  %1911 = vmatpush1.bf16.msra.mxu1 %v10122_v45  ;;  %v266_v44 = vld [vmem:[#allocation5 + $0x4f0] sm:$0xff]  ;;  %v263_v45 = vld [vmem:[#allocation5 + $0x4d8] sm:$0xff] }
 0x11a   :  { %1830 = vmatprep.subr.bf16.mxu0 %v10129_v46  ;;  %1912 = vmatprep.subr.bf16.mxu1 %v10131_v47  ;;  %v267_v46 = vld [vmem:[#allocation5 + $0x4f8] sm:$0xff]  ;;  %v10184_v47 = vcombine.low %v254_v35, %v258_v36  ;;  %v10193_v48 = vcombine.high %v262_v43, %v266_v44  ;;  %v318_v36 = vld [vmem:[#allocation5 + $0x690] sm:$0xff] }
 0x11b   :  { %v10195_v49 = vcombine.high %v263_v45, %v267_v46 }
 0x11d   :  { %1831 = vmatpush1.bf16.msra.mxu0 %v10128_v57  ;;  %1913 = vmatpush1.bf16.msra.mxu1 %v10130_v52  ;;  %v271_v57 = vld [vmem:[#allocation5 + $0x518] sm:$0xff] }
 0x11e   :  { %1832 = vmatprep.subr.bf16.mxu0 %v10137_v53  ;;  %1914 = vmatprep.subr.bf16.mxu1 %v10139_v54  ;;  %v275_v52 = vld [vmem:[#allocation5 + $0x538] sm:$0xff]  ;;  %v10192_v53 = vcombine.low %v262_v43, %v266_v44  ;;  %v10194_v54 = vcombine.low %v263_v45, %v267_v46  ;;  %v326_v44 = vld [vmem:[#allocation5 + $0x6d0] sm:$0xff] }
 0x11f   :  { %v330_v45 = vld [vmem:[#allocation5 + $0x6f0] sm:$0xff]  ;;  %v327_v46 = vld [vmem:[#allocation5 + $0x6d8] sm:$0xff] }
 0x121   :  { %1833 = vmatpush1.bf16.msra.mxu0 %v10136_v60  ;;  %1915 = vmatpush1.bf16.msra.mxu1 %v10138_v61  ;;  %v283_v60 = vld [vmem:[#allocation5 + $0x578] sm:$0xff]  ;;  %v10200_v61 = vcombine.low %v270_v50, %v274_v51  ;;  %v334_v51 = vld [vmem:[#allocation5 + $0x710] sm:$0xff] }
 0x122   :  { %1834 = vmatprep.subr.bf16.mxu0 %v10145_v62  ;;  %1916 = vmatprep.subr.bf16.mxu1 %v10147_v63  ;;  %v10202_v62 = vcombine.low %v271_v57, %v275_v52  ;;  %v10209_v63 = vcombine.high %v278_v56, %v282_v58  ;;  %v10211_v0 = vcombine.high %v279_v59, %v283_v60 }
 0x125   :  { %1835 = vmatpush1.bf16.msra.mxu0 %v10144_v4  ;;  %1917 = vmatpush1.bf16.msra.mxu1 %v10146_v5  ;;  %v291_v4 = vld [vmem:[#allocation5 + $0x5b8] sm:$0xff]  ;;  %v10208_v5 = vcombine.low %v278_v56, %v282_v58  ;;  %v342_v58 = vld [vmem:[#allocation5 + $0x750] sm:$0xff] }
 0x126   :  { %1836 = vmatprep.subr.bf16.mxu0 %v10153_v6  ;;  %1918 = vmatprep.subr.bf16.mxu1 %v10155_v7  ;;  %v10210_v6 = vcombine.low %v279_v59, %v283_v60  ;;  %v10217_v7 = vcombine.high %v286_v1, %v290_v2  ;;  %v10219_v8 = vcombine.high %v287_v3, %v291_v4  ;;  %v346_v59 = vld [vmem:[#allocation5 + $0x770] sm:$0xff]  ;;  %v343_v60 = vld [vmem:[#allocation5 + $0x758] sm:$0xff] }
 0x129   :  { %1837 = vmatpush1.bf16.msra.mxu0 %v10152_v13  ;;  %1919 = vmatpush1.bf16.msra.mxu1 %v10154_v14  ;;  %v299_v13 = vld [vmem:[#allocation5 + $0x5f8] sm:$0xff]  ;;  %v10216_v14 = vcombine.low %v286_v1, %v290_v2  ;;  %v350_v2 = vld [vmem:[#allocation5 + $0x790] sm:$0xff] }
 0x12a   :  { %1838 = vmatprep.subr.bf16.mxu0 %v10161_v15  ;;  %1920 = vmatprep.subr.bf16.mxu1 %v10163_v16  ;;  %v10218_v15 = vcombine.low %v287_v3, %v291_v4  ;;  %v10225_v16 = vcombine.high %v294_v9, %v298_v10  ;;  %v10227_v17 = vcombine.high %v295_v11, %v299_v13  ;;  %v354_v3 = vld [vmem:[#allocation5 + $0x7b0] sm:$0xff]  ;;  %v351_v4 = vld [vmem:[#allocation5 + $0x798] sm:$0xff] }
 0x12d   :  { %1839 = vmatpush1.bf16.msra.mxu0 %v10160_v23  ;;  %1921 = vmatpush1.bf16.msra.mxu1 %v10162_v24  ;;  %v307_v23 = vld [vmem:[#allocation5 + $0x638] sm:$0xff]  ;;  %v10224_v24 = vcombine.low %v294_v9, %v298_v10  ;;  %v358_v10 = vld [vmem:[#allocation5 + $0x7d0] sm:$0xff] }
 0x12e   :  { %1849 = vmatprep.subr.bf16.mxu0 %v10169_v25  ;;  %1931 = vmatprep.subr.bf16.mxu1 %v10171_v26  ;;  %v10226_v25 = vcombine.low %v295_v11, %v299_v13  ;;  %v10233_v26 = vcombine.high %v302_v18, %v306_v19  ;;  %v10235_v27 = vcombine.high %v303_v20, %v307_v23  ;;  %v362_v11 = vld [vmem:[#allocation5 + $0x7f0] sm:$0xff]  ;;  %v359_v13 = vld [vmem:[#allocation5 + $0x7d8] sm:$0xff] }
 0x130   :  { %1841 = vmatmul.mubr.bf16.vlgmr.msra.gmra.mrb[4].mxu0 %v11774_v12  ;;  %1923 = vmatmul.mubr.bf16.vlgmr.msra.gmra.mrb[4].mxu1 %v11774_v12  ;;  %v10186_v12 = vcombine.low %v255_v37, %v259_v38  ;;  %v322_v37 = vld [vmem:[#allocation5 + $0x6b0] sm:$0xff]  ;;  %v319_v38 = vld [vmem:[#allocation5 + $0x698] sm:$0xff] }
 0x131   :  { %1850 = vmatpush1.bf16.msra.mxu0 %v10168_v31  ;;  %1932 = vmatpush1.bf16.msra.mxu1 %v10170_v32  ;;  %v315_v31 = vld [vmem:[#allocation5 + $0x678] sm:$0xff]  ;;  %v10232_v32 = vcombine.low %v302_v18, %v306_v19  ;;  %v2242_v19 = vld [vmem:[#allocation7] sm:$0xff] }
 0x132   :  { %1851 = vmatprep.subr.bf16.mxu0 %v10177_v33  ;;  %1933 = vmatprep.subr.bf16.mxu1 %v10179_v34  ;;  %v10234_v33 = vcombine.low %v303_v20, %v307_v23  ;;  %v10241_v34 = vcombine.high %v310_v28, %v314_v29  ;;  %v10243_v35 = vcombine.high %v311_v30, %v315_v31  ;;  %v2246_v20 = vld [vmem:[#allocation7 + $0x20] sm:$0xff]  ;;  %v2243_v23 = vld [vmem:[#allocation7 + $0x8] sm:$0xff] }
 0x133   :  { %1881 = vmatprep.mubr.bf16.mxu0 %v11776_v22  ;;  %1963 = vmatprep.mubr.bf16.mxu1 %v11776_v22  ;;  %v10203_v22 = vcombine.high %v271_v57, %v275_v52  ;;  %v338_v57 = vld [vmem:[#allocation5 + $0x730] sm:$0xff]  ;;  %v335_v52 = vld [vmem:[#allocation5 + $0x718] sm:$0xff] }
 0x135   :  { %1852 = vmatpush1.bf16.msra.mxu0 %v10176_v39  ;;  %1934 = vmatpush1.bf16.msra.mxu1 %v10178_v40  ;;  %v323_v39 = vld [vmem:[#allocation5 + $0x6b8] sm:$0xff]  ;;  %v10240_v40 = vcombine.low %v310_v28, %v314_v29  ;;  %v2250_v29 = vld [vmem:[#allocation7 + $0x40] sm:$0xff] }
 0x136   :  { %1853 = vmatprep.subr.bf16.mxu0 %v10185_v41  ;;  %1935 = vmatprep.subr.bf16.mxu1 %v10187_v42  ;;  %v10242_v41 = vcombine.low %v311_v30, %v315_v31  ;;  %v10249_v42 = vcombine.high %v318_v36, %v322_v37  ;;  %v10251_v43 = vcombine.high %v319_v38, %v323_v39  ;;  %v2254_v30 = vld [vmem:[#allocation7 + $0x60] sm:$0xff]  ;;  %v2251_v31 = vld [vmem:[#allocation7 + $0x48] sm:$0xff] }
 0x139   :  { %1854 = vmatpush1.bf16.msra.mxu0 %v10184_v47  ;;  %1936 = vmatpush1.bf16.msra.mxu1 %v10186_v12  ;;  %v331_v47 = vld [vmem:[#allocation5 + $0x6f8] sm:$0xff]  ;;  %v10248_v12 = vcombine.low %v318_v36, %v322_v37  ;;  %v2258_v37 = vld [vmem:[#allocation7 + $0x80] sm:$0xff] }
 0x13a   :  { %1855 = vmatprep.subr.bf16.mxu0 %v10193_v48  ;;  %1937 = vmatprep.subr.bf16.mxu1 %v10195_v49  ;;  %v10250_v48 = vcombine.low %v319_v38, %v323_v39  ;;  %v10257_v49 = vcombine.high %v326_v44, %v330_v45  ;;  %v10259_v50 = vcombine.high %v327_v46, %v331_v47  ;;  %v2262_v38 = vld [vmem:[#allocation7 + $0xa0] sm:$0xff]  ;;  %v2259_v39 = vld [vmem:[#allocation7 + $0x88] sm:$0xff] }
 0x13d   :  { %1856 = vmatpush1.bf16.msra.mxu0 %v10192_v53  ;;  %1938 = vmatpush1.bf16.msra.mxu1 %v10194_v54  ;;  %v339_v53 = vld [vmem:[#allocation5 + $0x738] sm:$0xff]  ;;  %v10256_v54 = vcombine.low %v326_v44, %v330_v45  ;;  %v2266_v45 = vld [vmem:[#allocation7 + $0xc0] sm:$0xff] }
 0x13e   :  { %1857 = vmatprep.subr.bf16.mxu0 %v10201_v55  ;;  %1939 = vmatprep.subr.bf16.mxu1 %v10203_v22  ;;  %v10258_v55 = vcombine.low %v327_v46, %v331_v47  ;;  %v10265_v22 = vcombine.high %v334_v51, %v338_v57  ;;  %v10267_v56 = vcombine.high %v335_v52, %v339_v53  ;;  %v2270_v46 = vld [vmem:[#allocation7 + $0xe0] sm:$0xff]  ;;  %v2267_v47 = vld [vmem:[#allocation7 + $0xc8] sm:$0xff] }
 0x141   :  { %1858 = vmatpush1.bf16.msra.mxu0 %v10200_v61  ;;  %1940 = vmatpush1.bf16.msra.mxu1 %v10202_v62  ;;  %v347_v61 = vld [vmem:[#allocation5 + $0x778] sm:$0xff]  ;;  %v10264_v62 = vcombine.low %v334_v51, %v338_v57  ;;  %v2274_v51 = vld [vmem:[#allocation7 + $0x100] sm:$0xff] }
 0x142   :  { %1859 = vmatprep.subr.bf16.mxu0 %v10209_v63  ;;  %1941 = vmatprep.subr.bf16.mxu1 %v10211_v0  ;;  %v10266_v63 = vcombine.low %v335_v52, %v339_v53  ;;  %v10273_v0 = vcombine.high %v342_v58, %v346_v59  ;;  %v10275_v1 = vcombine.high %v343_v60, %v347_v61  ;;  %v2278_v57 = vld [vmem:[#allocation7 + $0x120] sm:$0xff]  ;;  %v2275_v52 = vld [vmem:[#allocation7 + $0x108] sm:$0xff] }
 0x143   :  { %v2279_v53 = vld [vmem:[#allocation7 + $0x128] sm:$0xff] }
 0x145   :  { %1860 = vmatpush1.bf16.msra.mxu0 %v10208_v5  ;;  %1942 = vmatpush1.bf16.msra.mxu1 %v10210_v6  ;;  %v355_v5 = vld [vmem:[#allocation5 + $0x7b8] sm:$0xff]  ;;  %v10272_v6 = vcombine.low %v342_v58, %v346_v59  ;;  %v2286_v58 = vld [vmem:[#allocation7 + $0x160] sm:$0xff]  ;;  %v10327_v59 = vcombine.high %v2275_v52, %v2279_v53 }
 0x146   :  { %1861 = vmatprep.subr.bf16.mxu0 %v10217_v7  ;;  %1943 = vmatprep.subr.bf16.mxu1 %v10219_v8  ;;  %v10274_v7 = vcombine.low %v343_v60, %v347_v61  ;;  %v10281_v8 = vcombine.high %v350_v2, %v354_v3  ;;  %v10283_v9 = vcombine.high %v351_v4, %v355_v5  ;;  %v11794_v60 = vld [vmem:[#allocation7 + $0x400] sm:$0xff] }
 0x147   :  { %v11796_v61 = vld [vmem:[#allocation7 + $0x420] sm:$0xff] }
 0x149   :  { %1862 = vmatpush1.bf16.msra.mxu0 %v10216_v14  ;;  %1944 = vmatpush1.bf16.msra.mxu1 %v10218_v15  ;;  %v363_v14 = vld [vmem:[#allocation5 + $0x7f8] sm:$0xff]  ;;  %v10280_v15 = vcombine.low %v350_v2, %v354_v3  ;;  %v10324_v2 = vcombine.low %v2274_v51, %v2278_v57  ;;  %v10420_v3 = vcombine.low %v11794_v60, %v11796_v61 }
 0x14a   :  { %1863 = vmatprep.subr.bf16.mxu0 %v10225_v16  ;;  %1945 = vmatprep.subr.bf16.mxu1 %v10227_v17  ;;  %v10282_v16 = vcombine.low %v351_v4, %v355_v5  ;;  %v10289_v17 = vcombine.high %v358_v10, %v362_v11  ;;  %v10291_v18 = vcombine.high %v359_v13, %v363_v14 }
 0x14b   :  { %v10326_v5 = vcombine.low %v2275_v52, %v2279_v53 }
 0x14d   :  { %1864 = vmatpush1.bf16.msra.mxu0 %v10224_v24  ;;  %1946 = vmatpush1.bf16.msra.mxu1 %v10226_v25  ;;  %v2247_v24 = vld [vmem:[#allocation7 + $0x28] sm:$0xff]  ;;  %v10288_v25 = vcombine.low %v358_v10, %v362_v11 }
 0x14e   :  { %1865 = vmatprep.subr.bf16.mxu0 %v10233_v26  ;;  %1947 = vmatprep.subr.bf16.mxu1 %v10235_v27  ;;  %v10290_v26 = vcombine.low %v359_v13, %v363_v14  ;;  %v10293_v27 = vcombine.high %v2242_v19, %v2246_v20  ;;  %v10295_v28 = vcombine.high %v2243_v23, %v2247_v24  ;;  %v2291_v10 = vld [vmem:[#allocation7 + $0x188] sm:$0xff] }
 0x14f   :  { %v2295_v11 = vld [vmem:[#allocation7 + $0x1a8] sm:$0xff] }
 0x151   :  { %1866 = vmatpush1.bf16.msra.mxu0 %v10232_v32  ;;  %1948 = vmatpush1.bf16.msra.mxu1 %v10234_v33  ;;  %v2255_v32 = vld [vmem:[#allocation7 + $0x68] sm:$0xff]  ;;  %v10292_v33 = vcombine.low %v2242_v19, %v2246_v20 }
 0x152   :  { %1867 = vmatprep.subr.bf16.mxu0 %v10241_v34  ;;  %1949 = vmatprep.subr.bf16.mxu1 %v10243_v35  ;;  %v10294_v34 = vcombine.low %v2243_v23, %v2247_v24  ;;  %v10301_v35 = vcombine.high %v2250_v29, %v2254_v30  ;;  %v10303_v36 = vcombine.high %v2251_v31, %v2255_v32  ;;  %v2299_v19 = vld [vmem:[#allocation7 + $0x1c8] sm:$0xff] }
 0x153   :  { %v2303_v20 = vld [vmem:[#allocation7 + $0x1e8] sm:$0xff]  ;;  %v10342_v24 = vcombine.low %v2291_v10, %v2295_v11 }
 0x155   :  { %1868 = vmatpush1.bf16.msra.mxu0 %v10240_v40  ;;  %1950 = vmatpush1.bf16.msra.mxu1 %v10242_v41  ;;  %v2263_v40 = vld [vmem:[#allocation7 + $0xa8] sm:$0xff]  ;;  %v10300_v41 = vcombine.low %v2250_v29, %v2254_v30 }
 0x156   :  { %1869 = vmatprep.subr.bf16.mxu0 %v10249_v42  ;;  %1951 = vmatprep.subr.bf16.mxu1 %v10251_v43  ;;  %v10302_v42 = vcombine.low %v2251_v31, %v2255_v32  ;;  %v10309_v43 = vcombine.high %v2258_v37, %v2262_v38  ;;  %v10311_v44 = vcombine.high %v2259_v39, %v2263_v40  ;;  %v2307_v29 = vld [vmem:[#allocation7 + $0x208] sm:$0xff] }
 0x157   :  { %v2311_v30 = vld [vmem:[#allocation7 + $0x228] sm:$0xff]  ;;  %v10350_v32 = vcombine.low %v2299_v19, %v2303_v20 }
 0x159   :  { %1870 = vmatpush1.bf16.msra.mxu0 %v10248_v12  ;;  %1952 = vmatpush1.bf16.msra.mxu1 %v10250_v48  ;;  %v2271_v12 = vld [vmem:[#allocation7 + $0xe8] sm:$0xff]  ;;  %v10308_v48 = vcombine.low %v2258_v37, %v2262_v38 }
 0x15a   :  { %1871 = vmatprep.subr.bf16.mxu0 %v10257_v49  ;;  %1953 = vmatprep.subr.bf16.mxu1 %v10259_v50  ;;  %v10310_v49 = vcombine.low %v2259_v39, %v2263_v40  ;;  %v10317_v50 = vcombine.high %v2266_v45, %v2270_v46  ;;  %v2315_v37 = vld [vmem:[#allocation7 + $0x248] sm:$0xff]  ;;  %v10358_v40 = vcombine.low %v2307_v29, %v2311_v30 }
 0x15b   :  { %v2319_v38 = vld [vmem:[#allocation7 + $0x268] sm:$0xff] }
 0x15d   :  { %1872 = vmatpush1.bf16.msra.mxu0 %v10256_v54  ;;  %1954 = vmatpush1.bf16.msra.mxu1 %v10258_v55  ;;  %v10316_v54 = vcombine.low %v2266_v45, %v2270_v46  ;;  %v10318_v55 = vcombine.low %v2267_v47, %v2271_v12  ;;  %v2323_v45 = vld [vmem:[#allocation7 + $0x288] sm:$0xff] }
 0x15e   :  { %1873 = vmatprep.subr.bf16.mxu0 %v10265_v22  ;;  %1955 = vmatprep.subr.bf16.mxu1 %v10267_v56  ;;  %v10325_v22 = vcombine.high %v2274_v51, %v2278_v57  ;;  %v2282_v56 = vld [vmem:[#allocation7 + $0x140] sm:$0xff]  ;;  %v2327_v46 = vld [vmem:[#allocation7 + $0x2a8] sm:$0xff] }
 0x15f   :  { %v10332_v13 = vcombine.low %v2282_v56, %v2286_v58  ;;  %v2331_v51 = vld [vmem:[#allocation7 + $0x2c8] sm:$0xff]  ;;  %v10374_v53 = vcombine.low %v2323_v45, %v2327_v46 }
 0x160   :  { %v2335_v57 = vld [vmem:[#allocation7 + $0x2e8] sm:$0xff] }
 0x161   :  { %1874 = vmatpush1.bf16.msra.mxu0 %v10264_v62  ;;  %1956 = vmatpush1.bf16.msra.mxu1 %v10266_v63  ;;  %v11798_v62 = vld [vmem:[#allocation7 + $0x408] sm:$0xff] }
 0x162   :  { %1875 = vmatprep.subr.bf16.mxu0 %v10273_v0  ;;  %1957 = vmatprep.subr.bf16.mxu1 %v10275_v1  ;;  %v2283_v63 = vld [vmem:[#allocation7 + $0x148] sm:$0xff] }
 0x163   :  { %v2287_v0 = vld [vmem:[#allocation7 + $0x168] sm:$0xff] }
 0x164   :  { %v11800_v1 = vld [vmem:[#allocation7 + $0x428] sm:$0xff]  ;;  %v10334_v14 = vcombine.low %v2283_v63, %v2287_v0 }
 0x165   :  { %1876 = vmatpush1.bf16.msra.mxu0 %v10272_v6  ;;  %1958 = vmatpush1.bf16.msra.mxu1 %v10274_v7  ;;  %v10422_v4 = vcombine.low %v11798_v62, %v11800_v1  ;;  %v10333_v6 = vcombine.high %v2282_v56, %v2286_v58  ;;  %v10335_v7 = vcombine.high %v2283_v63, %v2287_v0  ;;  %v2342_v56 = vld [vmem:[#allocation7 + $0x320] sm:$0xff]  ;;  %v2339_v58 = vld [vmem:[#allocation7 + $0x308] sm:$0xff] }
 0x166   :  { %1877 = vmatprep.subr.bf16.mxu0 %v10281_v8  ;;  %1959 = vmatprep.subr.bf16.mxu1 %v10283_v9  ;;  %v2290_v8 = vld [vmem:[#allocation7 + $0x180] sm:$0xff]  ;;  %v10382_v0 = vcombine.low %v2331_v51, %v2335_v57 }
 0x167   :  { %v2294_v9 = vld [vmem:[#allocation7 + $0x1a0] sm:$0xff] }
 0x168   :  { %v10340_v23 = vcombine.low %v2290_v8, %v2294_v9 }
 0x169   :  { %1878 = vmatpush1.bf16.msra.mxu0 %v10280_v15  ;;  %1960 = vmatpush1.bf16.msra.mxu1 %v10282_v16  ;;  %v10341_v15 = vcombine.high %v2290_v8, %v2294_v9  ;;  %v10343_v16 = vcombine.high %v2291_v10, %v2295_v11  ;;  %v2347_v8 = vld [vmem:[#allocation7 + $0x348] sm:$0xff] }
 0x16a   :  { %1879 = vmatprep.subr.bf16.mxu0 %v10289_v17  ;;  %1961 = vmatprep.subr.bf16.mxu1 %v10291_v18  ;;  %v2298_v17 = vld [vmem:[#allocation7 + $0x1c0] sm:$0xff]  ;;  %v2351_v9 = vld [vmem:[#allocation7 + $0x368] sm:$0xff] }
 0x16b   :  { %v2302_v18 = vld [vmem:[#allocation7 + $0x1e0] sm:$0xff] }
 0x16c   :  { %v10348_v31 = vcombine.low %v2298_v17, %v2302_v18 }
 0x16d   :  { %1880 = vmatpush1.bf16.msra.mxu0 %v10288_v25  ;;  %1962 = vmatpush1.bf16.msra.mxu1 %v10290_v26  ;;  %v10349_v25 = vcombine.high %v2298_v17, %v2302_v18  ;;  %v10351_v26 = vcombine.high %v2299_v19, %v2303_v20  ;;  %v2355_v17 = vld [vmem:[#allocation7 + $0x388] sm:$0xff]  ;;  %v10398_v20 = vcombine.low %v2347_v8, %v2351_v9 }
 0x16e   :  { %5314 = vmatprep.subr.bf16.mxu0 %v10293_v27  ;;  %5478 = vmatprep.subr.bf16.mxu1 %v10295_v28  ;;  %v2306_v27 = vld [vmem:[#allocation7 + $0x200] sm:$0xff]  ;;  %v2359_v18 = vld [vmem:[#allocation7 + $0x3a8] sm:$0xff] }
 0x16f   :  { %v2310_v28 = vld [vmem:[#allocation7 + $0x220] sm:$0xff] }
 0x170   :  { %1882 = vmatmul.mubr.bf16.vlgmr.msra.gmra.mrb[4].mxu0 %v11782_v21  ;;  %1964 = vmatmul.mubr.bf16.vlgmr.msra.gmra.mrb[4].mxu1 %v11782_v21  ;;  %v10319_v21 = vcombine.high %v2267_v47, %v2271_v12  ;;  %v10356_v39 = vcombine.low %v2306_v27, %v2310_v28  ;;  %v10366_v12 = vcombine.low %v2315_v37, %v2319_v38 }
 0x171   :  { %5315 = vmatpush1.bf16.msra.mxu0 %v10292_v33  ;;  %5479 = vmatpush1.bf16.msra.mxu1 %v10294_v34  ;;  %v10357_v33 = vcombine.high %v2306_v27, %v2310_v28  ;;  %v10359_v34 = vcombine.high %v2307_v29, %v2311_v30  ;;  %v2363_v27 = vld [vmem:[#allocation7 + $0x3c8] sm:$0xff]  ;;  %v10406_v30 = vcombine.low %v2355_v17, %v2359_v18 }
 0x172   :  { %5316 = vmatprep.subr.bf16.mxu0 %v10301_v35  ;;  %5480 = vmatprep.subr.bf16.mxu1 %v10303_v36  ;;  %v2314_v35 = vld [vmem:[#allocation7 + $0x240] sm:$0xff]  ;;  %v2367_v28 = vld [vmem:[#allocation7 + $0x3e8] sm:$0xff] }
 0x173   :  { %v2318_v36 = vld [vmem:[#allocation7 + $0x260] sm:$0xff] }
 0x174   :  { %v10364_v47 = vcombine.low %v2314_v35, %v2318_v36 }
 0x175   :  { %5317 = vmatpush1.bf16.msra.mxu0 %v10300_v41  ;;  %5481 = vmatpush1.bf16.msra.mxu1 %v10302_v42  ;;  %v10365_v41 = vcombine.high %v2314_v35, %v2318_v36  ;;  %v10367_v42 = vcombine.high %v2315_v37, %v2319_v38  ;;  %v10421_v35 = vcombine.high %v11794_v60, %v11796_v61 }
 0x176   :  { %5318 = vmatprep.subr.bf16.mxu0 %v10309_v43  ;;  %5482 = vmatprep.subr.bf16.mxu1 %v10311_v44  ;;  %v2322_v43 = vld [vmem:[#allocation7 + $0x280] sm:$0xff]  ;;  %v10423_v36 = vcombine.high %v11798_v62, %v11800_v1 }
 0x177   :  { %v2326_v44 = vld [vmem:[#allocation7 + $0x2a0] sm:$0xff] }
 0x178   :  { %v10372_v52 = vcombine.low %v2322_v43, %v2326_v44 }
 0x179   :  { %5319 = vmatpush1.bf16.msra.mxu0 %v10308_v48  ;;  %5483 = vmatpush1.bf16.msra.mxu1 %v10310_v49  ;;  %v10373_v48 = vcombine.high %v2322_v43, %v2326_v44  ;;  %v10375_v49 = vcombine.high %v2323_v45, %v2327_v46 }
 0x17a   :  { %5320 = vmatprep.subr.bf16.mxu0 %v10317_v50  ;;  %5484 = vmatprep.subr.bf16.mxu1 %v10319_v21  ;;  %v2330_v50 = vld [vmem:[#allocation7 + $0x2c0] sm:$0xff] }
 0x17b   :  { %v2334_v21 = vld [vmem:[#allocation7 + $0x2e0] sm:$0xff] }
 0x17c   :  { %v10380_v63 = vcombine.low %v2330_v50, %v2334_v21 }
 0x17d   :  { %5321 = vmatpush1.bf16.msra.mxu0 %v10316_v54  ;;  %5485 = vmatpush1.bf16.msra.mxu1 %v10318_v55  ;;  %v10381_v54 = vcombine.high %v2330_v50, %v2334_v21  ;;  %v10383_v55 = vcombine.high %v2331_v51, %v2335_v57 }
 0x17e   :  { %5322 = vmatprep.subr.bf16.mxu0 %v10325_v22  ;;  %5486 = vmatprep.subr.bf16.mxu1 %v10327_v59  ;;  %v2338_v22 = vld [vmem:[#allocation7 + $0x300] sm:$0xff]  ;;  %v2343_v59 = vld [vmem:[#allocation7 + $0x328] sm:$0xff] }
 0x17f   :  { %v10388_v10 = vcombine.low %v2338_v22, %v2342_v56  ;;  %v10390_v11 = vcombine.low %v2339_v58, %v2343_v59 }
 0x181   :  { %5323 = vmatpush1.bf16.msra.mxu0 %v10324_v2  ;;  %5487 = vmatpush1.bf16.msra.mxu1 %v10326_v5  ;;  %v10389_v2 = vcombine.high %v2338_v22, %v2342_v56  ;;  %v10391_v5 = vcombine.high %v2339_v58, %v2343_v59 }
 0x182   :  { %5324 = vmatprep.subr.bf16.mxu0 %v10333_v6  ;;  %5488 = vmatprep.subr.bf16.mxu1 %v10335_v7  ;;  %v2346_v6 = vld [vmem:[#allocation7 + $0x340] sm:$0xff] }
 0x183   :  { %v2350_v7 = vld [vmem:[#allocation7 + $0x360] sm:$0xff] }
 0x184   :  { %v10396_v19 = vcombine.low %v2346_v6, %v2350_v7 }
 0x185   :  { %5325 = vmatpush1.bf16.msra.mxu0 %v10332_v13  ;;  %5489 = vmatpush1.bf16.msra.mxu1 %v10334_v14  ;;  %v10397_v13 = vcombine.high %v2346_v6, %v2350_v7  ;;  %v10399_v14 = vcombine.high %v2347_v8, %v2351_v9 }
 0x186   :  { %5326 = vmatprep.subr.bf16.mxu0 %v10341_v15  ;;  %5490 = vmatprep.subr.bf16.mxu1 %v10343_v16  ;;  %v2354_v15 = vld [vmem:[#allocation7 + $0x380] sm:$0xff] }
 0x187   :  { %v2358_v16 = vld [vmem:[#allocation7 + $0x3a0] sm:$0xff] }
 0x188   :  { %v10404_v29 = vcombine.low %v2354_v15, %v2358_v16 }
 0x189   :  { %5327 = vmatpush1.bf16.msra.mxu0 %v10340_v23  ;;  %5491 = vmatpush1.bf16.msra.mxu1 %v10342_v24  ;;  %v10405_v23 = vcombine.high %v2354_v15, %v2358_v16  ;;  %v10407_v24 = vcombine.high %v2355_v17, %v2359_v18 }
 0x18a   :  { %5328 = vmatprep.subr.bf16.mxu0 %v10349_v25  ;;  %5492 = vmatprep.subr.bf16.mxu1 %v10351_v26  ;;  %v2362_v25 = vld [vmem:[#allocation7 + $0x3c0] sm:$0xff] }
 0x18b   :  { %v2366_v26 = vld [vmem:[#allocation7 + $0x3e0] sm:$0xff] }
 0x18d   :  { %5329 = vmatpush1.bf16.msra.mxu0 %v10348_v31  ;;  %5493 = vmatpush1.bf16.msra.mxu1 %v10350_v32  ;;  %v10413_v31 = vcombine.high %v2362_v25, %v2366_v26  ;;  %v10415_v32 = vcombine.high %v2363_v27, %v2367_v28 }
 0x18e   :  { %5330 = vmatprep.subr.bf16.mxu0 %v10357_v33  ;;  %5494 = vmatprep.subr.bf16.mxu1 %v10359_v34  ;;  %v10412_v33 = vcombine.low %v2362_v25, %v2366_v26  ;;  %v10414_v34 = vcombine.low %v2363_v27, %v2367_v28 }
 0x191   :  { %5331 = vmatpush1.bf16.msra.mxu0 %v10356_v39  ;;  %5495 = vmatpush1.bf16.msra.mxu1 %v10358_v40 }
 0x192   :  { %5332 = vmatprep.subr.bf16.mxu0 %v10365_v41  ;;  %5496 = vmatprep.subr.bf16.mxu1 %v10367_v42 }
 0x195   :  { %5333 = vmatpush1.bf16.msra.mxu0 %v10364_v47  ;;  %5497 = vmatpush1.bf16.msra.mxu1 %v10366_v12 }
 0x196   :  { %5334 = vmatprep.subr.bf16.mxu0 %v10373_v48  ;;  %5498 = vmatprep.subr.bf16.mxu1 %v10375_v49 }
 0x199   :  { %5335 = vmatpush1.bf16.msra.mxu0 %v10372_v52  ;;  %5499 = vmatpush1.bf16.msra.mxu1 %v10374_v53 }
 0x19a   :  { %5336 = vmatprep.subr.bf16.mxu0 %v10381_v54  ;;  %5500 = vmatprep.subr.bf16.mxu1 %v10383_v55 }
 0x19d   :  { %5337 = vmatpush1.bf16.msra.mxu0 %v10380_v63  ;;  %5501 = vmatpush1.bf16.msra.mxu1 %v10382_v0 }
 0x19e   :  { %5338 = vmatprep.subr.bf16.mxu0 %v10389_v2  ;;  %5502 = vmatprep.subr.bf16.mxu1 %v10391_v5 }
 0x1a1   :  { %5339 = vmatpush1.bf16.msra.mxu0 %v10388_v10  ;;  %5503 = vmatpush1.bf16.msra.mxu1 %v10390_v11 }
 0x1a2   :  { %5340 = vmatprep.subr.bf16.mxu0 %v10397_v13  ;;  %5504 = vmatprep.subr.bf16.mxu1 %v10399_v14 }
 0x1a5   :  { %5341 = vmatpush1.bf16.msra.mxu0 %v10396_v19  ;;  %5505 = vmatpush1.bf16.msra.mxu1 %v10398_v20 }
 0x1a6   :  { %5342 = vmatprep.subr.bf16.mxu0 %v10405_v23  ;;  %5506 = vmatprep.subr.bf16.mxu1 %v10407_v24 }
 0x1a9   :  { %5343 = vmatpush1.bf16.msra.mxu0 %v10404_v29  ;;  %5507 = vmatpush1.bf16.msra.mxu1 %v10406_v30 }
 0x1aa   :  { %5344 = vmatprep.subr.bf16.mxu0 %v10413_v31  ;;  %5508 = vmatprep.subr.bf16.mxu1 %v10415_v32 }
 0x1ad   :  { %5345 = vmatpush1.bf16.msra.mxu0 %v10412_v33  ;;  %5509 = vmatpush1.bf16.msra.mxu1 %v10414_v34 }
 0x1ae   :  { %5355 = vmatprep.subr.bf16.mxu0 %v10421_v35  ;;  %5519 = vmatprep.subr.bf16.mxu1 %v10423_v36  ;;  %v2129_v35 = vlaneseq }
 0x1c3   :  { %v1719_v37 = vpop.f32.mrb[0].mxu0  ;;  %v11810_v39 = vpop.f32.mrb[0].mxu1 }
 0x1c4   :  { %v1975_v38 = vrot.slane %v1719_v37, 4  ;;  %v1721_v40 = vpop.f32.mrb[1].mxu0  ;;  %v1803_v42 = vpop.f32.mrb[1].mxu1  ;;  %v1987_v19 = vrot.slane %v11810_v39, 4 }
 0x1c5   :  { %v1981_v41 = vrot.slane %v1721_v40, 4  ;;  %v1723_v43 = vpop.f32.mrb[2].mxu0  ;;  %v1993_v45 = vrot.slane %v1803_v42, 4  ;;  %v1805_v46 = vpop.f32.mrb[2].mxu1 }
 0x1c6   :  { %v1976_v44 = vadd.f32 %v1975_v38, %v1719_v37  ;;  %v1724_v47 = vpop.f32.mrb[3].mxu0  ;;  %v1806_v48 = vpop.f32.mrb[3].mxu1  ;;  %v1988_v28 = vadd.f32 %v1987_v19, %v11810_v39  ;;  %v11814_v43 = vshrl.u32 %v2129_v35, 7  ;;  %v2383_v19 = vld [vmem:[#allocation7 + $0x468] sm:$0xff]  ;;  %v2394_v35 = vld [vmem:[#allocation7 + $0x4c0] sm:$0xff] }
 0x1c7   :  { %v1982_v12 = vadd.f32 %v1981_v41, %v1721_v40  ;;  %v1994_v50 = vadd.f32 %v1993_v45, %v1803_v42  ;;  %v11819_v47 = vld [vmem:[#allocation8] ss:$4 sm:$0xff] }
 0x1c8   :  { %v1977_v49 = vrot.slane %v1976_v44, 2  ;;  %v1989_v36 = vrot.slane %v1988_v28, 2  ;;  %v11817_v45 = vsub.s32 0, %v11814_v43  ;;  %v11825_v48 = vsub.s32 3, %v11814_v43 }
 0x1c9   :  { %v1983_v21 = vrot.slane %v1982_v12, 2  ;;  %v1995_v57 = vrot.slane %v1994_v50, 2 }
 0x1ca   :  { %v1978_v51 = vadd.f32 %v1977_v49, %v1976_v44  ;;  %v1990_v44 = vadd.f32 %v1989_v36, %v1988_v28  ;;  %v11827_v49 = vld [vmem:[#allocation8 + $0x1] ss:$4 sm:$0xff] }
 0x1cb   :  { %v1984_v52 = vadd.f32 %v1983_v21, %v1982_v12  ;;  %v1996_v54 = vadd.f32 %v1995_v57, %v1994_v50  ;;  %v11822_v12 = vsub.s32 1, %v11814_v43  ;;  %v2132_v50 = vrot.slane %v11819_v47, %v11817_v45  ;;  %v2391_v28 = vld [vmem:[#allocation7 + $0x4a8] sm:$0xff]  ;;  %v2398_v36 = vld [vmem:[#allocation7 + $0x4e0] sm:$0xff] }
 0x1cc   :  { %v1979_v53 = vrot.slane %v1978_v51, 1  ;;  %v1991_v46 = vrot.slane %v1990_v44, 1  ;;  %v10445_v1 = vcombine.high %v2394_v35, %v2398_v36 }
 0x1cd   :  { %v1985_v55 = vrot.slane %v1984_v52, 1  ;;  %v1997_v56 = vrot.slane %v1996_v54, 1 }
 0x1ce   :  { %v1980_v22 = vadd.f32 %v1979_v53, %v1978_v51  ;;  %v1992_v21 = vadd.f32 %v1991_v46, %v1990_v44  ;;  %v2181_v53 = vrot.slane %v11827_v49, %v11817_v45  ;;  %v10444_v46 = vcombine.low %v2394_v35, %v2398_v36  ;;  %v2442_v35 = vld [vmem:[#allocation7 + $0x640] sm:$0xff] }
 0x1cf   :  { %v1986_v58 = vadd.f32 %v1985_v55, %v1984_v52  ;;  %v1998_v63 = vadd.f32 %v1997_v56, %v1996_v54  ;;  %v2136_v52 = vrot.slane %v11819_v47, %v11822_v12  ;;  %v2144_v55 = vrot.slane %v11819_v47, %v11825_v48  ;;  %v2446_v36 = vld [vmem:[#allocation7 + $0x660] sm:$0xff] }
 0x1d0   :  { %v2024_v59 = vmul.f32 0.125, %v1980_v22 }
 0x1d1   :  { %v2025_v0 = vmul.f32 0.125, %v1986_v58  ;;  %v2027_v5 = vmul.f32 0.125, %v1998_v63  ;;  %v2026_v58 = vmul.f32 0.125, %v1992_v21  ;;  %v2185_v63 = vrot.slane %v11827_v49, %v11822_v12 }
 0x1d2   :  { %v2032_v2 = vsub.f32 %v1719_v37, %v2024_v59 }
 0x1d3   :  { %v2033_v6 = vsub.f32 %v1721_v40, %v2025_v0  ;;  %v2035_v8 = vsub.f32 %v1803_v42, %v2027_v5 }
 0x1d4   :  { %v2040_v7 = vmul.f32 %v2032_v2, %v2032_v2 }
 0x1d5   :  { %v2041_v9 = vmul.f32 %v2033_v6, %v2033_v6  ;;  %v2043_v11 = vmul.f32 %v2035_v8, %v2035_v8 }
 0x1d6   :  { %v2048_v10 = vrot.slane %v2040_v7, 4 }
 0x1d7   :  { %v2054_v13 = vrot.slane %v2041_v9, 4  ;;  %v2066_v15 = vrot.slane %v2043_v11, 4 }
 0x1d8   :  { %v2049_v14 = vadd.f32 %v2048_v10, %v2040_v7  ;;  %v11842_v10 = vsub.f32 %v11810_v39, %v2026_v58 }
 0x1d9   :  { %v2055_v16 = vadd.f32 %v2054_v13, %v2041_v9  ;;  %v2067_v18 = vadd.f32 %v2066_v15, %v2043_v11 }
 0x1da   :  { %v2050_v17 = vrot.slane %v2049_v14, 2 }
 0x1db   :  { %v2056_v20 = vrot.slane %v2055_v16, 2  ;;  %v2068_v24 = vrot.slane %v2067_v18, 2 }
 0x1dc   :  { %v2051_v23 = vadd.f32 %v2050_v17, %v2049_v14 }
 0x1dd   :  { %v2057_v25 = vadd.f32 %v2056_v20, %v2055_v16  ;;  %v2069_v27 = vadd.f32 %v2068_v24, %v2067_v18  ;;  %v2378_v16 = vld [vmem:[#allocation7 + $0x440] sm:$0xff]  ;;  %v2379_v18 = vld [vmem:[#allocation7 + $0x448] sm:$0xff] }
 0x1de   :  { %v2052_v26 = vrot.slane %v2051_v23, 1  ;;  %v2386_v24 = vld [vmem:[#allocation7 + $0x480] sm:$0xff] }
 0x1df   :  { %v2058_v29 = vrot.slane %v2057_v25, 1  ;;  %v2070_v31 = vrot.slane %v2069_v27, 1 }
 0x1e0   :  { %v2053_v30 = vadd.f32 %v2052_v26, %v2051_v23  ;;  %v2390_v26 = vld [vmem:[#allocation7 + $0x4a0] sm:$0xff] }
 0x1e1   :  { %v2059_v32 = vadd.f32 %v2058_v29, %v2057_v25  ;;  %v2071_v34 = vadd.f32 %v2070_v31, %v2069_v27  ;;  %v10431_v25 = vcombine.high %v2379_v18, %v2383_v19  ;;  %v2387_v27 = vld [vmem:[#allocation7 + $0x488] sm:$0xff]  ;;  %v10436_v61 = vcombine.low %v2386_v24, %v2390_v26 }
 0x1e2   :  { %v2096_v33 = vmul.f32 0.125, %v2053_v30  ;;  %v10438_v62 = vcombine.low %v2387_v27, %v2391_v28 }
 0x1e3   :  { %v2097_v37 = vmul.f32 0.125, %v2059_v32  ;;  %v2099_v40 = vmul.f32 0.125, %v2071_v34  ;;  %v10430_v32 = vcombine.low %v2379_v18, %v2383_v19  ;;  %v10439_v34 = vcombine.high %v2387_v27, %v2391_v28  ;;  %v2435_v27 = vld [vmem:[#allocation7 + $0x608] sm:$0xff] }
 0x1e4   :  { %v2104_v38 = vadd.f32 1e-05, %v2096_v33  ;;  %v10437_v33 = vcombine.high %v2386_v24, %v2390_v26  ;;  %v2438_v26 = vld [vmem:[#allocation7 + $0x620] sm:$0xff]  ;;  %v2439_v28 = vld [vmem:[#allocation7 + $0x628] sm:$0xff] }
 0x1e5   :  { %v2105_v41 = vadd.f32 1e-05, %v2097_v37  ;;  %v2107_v42 = vadd.f32 1e-05, %v2099_v40  ;;  %v2395_v37 = vld [vmem:[#allocation7 + $0x4c8] sm:$0xff]  ;;  %v2406_v40 = vld [vmem:[#allocation7 + $0x520] sm:$0xff] }
 0x1e6   :  { %11445 = vrsqrt.f32 %v2104_v38  ;;  %v2399_v38 = vld [vmem:[#allocation7 + $0x4e8] sm:$0xff] }
 0x1e7   :  { %11447 = vrsqrt.f32 %v2105_v41  ;;  %v2403_v41 = vld [vmem:[#allocation7 + $0x508] sm:$0xff] }
 0x1e8   :  { %11449 = vrsqrt.f32 %v2107_v42  ;;  %v2407_v42 = vld [vmem:[#allocation7 + $0x528] sm:$0xff] }
 0x1f0   :  { %v11446_v51 = vpop.eup %11445 }
 0x1f1   :  { %v2120_v57 = vmul.f32 %v11446_v51, %v2032_v2  ;;  %v11448_v54 = vpop.eup %11447  ;;  %v2193_v2 = vrot.slane %v11827_v49, %v11825_v48  ;;  %v10455_v51 = vcombine.high %v2403_v41, %v2407_v42 }
 0x1f2   :  { %v11450_v22 = vpop.eup %11449  ;;  %v2121_v59 = vmul.f32 %v11448_v54, %v2033_v6  ;;  %v2382_v6 = vld [vmem:[#allocation7 + $0x460] sm:$0xff]  ;;  %v2415_v54 = vld [vmem:[#allocation7 + $0x568] sm:$0xff] }
 0x1f3   :  { %v2169_v56 = vmul.f32 %v2132_v50, %v2120_v57  ;;  %v2123_v0 = vmul.f32 %v11450_v22, %v2035_v8  ;;  %v2042_v8 = vmul.f32 %v11842_v10, %v11842_v10  ;;  %v10429_v39 = vcombine.high %v2378_v16, %v2382_v6  ;;  %v2410_v57 = vld [vmem:[#allocation7 + $0x540] sm:$0xff] }
 0x1f4   :  { %v2170_v5 = vmul.f32 %v2136_v52, %v2121_v59  ;;  %v10428_v31 = vcombine.low %v2378_v16, %v2382_v6  ;;  %v10446_v50 = vcombine.low %v2395_v37, %v2399_v38  ;;  %v2414_v52 = vld [vmem:[#allocation7 + $0x560] sm:$0xff]  ;;  %v2431_v6 = vld [vmem:[#allocation7 + $0x5e8] sm:$0xff] }
 0x1f5   :  { %v2218_v7 = vadd.f32 %v2181_v53, %v2169_v56  ;;  %v2172_v9 = vmul.f32 %v2144_v55, %v2123_v0  ;;  %v2060_v30 = vrot.slane %v2042_v8, 4  ;;  %v2411_v53 = vld [vmem:[#allocation7 + $0x548] sm:$0xff]  ;;  %v10454_v56 = vcombine.low %v2403_v41, %v2407_v42  ;;  %v2422_v0 = vld [vmem:[#allocation7 + $0x5a0] sm:$0xff] }
 0x1f6   :  { %v2219_v11 = vadd.f32 %v2185_v63, %v2170_v5  ;;  %v10461_v58 = vcombine.high %v2410_v57, %v2414_v52  ;;  %v10463_v59 = vcombine.high %v2411_v53, %v2415_v54  ;;  %v2418_v63 = vld [vmem:[#allocation7 + $0x580] sm:$0xff]  ;;  %v2423_v5 = vld [vmem:[#allocation7 + $0x5a8] sm:$0xff] }
 0x1f7   :  { %v2226_v13 = vmax.f32 %v2218_v7, 0.0  ;;  %v2221_v14 = vadd.f32 %v2193_v2, %v2172_v9  ;;  %v2061_v60 = vadd.f32 %v2060_v30, %v2042_v8  ;;  %v2419_v2 = vld [vmem:[#allocation7 + $0x588] sm:$0xff]  ;;  %v10460_v9 = vcombine.low %v2410_v57, %v2414_v52  ;;  %v2430_v16 = vld [vmem:[#allocation7 + $0x5e0] sm:$0xff] }
 0x1f8   :  { %v2227_v15 = vmax.f32 %v2219_v11, 0.0  ;;  %v10462_v11 = vcombine.low %v2411_v53, %v2415_v54  ;;  %v10468_v19 = vcombine.low %v2418_v63, %v2422_v0  ;;  %v10470_v8 = vcombine.low %v2419_v2, %v2423_v5  ;;  %v2451_v41 = vld [vmem:[#allocation7 + $0x688] sm:$0xff]  ;;  %v2462_v57 = vld [vmem:[#allocation7 + $0x6e0] sm:$0xff] }
 0x1f9   :  { %v2229_v17 = vmax.f32 %v2221_v14, 0.0  ;;  %v11848_v23 = vpack.c.bf16 %v2226_v13, %v2226_v13  ;;  %v2062_v44 = vrot.slane %v2061_v60, 2  ;;  %v10469_v13 = vcombine.high %v2418_v63, %v2422_v0  ;;  %v2455_v42 = vld [vmem:[#allocation7 + $0x6a8] sm:$0xff] }
 0x1fa   :  { %v11846_v20 = vpack.c.bf16 %v2227_v15, %v2227_v15  ;;  %v10471_v14 = vcombine.high %v2419_v2, %v2423_v5  ;;  %v2426_v15 = vld [vmem:[#allocation7 + $0x5c0] sm:$0xff]  ;;  %v2459_v52 = vld [vmem:[#allocation7 + $0x6c8] sm:$0xff]  ;;  %v11865_v2 = vsub.s32 2, %v11814_v43 }
 0x1fb   :  { %v11854_v29 = vpack.c.bf16 %v2229_v17, %v2229_v17  ;;  %v2063_v55 = vadd.f32 %v2062_v44, %v2061_v60  ;;  %v2427_v17 = vld [vmem:[#allocation7 + $0x5c8] sm:$0xff]  ;;  %v10477_v24 = vcombine.high %v2426_v15, %v2430_v16  ;;  %v10492_v44 = vcombine.low %v2442_v35, %v2446_v36 }
 0x1fc   :  { %5346 = vmatprep.mubr.bf16.mxu0 %v11846_v20  ;;  %5510 = vmatprep.mubr.bf16.mxu1 %v11846_v20  ;;  %v2463_v53 = vld [vmem:[#allocation7 + $0x6e8] sm:$0xff] }
 0x1fd   :  { %5347 = vmatmul.mubr.bf16.vlgmr.msra.gmra.mrb[8].mxu0 %v11848_v23  ;;  %5511 = vmatmul.mubr.bf16.vlgmr.msra.gmra.mrb[8].mxu1 %v11848_v23  ;;  %v2064_v7 = vrot.slane %v2063_v55, 1  ;;  %v2467_v63 = vld [vmem:[#allocation7 + $0x708] sm:$0xff] }
 0x1fe   :  { %5356 = vmatpush1.bf16.msra.mxu0 %v10420_v3  ;;  %5520 = vmatpush1.bf16.msra.mxu1 %v10422_v4  ;;  %v10447_v3 = vcombine.high %v2395_v37, %v2399_v38  ;;  %v2402_v4 = vld [vmem:[#allocation7 + $0x500] sm:$0xff]  ;;  %v2443_v37 = vld [vmem:[#allocation7 + $0x648] sm:$0xff] }
 0x1ff   :  { %5387 = vmatprep.mubr.bf16.mxu0 %v11854_v29  ;;  %5551 = vmatprep.mubr.bf16.mxu1 %v11854_v29  ;;  %v10453_v21 = vcombine.high %v2402_v4, %v2406_v40  ;;  %v10452_v22 = vcombine.low %v2402_v4, %v2406_v40  ;;  %v2065_v18 = vadd.f32 %v2064_v7, %v2063_v55  ;;  %v2447_v38 = vld [vmem:[#allocation7 + $0x668] sm:$0xff]  ;;  %v2450_v4 = vld [vmem:[#allocation7 + $0x680] sm:$0xff] }
 0x200   :  { %5357 = vmatprep.subr.bf16.mxu0 %v10429_v39  ;;  %5521 = vmatprep.subr.bf16.mxu1 %v10431_v25  ;;  %v10479_v39 = vcombine.high %v2427_v17, %v2431_v6  ;;  %v2434_v25 = vld [vmem:[#allocation7 + $0x600] sm:$0xff]  ;;  %v10502_v55 = vcombine.low %v2451_v41, %v2455_v42  ;;  %v2471_v0 = vld [vmem:[#allocation7 + $0x728] sm:$0xff]  ;;  %v10510_v7 = vcombine.low %v2459_v52, %v2463_v53 }
 0x201   :  { %v2098_v30 = vmul.f32 0.125, %v2065_v18  ;;  %v2454_v40 = vld [vmem:[#allocation7 + $0x6a0] sm:$0xff] }
 0x202   :  { %5358 = vmatpush1.bf16.msra.mxu0 %v10428_v31  ;;  %5522 = vmatpush1.bf16.msra.mxu1 %v10430_v32  ;;  %v10476_v31 = vcombine.low %v2426_v15, %v2430_v16  ;;  %v10478_v32 = vcombine.low %v2427_v17, %v2431_v6  ;;  %v10500_v54 = vcombine.low %v2450_v4, %v2454_v40  ;;  %v2478_v15 = vld [vmem:[#allocation7 + $0x760] sm:$0xff]  ;;  %v2475_v16 = vld [vmem:[#allocation7 + $0x748] sm:$0xff] }
 0x203   :  { %5359 = vmatprep.subr.bf16.mxu0 %v10437_v33  ;;  %5523 = vmatprep.subr.bf16.mxu1 %v10439_v34  ;;  %v10485_v33 = vcombine.high %v2434_v25, %v2438_v26  ;;  %v10487_v34 = vcombine.high %v2435_v27, %v2439_v28  ;;  %v2106_v60 = vadd.f32 1e-05, %v2098_v30  ;;  %v2479_v17 = vld [vmem:[#allocation7 + $0x768] sm:$0xff]  ;;  %v2140_v6 = vrot.slane %v11819_v47, %v11865_v2 }
 0x205   :  { %11451 = vrsqrt.f32 %v2106_v60 }
 0x206   :  { %5360 = vmatpush1.bf16.msra.mxu0 %v10436_v61  ;;  %5524 = vmatpush1.bf16.msra.mxu1 %v10438_v62  ;;  %v10484_v61 = vcombine.low %v2434_v25, %v2438_v26  ;;  %v10486_v62 = vcombine.low %v2435_v27, %v2439_v28  ;;  %v2482_v25 = vld [vmem:[#allocation7 + $0x780] sm:$0xff]  ;;  %v2483_v27 = vld [vmem:[#allocation7 + $0x788] sm:$0xff] }
 0x207   :  { %5361 = vmatprep.subr.bf16.mxu0 %v10445_v1  ;;  %5525 = vmatprep.subr.bf16.mxu1 %v10447_v3  ;;  %v10493_v1 = vcombine.high %v2442_v35, %v2446_v36  ;;  %v10495_v3 = vcombine.high %v2443_v37, %v2447_v38  ;;  %v2486_v26 = vld [vmem:[#allocation7 + $0x7a0] sm:$0xff]  ;;  %v2487_v28 = vld [vmem:[#allocation7 + $0x7a8] sm:$0xff] }
 0x208   :  { %v2490_v35 = vld [vmem:[#allocation7 + $0x7c0] sm:$0xff]  ;;  %v10532_v60 = vcombine.low %v2482_v25, %v2486_v26 }
 0x209   :  { %v2494_v36 = vld [vmem:[#allocation7 + $0x7e0] sm:$0xff] }
 0x20a   :  { %5362 = vmatpush1.bf16.msra.mxu0 %v10444_v46  ;;  %5526 = vmatpush1.bf16.msra.mxu1 %v10446_v50  ;;  %v10494_v46 = vcombine.low %v2443_v37, %v2447_v38  ;;  %v10501_v50 = vcombine.high %v2450_v4, %v2454_v40  ;;  %v2491_v37 = vld [vmem:[#allocation7 + $0x7c8] sm:$0xff]  ;;  %v2498_v4 = vld [vmem:[#allocation7 + $0x800] sm:$0xff] }
 0x20b   :  { %5363 = vmatprep.subr.bf16.mxu0 %v10453_v21  ;;  %5527 = vmatprep.subr.bf16.mxu1 %v10455_v51  ;;  %v10503_v21 = vcombine.high %v2451_v41, %v2455_v42  ;;  %v2458_v51 = vld [vmem:[#allocation7 + $0x6c0] sm:$0xff]  ;;  %v2495_v38 = vld [vmem:[#allocation7 + $0x7e8] sm:$0xff] }
 0x20c   :  { %v10508_v5 = vcombine.low %v2458_v51, %v2462_v57  ;;  %v2502_v40 = vld [vmem:[#allocation7 + $0x820] sm:$0xff]  ;;  %v2499_v41 = vld [vmem:[#allocation7 + $0x808] sm:$0xff] }
 0x20d   :  { %v2503_v42 = vld [vmem:[#allocation7 + $0x828] sm:$0xff] }
 0x20e   :  { %5364 = vmatpush1.bf16.msra.mxu0 %v10452_v22  ;;  %5528 = vmatpush1.bf16.msra.mxu1 %v10454_v56  ;;  %v10509_v22 = vcombine.high %v2458_v51, %v2462_v57  ;;  %v10511_v56 = vcombine.high %v2459_v52, %v2463_v53  ;;  %v10551_v51 = vcombine.high %v2499_v41, %v2503_v42  ;;  %v2506_v57 = vld [vmem:[#allocation7 + $0x840] sm:$0xff]  ;;  %v2507_v53 = vld [vmem:[#allocation7 + $0x848] sm:$0xff] }
 0x20f   :  { %5365 = vmatprep.subr.bf16.mxu0 %v10461_v58  ;;  %5529 = vmatprep.subr.bf16.mxu1 %v10463_v59  ;;  %v2466_v58 = vld [vmem:[#allocation7 + $0x700] sm:$0xff] }
 0x210   :  { %v2470_v59 = vld [vmem:[#allocation7 + $0x720] sm:$0xff] }
 0x211   :  { %v10516_v18 = vcombine.low %v2466_v58, %v2470_v59  ;;  %v2510_v52 = vld [vmem:[#allocation7 + $0x860] sm:$0xff] }
 0x212   :  { %5366 = vmatpush1.bf16.msra.mxu0 %v10460_v9  ;;  %5530 = vmatpush1.bf16.msra.mxu1 %v10462_v11  ;;  %v10517_v9 = vcombine.high %v2466_v58, %v2470_v59  ;;  %v10519_v11 = vcombine.high %v2467_v63, %v2471_v0  ;;  %v10557_v58 = vcombine.high %v2506_v57, %v2510_v52 }
 0x213   :  { %5367 = vmatprep.subr.bf16.mxu0 %v10469_v13  ;;  %5531 = vmatprep.subr.bf16.mxu1 %v10471_v14  ;;  %v2474_v13 = vld [vmem:[#allocation7 + $0x740] sm:$0xff]  ;;  %v11452_v14 = vpop.eup %11451 }
 0x214   :  { %v10524_v30 = vcombine.low %v2474_v13, %v2478_v15 }
 0x216   :  { %5368 = vmatpush1.bf16.msra.mxu0 %v10468_v19  ;;  %5532 = vmatpush1.bf16.msra.mxu1 %v10470_v8  ;;  %v10518_v19 = vcombine.low %v2467_v63, %v2471_v0  ;;  %v2122_v8 = vmul.f32 %v11452_v14, %v11842_v10  ;;  %v10535_v10 = vcombine.high %v2483_v27, %v2487_v28  ;;  %v2514_v63 = vld [vmem:[#allocation7 + $0x880] sm:$0xff] }
 0x217   :  { %5369 = vmatprep.subr.bf16.mxu0 %v10477_v24  ;;  %5533 = vmatprep.subr.bf16.mxu1 %v10479_v39  ;;  %v10525_v24 = vcombine.high %v2474_v13, %v2478_v15  ;;  %v10527_v39 = vcombine.high %v2475_v16, %v2479_v17  ;;  %v2518_v0 = vld [vmem:[#allocation7 + $0x8a0] sm:$0xff] }
 0x218   :  { %v10565_v13 = vcombine.high %v2514_v63, %v2518_v0  ;;  %v2522_v15 = vld [vmem:[#allocation7 + $0x8c0] sm:$0xff] }
 0x21a   :  { %5370 = vmatpush1.bf16.msra.mxu0 %v10476_v31  ;;  %5534 = vmatpush1.bf16.msra.mxu1 %v10478_v32  ;;  %v10526_v31 = vcombine.low %v2475_v16, %v2479_v17  ;;  %v2189_v32 = vrot.slane %v11827_v49, %v11865_v2  ;;  %v2526_v16 = vld [vmem:[#allocation7 + $0x8e0] sm:$0xff]  ;;  %v2523_v17 = vld [vmem:[#allocation7 + $0x8c8] sm:$0xff] }
 0x21b   :  { %5371 = vmatprep.subr.bf16.mxu0 %v10485_v33  ;;  %5535 = vmatprep.subr.bf16.mxu1 %v10487_v34  ;;  %v2171_v33 = vmul.f32 %v2140_v6, %v2122_v8  ;;  %v10533_v34 = vcombine.high %v2482_v25, %v2486_v26  ;;  %v2527_v6 = vld [vmem:[#allocation7 + $0x8e8] sm:$0xff]  ;;  %v10573_v26 = vcombine.high %v2522_v15, %v2526_v16 }
 0x21e   :  { %5372 = vmatpush1.bf16.msra.mxu0 %v10484_v61  ;;  %5536 = vmatpush1.bf16.msra.mxu1 %v10486_v62  ;;  %v10534_v61 = vcombine.low %v2483_v27, %v2487_v28  ;;  %v10541_v62 = vcombine.high %v2490_v35, %v2494_v36  ;;  %v10575_v27 = vcombine.high %v2523_v17, %v2527_v6  ;;  %v2530_v28 = vld [vmem:[#allocation7 + $0x900] sm:$0xff] }
 0x21f   :  { %5373 = vmatprep.subr.bf16.mxu0 %v10493_v1  ;;  %5537 = vmatprep.subr.bf16.mxu1 %v10495_v3  ;;  %v10543_v1 = vcombine.high %v2491_v37, %v2495_v38  ;;  %v2220_v3 = vadd.f32 %v2189_v32, %v2171_v33  ;;  %v2534_v33 = vld [vmem:[#allocation7 + $0x920] sm:$0xff] }
 0x222   :  { %5374 = vmatpush1.bf16.msra.mxu0 %v10492_v44  ;;  %5538 = vmatpush1.bf16.msra.mxu1 %v10494_v46  ;;  %v10540_v44 = vcombine.low %v2490_v35, %v2494_v36  ;;  %v10542_v46 = vcombine.low %v2491_v37, %v2495_v38 }
 0x223   :  { %5375 = vmatprep.subr.bf16.mxu0 %v10501_v50  ;;  %5539 = vmatprep.subr.bf16.mxu1 %v10503_v21  ;;  %v2228_v50 = vmax.f32 %v2220_v3, 0.0  ;;  %v10549_v21 = vcombine.high %v2498_v4, %v2502_v40 }
 0x226   :  { %5376 = vmatpush1.bf16.msra.mxu0 %v10500_v54  ;;  %5540 = vmatpush1.bf16.msra.mxu1 %v10502_v55  ;;  %v2511_v54 = vld [vmem:[#allocation7 + $0x868] sm:$0xff]  ;;  %v10548_v55 = vcombine.low %v2498_v4, %v2502_v40  ;;  %v10581_v40 = vcombine.high %v2530_v28, %v2534_v33 }
 0x227   :  { %5377 = vmatprep.subr.bf16.mxu0 %v10509_v22  ;;  %5541 = vmatprep.subr.bf16.mxu1 %v10511_v56  ;;  %v10550_v22 = vcombine.low %v2499_v41, %v2503_v42  ;;  %v11872_v56 = vpack.c.bf16 %v2228_v50, %v2228_v50  ;;  %v10559_v59 = vcombine.high %v2507_v53, %v2511_v54  ;;  %v2538_v42 = vld [vmem:[#allocation7 + $0x940] sm:$0xff]  ;;  %v2539_v50 = vld [vmem:[#allocation7 + $0x948] sm:$0xff] }
 0x22a   :  { %5378 = vmatpush1.bf16.msra.mxu0 %v10508_v5  ;;  %5542 = vmatpush1.bf16.msra.mxu1 %v10510_v7  ;;  %v2515_v5 = vld [vmem:[#allocation7 + $0x888] sm:$0xff] }
 0x22b   :  { %5379 = vmatprep.subr.bf16.mxu0 %v10517_v9  ;;  %5543 = vmatprep.subr.bf16.mxu1 %v10519_v11  ;;  %v2519_v7 = vld [vmem:[#allocation7 + $0x8a8] sm:$0xff]  ;;  %v10556_v9 = vcombine.low %v2506_v57, %v2510_v52  ;;  %v10558_v11 = vcombine.low %v2507_v53, %v2511_v54  ;;  %v10580_v53 = vcombine.low %v2530_v28, %v2534_v33 }
 0x22c   :  { %v10567_v14 = vcombine.high %v2515_v5, %v2519_v7  ;;  %v10566_v8 = vcombine.low %v2515_v5, %v2519_v7  ;;  %v2550_v5 = vld [vmem:[#allocation7 + $0x9a0] sm:$0xff]  ;;  %v2547_v7 = vld [vmem:[#allocation7 + $0x988] sm:$0xff] }
 0x22d   :  { %v2555_v28 = vld [vmem:[#allocation7 + $0x9c8] sm:$0xff] }
 0x22e   :  { %5380 = vmatpush1.bf16.msra.mxu0 %v10516_v18  ;;  %5544 = vmatpush1.bf16.msra.mxu1 %v10518_v19  ;;  %v10564_v19 = vcombine.low %v2514_v63, %v2518_v0  ;;  %v2546_v63 = vld [vmem:[#allocation7 + $0x980] sm:$0xff] }
 0x22f   :  { %5381 = vmatprep.subr.bf16.mxu0 %v10525_v24  ;;  %5545 = vmatprep.subr.bf16.mxu1 %v10527_v39 }
 0x232   :  { %5382 = vmatpush1.bf16.msra.mxu0 %v10524_v30  ;;  %5546 = vmatpush1.bf16.msra.mxu1 %v10526_v31 }
 0x233   :  { %5383 = vmatprep.subr.bf16.mxu0 %v10533_v34  ;;  %5547 = vmatprep.subr.bf16.mxu1 %v10535_v10  ;;  %v2531_v34 = vld [vmem:[#allocation7 + $0x908] sm:$0xff] }
 0x234   :  { %v2535_v10 = vld [vmem:[#allocation7 + $0x928] sm:$0xff] }
 0x235   :  { %v10583_v41 = vcombine.high %v2531_v34, %v2535_v10  ;;  %v10582_v54 = vcombine.low %v2531_v34, %v2535_v10  ;;  %v10596_v34 = vcombine.low %v2546_v63, %v2550_v5 }
 0x236   :  { %5384 = vmatpush1.bf16.msra.mxu0 %v10532_v60  ;;  %5548 = vmatpush1.bf16.msra.mxu1 %v10534_v61 }
 0x237   :  { %5385 = vmatprep.subr.bf16.mxu0 %v10541_v62  ;;  %5549 = vmatprep.subr.bf16.mxu1 %v10543_v1  ;;  %v10572_v62 = vcombine.low %v2522_v15, %v2526_v16  ;;  %v10574_v1 = vcombine.low %v2523_v17, %v2527_v6 }
 0x23a   :  { %5386 = vmatpush1.bf16.msra.mxu0 %v10540_v44  ;;  %5550 = vmatpush1.bf16.msra.mxu1 %v10542_v46  ;;  %v2542_v46 = vld [vmem:[#allocation7 + $0x960] sm:$0xff] }
 0x23b   :  { %5396 = vmatprep.subr.bf16.mxu0 %v10549_v21  ;;  %5560 = vmatprep.subr.bf16.mxu1 %v10551_v51  ;;  %v2543_v21 = vld [vmem:[#allocation7 + $0x968] sm:$0xff]  ;;  %v10588_v15 = vcombine.low %v2538_v42, %v2542_v46 }
 0x23c   :  { %v10590_v16 = vcombine.low %v2539_v50, %v2543_v21 }
 0x23d   :  { %5388 = vmatmul.mubr.bf16.vlgmr.msra.gmra.mrb[8].mxu0 %v11872_v56  ;;  %5552 = vmatmul.mubr.bf16.vlgmr.msra.gmra.mrb[8].mxu1 %v11872_v56 }
 0x23e   :  { %5397 = vmatpush1.bf16.msra.mxu0 %v10548_v55  ;;  %5561 = vmatpush1.bf16.msra.mxu1 %v10550_v22 }
 0x23f   :  { %5398 = vmatprep.subr.bf16.mxu0 %v10557_v58  ;;  %5562 = vmatprep.subr.bf16.mxu1 %v10559_v59  ;;  %v10589_v58 = vcombine.high %v2538_v42, %v2542_v46  ;;  %v10591_v59 = vcombine.high %v2539_v50, %v2543_v21  ;;  %v2570_v21 = vld [vmem:[#allocation7 + $0xa40] sm:$0xff] }
 0x242   :  { %5399 = vmatpush1.bf16.msra.mxu0 %v10556_v9  ;;  %5563 = vmatpush1.bf16.msra.mxu1 %v10558_v11  ;;  %v2551_v9 = vld [vmem:[#allocation7 + $0x9a8] sm:$0xff] }
 0x243   :  { %v11876_v18 = vpop.f32.mrb[4].mxu0  ;;  %v11879_v39 = vpop.f32.mrb[4].mxu1  ;;  %5400 = vmatprep.subr.bf16.mxu0 %v10565_v13  ;;  %5564 = vmatprep.subr.bf16.mxu1 %v10567_v14 }
 0x244   :  { %v1999_v24 = vrot.slane %v11876_v18, 4  ;;  %v11881_v25 = vpop.f32.mrb[5].mxu0  ;;  %v11884_v31 = vpop.f32.mrb[5].mxu1 }
 0x245   :  { %v2005_v30 = vrot.slane %v11881_v25, 4  ;;  %v1887_v32 = vpop.f32.mrb[6].mxu0  ;;  %v2017_v36 = vrot.slane %v11884_v31, 4  ;;  %v1969_v37 = vpop.f32.mrb[6].mxu1 }
 0x246   :  { %v2000_v35 = vadd.f32 %v1999_v24, %v11876_v18  ;;  %v1888_v38 = vpop.f32.mrb[7].mxu0  ;;  %5401 = vmatpush1.bf16.msra.mxu0 %v10564_v19  ;;  %5565 = vmatpush1.bf16.msra.mxu1 %v10566_v8  ;;  %v1970_v61 = vpop.f32.mrb[7].mxu1  ;;  %v10597_v19 = vcombine.high %v2546_v63, %v2550_v5  ;;  %v10599_v8 = vcombine.high %v2547_v7, %v2551_v9  ;;  %v2554_v24 = vld [vmem:[#allocation7 + $0x9c0] sm:$0xff] }
 0x247   :  { %v2006_v60 = vadd.f32 %v2005_v30, %v11881_v25  ;;  %v2018_v4 = vadd.f32 %v2017_v36, %v11884_v31  ;;  %5402 = vmatprep.subr.bf16.mxu0 %v10573_v26  ;;  %5566 = vmatprep.subr.bf16.mxu1 %v10575_v27  ;;  %v2558_v26 = vld [vmem:[#allocation7 + $0x9e0] sm:$0xff]  ;;  %v2559_v30 = vld [vmem:[#allocation7 + $0x9e8] sm:$0xff] }
 0x248   :  { %v2001_v3 = vrot.slane %v2000_v35, 2  ;;  %v10605_v36 = vcombine.high %v2554_v24, %v2558_v26 }
 0x249   :  { %v2007_v44 = vrot.slane %v2006_v60, 2  ;;  %v2019_v57 = vrot.slane %v2018_v4, 2 }
 0x24a   :  { %v2002_v51 = vadd.f32 %v2001_v3, %v2000_v35  ;;  %5403 = vmatpush1.bf16.msra.mxu0 %v10572_v62  ;;  %5567 = vmatpush1.bf16.msra.mxu1 %v10574_v1  ;;  %v10598_v35 = vcombine.low %v2547_v7, %v2551_v9  ;;  %v2566_v62 = vld [vmem:[#allocation7 + $0xa20] sm:$0xff]  ;;  %v2567_v1 = vld [vmem:[#allocation7 + $0xa28] sm:$0xff] }
 0x24b   :  { %v2008_v52 = vadd.f32 %v2007_v44, %v2006_v60  ;;  %v2020_v22 = vadd.f32 %v2019_v57, %v2018_v4  ;;  %5404 = vmatprep.subr.bf16.mxu0 %v10581_v40  ;;  %5568 = vmatprep.subr.bf16.mxu1 %v10583_v41  ;;  %v10607_v60 = vcombine.high %v2555_v28, %v2559_v30  ;;  %v2574_v57 = vld [vmem:[#allocation7 + $0xa60] sm:$0xff] }
 0x24c   :  { %v2003_v55 = vrot.slane %v2002_v51, 1  ;;  %v10604_v41 = vcombine.low %v2554_v24, %v2558_v26  ;;  %v10621_v7 = vcombine.high %v2570_v21, %v2574_v57  ;;  %v10620_v24 = vcombine.low %v2570_v21, %v2574_v57  ;;  %v2599_v21 = vld [vmem:[#allocation7 + $0xb28] sm:$0xff] }
 0x24d   :  { %v2009_v0 = vrot.slane %v2008_v52, 1  ;;  %v2021_v13 = vrot.slane %v2020_v22, 1 }
 0x24e   :  { %v2004_v11 = vadd.f32 %v2003_v55, %v2002_v51  ;;  %5405 = vmatpush1.bf16.msra.mxu0 %v10580_v53  ;;  %5569 = vmatpush1.bf16.msra.mxu1 %v10582_v54  ;;  %v2575_v53 = vld [vmem:[#allocation7 + $0xa68] sm:$0xff] }
 0x24f   :  { %v2010_v14 = vadd.f32 %v2009_v0, %v2008_v52  ;;  %v2022_v6 = vadd.f32 %v2021_v13, %v2020_v22  ;;  %5406 = vmatprep.subr.bf16.mxu0 %v10589_v58  ;;  %5570 = vmatprep.subr.bf16.mxu1 %v10591_v59  ;;  %v2571_v52 = vld [vmem:[#allocation7 + $0xa48] sm:$0xff]  ;;  %v2011_v22 = vrot.slane %v11879_v39, 4 }
 0x250   :  { %v2028_v17 = vmul.f32 0.125, %v2004_v11  ;;  %v10623_v9 = vcombine.high %v2571_v52, %v2575_v53  ;;  %v2578_v11 = vld [vmem:[#allocation7 + $0xa80] sm:$0xff]  ;;  %v10622_v26 = vcombine.low %v2571_v52, %v2575_v53 }
 0x251   :  { %v2029_v27 = vmul.f32 0.125, %v2010_v14  ;;  %v2031_v33 = vmul.f32 0.125, %v2022_v6  ;;  %v2582_v14 = vld [vmem:[#allocation7 + $0xaa0] sm:$0xff] }
 0x252   :  { %v11891_v32 = vsub.f32 %v11876_v18, %v2028_v17  ;;  %5407 = vmatpush1.bf16.msra.mxu0 %v10588_v15  ;;  %5571 = vmatpush1.bf16.msra.mxu1 %v10590_v16  ;;  %v2562_v18 = vld [vmem:[#allocation7 + $0xa00] sm:$0xff]  ;;  %v2579_v15 = vld [vmem:[#allocation7 + $0xa88] sm:$0xff] }
 0x253   :  { %v11894_v10 = vsub.f32 %v11881_v25, %v2029_v27  ;;  %v11899_v38 = vsub.f32 %v11884_v31, %v2031_v33  ;;  %5408 = vmatprep.subr.bf16.mxu0 %v10597_v19  ;;  %5572 = vmatprep.subr.bf16.mxu1 %v10599_v8  ;;  %v2563_v25 = vld [vmem:[#allocation7 + $0xa08] sm:$0xff]  ;;  %v10606_v31 = vcombine.low %v2555_v28, %v2559_v30 }
 0x254   :  { %v2044_v37 = vmul.f32 %v11891_v32, %v11891_v32  ;;  %v10613_v46 = vcombine.high %v2562_v18, %v2566_v62  ;;  %v10615_v50 = vcombine.high %v2563_v25, %v2567_v1  ;;  %v10612_v59 = vcombine.low %v2562_v18, %v2566_v62  ;;  %v2583_v16 = vld [vmem:[#allocation7 + $0xaa8] sm:$0xff] }
 0x255   :  { %v2045_v61 = vmul.f32 %v11894_v10, %v11894_v10  ;;  %v2047_v4 = vmul.f32 %v11899_v38, %v11899_v38  ;;  %v10614_v63 = vcombine.low %v2563_v25, %v2567_v1  ;;  %v2012_v19 = vadd.f32 %v2011_v22, %v11879_v39  ;;  %v2602_v22 = vld [vmem:[#allocation7 + $0xb40] sm:$0xff] }
 0x256   :  { %v2072_v3 = vrot.slane %v2044_v37, 4  ;;  %5409 = vmatpush1.bf16.msra.mxu0 %v10596_v34  ;;  %5573 = vmatpush1.bf16.msra.mxu1 %v10598_v35  ;;  %v10629_v30 = vcombine.high %v2578_v11, %v2582_v14  ;;  %v10631_v33 = vcombine.high %v2579_v15, %v2583_v16  ;;  %v2586_v34 = vld [vmem:[#allocation7 + $0xac0] sm:$0xff]  ;;  %v10628_v1 = vcombine.low %v2578_v11, %v2582_v14 }
 0x257   :  { %v2078_v40 = vrot.slane %v2045_v61, 4  ;;  %v2090_v44 = vrot.slane %v2047_v4, 4  ;;  %5410 = vmatprep.subr.bf16.mxu0 %v10605_v36  ;;  %5574 = vmatprep.subr.bf16.mxu1 %v10607_v60  ;;  %v2590_v36 = vld [vmem:[#allocation7 + $0xae0] sm:$0xff]  ;;  %v2591_v60 = vld [vmem:[#allocation7 + $0xae8] sm:$0xff]  ;;  %v2013_v62 = vrot.slane %v2012_v19, 2 }
 0x258   :  { %v2073_v42 = vadd.f32 %v2072_v3, %v2044_v37  ;;  %v2587_v37 = vld [vmem:[#allocation7 + $0xac8] sm:$0xff]  ;;  %v10630_v3 = vcombine.low %v2579_v15, %v2583_v16  ;;  %v10636_v52 = vcombine.low %v2586_v34, %v2590_v36  ;;  %v2610_v14 = vld [vmem:[#allocation7 + $0xb80] sm:$0xff]  ;;  %v11911_v15 = vsub.s32 5, %v11814_v43 }
 0x259   :  { %v2079_v51 = vadd.f32 %v2078_v40, %v2045_v61  ;;  %v2091_v55 = vadd.f32 %v2090_v44, %v2047_v4  ;;  %v2014_v57 = vadd.f32 %v2013_v62, %v2012_v19  ;;  %v10638_v53 = vcombine.low %v2587_v37, %v2591_v60  ;;  %v2614_v16 = vld [vmem:[#allocation7 + $0xba0] sm:$0xff] }
 0x25a   :  { %v2074_v54 = vrot.slane %v2073_v42, 2  ;;  %5411 = vmatpush1.bf16.msra.mxu0 %v10604_v41  ;;  %5575 = vmatpush1.bf16.msra.mxu1 %v10606_v31  ;;  %v10637_v41 = vcombine.high %v2586_v34, %v2590_v36  ;;  %v10639_v31 = vcombine.high %v2587_v37, %v2591_v60  ;;  %v11914_v19 = vsub.s32 7, %v11814_v43  ;;  %v2618_v34 = vld [vmem:[#allocation7 + $0xbc0] sm:$0xff]  ;;  %v2619_v60 = vld [vmem:[#allocation7 + $0xbc8] sm:$0xff] }
 0x25b   :  { %v2080_v58 = vrot.slane %v2079_v51, 2  ;;  %v2092_v5 = vrot.slane %v2091_v55, 2  ;;  %5412 = vmatprep.subr.bf16.mxu0 %v10613_v46  ;;  %5576 = vmatprep.subr.bf16.mxu1 %v10615_v50  ;;  %v2598_v46 = vld [vmem:[#allocation7 + $0xb20] sm:$0xff]  ;;  %v2595_v50 = vld [vmem:[#allocation7 + $0xb08] sm:$0xff]  ;;  %v2152_v37 = vrot.slane %v11819_v47, %v11911_v15 }
 0x25c   :  { %v2075_v0 = vadd.f32 %v2074_v54, %v2073_v42  ;;  %v2594_v42 = vld [vmem:[#allocation7 + $0xb00] sm:$0xff] }
 0x25d   :  { %v2081_v13 = vadd.f32 %v2080_v58, %v2079_v51  ;;  %v2093_v6 = vadd.f32 %v2092_v5, %v2091_v55  ;;  %v10645_v54 = vcombine.high %v2594_v42, %v2598_v46  ;;  %v10647_v55 = vcombine.high %v2595_v50, %v2599_v21  ;;  %v2606_v58 = vld [vmem:[#allocation7 + $0xb60] sm:$0xff] }
 0x25e   :  { %v2076_v17 = vrot.slane %v2075_v0, 1  ;;  %5413 = vmatpush1.bf16.msra.mxu0 %v10612_v59  ;;  %5577 = vmatpush1.bf16.msra.mxu1 %v10614_v63  ;;  %v2603_v59 = vld [vmem:[#allocation7 + $0xb48] sm:$0xff]  ;;  %v2015_v5 = vrot.slane %v2014_v57, 1  ;;  %v10653_v11 = vcombine.high %v2602_v22, %v2606_v58 }
 0x25f   :  { %v2082_v8 = vrot.slane %v2081_v13, 1  ;;  %v2094_v28 = vrot.slane %v2093_v6, 1  ;;  %5414 = vmatprep.subr.bf16.mxu0 %v10621_v7  ;;  %5578 = vmatprep.subr.bf16.mxu1 %v10623_v9  ;;  %v2607_v63 = vld [vmem:[#allocation7 + $0xb68] sm:$0xff]  ;;  %v10644_v7 = vcombine.low %v2594_v42, %v2598_v46  ;;  %v10646_v9 = vcombine.low %v2595_v50, %v2599_v21  ;;  %v2626_v50 = vld [vmem:[#allocation7 + $0xc00] sm:$0xff] }
 0x260   :  { %v2077_v27 = vadd.f32 %v2076_v17, %v2075_v0  ;;  %v11908_v0 = vsub.s32 4, %v11814_v43  ;;  %v2611_v17 = vld [vmem:[#allocation7 + $0xb88] sm:$0xff] }
 0x261   :  { %v2083_v35 = vadd.f32 %v2082_v8, %v2081_v13  ;;  %v2095_v61 = vadd.f32 %v2094_v28, %v2093_v6  ;;  %v10655_v13 = vcombine.high %v2603_v59, %v2607_v63  ;;  %v2615_v6 = vld [vmem:[#allocation7 + $0xba8] sm:$0xff]  ;;  %v10652_v8 = vcombine.low %v2602_v22, %v2606_v58 }
 0x262   :  { %v2100_v18 = vmul.f32 0.125, %v2077_v27  ;;  %5415 = vmatpush1.bf16.msra.mxu0 %v10620_v24  ;;  %5579 = vmatpush1.bf16.msra.mxu1 %v10622_v26  ;;  %v2148_v24 = vrot.slane %v11819_v47, %v11908_v0  ;;  %v2016_v26 = vadd.f32 %v2015_v5, %v2014_v57  ;;  %v10654_v27 = vcombine.low %v2603_v59, %v2607_v63  ;;  %v2627_v57 = vld [vmem:[#allocation7 + $0xc08] sm:$0xff] }
 0x263   :  { %v2101_v25 = vmul.f32 0.125, %v2083_v35  ;;  %v2103_v40 = vmul.f32 0.125, %v2095_v61  ;;  %5416 = vmatprep.subr.bf16.mxu0 %v10629_v30  ;;  %5580 = vmatprep.subr.bf16.mxu1 %v10631_v33  ;;  %v10661_v30 = vcombine.high %v2610_v14, %v2614_v16  ;;  %v10663_v33 = vcombine.high %v2611_v17, %v2615_v6  ;;  %v2622_v35 = vld [vmem:[#allocation7 + $0xbe0] sm:$0xff] }
 0x264   :  { %v2108_v4 = vadd.f32 1e-05, %v2100_v18  ;;  %v2623_v18 = vld [vmem:[#allocation7 + $0xbe8] sm:$0xff]  ;;  %v2197_v61 = vrot.slane %v11827_v49, %v11908_v0  ;;  %v10669_v42 = vcombine.high %v2618_v34, %v2622_v35 }
 0x265   :  { %v2109_v44 = vadd.f32 1e-05, %v2101_v25  ;;  %v2111_v51 = vadd.f32 1e-05, %v2103_v40  ;;  %v2160_v25 = vrot.slane %v11819_v47, %v11914_v19  ;;  %v10671_v46 = vcombine.high %v2619_v60, %v2623_v18 }
 0x266   :  { %11453 = vrsqrt.f32 %v2108_v4  ;;  %5417 = vmatpush1.bf16.msra.mxu0 %v10628_v1  ;;  %5581 = vmatpush1.bf16.msra.mxu1 %v10630_v3  ;;  %v10660_v1 = vcombine.low %v2610_v14, %v2614_v16  ;;  %v10662_v3 = vcombine.low %v2611_v17, %v2615_v6  ;;  %v2201_v4 = vrot.slane %v11827_v49, %v11911_v15  ;;  %v2635_v14 = vld [vmem:[#allocation7 + $0xc48] sm:$0xff] }
 0x267   :  { %11455 = vrsqrt.f32 %v2109_v44  ;;  %5418 = vmatprep.subr.bf16.mxu0 %v10637_v41  ;;  %5582 = vmatprep.subr.bf16.mxu1 %v10639_v31  ;;  %v2209_v47 = vrot.slane %v11827_v49, %v11914_v19  ;;  %v2639_v16 = vld [vmem:[#allocation7 + $0xc68] sm:$0xff] }
 0x268   :  { %11457 = vrsqrt.f32 %v2111_v51  ;;  %v2630_v51 = vld [vmem:[#allocation7 + $0xc20] sm:$0xff] }
 0x269   :  { %v10677_v58 = vcombine.high %v2626_v50, %v2630_v51 }
 0x26a   :  { %5419 = vmatpush1.bf16.msra.mxu0 %v10636_v52  ;;  %5583 = vmatpush1.bf16.msra.mxu1 %v10638_v53  ;;  %v2631_v52 = vld [vmem:[#allocation7 + $0xc28] sm:$0xff] }
 0x26b   :  { %5420 = vmatprep.subr.bf16.mxu0 %v10645_v54  ;;  %5584 = vmatprep.subr.bf16.mxu1 %v10647_v55  ;;  %v10668_v55 = vcombine.low %v2618_v34, %v2622_v35  ;;  %v10679_v59 = vcombine.high %v2627_v57, %v2631_v52  ;;  %v10678_v6 = vcombine.low %v2627_v57, %v2631_v52  ;;  %v2666_v52 = vld [vmem:[#allocation7 + $0xd40] sm:$0xff] }
 0x26e   :  { %5421 = vmatpush1.bf16.msra.mxu0 %v10644_v7  ;;  %5585 = vmatpush1.bf16.msra.mxu1 %v10646_v9  ;;  %v2634_v7 = vld [vmem:[#allocation7 + $0xc40] sm:$0xff]  ;;  %v10676_v9 = vcombine.low %v2626_v50, %v2630_v51 }
 0x26f   :  { %5422 = vmatprep.subr.bf16.mxu0 %v10653_v11  ;;  %5586 = vmatprep.subr.bf16.mxu1 %v10655_v13  ;;  %v2638_v13 = vld [vmem:[#allocation7 + $0xc60] sm:$0xff] }
 0x270   :  { %v11454_v28 = vpop.eup %11453 }
 0x271   :  { %v2124_v36 = vmul.f32 %v11454_v28, %v11891_v32  ;;  %v11456_v62 = vpop.eup %11455  ;;  %v2030_v32 = vmul.f32 0.125, %v2016_v26  ;;  %v10685_v26 = vcombine.high %v2634_v7, %v2638_v13  ;;  %v2646_v28 = vld [vmem:[#allocation7 + $0xca0] sm:$0xff] }
 0x272   :  { %v11458_v40 = vpop.eup %11457  ;;  %v2125_v31 = vmul.f32 %v11456_v62, %v11894_v10  ;;  %5423 = vmatpush1.bf16.msra.mxu0 %v10652_v8  ;;  %5587 = vmatpush1.bf16.msra.mxu1 %v10654_v27  ;;  %v10687_v27 = vcombine.high %v2635_v14, %v2639_v16  ;;  %v2654_v62 = vld [vmem:[#allocation7 + $0xce0] sm:$0xff] }
 0x273   :  { %v2173_v41 = vmul.f32 %v2148_v24, %v2124_v36  ;;  %v2127_v44 = vmul.f32 %v11458_v40, %v11899_v38  ;;  %5424 = vmatprep.subr.bf16.mxu0 %v10661_v30  ;;  %5588 = vmatprep.subr.bf16.mxu1 %v10663_v33  ;;  %v11932_v10 = vsub.f32 %v11879_v39, %v2030_v32  ;;  %v2642_v24 = vld [vmem:[#allocation7 + $0xc80] sm:$0xff]  ;;  %v2643_v30 = vld [vmem:[#allocation7 + $0xc88] sm:$0xff] }
 0x274   :  { %v2174_v21 = vmul.f32 %v2152_v37, %v2125_v31  ;;  %v10670_v38 = vcombine.low %v2619_v60, %v2623_v18  ;;  %v2647_v33 = vld [vmem:[#allocation7 + $0xca8] sm:$0xff]  ;;  %v10684_v36 = vcombine.low %v2634_v7, %v2638_v13  ;;  %v10686_v37 = vcombine.low %v2635_v14, %v2639_v16  ;;  %v2658_v31 = vld [vmem:[#allocation7 + $0xd00] sm:$0xff] }
 0x275   :  { %v2222_v53 = vadd.f32 %v2197_v61, %v2173_v41  ;;  %v2176_v54 = vmul.f32 %v2160_v25, %v2127_v44  ;;  %v2046_v39 = vmul.f32 %v11932_v10, %v11932_v10  ;;  %v10693_v60 = vcombine.high %v2642_v24, %v2646_v28  ;;  %v2650_v61 = vld [vmem:[#allocation7 + $0xcc0] sm:$0xff]  ;;  %v2651_v25 = vld [vmem:[#allocation7 + $0xcc8] sm:$0xff] }
 0x276   :  { %5425 = vmatpush1.bf16.msra.mxu0 %v10660_v1  ;;  %5589 = vmatpush1.bf16.msra.mxu1 %v10662_v3  ;;  %v2223_v22 = vadd.f32 %v2201_v4, %v2174_v21  ;;  %v10695_v18 = vcombine.high %v2643_v30, %v2647_v33  ;;  %v2655_v1 = vld [vmem:[#allocation7 + $0xce8] sm:$0xff]  ;;  %v10692_v4 = vcombine.low %v2642_v24, %v2646_v28  ;;  %v2686_v24 = vld [vmem:[#allocation7 + $0xde0] sm:$0xff] }
 0x277   :  { %5426 = vmatprep.subr.bf16.mxu0 %v10669_v42  ;;  %5590 = vmatprep.subr.bf16.mxu1 %v10671_v46  ;;  %v2230_v63 = vmax.f32 %v2222_v53, 0.0  ;;  %v2225_v49 = vadd.f32 %v2209_v47, %v2176_v54  ;;  %v2084_v35 = vrot.slane %v2046_v39, 4  ;;  %v10694_v40 = vcombine.low %v2643_v30, %v2647_v33  ;;  %v2662_v42 = vld [vmem:[#allocation7 + $0xd20] sm:$0xff]  ;;  %v2659_v44 = vld [vmem:[#allocation7 + $0xd08] sm:$0xff] }
 0x278   :  { %v2231_v5 = vmax.f32 %v2223_v22, 0.0  ;;  %v10701_v41 = vcombine.high %v2650_v61, %v2654_v62  ;;  %v10703_v32 = vcombine.high %v2651_v25, %v2655_v1  ;;  %v2663_v46 = vld [vmem:[#allocation7 + $0xd28] sm:$0xff]  ;;  %v10700_v47 = vcombine.low %v2650_v61, %v2654_v62  ;;  %v2670_v53 = vld [vmem:[#allocation7 + $0xd60] sm:$0xff] }
 0x279   :  { %v2233_v11 = vmax.f32 %v2225_v49, 0.0  ;;  %v11938_v8 = vpack.c.bf16 %v2230_v63, %v2230_v63  ;;  %v2085_v3 = vadd.f32 %v2084_v35, %v2046_v39  ;;  %v10702_v21 = vcombine.low %v2651_v25, %v2655_v1  ;;  %v2667_v54 = vld [vmem:[#allocation7 + $0xd48] sm:$0xff]  ;;  %v2674_v49 = vld [vmem:[#allocation7 + $0xd80] sm:$0xff] }
 0x27a   :  { %5427 = vmatpush1.bf16.msra.mxu0 %v10668_v55  ;;  %5591 = vmatpush1.bf16.msra.mxu1 %v10670_v38  ;;  %v11936_v17 = vpack.c.bf16 %v2231_v5, %v2231_v5  ;;  %v10709_v51 = vcombine.high %v2658_v31, %v2662_v42  ;;  %v10711_v57 = vcombine.high %v2659_v44, %v2663_v46  ;;  %v2671_v55 = vld [vmem:[#allocation7 + $0xd68] sm:$0xff]  ;;  %v2678_v5 = vld [vmem:[#allocation7 + $0xda0] sm:$0xff] }
 0x27b   :  { %5437 = vmatprep.subr.bf16.mxu0 %v10677_v58  ;;  %5601 = vmatprep.subr.bf16.mxu1 %v10679_v59  ;;  %v11944_v34 = vpack.c.bf16 %v2233_v11, %v2233_v11  ;;  %v2086_v50 = vrot.slane %v2085_v3, 2  ;;  %v10708_v22 = vcombine.low %v2658_v31, %v2662_v42  ;;  %v10710_v58 = vcombine.low %v2659_v44, %v2663_v46  ;;  %v2675_v7 = vld [vmem:[#allocation7 + $0xd88] sm:$0xff] }
 0x27c   :  { %5428 = vmatprep.mubr.bf16.mxu0 %v11936_v17  ;;  %5592 = vmatprep.mubr.bf16.mxu1 %v11936_v17  ;;  %v10717_v59 = vcombine.high %v2666_v52, %v2670_v53  ;;  %v10719_v63 = vcombine.high %v2667_v54, %v2671_v55  ;;  %v10716_v13 = vcombine.low %v2666_v52, %v2670_v53  ;;  %v2695_v61 = vld [vmem:[#allocation7 + $0xe28] sm:$0xff] }
 0x27d   :  { %5429 = vmatmul.mubr.bf16.vlgmr.msra.gmra.mrb[8].mxu0 %v11938_v8  ;;  %5593 = vmatmul.mubr.bf16.vlgmr.msra.gmra.mrb[8].mxu1 %v11938_v8  ;;  %v2087_v38 = vadd.f32 %v2086_v50, %v2085_v3  ;;  %v10718_v14 = vcombine.low %v2667_v54, %v2671_v55  ;;  %v10725_v16 = vcombine.high %v2674_v49, %v2678_v5  ;;  %v2703_v31 = vld [vmem:[#allocation7 + $0xe68] sm:$0xff] }
 0x27e   :  { %5438 = vmatpush1.bf16.msra.mxu0 %v10676_v9  ;;  %5602 = vmatpush1.bf16.msra.mxu1 %v10678_v6  ;;  %v2679_v9 = vld [vmem:[#allocation7 + $0xda8] sm:$0xff]  ;;  %v2682_v6 = vld [vmem:[#allocation7 + $0xdc0] sm:$0xff]  ;;  %v10724_v30 = vcombine.low %v2674_v49, %v2678_v5 }
 0x27f   :  { %5469 = vmatprep.mubr.bf16.mxu0 %v11944_v34  ;;  %5633 = vmatprep.mubr.bf16.mxu1 %v11944_v34  ;;  %v2088_v11 = vrot.slane %v2087_v38, 1  ;;  %v10727_v39 = vcombine.high %v2675_v7, %v2679_v9  ;;  %v10726_v33 = vcombine.low %v2675_v7, %v2679_v9  ;;  %v10733_v35 = vcombine.high %v2682_v6, %v2686_v24  ;;  %v2711_v52 = vld [vmem:[#allocation7 + $0xea8] sm:$0xff] }
 0x280   :  { %5439 = vmatprep.subr.bf16.mxu0 %v10685_v26  ;;  %5603 = vmatprep.subr.bf16.mxu1 %v10687_v27  ;;  %v2683_v26 = vld [vmem:[#allocation7 + $0xdc8] sm:$0xff]  ;;  %v10732_v25 = vcombine.low %v2682_v6, %v2686_v24 }
 0x281   :  { %v2687_v27 = vld [vmem:[#allocation7 + $0xde8] sm:$0xff]  ;;  %v2089_v28 = vadd.f32 %v2088_v11, %v2087_v38  ;;  %v2722_v11 = vld [vmem:[#allocation7 + $0xf00] sm:$0xff] }
 0x282   :  { %5440 = vmatpush1.bf16.msra.mxu0 %v10684_v36  ;;  %5604 = vmatpush1.bf16.msra.mxu1 %v10686_v37  ;;  %v10735_v36 = vcombine.high %v2683_v26, %v2687_v27  ;;  %v2690_v37 = vld [vmem:[#allocation7 + $0xe00] sm:$0xff]  ;;  %v10734_v1 = vcombine.low %v2683_v26, %v2687_v27 }
 0x283   :  { %5441 = vmatprep.subr.bf16.mxu0 %v10693_v60  ;;  %5605 = vmatprep.subr.bf16.mxu1 %v10695_v18  ;;  %v2694_v60 = vld [vmem:[#allocation7 + $0xe20] sm:$0xff]  ;;  %v2691_v18 = vld [vmem:[#allocation7 + $0xe08] sm:$0xff]  ;;  %v2102_v62 = vmul.f32 0.125, %v2089_v28 }
 0x284   :  { %v10741_v3 = vcombine.high %v2690_v37, %v2694_v60  ;;  %v10740_v44 = vcombine.low %v2690_v37, %v2694_v60  ;;  %v10742_v46 = vcombine.low %v2691_v18, %v2695_v61  ;;  %v2730_v28 = vld [vmem:[#allocation7 + $0xf40] sm:$0xff] }
 0x285   :  { %v2110_v42 = vadd.f32 1e-05, %v2102_v62  ;;  %v11477_v37 = vld [vmem:[#allocation8] ss:$4 sm:$0xff] }
 0x286   :  { %5442 = vmatpush1.bf16.msra.mxu0 %v10692_v4  ;;  %5606 = vmatpush1.bf16.msra.mxu1 %v10694_v40  ;;  %v10743_v4 = vcombine.high %v2691_v18, %v2695_v61  ;;  %v2698_v40 = vld [vmem:[#allocation7 + $0xe40] sm:$0xff] }
 0x287   :  { %5443 = vmatprep.subr.bf16.mxu0 %v10701_v41  ;;  %5607 = vmatprep.subr.bf16.mxu1 %v10703_v32  ;;  %v2702_v41 = vld [vmem:[#allocation7 + $0xe60] sm:$0xff]  ;;  %v2699_v32 = vld [vmem:[#allocation7 + $0xe48] sm:$0xff]  ;;  %11459 = vrsqrt.f32 %v2110_v42 }
 0x288   :  { %v10749_v50 = vcombine.high %v2698_v40, %v2702_v41  ;;  %v10748_v53 = vcombine.low %v2698_v40, %v2702_v41  ;;  %v10750_v54 = vcombine.low %v2699_v32, %v2703_v31  ;;  %v2743_v40 = vld [vmem:[#allocation7 + $0xfa8] sm:$0xff] }
 0x28a   :  { %5444 = vmatpush1.bf16.msra.mxu0 %v10700_v47  ;;  %5608 = vmatpush1.bf16.msra.mxu1 %v10702_v21  ;;  %v10751_v47 = vcombine.high %v2699_v32, %v2703_v31  ;;  %v2706_v21 = vld [vmem:[#allocation7 + $0xe80] sm:$0xff] }
 0x28b   :  { %5445 = vmatprep.subr.bf16.mxu0 %v10709_v51  ;;  %5609 = vmatprep.subr.bf16.mxu1 %v10711_v57  ;;  %v2710_v51 = vld [vmem:[#allocation7 + $0xea0] sm:$0xff]  ;;  %v2707_v57 = vld [vmem:[#allocation7 + $0xe88] sm:$0xff] }
 0x28c   :  { %v10757_v55 = vcombine.high %v2706_v21, %v2710_v51  ;;  %v10759_v38 = vcombine.high %v2707_v57, %v2711_v52  ;;  %v10756_v49 = vcombine.low %v2706_v21, %v2710_v51  ;;  %v10758_v5 = vcombine.low %v2707_v57, %v2711_v52  ;;  %v11478_v31 = vld [vmem:[#allocation8 + $0x1] ss:$4 sm:$0xff] }
 0x28d   :  { %v2747_v21 = vld [vmem:[#allocation7 + $0xfc8] sm:$0xff] }
 0x28e   :  { %5446 = vmatpush1.bf16.msra.mxu0 %v10708_v22  ;;  %5610 = vmatpush1.bf16.msra.mxu1 %v10710_v58  ;;  %v2714_v22 = vld [vmem:[#allocation7 + $0xec0] sm:$0xff]  ;;  %v2751_v51 = vld [vmem:[#allocation7 + $0xfe8] sm:$0xff] }
 0x28f   :  { %5447 = vmatprep.subr.bf16.mxu0 %v10717_v59  ;;  %5611 = vmatprep.subr.bf16.mxu1 %v10719_v63  ;;  %v2718_v58 = vld [vmem:[#allocation7 + $0xee0] sm:$0xff]  ;;  %v2715_v59 = vld [vmem:[#allocation7 + $0xec8] sm:$0xff] }
 0x290   :  { %v2719_v63 = vld [vmem:[#allocation7 + $0xee8] sm:$0xff]  ;;  %v10765_v7 = vcombine.high %v2714_v22, %v2718_v58  ;;  %v10764_v6 = vcombine.low %v2714_v22, %v2718_v58  ;;  %v2248_v22 = vld [vmem:[#allocation7 + $0x30] sm:$0xff]  ;;  %v2245_v58 = vld [vmem:[#allocation7 + $0x18] sm:$0xff] }
 0x291   :  { %v10767_v9 = vcombine.high %v2715_v59, %v2719_v63  ;;  %v10766_v24 = vcombine.low %v2715_v59, %v2719_v63  ;;  %v2249_v59 = vld [vmem:[#allocation7 + $0x38] sm:$0xff] }
 0x292   :  { %5448 = vmatpush1.bf16.msra.mxu0 %v10716_v13  ;;  %5612 = vmatpush1.bf16.msra.mxu1 %v10718_v14  ;;  %v2726_v13 = vld [vmem:[#allocation7 + $0xf20] sm:$0xff]  ;;  %v2723_v14 = vld [vmem:[#allocation7 + $0xf08] sm:$0xff] }
 0x293   :  { %5449 = vmatprep.subr.bf16.mxu0 %v10725_v16  ;;  %5613 = vmatprep.subr.bf16.mxu1 %v10727_v39  ;;  %v2727_v16 = vld [vmem:[#allocation7 + $0xf28] sm:$0xff]  ;;  %v11949_v39 = vsub.s32 6, %v11814_v43  ;;  %v10773_v26 = vcombine.high %v2722_v11, %v2726_v13  ;;  %v10772_v43 = vcombine.low %v2722_v11, %v2726_v13  ;;  %v2252_v11 = vld [vmem:[#allocation7 + $0x50] sm:$0xff] }
 0x294   :  { %v10775_v27 = vcombine.high %v2723_v14, %v2727_v16  ;;  %v10774_v18 = vcombine.low %v2723_v14, %v2727_v16  ;;  %v2256_v13 = vld [vmem:[#allocation7 + $0x70] sm:$0xff]  ;;  %v2253_v14 = vld [vmem:[#allocation7 + $0x58] sm:$0xff] }
 0x295   :  { %v2156_v60 = vrot.slane %v11477_v37, %v11949_v39  ;;  %v2205_v42 = vrot.slane %v11478_v31, %v11949_v39  ;;  %v2257_v16 = vld [vmem:[#allocation7 + $0x78] sm:$0xff]  ;;  %v10304_v37 = vcombine.low %v2252_v11, %v2256_v13  ;;  %v2280_v31 = vld [vmem:[#allocation7 + $0x130] sm:$0xff] }
 0x296   :  { %5450 = vmatpush1.bf16.msra.mxu0 %v10724_v30  ;;  %5614 = vmatpush1.bf16.msra.mxu1 %v10726_v33  ;;  %v11460_v30 = vpop.eup %11459  ;;  %v2734_v33 = vld [vmem:[#allocation7 + $0xf60] sm:$0xff] }
 0x297   :  { %5451 = vmatprep.subr.bf16.mxu0 %v10733_v35  ;;  %5615 = vmatprep.subr.bf16.mxu1 %v10735_v36  ;;  %v2731_v35 = vld [vmem:[#allocation7 + $0xf48] sm:$0xff]  ;;  %v2126_v61 = vmul.f32 %v11460_v30, %v11932_v10  ;;  %v10781_v62 = vcombine.high %v2730_v28, %v2734_v33  ;;  %v10780_v41 = vcombine.low %v2730_v28, %v2734_v33  ;;  %v2260_v30 = vld [vmem:[#allocation7 + $0x90] sm:$0xff] }
 0x298   :  { %v2735_v36 = vld [vmem:[#allocation7 + $0xf68] sm:$0xff]  ;;  %v10307_v28 = vcombine.high %v2253_v14, %v2257_v16  ;;  %v2264_v33 = vld [vmem:[#allocation7 + $0xb0] sm:$0xff] }
 0x299   :  { %v10782_v32 = vcombine.low %v2731_v35, %v2735_v36 }
 0x29a   :  { %5452 = vmatpush1.bf16.msra.mxu0 %v10732_v25  ;;  %5616 = vmatpush1.bf16.msra.mxu1 %v10734_v1  ;;  %v10783_v25 = vcombine.high %v2731_v35, %v2735_v36  ;;  %v2738_v1 = vld [vmem:[#allocation7 + $0xf80] sm:$0xff]  ;;  %v2261_v35 = vld [vmem:[#allocation7 + $0x98] sm:$0xff] }
 0x29b   :  { %5453 = vmatprep.subr.bf16.mxu0 %v10741_v3  ;;  %5617 = vmatprep.subr.bf16.mxu1 %v10743_v4  ;;  %v2742_v3 = vld [vmem:[#allocation7 + $0xfa0] sm:$0xff]  ;;  %v2739_v4 = vld [vmem:[#allocation7 + $0xf88] sm:$0xff]  ;;  %v2265_v36 = vld [vmem:[#allocation7 + $0xb8] sm:$0xff] }
 0x29c   :  { %v10791_v10 = vcombine.high %v2739_v4, %v2743_v40  ;;  %v10788_v57 = vcombine.low %v2738_v1, %v2742_v3  ;;  %v10790_v52 = vcombine.low %v2739_v4, %v2743_v40  ;;  %v10314_v4 = vcombine.low %v2261_v35, %v2265_v36 }
 0x29e   :  { %5454 = vmatpush1.bf16.msra.mxu0 %v10740_v44  ;;  %5618 = vmatpush1.bf16.msra.mxu1 %v10742_v46  ;;  %v2175_v44 = vmul.f32 %v2156_v60, %v2126_v61  ;;  %v10789_v46 = vcombine.high %v2738_v1, %v2742_v3  ;;  %v10306_v60 = vcombine.low %v2253_v14, %v2257_v16  ;;  %v2268_v61 = vld [vmem:[#allocation7 + $0xd0] sm:$0xff]  ;;  %v2273_v1 = vld [vmem:[#allocation7 + $0xf8] sm:$0xff] }
 0x29f   :  { %5455 = vmatprep.subr.bf16.mxu0 %v10749_v50  ;;  %5619 = vmatprep.subr.bf16.mxu1 %v10751_v47  ;;  %v2746_v50 = vld [vmem:[#allocation7 + $0xfc0] sm:$0xff]  ;;  %v10312_v3 = vcombine.low %v2260_v30, %v2264_v33  ;;  %v2305_v14 = vld [vmem:[#allocation7 + $0x1f8] sm:$0xff] }
 0x2a0   :  { %v2750_v47 = vld [vmem:[#allocation7 + $0xfe0] sm:$0xff] }
 0x2a1   :  { %v10796_v63 = vcombine.low %v2746_v50, %v2750_v47 }
 0x2a2   :  { %5456 = vmatpush1.bf16.msra.mxu0 %v10748_v53  ;;  %5620 = vmatpush1.bf16.msra.mxu1 %v10750_v54  ;;  %v10797_v53 = vcombine.high %v2746_v50, %v2750_v47  ;;  %v10799_v54 = vcombine.high %v2747_v21, %v2751_v51  ;;  %v2284_v47 = vld [vmem:[#allocation7 + $0x150] sm:$0xff] }
 0x2a3   :  { %5457 = vmatprep.subr.bf16.mxu0 %v10757_v55  ;;  %5621 = vmatprep.subr.bf16.mxu1 %v10759_v38  ;;  %v2224_v55 = vadd.f32 %v2205_v42, %v2175_v44  ;;  %v2244_v38 = vld [vmem:[#allocation7 + $0x10] sm:$0xff]  ;;  %v2281_v42 = vld [vmem:[#allocation7 + $0x138] sm:$0xff] }
 0x2a6   :  { %5458 = vmatpush1.bf16.msra.mxu0 %v10756_v49  ;;  %5622 = vmatpush1.bf16.msra.mxu1 %v10758_v5  ;;  %v10798_v49 = vcombine.low %v2747_v21, %v2751_v51  ;;  %v2232_v5 = vmax.f32 %v2224_v55, 0.0  ;;  %v2288_v21 = vld [vmem:[#allocation7 + $0x170] sm:$0xff]  ;;  %v2285_v51 = vld [vmem:[#allocation7 + $0x158] sm:$0xff] }
 0x2a7   :  { %5459 = vmatprep.subr.bf16.mxu0 %v10765_v7  ;;  %5623 = vmatprep.subr.bf16.mxu1 %v10767_v9  ;;  %v10297_v7 = vcombine.high %v2244_v38, %v2248_v22  ;;  %v10299_v9 = vcombine.high %v2245_v58, %v2249_v59 }
 0x2aa   :  { %5460 = vmatpush1.bf16.msra.mxu0 %v10764_v6  ;;  %5624 = vmatpush1.bf16.msra.mxu1 %v10766_v24  ;;  %v10296_v6 = vcombine.low %v2244_v38, %v2248_v22  ;;  %v11954_v24 = vpack.c.bf16 %v2232_v5, %v2232_v5  ;;  %v2292_v38 = vld [vmem:[#allocation7 + $0x190] sm:$0xff] }
 0x2ab   :  { %5461 = vmatprep.subr.bf16.mxu0 %v10773_v26  ;;  %5625 = vmatprep.subr.bf16.mxu1 %v10775_v27  ;;  %v10298_v26 = vcombine.low %v2245_v58, %v2249_v59  ;;  %v10305_v27 = vcombine.high %v2252_v11, %v2256_v13  ;;  %v2296_v22 = vld [vmem:[#allocation7 + $0x1b0] sm:$0xff]  ;;  %v2293_v58 = vld [vmem:[#allocation7 + $0x198] sm:$0xff] }
 0x2ac   :  { %v2297_v59 = vld [vmem:[#allocation7 + $0x1b8] sm:$0xff]  ;;  %v10345_v5 = vcombine.high %v2292_v38, %v2296_v22  ;;  %v2304_v11 = vld [vmem:[#allocation7 + $0x1f0] sm:$0xff]  ;;  %v10344_v16 = vcombine.low %v2292_v38, %v2296_v22 }
 0x2ad   :  { %v2301_v13 = vld [vmem:[#allocation7 + $0x1d8] sm:$0xff]  ;;  %v2344_v38 = vld [vmem:[#allocation7 + $0x330] sm:$0xff] }
 0x2ae   :  { %5462 = vmatpush1.bf16.msra.mxu0 %v10772_v43  ;;  %5626 = vmatpush1.bf16.msra.mxu1 %v10774_v18  ;;  %v10313_v43 = vcombine.high %v2260_v30, %v2264_v33  ;;  %v10315_v18 = vcombine.high %v2261_v35, %v2265_v36  ;;  %v2312_v30 = vld [vmem:[#allocation7 + $0x230] sm:$0xff]  ;;  %v2309_v33 = vld [vmem:[#allocation7 + $0x218] sm:$0xff] }
 0x2af   :  { %5463 = vmatprep.subr.bf16.mxu0 %v10781_v62  ;;  %5627 = vmatprep.subr.bf16.mxu1 %v10783_v25  ;;  %v2272_v62 = vld [vmem:[#allocation7 + $0xf0] sm:$0xff]  ;;  %v2269_v25 = vld [vmem:[#allocation7 + $0xd8] sm:$0xff] }
 0x2b0   :  { %v10321_v40 = vcombine.high %v2268_v61, %v2272_v62  ;;  %v10320_v44 = vcombine.low %v2268_v61, %v2272_v62  ;;  %v2313_v35 = vld [vmem:[#allocation7 + $0x238] sm:$0xff]  ;;  %v2320_v61 = vld [vmem:[#allocation7 + $0x270] sm:$0xff] }
 0x2b1   :  { %v2317_v62 = vld [vmem:[#allocation7 + $0x258] sm:$0xff] }
 0x2b2   :  { %5464 = vmatpush1.bf16.msra.mxu0 %v10780_v41  ;;  %5628 = vmatpush1.bf16.msra.mxu1 %v10782_v32  ;;  %v10323_v41 = vcombine.high %v2269_v25, %v2273_v1  ;;  %v2276_v32 = vld [vmem:[#allocation7 + $0x110] sm:$0xff]  ;;  %v2341_v22 = vld [vmem:[#allocation7 + $0x318] sm:$0xff] }
 0x2b3   :  { %5465 = vmatprep.subr.bf16.mxu0 %v10789_v46  ;;  %5629 = vmatprep.subr.bf16.mxu1 %v10791_v10  ;;  %v10322_v46 = vcombine.low %v2269_v25, %v2273_v1  ;;  %v10329_v10 = vcombine.high %v2276_v32, %v2280_v31  ;;  %v2321_v25 = vld [vmem:[#allocation7 + $0x278] sm:$0xff] }
 0x2b6   :  { %5466 = vmatpush1.bf16.msra.mxu0 %v10788_v57  ;;  %5630 = vmatpush1.bf16.msra.mxu1 %v10790_v52  ;;  %v2289_v57 = vld [vmem:[#allocation7 + $0x178] sm:$0xff]  ;;  %v10328_v52 = vcombine.low %v2276_v32, %v2280_v31  ;;  %v2328_v32 = vld [vmem:[#allocation7 + $0x2b0] sm:$0xff] }
 0x2b7   :  { %5467 = vmatprep.subr.bf16.mxu0 %v10797_v53  ;;  %5631 = vmatprep.subr.bf16.mxu1 %v10799_v54  ;;  %v10337_v54 = vcombine.high %v2284_v47, %v2288_v21  ;;  %v10339_v55 = vcombine.high %v2285_v51, %v2289_v57  ;;  %v2325_v31 = vld [vmem:[#allocation7 + $0x298] sm:$0xff] }
 0x2ba   :  { %5468 = vmatpush1.bf16.msra.mxu0 %v10796_v63  ;;  %5632 = vmatpush1.bf16.msra.mxu1 %v10798_v49  ;;  %v10336_v63 = vcombine.low %v2284_v47, %v2288_v21  ;;  %v10338_v49 = vcombine.low %v2285_v51, %v2289_v57  ;;  %v2336_v47 = vld [vmem:[#allocation7 + $0x2f0] sm:$0xff]  ;;  %v2333_v21 = vld [vmem:[#allocation7 + $0x2d8] sm:$0xff] }
 0x2bb   :  { %5642 = vmatprep.subr.bf16.mxu0 %v10297_v7  ;;  %5806 = vmatprep.subr.bf16.mxu1 %v10299_v9  ;;  %v10347_v7 = vcombine.high %v2293_v58, %v2297_v59  ;;  %v2300_v9 = vld [vmem:[#allocation7 + $0x1d0] sm:$0xff]  ;;  %v2337_v51 = vld [vmem:[#allocation7 + $0x2f8] sm:$0xff] }
 0x2bc   :  { %v10352_v36 = vcombine.low %v2300_v9, %v2304_v11 }
 0x2bd   :  { %5470 = vmatmul.mubr.bf16.vlgmr.msra.gmra.mrb[8].mxu0 %v11954_v24  ;;  %5634 = vmatmul.mubr.bf16.vlgmr.msra.gmra.mrb[8].mxu1 %v11954_v24 }
 0x2be   :  { %5643 = vmatpush1.bf16.msra.mxu0 %v10296_v6  ;;  %5674 = vmatprep.mubr.bf16.mxu0 %v11846_v20  ;;  %v10346_v6 = vcombine.low %v2293_v58, %v2297_v59  ;;  %v2345_v58 = vld [vmem:[#allocation7 + $0x338] sm:$0xff] }
 0x2bf   :  { %5807 = vmatpush1.bf16.msra.mxu1 %v10298_v26  ;;  %5838 = vmatprep.mubr.bf16.mxu1 %v11846_v20  ;;  %v2277_v20 = vld [vmem:[#allocation7 + $0x118] sm:$0xff]  ;;  %v10353_v26 = vcombine.high %v2300_v9, %v2304_v11  ;;  %v2352_v9 = vld [vmem:[#allocation7 + $0x370] sm:$0xff] }
 0x2c0   :  { %5644 = vmatprep.subr.bf16.mxu0 %v10305_v27  ;;  %5808 = vmatprep.subr.bf16.mxu1 %v10307_v28  ;;  %v10331_v50 = vcombine.high %v2277_v20, %v2281_v42  ;;  %v10330_v53 = vcombine.low %v2277_v20, %v2281_v42  ;;  %v10355_v27 = vcombine.high %v2301_v13, %v2305_v14  ;;  %v2308_v28 = vld [vmem:[#allocation7 + $0x210] sm:$0xff]  ;;  %v2329_v20 = vld [vmem:[#allocation7 + $0x2b8] sm:$0xff] }
 0x2c1   :  { %v10360_v1 = vcombine.low %v2308_v28, %v2312_v30  ;;  %v2349_v11 = vld [vmem:[#allocation7 + $0x358] sm:$0xff] }
 0x2c2   :  { %5645 = vmatpush1.bf16.msra.mxu0 %v10304_v37  ;;  %v10354_v37 = vcombine.low %v2301_v13, %v2305_v14  ;;  %v2353_v13 = vld [vmem:[#allocation7 + $0x378] sm:$0xff] }
 0x2c3   :  { %5809 = vmatpush1.bf16.msra.mxu1 %v10306_v60  ;;  %5646 = vmatprep.subr.bf16.mxu0 %v10313_v43  ;;  %v10361_v60 = vcombine.high %v2308_v28, %v2312_v30  ;;  %v10363_v43 = vcombine.high %v2309_v33, %v2313_v35  ;;  %v2360_v28 = vld [vmem:[#allocation7 + $0x3b0] sm:$0xff]  ;;  %v2357_v30 = vld [vmem:[#allocation7 + $0x398] sm:$0xff] }
 0x2c4   :  { %5810 = vmatprep.subr.bf16.mxu1 %v10315_v18  ;;  %v2316_v18 = vld [vmem:[#allocation7 + $0x250] sm:$0xff] }
 0x2c5   :  { %v10368_v42 = vcombine.low %v2316_v18, %v2320_v61 }
 0x2c6   :  { %5647 = vmatpush1.bf16.msra.mxu0 %v10312_v3  ;;  %v10362_v3 = vcombine.low %v2309_v33, %v2313_v35  ;;  %v2361_v33 = vld [vmem:[#allocation7 + $0x3b8] sm:$0xff] }
 0x2c7   :  { %5811 = vmatpush1.bf16.msra.mxu1 %v10314_v4  ;;  %5648 = vmatprep.subr.bf16.mxu0 %v10321_v40  ;;  %v10369_v4 = vcombine.high %v2316_v18, %v2320_v61  ;;  %v10371_v40 = vcombine.high %v2317_v62, %v2321_v25  ;;  %v2368_v18 = vld [vmem:[#allocation7 + $0x3f0] sm:$0xff]  ;;  %v2365_v61 = vld [vmem:[#allocation7 + $0x3d8] sm:$0xff] }
 0x2c8   :  { %5812 = vmatprep.subr.bf16.mxu1 %v10323_v41  ;;  %v2324_v41 = vld [vmem:[#allocation7 + $0x290] sm:$0xff] }
 0x2c9   :  { %v10376_v57 = vcombine.low %v2324_v41, %v2328_v32 }
 0x2ca   :  { %5649 = vmatpush1.bf16.msra.mxu0 %v10320_v44  ;;  %v10370_v44 = vcombine.low %v2317_v62, %v2321_v25  ;;  %v2369_v62 = vld [vmem:[#allocation7 + $0x3f8] sm:$0xff] }
 0x2cb   :  { %5813 = vmatpush1.bf16.msra.mxu1 %v10322_v46  ;;  %5650 = vmatprep.subr.bf16.mxu0 %v10329_v10  ;;  %v10377_v46 = vcombine.high %v2324_v41, %v2328_v32  ;;  %v10379_v10 = vcombine.high %v2325_v31, %v2329_v20  ;;  %v2376_v41 = vld [vmem:[#allocation7 + $0x430] sm:$0xff]  ;;  %v2373_v32 = vld [vmem:[#allocation7 + $0x418] sm:$0xff] }
 0x2cc   :  { %5814 = vmatprep.subr.bf16.mxu1 %v10331_v50  ;;  %v2332_v50 = vld [vmem:[#allocation7 + $0x2d0] sm:$0xff] }
 0x2cd   :  { %v10384_v59 = vcombine.low %v2332_v50, %v2336_v47 }
 0x2ce   :  { %5651 = vmatpush1.bf16.msra.mxu0 %v10328_v52  ;;  %v10378_v52 = vcombine.low %v2325_v31, %v2329_v20  ;;  %v2377_v31 = vld [vmem:[#allocation7 + $0x438] sm:$0xff] }
 0x2cf   :  { %5815 = vmatpush1.bf16.msra.mxu1 %v10330_v53  ;;  %5652 = vmatprep.subr.bf16.mxu0 %v10337_v54  ;;  %v10385_v53 = vcombine.high %v2332_v50, %v2336_v47  ;;  %v10387_v54 = vcombine.high %v2333_v21, %v2337_v51  ;;  %v2384_v50 = vld [vmem:[#allocation7 + $0x470] sm:$0xff] }
 0x2d0   :  { %5816 = vmatprep.subr.bf16.mxu1 %v10339_v55  ;;  %v2340_v55 = vld [vmem:[#allocation7 + $0x310] sm:$0xff] }
 0x2d1   :  { %v10392_v14 = vcombine.low %v2340_v55, %v2344_v38 }
 0x2d2   :  { %5653 = vmatpush1.bf16.msra.mxu0 %v10336_v63  ;;  %v10386_v63 = vcombine.low %v2333_v21, %v2337_v51  ;;  %v2381_v21 = vld [vmem:[#allocation7 + $0x458] sm:$0xff] }
 0x2d3   :  { %5817 = vmatpush1.bf16.msra.mxu1 %v10338_v49  ;;  %5654 = vmatprep.subr.bf16.mxu0 %v10345_v5  ;;  %v10393_v49 = vcombine.high %v2340_v55, %v2344_v38  ;;  %v10395_v5 = vcombine.high %v2341_v22, %v2345_v58  ;;  %v2385_v51 = vld [vmem:[#allocation7 + $0x478] sm:$0xff] }
 0x2d4   :  { %5818 = vmatprep.subr.bf16.mxu1 %v10347_v7  ;;  %v2348_v7 = vld [vmem:[#allocation7 + $0x350] sm:$0xff]  ;;  %v10435_v55 = vcombine.high %v2381_v21, %v2385_v51  ;;  %v2389_v38 = vld [vmem:[#allocation7 + $0x498] sm:$0xff] }
 0x2d5   :  { %v10400_v35 = vcombine.low %v2348_v7, %v2352_v9 }
 0x2d6   :  { %5655 = vmatpush1.bf16.msra.mxu0 %v10344_v16  ;;  %v10394_v16 = vcombine.low %v2341_v22, %v2345_v58  ;;  %v2393_v22 = vld [vmem:[#allocation7 + $0x4b8] sm:$0xff] }
 0x2d7   :  { %5819 = vmatpush1.bf16.msra.mxu1 %v10346_v6  ;;  %5656 = vmatprep.subr.bf16.mxu0 %v10353_v26  ;;  %v10401_v6 = vcombine.high %v2348_v7, %v2352_v9  ;;  %v10403_v26 = vcombine.high %v2349_v11, %v2353_v13  ;;  %v2400_v7 = vld [vmem:[#allocation7 + $0x4f0] sm:$0xff]  ;;  %v2397_v9 = vld [vmem:[#allocation7 + $0x4d8] sm:$0xff] }
 0x2d8   :  { %5820 = vmatprep.subr.bf16.mxu1 %v10355_v27  ;;  %v2356_v27 = vld [vmem:[#allocation7 + $0x390] sm:$0xff] }
 0x2d9   :  { %v10408_v25 = vcombine.low %v2356_v27, %v2360_v28 }
 0x2da   :  { %5657 = vmatpush1.bf16.msra.mxu0 %v10352_v36  ;;  %v10402_v36 = vcombine.low %v2349_v11, %v2353_v13  ;;  %v2401_v11 = vld [vmem:[#allocation7 + $0x4f8] sm:$0xff] }
 0x2db   :  { %5821 = vmatpush1.bf16.msra.mxu1 %v10354_v37  ;;  %5658 = vmatprep.subr.bf16.mxu0 %v10361_v60  ;;  %v10409_v37 = vcombine.high %v2356_v27, %v2360_v28  ;;  %v10411_v60 = vcombine.high %v2357_v30, %v2361_v33  ;;  %v2405_v27 = vld [vmem:[#allocation7 + $0x518] sm:$0xff] }
 0x2dc   :  { %5822 = vmatprep.subr.bf16.mxu1 %v10363_v43  ;;  %v2364_v43 = vld [vmem:[#allocation7 + $0x3d0] sm:$0xff]  ;;  %v2409_v28 = vld [vmem:[#allocation7 + $0x538] sm:$0xff] }
 0x2dd   :  { %v10416_v20 = vcombine.low %v2364_v43, %v2368_v18 }
 0x2de   :  { %5659 = vmatpush1.bf16.msra.mxu0 %v10360_v1  ;;  %v10410_v1 = vcombine.low %v2357_v30, %v2361_v33  ;;  %v10450_v30 = vcombine.low %v2397_v9, %v2401_v11 }
 0x2df   :  { %5823 = vmatpush1.bf16.msra.mxu1 %v10362_v3  ;;  %5660 = vmatprep.subr.bf16.mxu0 %v10369_v4  ;;  %v10417_v3 = vcombine.high %v2364_v43, %v2368_v18  ;;  %v10419_v4 = vcombine.high %v2365_v61, %v2369_v62  ;;  %v2417_v43 = vld [vmem:[#allocation7 + $0x578] sm:$0xff] }
 0x2e0   :  { %5824 = vmatprep.subr.bf16.mxu1 %v10371_v40  ;;  %v2372_v40 = vld [vmem:[#allocation7 + $0x410] sm:$0xff] }
 0x2e1   :  { %v10424_v47 = vcombine.low %v2372_v40, %v2376_v41 }
 0x2e2   :  { %5661 = vmatpush1.bf16.msra.mxu0 %v10368_v42  ;;  %v10418_v42 = vcombine.low %v2365_v61, %v2369_v62  ;;  %v10458_v61 = vcombine.low %v2405_v27, %v2409_v28 }
 0x2e3   :  { %5825 = vmatpush1.bf16.msra.mxu1 %v10370_v44  ;;  %5662 = vmatprep.subr.bf16.mxu0 %v10377_v46  ;;  %v10425_v44 = vcombine.high %v2372_v40, %v2376_v41  ;;  %v10427_v46 = vcombine.high %v2373_v32, %v2377_v31  ;;  %v2425_v40 = vld [vmem:[#allocation7 + $0x5b8] sm:$0xff] }
 0x2e4   :  { %5826 = vmatprep.subr.bf16.mxu1 %v10379_v10  ;;  %v2380_v10 = vld [vmem:[#allocation7 + $0x450] sm:$0xff] }
 0x2e5   :  { %v10432_v58 = vcombine.low %v2380_v10, %v2384_v50 }
 0x2e6   :  { %5663 = vmatpush1.bf16.msra.mxu0 %v10376_v57  ;;  %v10426_v57 = vcombine.low %v2373_v32, %v2377_v31 }
 0x2e7   :  { %5827 = vmatpush1.bf16.msra.mxu1 %v10378_v52  ;;  %5664 = vmatprep.subr.bf16.mxu0 %v10385_v53  ;;  %v10433_v52 = vcombine.high %v2380_v10, %v2384_v50  ;;  %v2388_v53 = vld [vmem:[#allocation7 + $0x490] sm:$0xff]  ;;  %v2433_v10 = vld [vmem:[#allocation7 + $0x5f8] sm:$0xff] }
 0x2e8   :  { %5828 = vmatprep.subr.bf16.mxu1 %v10387_v54  ;;  %v2392_v54 = vld [vmem:[#allocation7 + $0x4b0] sm:$0xff] }
 0x2e9   :  { %v10440_v13 = vcombine.low %v2388_v53, %v2392_v54 }
 0x2ea   :  { %5665 = vmatpush1.bf16.msra.mxu0 %v10384_v59  ;;  %v10434_v59 = vcombine.low %v2381_v21, %v2385_v51 }
 0x2eb   :  { %5829 = vmatpush1.bf16.msra.mxu1 %v10386_v63  ;;  %5666 = vmatprep.subr.bf16.mxu0 %v10393_v49  ;;  %v10441_v63 = vcombine.high %v2388_v53, %v2392_v54  ;;  %v10443_v49 = vcombine.high %v2389_v38, %v2393_v22  ;;  %v2437_v53 = vld [vmem:[#allocation7 + $0x618] sm:$0xff] }
 0x2ec   :  { %5830 = vmatprep.subr.bf16.mxu1 %v10395_v5  ;;  %v2396_v5 = vld [vmem:[#allocation7 + $0x4d0] sm:$0xff]  ;;  %v2441_v54 = vld [vmem:[#allocation7 + $0x638] sm:$0xff] }
 0x2ee   :  { %5667 = vmatpush1.bf16.msra.mxu0 %v10392_v14  ;;  %v10449_v14 = vcombine.high %v2396_v5, %v2400_v7 }
 0x2ef   :  { %5831 = vmatpush1.bf16.msra.mxu1 %v10394_v16  ;;  %5668 = vmatprep.subr.bf16.mxu0 %v10401_v6  ;;  %v10451_v16 = vcombine.high %v2397_v9, %v2401_v11  ;;  %v2404_v6 = vld [vmem:[#allocation7 + $0x510] sm:$0xff]  ;;  %v10490_v9 = vcombine.low %v2437_v53, %v2441_v54 }
 0x2f0   :  { %5832 = vmatprep.subr.bf16.mxu1 %v10403_v26  ;;  %v2408_v26 = vld [vmem:[#allocation7 + $0x530] sm:$0xff] }
 0x2f1   :  { %v10457_v33 = vcombine.high %v2404_v6, %v2408_v26  ;;  %v10456_v18 = vcombine.low %v2404_v6, %v2408_v26  ;;  %v2457_v6 = vld [vmem:[#allocation7 + $0x6b8] sm:$0xff] }
 0x2f2   :  { %5669 = vmatpush1.bf16.msra.mxu0 %v10400_v35  ;;  %v10459_v35 = vcombine.high %v2405_v27, %v2409_v28 }
 0x2f3   :  { %5833 = vmatpush1.bf16.msra.mxu1 %v10402_v36  ;;  %5670 = vmatprep.subr.bf16.mxu0 %v10409_v37  ;;  %v2412_v36 = vld [vmem:[#allocation7 + $0x550] sm:$0xff] }
 0x2f4   :  { %5834 = vmatprep.subr.bf16.mxu1 %v10411_v60  ;;  %v2416_v37 = vld [vmem:[#allocation7 + $0x570] sm:$0xff]  ;;  %v2413_v60 = vld [vmem:[#allocation7 + $0x558] sm:$0xff] }
 0x2f5   :  { %v10465_v62 = vcombine.high %v2412_v36, %v2416_v37  ;;  %v10464_v41 = vcombine.low %v2412_v36, %v2416_v37  ;;  %v10466_v32 = vcombine.low %v2413_v60, %v2417_v43  ;;  %v2465_v36 = vld [vmem:[#allocation7 + $0x6f8] sm:$0xff] }
 0x2f6   :  { %5671 = vmatpush1.bf16.msra.mxu0 %v10408_v25  ;;  %v10467_v25 = vcombine.high %v2413_v60, %v2417_v43 }
 0x2f7   :  { %5835 = vmatpush1.bf16.msra.mxu1 %v10410_v1  ;;  %5672 = vmatprep.subr.bf16.mxu0 %v10417_v3  ;;  %v2420_v1 = vld [vmem:[#allocation7 + $0x590] sm:$0xff] }
 0x2f8   :  { %5836 = vmatprep.subr.bf16.mxu1 %v10419_v4  ;;  %v2424_v3 = vld [vmem:[#allocation7 + $0x5b0] sm:$0xff]  ;;  %v2421_v4 = vld [vmem:[#allocation7 + $0x598] sm:$0xff] }
 0x2f9   :  { %v10473_v31 = vcombine.high %v2420_v1, %v2424_v3  ;;  %v10472_v50 = vcombine.low %v2420_v1, %v2424_v3  ;;  %v2473_v1 = vld [vmem:[#allocation7 + $0x738] sm:$0xff] }
 0x2fa   :  { %5673 = vmatpush1.bf16.msra.mxu0 %v10416_v20  ;;  %v10475_v20 = vcombine.high %v2421_v4, %v2425_v40 }
 0x2fb   :  { %5837 = vmatpush1.bf16.msra.mxu1 %v10418_v42  ;;  %5683 = vmatprep.subr.bf16.mxu0 %v10425_v44  ;;  %v2428_v42 = vld [vmem:[#allocation7 + $0x5d0] sm:$0xff] }
 0x2fc   :  { %5847 = vmatprep.subr.bf16.mxu1 %v10427_v46  ;;  %v2432_v44 = vld [vmem:[#allocation7 + $0x5f0] sm:$0xff]  ;;  %v2429_v46 = vld [vmem:[#allocation7 + $0x5d8] sm:$0xff] }
 0x2fd   :  { %5675 = vmatmul.mubr.bf16.vlgmr.msra.gmra.mrb[12].mxu0 %v11848_v23  ;;  %v10481_v21 = vcombine.high %v2428_v42, %v2432_v44  ;;  %v10483_v51 = vcombine.high %v2429_v46, %v2433_v10 }
 0x2fe   :  { %5839 = vmatmul.mubr.bf16.vlgmr.msra.gmra.mrb[12].mxu1 %v11848_v23  ;;  %5684 = vmatpush1.bf16.msra.mxu0 %v10424_v47  ;;  %v10442_v23 = vcombine.low %v2389_v38, %v2393_v22  ;;  %v10474_v47 = vcombine.low %v2421_v4, %v2425_v40  ;;  %v10482_v38 = vcombine.low %v2429_v46, %v2433_v10 }
 0x2ff   :  { %5715 = vmatprep.mubr.bf16.mxu0 %v11854_v29  ;;  %5848 = vmatpush1.bf16.msra.mxu1 %v10426_v57  ;;  %v2436_v57 = vld [vmem:[#allocation7 + $0x610] sm:$0xff] }
 0x300   :  { %5879 = vmatprep.mubr.bf16.mxu1 %v11854_v29  ;;  %5685 = vmatprep.subr.bf16.mxu0 %v10433_v52  ;;  %v10448_v29 = vcombine.low %v2396_v5, %v2400_v7  ;;  %v2440_v52 = vld [vmem:[#allocation7 + $0x630] sm:$0xff]  ;;  %v2449_v5 = vld [vmem:[#allocation7 + $0x678] sm:$0xff] }
 0x301   :  { %5849 = vmatprep.subr.bf16.mxu1 %v10435_v55  ;;  %v10480_v55 = vcombine.low %v2428_v42, %v2432_v44  ;;  %v10489_v22 = vcombine.high %v2436_v57, %v2440_v52  ;;  %v10488_v7 = vcombine.low %v2436_v57, %v2440_v52  ;;  %v2481_v42 = vld [vmem:[#allocation7 + $0x778] sm:$0xff] }
 0x302   :  { %5686 = vmatpush1.bf16.msra.mxu0 %v10432_v58  ;;  %v10491_v58 = vcombine.high %v2437_v53, %v2441_v54  ;;  %v2489_v57 = vld [vmem:[#allocation7 + $0x7b8] sm:$0xff] }
 0x303   :  { %5850 = vmatpush1.bf16.msra.mxu1 %v10434_v59  ;;  %5687 = vmatprep.subr.bf16.mxu0 %v10441_v63  ;;  %v2444_v59 = vld [vmem:[#allocation7 + $0x650] sm:$0xff] }
 0x304   :  { %5851 = vmatprep.subr.bf16.mxu1 %v10443_v49  ;;  %v2448_v63 = vld [vmem:[#allocation7 + $0x670] sm:$0xff]  ;;  %v2445_v49 = vld [vmem:[#allocation7 + $0x658] sm:$0xff] }
 0x305   :  { %v10497_v11 = vcombine.high %v2444_v59, %v2448_v63  ;;  %v10496_v26 = vcombine.low %v2444_v59, %v2448_v63  ;;  %v10498_v27 = vcombine.low %v2445_v49, %v2449_v5  ;;  %v2497_v59 = vld [vmem:[#allocation7 + $0x7f8] sm:$0xff] }
 0x306   :  { %5688 = vmatpush1.bf16.msra.mxu0 %v10440_v13  ;;  %v10499_v13 = vcombine.high %v2445_v49, %v2449_v5 }
 0x307   :  { %5852 = vmatpush1.bf16.msra.mxu1 %v10442_v23  ;;  %5689 = vmatprep.subr.bf16.mxu0 %v10449_v14  ;;  %v2452_v23 = vld [vmem:[#allocation7 + $0x690] sm:$0xff] }
 0x308   :  { %5853 = vmatprep.subr.bf16.mxu1 %v10451_v16  ;;  %v2456_v14 = vld [vmem:[#allocation7 + $0x6b0] sm:$0xff]  ;;  %v2453_v16 = vld [vmem:[#allocation7 + $0x698] sm:$0xff] }
 0x309   :  { %v10505_v28 = vcombine.high %v2452_v23, %v2456_v14  ;;  %v10504_v37 = vcombine.low %v2452_v23, %v2456_v14  ;;  %v10506_v60 = vcombine.low %v2453_v16, %v2457_v6  ;;  %v2505_v23 = vld [vmem:[#allocation7 + $0x838] sm:$0xff] }
 0x30a   :  { %5690 = vmatpush1.bf16.msra.mxu0 %v10448_v29  ;;  %v10507_v29 = vcombine.high %v2453_v16, %v2457_v6 }
 0x30b   :  { %5854 = vmatpush1.bf16.msra.mxu1 %v10450_v30  ;;  %5691 = vmatprep.subr.bf16.mxu0 %v10457_v33  ;;  %v2460_v30 = vld [vmem:[#allocation7 + $0x6d0] sm:$0xff] }
 0x30c   :  { %5855 = vmatprep.subr.bf16.mxu1 %v10459_v35  ;;  %v2464_v33 = vld [vmem:[#allocation7 + $0x6f0] sm:$0xff]  ;;  %v2461_v35 = vld [vmem:[#allocation7 + $0x6d8] sm:$0xff] }
 0x30d   :  { %v10513_v43 = vcombine.high %v2460_v30, %v2464_v33  ;;  %v10512_v3 = vcombine.low %v2460_v30, %v2464_v33  ;;  %v10514_v4 = vcombine.low %v2461_v35, %v2465_v36  ;;  %v2509_v30 = vld [vmem:[#allocation7 + $0x858] sm:$0xff] }
 0x30e   :  { %5692 = vmatpush1.bf16.msra.mxu0 %v10456_v18  ;;  %v10515_v18 = vcombine.high %v2461_v35, %v2465_v36  ;;  %v2513_v33 = vld [vmem:[#allocation7 + $0x878] sm:$0xff] }
 0x30f   :  { %5856 = vmatpush1.bf16.msra.mxu1 %v10458_v61  ;;  %5693 = vmatprep.subr.bf16.mxu0 %v10465_v62  ;;  %v2468_v61 = vld [vmem:[#allocation7 + $0x710] sm:$0xff] }
 0x310   :  { %5857 = vmatprep.subr.bf16.mxu1 %v10467_v25  ;;  %v2472_v62 = vld [vmem:[#allocation7 + $0x730] sm:$0xff]  ;;  %v2469_v25 = vld [vmem:[#allocation7 + $0x718] sm:$0xff] }
 0x311   :  { %v10521_v40 = vcombine.high %v2468_v61, %v2472_v62  ;;  %v10520_v44 = vcombine.low %v2468_v61, %v2472_v62  ;;  %v10522_v46 = vcombine.low %v2469_v25, %v2473_v1  ;;  %v2521_v61 = vld [vmem:[#allocation7 + $0x8b8] sm:$0xff] }
 0x312   :  { %5694 = vmatpush1.bf16.msra.mxu0 %v10464_v41  ;;  %v10523_v41 = vcombine.high %v2469_v25, %v2473_v1  ;;  %v10562_v25 = vcombine.low %v2509_v30, %v2513_v33 }
 0x313   :  { %5858 = vmatpush1.bf16.msra.mxu1 %v10466_v32  ;;  %5695 = vmatprep.subr.bf16.mxu0 %v10473_v31  ;;  %v2476_v32 = vld [vmem:[#allocation7 + $0x750] sm:$0xff] }
 0x314   :  { %5859 = vmatprep.subr.bf16.mxu1 %v10475_v20  ;;  %v2480_v31 = vld [vmem:[#allocation7 + $0x770] sm:$0xff]  ;;  %v2477_v20 = vld [vmem:[#allocation7 + $0x758] sm:$0xff] }
 0x315   :  { %v10529_v10 = vcombine.high %v2476_v32, %v2480_v31  ;;  %v10528_v52 = vcombine.low %v2476_v32, %v2480_v31  ;;  %v10530_v53 = vcombine.low %v2477_v20, %v2481_v42  ;;  %v2529_v32 = vld [vmem:[#allocation7 + $0x8f8] sm:$0xff] }
 0x316   :  { %5696 = vmatpush1.bf16.msra.mxu0 %v10472_v50  ;;  %v10531_v50 = vcombine.high %v2477_v20, %v2481_v42 }
 0x317   :  { %5860 = vmatpush1.bf16.msra.mxu1 %v10474_v47  ;;  %5697 = vmatprep.subr.bf16.mxu0 %v10481_v21  ;;  %v2484_v47 = vld [vmem:[#allocation7 + $0x790] sm:$0xff] }
 0x318   :  { %5861 = vmatprep.subr.bf16.mxu1 %v10483_v51  ;;  %v2488_v21 = vld [vmem:[#allocation7 + $0x7b0] sm:$0xff]  ;;  %v2485_v51 = vld [vmem:[#allocation7 + $0x798] sm:$0xff] }
 0x319   :  { %v10537_v54 = vcombine.high %v2484_v47, %v2488_v21  ;;  %v10536_v63 = vcombine.low %v2484_v47, %v2488_v21  ;;  %v10538_v49 = vcombine.low %v2485_v51, %v2489_v57 }
 0x31a   :  { %5698 = vmatpush1.bf16.msra.mxu0 %v10480_v55  ;;  %v10539_v55 = vcombine.high %v2485_v51, %v2489_v57  ;;  %v2540_v57 = vld [vmem:[#allocation7 + $0x950] sm:$0xff] }
 0x31b   :  { %5862 = vmatpush1.bf16.msra.mxu1 %v10482_v38  ;;  %5699 = vmatprep.subr.bf16.mxu0 %v10489_v22  ;;  %v2492_v38 = vld [vmem:[#allocation7 + $0x7d0] sm:$0xff] }
 0x31c   :  { %5863 = vmatprep.subr.bf16.mxu1 %v10491_v58  ;;  %v2496_v22 = vld [vmem:[#allocation7 + $0x7f0] sm:$0xff]  ;;  %v2493_v58 = vld [vmem:[#allocation7 + $0x7d8] sm:$0xff] }
 0x31d   :  { %v10545_v5 = vcombine.high %v2492_v38, %v2496_v22  ;;  %v10544_v14 = vcombine.low %v2492_v38, %v2496_v22  ;;  %v10546_v16 = vcombine.low %v2493_v58, %v2497_v59 }
 0x31e   :  { %5700 = vmatpush1.bf16.msra.mxu0 %v10488_v7  ;;  %v10547_v7 = vcombine.high %v2493_v58, %v2497_v59  ;;  %v2548_v59 = vld [vmem:[#allocation7 + $0x990] sm:$0xff] }
 0x31f   :  { %5864 = vmatpush1.bf16.msra.mxu1 %v10490_v9  ;;  %5701 = vmatprep.subr.bf16.mxu0 %v10497_v11  ;;  %v2500_v9 = vld [vmem:[#allocation7 + $0x810] sm:$0xff] }
 0x320   :  { %5865 = vmatprep.subr.bf16.mxu1 %v10499_v13  ;;  %v2504_v11 = vld [vmem:[#allocation7 + $0x830] sm:$0xff]  ;;  %v2501_v13 = vld [vmem:[#allocation7 + $0x818] sm:$0xff] }
 0x321   :  { %v10553_v6 = vcombine.high %v2500_v9, %v2504_v11  ;;  %v10554_v35 = vcombine.low %v2501_v13, %v2505_v23 }
 0x322   :  { %5702 = vmatpush1.bf16.msra.mxu0 %v10496_v26  ;;  %v10555_v26 = vcombine.high %v2501_v13, %v2505_v23  ;;  %v2556_v23 = vld [vmem:[#allocation7 + $0x9d0] sm:$0xff] }
 0x323   :  { %5866 = vmatpush1.bf16.msra.mxu1 %v10498_v27  ;;  %5703 = vmatprep.subr.bf16.mxu0 %v10505_v28  ;;  %v2508_v27 = vld [vmem:[#allocation7 + $0x850] sm:$0xff] }
 0x324   :  { %5867 = vmatprep.subr.bf16.mxu1 %v10507_v29  ;;  %v2512_v28 = vld [vmem:[#allocation7 + $0x870] sm:$0xff]  ;;  %v10552_v29 = vcombine.low %v2500_v9, %v2504_v11 }
 0x325   :  { %v10561_v36 = vcombine.high %v2508_v27, %v2512_v28  ;;  %v10560_v62 = vcombine.low %v2508_v27, %v2512_v28 }
 0x326   :  { %5704 = vmatpush1.bf16.msra.mxu0 %v10504_v37  ;;  %v2516_v37 = vld [vmem:[#allocation7 + $0x890] sm:$0xff] }
 0x327   :  { %5868 = vmatpush1.bf16.msra.mxu1 %v10506_v60  ;;  %5705 = vmatprep.subr.bf16.mxu0 %v10513_v43  ;;  %v2520_v60 = vld [vmem:[#allocation7 + $0x8b0] sm:$0xff]  ;;  %v10563_v43 = vcombine.high %v2509_v30, %v2513_v33 }
 0x328   :  { %5869 = vmatprep.subr.bf16.mxu1 %v10515_v18  ;;  %v2517_v18 = vld [vmem:[#allocation7 + $0x898] sm:$0xff]  ;;  %v10569_v1 = vcombine.high %v2516_v37, %v2520_v60  ;;  %v10568_v31 = vcombine.low %v2516_v37, %v2520_v60  ;;  %v2564_v30 = vld [vmem:[#allocation7 + $0xa10] sm:$0xff] }
 0x329   :  { %v2568_v33 = vld [vmem:[#allocation7 + $0xa30] sm:$0xff] }
 0x32a   :  { %5706 = vmatpush1.bf16.msra.mxu0 %v10512_v3  ;;  %v10571_v3 = vcombine.high %v2517_v18, %v2521_v61 }
 0x32b   :  { %5870 = vmatpush1.bf16.msra.mxu1 %v10514_v4  ;;  %5707 = vmatprep.subr.bf16.mxu0 %v10521_v40  ;;  %v2524_v4 = vld [vmem:[#allocation7 + $0x8d0] sm:$0xff] }
 0x32c   :  { %5871 = vmatprep.subr.bf16.mxu1 %v10523_v41  ;;  %v2528_v40 = vld [vmem:[#allocation7 + $0x8f0] sm:$0xff]  ;;  %v2525_v41 = vld [vmem:[#allocation7 + $0x8d8] sm:$0xff] }
 0x32d   :  { %v10577_v20 = vcombine.high %v2524_v4, %v2528_v40  ;;  %v10579_v42 = vcombine.high %v2525_v41, %v2529_v32  ;;  %v10578_v47 = vcombine.low %v2525_v41, %v2529_v32  ;;  %v2580_v32 = vld [vmem:[#allocation7 + $0xa90] sm:$0xff] }
 0x32e   :  { %5708 = vmatpush1.bf16.msra.mxu0 %v10520_v44  ;;  %v2532_v44 = vld [vmem:[#allocation7 + $0x910] sm:$0xff] }
 0x32f   :  { %5872 = vmatpush1.bf16.msra.mxu1 %v10522_v46  ;;  %5709 = vmatprep.subr.bf16.mxu0 %v10529_v10  ;;  %v2536_v46 = vld [vmem:[#allocation7 + $0x930] sm:$0xff]  ;;  %v2533_v10 = vld [vmem:[#allocation7 + $0x918] sm:$0xff] }
 0x330   :  { %5873 = vmatprep.subr.bf16.mxu1 %v10531_v50  ;;  %v2537_v50 = vld [vmem:[#allocation7 + $0x938] sm:$0xff]  ;;  %v10585_v21 = vcombine.high %v2532_v44, %v2536_v46 }
 0x331   :  { %v10587_v51 = vcombine.high %v2533_v10, %v2537_v50  ;;  %v10586_v38 = vcombine.low %v2533_v10, %v2537_v50  ;;  %v2588_v50 = vld [vmem:[#allocation7 + $0xad0] sm:$0xff] }
 0x332   :  { %5710 = vmatpush1.bf16.msra.mxu0 %v10528_v52  ;;  %v2544_v52 = vld [vmem:[#allocation7 + $0x970] sm:$0xff] }
 0x333   :  { %5874 = vmatpush1.bf16.msra.mxu1 %v10530_v53  ;;  %5711 = vmatprep.subr.bf16.mxu0 %v10537_v54  ;;  %v2541_v53 = vld [vmem:[#allocation7 + $0x958] sm:$0xff]  ;;  %v10593_v22 = vcombine.high %v2540_v57, %v2544_v52 }
 0x334   :  { %5875 = vmatprep.subr.bf16.mxu1 %v10539_v55  ;;  %v2545_v54 = vld [vmem:[#allocation7 + $0x978] sm:$0xff]  ;;  %v10584_v55 = vcombine.low %v2532_v44, %v2536_v46 }
 0x335   :  { %v10595_v58 = vcombine.high %v2541_v53, %v2545_v54  ;;  %v10594_v9 = vcombine.low %v2541_v53, %v2545_v54  ;;  %v2596_v54 = vld [vmem:[#allocation7 + $0xb10] sm:$0xff] }
 0x336   :  { %5712 = vmatpush1.bf16.msra.mxu0 %v10536_v63  ;;  %v2552_v63 = vld [vmem:[#allocation7 + $0x9b0] sm:$0xff] }
 0x337   :  { %5876 = vmatpush1.bf16.msra.mxu1 %v10538_v49  ;;  %5713 = vmatprep.subr.bf16.mxu0 %v10545_v5  ;;  %v2549_v49 = vld [vmem:[#allocation7 + $0x998] sm:$0xff]  ;;  %v10601_v11 = vcombine.high %v2548_v59, %v2552_v63 }
 0x338   :  { %5877 = vmatprep.subr.bf16.mxu1 %v10547_v7  ;;  %v2553_v5 = vld [vmem:[#allocation7 + $0x9b8] sm:$0xff]  ;;  %v10592_v7 = vcombine.low %v2540_v57, %v2544_v52 }
 0x339   :  { %v10603_v13 = vcombine.high %v2549_v49, %v2553_v5  ;;  %v10602_v27 = vcombine.low %v2549_v49, %v2553_v5  ;;  %v2604_v5 = vld [vmem:[#allocation7 + $0xb50] sm:$0xff] }
 0x33a   :  { %5714 = vmatpush1.bf16.msra.mxu0 %v10544_v14  ;;  %v2560_v14 = vld [vmem:[#allocation7 + $0x9f0] sm:$0xff] }
 0x33b   :  { %5878 = vmatpush1.bf16.msra.mxu1 %v10546_v16  ;;  %5724 = vmatprep.subr.bf16.mxu0 %v10553_v6  ;;  %v2557_v16 = vld [vmem:[#allocation7 + $0x9d8] sm:$0xff]  ;;  %v10609_v28 = vcombine.high %v2556_v23, %v2560_v14  ;;  %v10608_v37 = vcombine.low %v2556_v23, %v2560_v14 }
 0x33c   :  { %5888 = vmatprep.subr.bf16.mxu1 %v10555_v26  ;;  %v2561_v6 = vld [vmem:[#allocation7 + $0x9f8] sm:$0xff]  ;;  %v10600_v26 = vcombine.low %v2548_v59, %v2552_v63 }
 0x33d   :  { %5716 = vmatmul.mubr.bf16.vlgmr.msra.gmra.mrb[12].mxu0 %v11872_v56  ;;  %v10610_v60 = vcombine.low %v2557_v16, %v2561_v6 }
 0x33e   :  { %5880 = vmatmul.mubr.bf16.vlgmr.msra.gmra.mrb[12].mxu1 %v11872_v56  ;;  %5725 = vmatpush1.bf16.msra.mxu0 %v10552_v29  ;;  %v10570_v56 = vcombine.low %v2517_v18, %v2521_v61  ;;  %v10611_v29 = vcombine.high %v2557_v16, %v2561_v6  ;;  %v2572_v61 = vld [vmem:[#allocation7 + $0xa50] sm:$0xff] }
 0x33f   :  { %5756 = vmatprep.mubr.bf16.mxu0 %v11936_v17  ;;  %5889 = vmatpush1.bf16.msra.mxu1 %v10554_v35  ;;  %v2565_v35 = vld [vmem:[#allocation7 + $0xa18] sm:$0xff]  ;;  %v2612_v6 = vld [vmem:[#allocation7 + $0xb90] sm:$0xff] }
 0x340   :  { %5920 = vmatprep.mubr.bf16.mxu1 %v11936_v17  ;;  %5726 = vmatprep.subr.bf16.mxu0 %v10561_v36  ;;  %v10576_v17 = vcombine.low %v2524_v4, %v2528_v40  ;;  %v2569_v36 = vld [vmem:[#allocation7 + $0xa38] sm:$0xff] }
 0x341   :  { %5890 = vmatprep.subr.bf16.mxu1 %v10563_v43  ;;  %v10617_v43 = vcombine.high %v2564_v30, %v2568_v33  ;;  %v10619_v18 = vcombine.high %v2565_v35, %v2569_v36  ;;  %v10618_v4 = vcombine.low %v2565_v35, %v2569_v36  ;;  %v2620_v36 = vld [vmem:[#allocation7 + $0xbd0] sm:$0xff] }
 0x342   :  { %5727 = vmatpush1.bf16.msra.mxu0 %v10560_v62  ;;  %v2576_v62 = vld [vmem:[#allocation7 + $0xa70] sm:$0xff] }
 0x343   :  { %5891 = vmatpush1.bf16.msra.mxu1 %v10562_v25  ;;  %5728 = vmatprep.subr.bf16.mxu0 %v10569_v1  ;;  %v2573_v25 = vld [vmem:[#allocation7 + $0xa58] sm:$0xff]  ;;  %v10625_v40 = vcombine.high %v2572_v61, %v2576_v62 }
 0x344   :  { %5892 = vmatprep.subr.bf16.mxu1 %v10571_v3  ;;  %v2577_v1 = vld [vmem:[#allocation7 + $0xa78] sm:$0xff]  ;;  %v10616_v3 = vcombine.low %v2564_v30, %v2568_v33 }
 0x345   :  { %v10627_v41 = vcombine.high %v2573_v25, %v2577_v1  ;;  %v10626_v44 = vcombine.low %v2573_v25, %v2577_v1  ;;  %v2628_v1 = vld [vmem:[#allocation7 + $0xc10] sm:$0xff] }
 0x346   :  { %5729 = vmatpush1.bf16.msra.mxu0 %v10568_v31  ;;  %v2584_v31 = vld [vmem:[#allocation7 + $0xab0] sm:$0xff] }
 0x347   :  { %5893 = vmatpush1.bf16.msra.mxu1 %v10570_v56  ;;  %5730 = vmatprep.subr.bf16.mxu0 %v10577_v20  ;;  %v2581_v56 = vld [vmem:[#allocation7 + $0xa98] sm:$0xff]  ;;  %v10633_v46 = vcombine.high %v2580_v32, %v2584_v31 }
 0x348   :  { %5894 = vmatprep.subr.bf16.mxu1 %v10579_v42  ;;  %v2585_v20 = vld [vmem:[#allocation7 + $0xab8] sm:$0xff]  ;;  %v10624_v42 = vcombine.low %v2572_v61, %v2576_v62 }
 0x349   :  { %v10635_v10 = vcombine.high %v2581_v56, %v2585_v20  ;;  %v10634_v57 = vcombine.low %v2581_v56, %v2585_v20  ;;  %v2636_v20 = vld [vmem:[#allocation7 + $0xc50] sm:$0xff] }
 0x34a   :  { %5731 = vmatpush1.bf16.msra.mxu0 %v10576_v17  ;;  %v2592_v17 = vld [vmem:[#allocation7 + $0xaf0] sm:$0xff] }
 0x34b   :  { %5895 = vmatpush1.bf16.msra.mxu1 %v10578_v47  ;;  %5732 = vmatprep.subr.bf16.mxu0 %v10585_v21  ;;  %v2589_v47 = vld [vmem:[#allocation7 + $0xad8] sm:$0xff]  ;;  %v10641_v52 = vcombine.high %v2588_v50, %v2592_v17 }
 0x34c   :  { %5896 = vmatprep.subr.bf16.mxu1 %v10587_v51  ;;  %v2593_v21 = vld [vmem:[#allocation7 + $0xaf8] sm:$0xff]  ;;  %v10632_v51 = vcombine.low %v2580_v32, %v2584_v31 }
 0x34d   :  { %v10643_v53 = vcombine.high %v2589_v47, %v2593_v21  ;;  %v10642_v59 = vcombine.low %v2589_v47, %v2593_v21  ;;  %v2644_v47 = vld [vmem:[#allocation7 + $0xc90] sm:$0xff] }
 0x34e   :  { %5733 = vmatpush1.bf16.msra.mxu0 %v10584_v55  ;;  %v2600_v55 = vld [vmem:[#allocation7 + $0xb30] sm:$0xff] }
 0x34f   :  { %5897 = vmatpush1.bf16.msra.mxu1 %v10586_v38  ;;  %5734 = vmatprep.subr.bf16.mxu0 %v10593_v22  ;;  %v2597_v38 = vld [vmem:[#allocation7 + $0xb18] sm:$0xff]  ;;  %v10649_v63 = vcombine.high %v2596_v54, %v2600_v55  ;;  %v2648_v21 = vld [vmem:[#allocation7 + $0xcb0] sm:$0xff] }
 0x350   :  { %5898 = vmatprep.subr.bf16.mxu1 %v10595_v58  ;;  %v2601_v22 = vld [vmem:[#allocation7 + $0xb38] sm:$0xff]  ;;  %v10640_v58 = vcombine.low %v2588_v50, %v2592_v17 }
 0x351   :  { %v10651_v49 = vcombine.high %v2597_v38, %v2601_v22  ;;  %v10650_v23 = vcombine.low %v2597_v38, %v2601_v22  ;;  %v2652_v22 = vld [vmem:[#allocation7 + $0xcd0] sm:$0xff] }
 0x352   :  { %5735 = vmatpush1.bf16.msra.mxu0 %v10592_v7  ;;  %v2608_v7 = vld [vmem:[#allocation7 + $0xb70] sm:$0xff] }
 0x353   :  { %5899 = vmatpush1.bf16.msra.mxu1 %v10594_v9  ;;  %5736 = vmatprep.subr.bf16.mxu0 %v10601_v11  ;;  %v2605_v9 = vld [vmem:[#allocation7 + $0xb58] sm:$0xff]  ;;  %v10657_v14 = vcombine.high %v2604_v5, %v2608_v7 }
 0x354   :  { %5900 = vmatprep.subr.bf16.mxu1 %v10603_v13  ;;  %v2609_v11 = vld [vmem:[#allocation7 + $0xb78] sm:$0xff]  ;;  %v10648_v13 = vcombine.low %v2596_v54, %v2600_v55  ;;  %v10697_v55 = vcombine.high %v2644_v47, %v2648_v21 }
 0x355   :  { %v10659_v16 = vcombine.high %v2605_v9, %v2609_v11  ;;  %v10658_v30 = vcombine.low %v2605_v9, %v2609_v11  ;;  %v2660_v9 = vld [vmem:[#allocation7 + $0xd10] sm:$0xff] }
 0x356   :  { %5737 = vmatpush1.bf16.msra.mxu0 %v10600_v26  ;;  %v2616_v26 = vld [vmem:[#allocation7 + $0xbb0] sm:$0xff] }
 0x357   :  { %5901 = vmatpush1.bf16.msra.mxu1 %v10602_v27  ;;  %5738 = vmatprep.subr.bf16.mxu0 %v10609_v28  ;;  %v2613_v27 = vld [vmem:[#allocation7 + $0xb98] sm:$0xff]  ;;  %v10665_v33 = vcombine.high %v2612_v6, %v2616_v26  ;;  %v2664_v11 = vld [vmem:[#allocation7 + $0xd30] sm:$0xff] }
 0x358   :  { %5902 = vmatprep.subr.bf16.mxu1 %v10611_v29  ;;  %v2617_v28 = vld [vmem:[#allocation7 + $0xbb8] sm:$0xff]  ;;  %v10656_v29 = vcombine.low %v2604_v5, %v2608_v7 }
 0x359   :  { %v10667_v35 = vcombine.high %v2613_v27, %v2617_v28  ;;  %v10666_v61 = vcombine.low %v2613_v27, %v2617_v28  ;;  %v2672_v27 = vld [vmem:[#allocation7 + $0xd70] sm:$0xff]  ;;  %v2669_v28 = vld [vmem:[#allocation7 + $0xd58] sm:$0xff] }
 0x35a   :  { %5739 = vmatpush1.bf16.msra.mxu0 %v10608_v37  ;;  %v2624_v37 = vld [vmem:[#allocation7 + $0xbf0] sm:$0xff] }
 0x35b   :  { %5903 = vmatpush1.bf16.msra.mxu1 %v10610_v60  ;;  %5740 = vmatprep.subr.bf16.mxu0 %v10617_v43  ;;  %v2621_v60 = vld [vmem:[#allocation7 + $0xbd8] sm:$0xff]  ;;  %v10673_v62 = vcombine.high %v2620_v36, %v2624_v37 }
 0x35c   :  { %5904 = vmatprep.subr.bf16.mxu1 %v10619_v18  ;;  %v2625_v43 = vld [vmem:[#allocation7 + $0xbf8] sm:$0xff]  ;;  %v10664_v18 = vcombine.low %v2612_v6, %v2616_v26  ;;  %v2668_v26 = vld [vmem:[#allocation7 + $0xd50] sm:$0xff] }
 0x35d   :  { %v10675_v25 = vcombine.high %v2621_v60, %v2625_v43  ;;  %v10674_v32 = vcombine.low %v2621_v60, %v2625_v43  ;;  %v2680_v60 = vld [vmem:[#allocation7 + $0xdb0] sm:$0xff]  ;;  %v2677_v43 = vld [vmem:[#allocation7 + $0xd98] sm:$0xff] }
 0x35e   :  { %5741 = vmatpush1.bf16.msra.mxu0 %v10616_v3  ;;  %v2632_v3 = vld [vmem:[#allocation7 + $0xc30] sm:$0xff] }
 0x35f   :  { %5905 = vmatpush1.bf16.msra.mxu1 %v10618_v4  ;;  %5742 = vmatprep.subr.bf16.mxu0 %v10625_v40  ;;  %v2629_v4 = vld [vmem:[#allocation7 + $0xc18] sm:$0xff]  ;;  %v10681_v31 = vcombine.high %v2628_v1, %v2632_v3 }
 0x360   :  { %5906 = vmatprep.subr.bf16.mxu1 %v10627_v41  ;;  %v2633_v40 = vld [vmem:[#allocation7 + $0xc38] sm:$0xff]  ;;  %v10672_v41 = vcombine.low %v2620_v36, %v2624_v37  ;;  %v2676_v37 = vld [vmem:[#allocation7 + $0xd90] sm:$0xff] }
 0x361   :  { %v10683_v56 = vcombine.high %v2629_v4, %v2633_v40  ;;  %v10682_v50 = vcombine.low %v2629_v4, %v2633_v40  ;;  %v2684_v40 = vld [vmem:[#allocation7 + $0xdd0] sm:$0xff] }
 0x362   :  { %5743 = vmatpush1.bf16.msra.mxu0 %v10624_v42  ;;  %v2640_v42 = vld [vmem:[#allocation7 + $0xc70] sm:$0xff] }
 0x363   :  { %5907 = vmatpush1.bf16.msra.mxu1 %v10626_v44  ;;  %5744 = vmatprep.subr.bf16.mxu0 %v10633_v46  ;;  %v10680_v44 = vcombine.low %v2628_v1, %v2632_v3  ;;  %v2637_v46 = vld [vmem:[#allocation7 + $0xc58] sm:$0xff]  ;;  %v10689_v17 = vcombine.high %v2636_v20, %v2640_v42 }
 0x364   :  { %5908 = vmatprep.subr.bf16.mxu1 %v10635_v10  ;;  %v2641_v10 = vld [vmem:[#allocation7 + $0xc78] sm:$0xff] }
 0x365   :  { %v10690_v54 = vcombine.low %v2637_v46, %v2641_v10 }
 0x366   :  { %5745 = vmatpush1.bf16.msra.mxu0 %v10632_v51  ;;  %v10691_v51 = vcombine.high %v2637_v46, %v2641_v10  ;;  %v10728_v10 = vcombine.low %v2676_v37, %v2680_v60 }
 0x367   :  { %5909 = vmatpush1.bf16.msra.mxu1 %v10634_v57  ;;  %5746 = vmatprep.subr.bf16.mxu0 %v10641_v52  ;;  %v2645_v57 = vld [vmem:[#allocation7 + $0xc98] sm:$0xff] }
 0x368   :  { %5910 = vmatprep.subr.bf16.mxu1 %v10643_v53  ;;  %v2649_v52 = vld [vmem:[#allocation7 + $0xcb8] sm:$0xff]  ;;  %v10688_v53 = vcombine.low %v2636_v20, %v2640_v42 }
 0x369   :  { %v10699_v38 = vcombine.high %v2645_v57, %v2649_v52  ;;  %v2689_v20 = vld [vmem:[#allocation7 + $0xdf8] sm:$0xff] }
 0x36a   :  { %5747 = vmatpush1.bf16.msra.mxu0 %v10640_v58  ;;  %v2656_v58 = vld [vmem:[#allocation7 + $0xcf0] sm:$0xff] }
 0x36b   :  { %5911 = vmatpush1.bf16.msra.mxu1 %v10642_v59  ;;  %5748 = vmatprep.subr.bf16.mxu0 %v10649_v63  ;;  %v2653_v59 = vld [vmem:[#allocation7 + $0xcd8] sm:$0xff]  ;;  %v10705_v5 = vcombine.high %v2652_v22, %v2656_v58 }
 0x36c   :  { %5912 = vmatprep.subr.bf16.mxu1 %v10651_v49  ;;  %v2657_v63 = vld [vmem:[#allocation7 + $0xcf8] sm:$0xff]  ;;  %v10696_v49 = vcombine.low %v2644_v47, %v2648_v21 }
 0x36d   :  { %v10707_v7 = vcombine.high %v2653_v59, %v2657_v63 }
 0x36e   :  { %5749 = vmatpush1.bf16.msra.mxu0 %v10648_v13  ;;  %v2661_v13 = vld [vmem:[#allocation7 + $0xd18] sm:$0xff] }
 0x36f   :  { %5913 = vmatpush1.bf16.msra.mxu1 %v10650_v23  ;;  %5750 = vmatprep.subr.bf16.mxu0 %v10657_v14  ;;  %v2665_v23 = vld [vmem:[#allocation7 + $0xd38] sm:$0xff]  ;;  %v10706_v14 = vcombine.low %v2653_v59, %v2657_v63 }
 0x370   :  { %5914 = vmatprep.subr.bf16.mxu1 %v10659_v16  ;;  %v10713_v16 = vcombine.high %v2660_v9, %v2664_v11  ;;  %v10715_v6 = vcombine.high %v2661_v13, %v2665_v23 }
 0x372   :  { %5751 = vmatpush1.bf16.msra.mxu0 %v10656_v29  ;;  %v2673_v29 = vld [vmem:[#allocation7 + $0xd78] sm:$0xff] }
 0x373   :  { %5915 = vmatpush1.bf16.msra.mxu1 %v10658_v30  ;;  %5752 = vmatprep.subr.bf16.mxu0 %v10665_v33  ;;  %v10712_v30 = vcombine.low %v2660_v9, %v2664_v11  ;;  %v10714_v33 = vcombine.low %v2661_v13, %v2665_v23  ;;  %v10723_v36 = vcombine.high %v2669_v28, %v2673_v29  ;;  %v2705_v9 = vld [vmem:[#allocation7 + $0xe78] sm:$0xff] }
 0x374   :  { %5916 = vmatprep.subr.bf16.mxu1 %v10667_v35  ;;  %v10721_v35 = vcombine.high %v2668_v26, %v2672_v27 }
 0x376   :  { %5753 = vmatpush1.bf16.msra.mxu0 %v10664_v18  ;;  %v2681_v18 = vld [vmem:[#allocation7 + $0xdb8] sm:$0xff] }
 0x377   :  { %5917 = vmatpush1.bf16.msra.mxu1 %v10666_v61  ;;  %5754 = vmatprep.subr.bf16.mxu0 %v10673_v62  ;;  %v10720_v61 = vcombine.low %v2668_v26, %v2672_v27  ;;  %v10722_v62 = vcombine.low %v2669_v28, %v2673_v29  ;;  %v10731_v4 = vcombine.high %v2677_v43, %v2681_v18  ;;  %v2708_v27 = vld [vmem:[#allocation7 + $0xe90] sm:$0xff]  ;;  %v2709_v29 = vld [vmem:[#allocation7 + $0xe98] sm:$0xff] }
 0x378   :  { %5918 = vmatprep.subr.bf16.mxu1 %v10675_v25  ;;  %v10729_v25 = vcombine.high %v2676_v37, %v2680_v60  ;;  %v10730_v47 = vcombine.low %v2677_v43, %v2681_v18  ;;  %v2712_v28 = vld [vmem:[#allocation7 + $0xeb0] sm:$0xff] }
 0x379   :  { %v10761_v60 = vcombine.high %v2708_v27, %v2712_v28 }
 0x37a   :  { %5755 = vmatpush1.bf16.msra.mxu0 %v10672_v41  ;;  %v2688_v41 = vld [vmem:[#allocation7 + $0xdf0] sm:$0xff] }
 0x37b   :  { %5919 = vmatpush1.bf16.msra.mxu1 %v10674_v32  ;;  %5765 = vmatprep.subr.bf16.mxu0 %v10681_v31  ;;  %v10737_v21 = vcombine.high %v2684_v40, %v2688_v41 }
 0x37c   :  { %5929 = vmatprep.subr.bf16.mxu1 %v10683_v56  ;;  %v2685_v56 = vld [vmem:[#allocation7 + $0xdd8] sm:$0xff] }
 0x37d   :  { %5757 = vmatmul.mubr.bf16.vlgmr.msra.gmra.mrb[12].mxu0 %v11938_v8 }
 0x37e   :  { %5921 = vmatmul.mubr.bf16.vlgmr.msra.gmra.mrb[12].mxu1 %v11938_v8  ;;  %5766 = vmatpush1.bf16.msra.mxu0 %v10680_v44  ;;  %v10698_v8 = vcombine.low %v2645_v57, %v2649_v52  ;;  %v10739_v57 = vcombine.high %v2685_v56, %v2689_v20  ;;  %v2692_v52 = vld [vmem:[#allocation7 + $0xe10] sm:$0xff] }
 0x37f   :  { %5797 = vmatprep.mubr.bf16.mxu0 %v11944_v34  ;;  %5930 = vmatpush1.bf16.msra.mxu1 %v10682_v50 }
 0x380   :  { %5961 = vmatprep.mubr.bf16.mxu1 %v11944_v34  ;;  %5767 = vmatprep.subr.bf16.mxu0 %v10689_v17  ;;  %v10704_v34 = vcombine.low %v2652_v22, %v2656_v58  ;;  %v10736_v22 = vcombine.low %v2684_v40, %v2688_v41  ;;  %v10738_v58 = vcombine.low %v2685_v56, %v2689_v20  ;;  %v2721_v40 = vld [vmem:[#allocation7 + $0xef8] sm:$0xff] }
 0x381   :  { %5931 = vmatprep.subr.bf16.mxu1 %v10691_v51  ;;  %v10760_v56 = vcombine.low %v2708_v27, %v2712_v28 }
 0x382   :  { %5768 = vmatpush1.bf16.msra.mxu0 %v10688_v53  ;;  %v2696_v53 = vld [vmem:[#allocation7 + $0xe30] sm:$0xff] }
 0x383   :  { %5932 = vmatpush1.bf16.msra.mxu1 %v10690_v54  ;;  %5769 = vmatprep.subr.bf16.mxu0 %v10697_v55  ;;  %v2693_v54 = vld [vmem:[#allocation7 + $0xe18] sm:$0xff]  ;;  %v10745_v59 = vcombine.high %v2692_v52, %v2696_v53  ;;  %v10744_v13 = vcombine.low %v2692_v52, %v2696_v53 }
 0x384   :  { %5933 = vmatprep.subr.bf16.mxu1 %v10699_v38  ;;  %v2697_v55 = vld [vmem:[#allocation7 + $0xe38] sm:$0xff] }
 0x386   :  { %5770 = vmatpush1.bf16.msra.mxu0 %v10696_v49  ;;  %v10747_v49 = vcombine.high %v2693_v54, %v2697_v55 }
 0x387   :  { %5934 = vmatpush1.bf16.msra.mxu1 %v10698_v8  ;;  %5771 = vmatprep.subr.bf16.mxu0 %v10705_v5  ;;  %v2700_v8 = vld [vmem:[#allocation7 + $0xe50] sm:$0xff] }
 0x388   :  { %5935 = vmatprep.subr.bf16.mxu1 %v10707_v7  ;;  %v2704_v5 = vld [vmem:[#allocation7 + $0xe70] sm:$0xff]  ;;  %v2701_v7 = vld [vmem:[#allocation7 + $0xe58] sm:$0xff] }
 0x389   :  { %v10755_v26 = vcombine.high %v2701_v7, %v2705_v9  ;;  %v10754_v37 = vcombine.low %v2701_v7, %v2705_v9 }
 0x38a   :  { %5772 = vmatpush1.bf16.msra.mxu0 %v10704_v34  ;;  %v10746_v34 = vcombine.low %v2693_v54, %v2697_v55 }
 0x38b   :  { %5936 = vmatpush1.bf16.msra.mxu1 %v10706_v14  ;;  %5773 = vmatprep.subr.bf16.mxu0 %v10713_v16  ;;  %v10753_v14 = vcombine.high %v2700_v8, %v2704_v5 }
 0x38c   :  { %5937 = vmatprep.subr.bf16.mxu1 %v10715_v6 }
 0x38e   :  { %5774 = vmatpush1.bf16.msra.mxu0 %v10712_v30  ;;  %v2713_v30 = vld [vmem:[#allocation7 + $0xeb8] sm:$0xff] }
 0x38f   :  { %5938 = vmatpush1.bf16.msra.mxu1 %v10714_v33  ;;  %5775 = vmatprep.subr.bf16.mxu0 %v10721_v35  ;;  %v10752_v35 = vcombine.low %v2700_v8, %v2704_v5 }
 0x390   :  { %v11972_v1 = vpop.f32.mrb[8].mxu0  ;;  %v11974_v3 = vpop.f32.mrb[8].mxu1  ;;  %5939 = vmatprep.subr.bf16.mxu1 %v10723_v36 }
 0x391   :  { %v5473_v32 = vpop.f32.mrb[9].mxu0  ;;  %v11976_v31 = vpop.f32.mrb[9].mxu1  ;;  %v5974_v23 = vrot.slane %v11972_v1, 4 }
 0x392   :  { %v5980_v42 = vrot.slane %v5473_v32, 4  ;;  %v5475_v44 = vpop.f32.mrb[10].mxu0  ;;  %v5639_v46 = vpop.f32.mrb[10].mxu1  ;;  %5776 = vmatpush1.bf16.msra.mxu0 %v10720_v61  ;;  %v5992_v6 = vrot.slane %v11976_v31, 4  ;;  %v10763_v61 = vcombine.high %v2709_v29, %v2713_v30 }
 0x393   :  { %5940 = vmatpush1.bf16.msra.mxu1 %v10722_v62  ;;  %v5476_v50 = vpop.f32.mrb[11].mxu0  ;;  %v5640_v17 = vpop.f32.mrb[11].mxu1  ;;  %5777 = vmatprep.subr.bf16.mxu0 %v10729_v25  ;;  %v5975_v36 = vadd.f32 %v5974_v23, %v11972_v1  ;;  %v2716_v62 = vld [vmem:[#allocation7 + $0xed0] sm:$0xff] }
 0x394   :  { %v5981_v51 = vadd.f32 %v5980_v42, %v5473_v32  ;;  %5941 = vmatprep.subr.bf16.mxu1 %v10731_v4  ;;  %v5993_v18 = vadd.f32 %v5992_v6, %v11976_v31  ;;  %v2720_v25 = vld [vmem:[#allocation7 + $0xef0] sm:$0xff]  ;;  %v2717_v4 = vld [vmem:[#allocation7 + $0xed8] sm:$0xff]  ;;  %v10762_v42 = vcombine.low %v2709_v29, %v2713_v30 }
 0x395   :  { %v5976_v20 = vrot.slane %v5975_v36, 2  ;;  %v10769_v44 = vcombine.high %v2716_v62, %v2720_v25  ;;  %v2724_v50 = vld [vmem:[#allocation7 + $0xf10] sm:$0xff]  ;;  %v10770_v53 = vcombine.low %v2717_v4, %v2721_v40  ;;  %v2741_v6 = vld [vmem:[#allocation7 + $0xf98] sm:$0xff] }
 0x396   :  { %v5982_v38 = vrot.slane %v5981_v51, 2  ;;  %5778 = vmatpush1.bf16.msra.mxu0 %v10728_v10  ;;  %v5994_v46 = vrot.slane %v5993_v18, 2  ;;  %v10771_v10 = vcombine.high %v2717_v4, %v2721_v40  ;;  %v2728_v17 = vld [vmem:[#allocation7 + $0xf30] sm:$0xff] }
 0x397   :  { %5942 = vmatpush1.bf16.msra.mxu1 %v10730_v47  ;;  %5779 = vmatprep.subr.bf16.mxu0 %v10737_v21  ;;  %v2725_v47 = vld [vmem:[#allocation7 + $0xf18] sm:$0xff]  ;;  %v5977_v52 = vadd.f32 %v5976_v20, %v5975_v36  ;;  %v10777_v54 = vcombine.high %v2724_v50, %v2728_v17  ;;  %v10776_v5 = vcombine.low %v2724_v50, %v2728_v17 }
 0x398   :  { %v5983_v63 = vadd.f32 %v5982_v38, %v5981_v51  ;;  %5943 = vmatprep.subr.bf16.mxu1 %v10739_v57  ;;  %v2729_v21 = vld [vmem:[#allocation7 + $0xf38] sm:$0xff]  ;;  %v10768_v57 = vcombine.low %v2716_v62, %v2720_v25  ;;  %v5995_v38 = vadd.f32 %v5994_v46, %v5993_v18  ;;  %v2752_v18 = vld [vmem:[#allocation7 + $0xff0] sm:$0xff]  ;;  %v6241_v46 = vld [vmem:[#allocation10 + $0x8] sm:$0xff] }
 0x399   :  { %v5978_v7 = vrot.slane %v5977_v52, 1  ;;  %v10778_v9 = vcombine.low %v2725_v47, %v2729_v21  ;;  %v2753_v62 = vld [vmem:[#allocation7 + $0xff8] sm:$0xff] }
 0x39a   :  { %v5984_v11 = vrot.slane %v5983_v63, 1  ;;  %5780 = vmatpush1.bf16.msra.mxu0 %v10736_v22  ;;  %v10779_v22 = vcombine.high %v2725_v47, %v2729_v21  ;;  %v5996_v23 = vrot.slane %v5995_v38, 1 }
 0x39b   :  { %5944 = vmatpush1.bf16.msra.mxu1 %v10738_v58  ;;  %5781 = vmatprep.subr.bf16.mxu0 %v10745_v59  ;;  %v2732_v58 = vld [vmem:[#allocation7 + $0xf50] sm:$0xff]  ;;  %v5979_v29 = vadd.f32 %v5978_v7, %v5977_v52  ;;  %v6248_v52 = vld [vmem:[#allocation10 + $0x40] sm:$0xff]  ;;  %v6261_v7 = vld [vmem:[#allocation10 + $0xa8] sm:$0xff] }
 0x39c   :  { %v5985_v16 = vadd.f32 %v5984_v11, %v5983_v63  ;;  %5945 = vmatprep.subr.bf16.mxu1 %v10747_v49  ;;  %v2736_v59 = vld [vmem:[#allocation7 + $0xf70] sm:$0xff]  ;;  %v2733_v63 = vld [vmem:[#allocation7 + $0xf58] sm:$0xff]  ;;  %v5997_v36 = vadd.f32 %v5996_v23, %v5995_v38 }
 0x39d   :  { %v2737_v49 = vld [vmem:[#allocation7 + $0xf78] sm:$0xff]  ;;  %v10785_v11 = vcombine.high %v2732_v58, %v2736_v59  ;;  %v10784_v28 = vcombine.low %v2732_v58, %v2736_v59  ;;  %v6022_v40 = vmul.f32 0.125, %v5979_v29  ;;  %v6268_v29 = vld [vmem:[#allocation10 + $0xe0] sm:$0xff] }
 0x39e   :  { %v6023_v33 = vmul.f32 0.125, %v5985_v16  ;;  %5782 = vmatpush1.bf16.msra.mxu0 %v10744_v13  ;;  %v2744_v16 = vld [vmem:[#allocation7 + $0xfb0] sm:$0xff]  ;;  %v10786_v30 = vcombine.low %v2733_v63, %v2737_v49  ;;  %v6025_v20 = vmul.f32 0.125, %v5997_v36 }
 0x39f   :  { %5946 = vmatpush1.bf16.msra.mxu1 %v10746_v34  ;;  %5783 = vmatprep.subr.bf16.mxu0 %v10753_v14  ;;  %v10787_v34 = vcombine.high %v2733_v63, %v2737_v49  ;;  %v2740_v14 = vld [vmem:[#allocation7 + $0xf90] sm:$0xff]  ;;  %v11987_v17 = vsub.f32 %v11972_v1, %v6022_v40  ;;  %v6256_v49 = vld [vmem:[#allocation10 + $0x80] sm:$0xff]  ;;  %v6273_v40 = vld [vmem:[#allocation10 + $0x108] sm:$0xff] }
 0x3a0   :  { %v11981_v43 = vsub.f32 %v5473_v32, %v6023_v33  ;;  %5947 = vmatprep.subr.bf16.mxu1 %v10755_v26  ;;  %v2745_v26 = vld [vmem:[#allocation7 + $0xfb8] sm:$0xff]  ;;  %v10793_v33 = vcombine.high %v2740_v14, %v2744_v16  ;;  %v10792_v4 = vcombine.low %v2740_v14, %v2744_v16 }
 0x3a1   :  { %v6038_v1 = vmul.f32 %v11987_v17, %v11987_v17 }
 0x3a2   :  { %v6039_v41 = vmul.f32 %v11981_v43, %v11981_v43  ;;  %5784 = vmatpush1.bf16.msra.mxu0 %v10752_v35 }
 0x3a3   :  { %5948 = vmatpush1.bf16.msra.mxu1 %v10754_v37  ;;  %5785 = vmatprep.subr.bf16.mxu0 %v10761_v60  ;;  %v10795_v37 = vcombine.high %v2741_v6, %v2745_v26  ;;  %v2748_v60 = vld [vmem:[#allocation7 + $0xfd0] sm:$0xff] }
 0x3a4   :  { %v6052_v32 = vrot.slane %v6039_v41, 4  ;;  %5949 = vmatprep.subr.bf16.mxu1 %v10763_v61  ;;  %v2749_v61 = vld [vmem:[#allocation7 + $0xfd8] sm:$0xff]  ;;  %v10800_v50 = vcombine.low %v2748_v60, %v2752_v18 }
 0x3a5   :  { %v10802_v47 = vcombine.low %v2749_v61, %v2753_v62 }
 0x3a6   :  { %v6053_v51 = vadd.f32 %v6052_v32, %v6039_v41  ;;  %5786 = vmatpush1.bf16.msra.mxu0 %v10760_v56  ;;  %v10794_v41 = vcombine.low %v2741_v6, %v2745_v26  ;;  %v10801_v56 = vcombine.high %v2748_v60, %v2752_v18  ;;  %v6244_v32 = vld [vmem:[#allocation10 + $0x20] sm:$0xff] }
 0x3a7   :  { %5950 = vmatpush1.bf16.msra.mxu1 %v10762_v42  ;;  %5787 = vmatprep.subr.bf16.mxu0 %v10769_v44  ;;  %v10803_v42 = vcombine.high %v2749_v61, %v2753_v62  ;;  %v6240_v44 = vld [vmem:[#allocation10] sm:$0xff] }
 0x3a8   :  { %v6054_v55 = vrot.slane %v6053_v51, 2  ;;  %5951 = vmatprep.subr.bf16.mxu1 %v10771_v10  ;;  %v6245_v10 = vld [vmem:[#allocation10 + $0x28] sm:$0xff]  ;;  %v10805_v21 = vcombine.high %v6240_v44, %v6244_v32  ;;  %v10804_v38 = vcombine.low %v6240_v44, %v6244_v32 }
 0x3a9   :  { %v10806_v58 = vcombine.low %v6241_v46, %v6245_v10 }
 0x3aa   :  { %v6055_v8 = vadd.f32 %v6054_v55, %v6053_v51  ;;  %5788 = vmatpush1.bf16.msra.mxu0 %v10768_v57  ;;  %v11990_v51 = vsub.f32 %v11976_v31, %v6025_v20  ;;  %v10807_v57 = vcombine.high %v6241_v46, %v6245_v10  ;;  %v6253_v55 = vld [vmem:[#allocation10 + $0x68] sm:$0xff] }
 0x3ab   :  { %5952 = vmatpush1.bf16.msra.mxu1 %v10770_v53  ;;  %5789 = vmatprep.subr.bf16.mxu0 %v10777_v54  ;;  %v6252_v53 = vld [vmem:[#allocation10 + $0x60] sm:$0xff]  ;;  %v6249_v54 = vld [vmem:[#allocation10 + $0x48] sm:$0xff] }
 0x3ac   :  { %v6056_v13 = vrot.slane %v6055_v8, 1  ;;  %5953 = vmatprep.subr.bf16.mxu1 %v10779_v22  ;;  %v11992_v22 = vld [vmem:[#allocation8 + $0x2] ss:$4 sm:$0xff]  ;;  %v10813_v59 = vcombine.high %v6248_v52, %v6252_v53  ;;  %v6041_v31 = vmul.f32 %v11990_v51, %v11990_v51  ;;  %v10815_v63 = vcombine.high %v6249_v54, %v6253_v55 }
 0x3ad   :  { %v10814_v14 = vcombine.low %v6249_v54, %v6253_v55 }
 0x3ae   :  { %v6057_v27 = vadd.f32 %v6056_v13, %v6055_v8  ;;  %5790 = vmatpush1.bf16.msra.mxu0 %v10776_v5  ;;  %v6260_v8 = vld [vmem:[#allocation10 + $0xa0] sm:$0xff]  ;;  %v6257_v5 = vld [vmem:[#allocation10 + $0x88] sm:$0xff]  ;;  %v10812_v13 = vcombine.low %v6248_v52, %v6252_v53  ;;  %v6064_v26 = vrot.slane %v6041_v31, 4 }
 0x3af   :  { %5954 = vmatpush1.bf16.msra.mxu1 %v10778_v9  ;;  %5791 = vmatprep.subr.bf16.mxu0 %v10785_v11  ;;  %v11999_v9 = vld [vmem:[#allocation8 + $0x3] ss:$4 sm:$0xff]  ;;  %v6134_v11 = vrot.slane %v11992_v22, %v11822_v12  ;;  %v10821_v16 = vcombine.high %v6256_v49, %v6260_v8  ;;  %v10820_v36 = vcombine.low %v6256_v49, %v6260_v8 }
 0x3b0   :  { %v6095_v35 = vmul.f32 0.125, %v6057_v27  ;;  %5955 = vmatprep.subr.bf16.mxu1 %v10787_v34  ;;  %v6046_v34 = vrot.slane %v6038_v1, 4  ;;  %v10823_v27 = vcombine.high %v6257_v5, %v6261_v7  ;;  %v10822_v60 = vcombine.low %v6257_v5, %v6261_v7  ;;  %v6285_v52 = vld [vmem:[#allocation10 + $0x168] sm:$0xff] }
 0x3b1   :  { %v6065_v61 = vadd.f32 %v6064_v26, %v6041_v31  ;;  %v6292_v31 = vld [vmem:[#allocation10 + $0x1a0] sm:$0xff]  ;;  %v6293_v49 = vld [vmem:[#allocation10 + $0x1a8] sm:$0xff] }
 0x3b2   :  { %v6103_v25 = vadd.f32 1e-05, %v6095_v35  ;;  %5792 = vmatpush1.bf16.msra.mxu0 %v10784_v28  ;;  %v6264_v28 = vld [vmem:[#allocation10 + $0xc0] sm:$0xff] }
 0x3b3   :  { %5956 = vmatpush1.bf16.msra.mxu1 %v10786_v30  ;;  %5793 = vmatprep.subr.bf16.mxu0 %v10793_v33  ;;  %v6183_v30 = vrot.slane %v11999_v9, %v11822_v12  ;;  %v6265_v33 = vld [vmem:[#allocation10 + $0xc8] sm:$0xff]  ;;  %v10829_v18 = vcombine.high %v6264_v28, %v6268_v29  ;;  %v6066_v32 = vrot.slane %v6065_v61, 2 }
 0x3b4   :  { %5957 = vmatprep.subr.bf16.mxu1 %v10795_v37  ;;  %11461 = vrsqrt.f32 %v6103_v25  ;;  %v6047_v37 = vadd.f32 %v6046_v34, %v6038_v1  ;;  %v6272_v25 = vld [vmem:[#allocation10 + $0x100] sm:$0xff] }
 0x3b5   :  { %v6296_v34 = vld [vmem:[#allocation10 + $0x1c0] sm:$0xff] }
 0x3b6   :  { %5794 = vmatpush1.bf16.msra.mxu0 %v10792_v4  ;;  %v6276_v4 = vld [vmem:[#allocation10 + $0x120] sm:$0xff]  ;;  %v6048_v20 = vrot.slane %v6047_v37, 2 }
 0x3b7   :  { %5958 = vmatpush1.bf16.msra.mxu1 %v10794_v41  ;;  %5795 = vmatprep.subr.bf16.mxu0 %v10801_v56  ;;  %v6277_v41 = vld [vmem:[#allocation10 + $0x128] sm:$0xff]  ;;  %v10837_v10 = vcombine.high %v6272_v25, %v6276_v4  ;;  %v10836_v54 = vcombine.low %v6272_v25, %v6276_v4  ;;  %v6312_v4 = vld [vmem:[#allocation10 + $0x240] sm:$0xff] }
 0x3b8   :  { %5959 = vmatprep.subr.bf16.mxu1 %v10803_v42  ;;  %v10828_v42 = vcombine.low %v6264_v28, %v6268_v29  ;;  %v6049_v53 = vadd.f32 %v6048_v20, %v6047_v37  ;;  %v10838_v55 = vcombine.low %v6273_v40, %v6277_v41  ;;  %v6309_v37 = vld [vmem:[#allocation10 + $0x228] sm:$0xff] }
 0x3ba   :  { %5796 = vmatpush1.bf16.msra.mxu0 %v10800_v50  ;;  %v10839_v50 = vcombine.high %v6273_v40, %v6277_v41  ;;  %v6050_v8 = vrot.slane %v6049_v53, 1  ;;  %v6316_v40 = vld [vmem:[#allocation10 + $0x260] sm:$0xff]  ;;  %v6313_v41 = vld [vmem:[#allocation10 + $0x248] sm:$0xff] }
 0x3bb   :  { %5960 = vmatpush1.bf16.msra.mxu1 %v10802_v47  ;;  %9354 = vmatprep.subr.bf16.mxu0 %v10805_v21  ;;  %v6280_v47 = vld [vmem:[#allocation10 + $0x140] sm:$0xff] }
 0x3bc   :  { %9518 = vmatprep.subr.bf16.mxu1 %v10807_v57  ;;  %v6284_v21 = vld [vmem:[#allocation10 + $0x160] sm:$0xff]  ;;  %v6281_v57 = vld [vmem:[#allocation10 + $0x148] sm:$0xff]  ;;  %v6051_v26 = vadd.f32 %v6050_v8, %v6049_v53 }
 0x3bd   :  { %5798 = vmatmul.mubr.bf16.vlgmr.msra.gmra.mrb[12].mxu0 %v11954_v24  ;;  %v10845_v1 = vcombine.high %v6280_v47, %v6284_v21  ;;  %v10844_v5 = vcombine.low %v6280_v47, %v6284_v21  ;;  %v10846_v7 = vcombine.low %v6281_v57, %v6285_v52  ;;  %v6320_v21 = vld [vmem:[#allocation10 + $0x280] sm:$0xff]  ;;  %v6325_v53 = vld [vmem:[#allocation10 + $0x2a8] sm:$0xff] }
 0x3be   :  { %5962 = vmatmul.mubr.bf16.vlgmr.msra.gmra.mrb[12].mxu1 %v11954_v24  ;;  %9355 = vmatpush1.bf16.msra.mxu0 %v10804_v38  ;;  %v11462_v23 = vpop.eup %11461  ;;  %v6269_v24 = vld [vmem:[#allocation10 + $0xe8] sm:$0xff]  ;;  %v6067_v38 = vadd.f32 %v6066_v32, %v6065_v61 }
 0x3bf   :  { %9519 = vmatpush1.bf16.msra.mxu1 %v10806_v58  ;;  %9356 = vmatprep.subr.bf16.mxu0 %v10813_v59  ;;  %v6119_v6 = vmul.f32 %v11462_v23, %v11981_v43  ;;  %v10831_v62 = vcombine.high %v6265_v33, %v6269_v24  ;;  %v10830_v44 = vcombine.low %v6265_v33, %v6269_v24  ;;  %v6288_v59 = vld [vmem:[#allocation10 + $0x180] sm:$0xff] }
 0x3c0   :  { %9520 = vmatprep.subr.bf16.mxu1 %v10815_v63  ;;  %v10847_v58 = vcombine.high %v6281_v57, %v6285_v52  ;;  %v6289_v63 = vld [vmem:[#allocation10 + $0x188] sm:$0xff]  ;;  %v6304_v24 = vld [vmem:[#allocation10 + $0x200] sm:$0xff] }
 0x3c1   :  { %v6168_v35 = vmul.f32 %v6134_v11, %v6119_v6  ;;  %v6068_v11 = vrot.slane %v6067_v38, 1  ;;  %v10855_v23 = vcombine.high %v6289_v63, %v6293_v49  ;;  %v6301_v6 = vld [vmem:[#allocation10 + $0x1e8] sm:$0xff]  ;;  %v10854_v28 = vcombine.low %v6289_v63, %v6293_v49  ;;  %v6324_v57 = vld [vmem:[#allocation10 + $0x2a0] sm:$0xff] }
 0x3c2   :  { %9357 = vmatpush1.bf16.msra.mxu0 %v10812_v13  ;;  %v10853_v13 = vcombine.high %v6288_v59, %v6292_v31  ;;  %v6321_v52 = vld [vmem:[#allocation10 + $0x288] sm:$0xff] }
 0x3c3   :  { %9521 = vmatpush1.bf16.msra.mxu1 %v10814_v14  ;;  %9358 = vmatprep.subr.bf16.mxu0 %v10821_v16  ;;  %v6217_v43 = vadd.f32 %v6183_v30, %v6168_v35  ;;  %v6300_v14 = vld [vmem:[#allocation10 + $0x1e0] sm:$0xff]  ;;  %v6297_v16 = vld [vmem:[#allocation10 + $0x1c8] sm:$0xff]  ;;  %v6069_v29 = vadd.f32 %v6068_v11, %v6067_v38 }
 0x3c4   :  { %9522 = vmatprep.subr.bf16.mxu1 %v10823_v27  ;;  %v10852_v27 = vcombine.low %v6288_v59, %v6292_v31  ;;  %v10861_v30 = vcombine.high %v6296_v34, %v6300_v14  ;;  %v10863_v33 = vcombine.high %v6297_v16, %v6301_v6  ;;  %v6308_v35 = vld [vmem:[#allocation10 + $0x220] sm:$0xff]  ;;  %v10862_v61 = vcombine.low %v6297_v16, %v6301_v6  ;;  %v6329_v63 = vld [vmem:[#allocation10 + $0x2c8] sm:$0xff] }
 0x3c5   :  { %v6225_v56 = vmax.f32 %v6217_v43, 0.0  ;;  %v6097_v43 = vmul.f32 0.125, %v6069_v29  ;;  %v6328_v59 = vld [vmem:[#allocation10 + $0x2c0] sm:$0xff]  ;;  %v6333_v49 = vld [vmem:[#allocation10 + $0x2e8] sm:$0xff] }
 0x3c6   :  { %9359 = vmatpush1.bf16.msra.mxu0 %v10820_v36  ;;  %v6305_v36 = vld [vmem:[#allocation10 + $0x208] sm:$0xff]  ;;  %v6332_v31 = vld [vmem:[#allocation10 + $0x2e0] sm:$0xff] }
 0x3c7   :  { %9523 = vmatpush1.bf16.msra.mxu1 %v10822_v60  ;;  %9360 = vmatprep.subr.bf16.mxu0 %v10829_v18  ;;  %v12007_v46 = vpack.c.bf16 %v6225_v56, %v6225_v56  ;;  %v6094_v60 = vmul.f32 0.125, %v6051_v26  ;;  %v10860_v18 = vcombine.low %v6296_v34, %v6300_v14  ;;  %v10871_v25 = vcombine.high %v6305_v36, %v6309_v37  ;;  %v6317_v56 = vld [vmem:[#allocation10 + $0x268] sm:$0xff]  ;;  %v6340_v34 = vld [vmem:[#allocation10 + $0x320] sm:$0xff] }
 0x3c8   :  { %9524 = vmatprep.subr.bf16.mxu1 %v10831_v62  ;;  %v10869_v62 = vcombine.high %v6304_v24, %v6308_v35  ;;  %v10870_v32 = vcombine.low %v6305_v36, %v6309_v37  ;;  %v10879_v47 = vcombine.high %v6313_v41, %v6317_v56  ;;  %v10878_v38 = vcombine.low %v6313_v41, %v6317_v56  ;;  %v6337_v14 = vld [vmem:[#allocation10 + $0x308] sm:$0xff] }
 0x3c9   :  { %9386 = vmatprep.mubr.bf16.mxu0 %v12007_v46  ;;  %9550 = vmatprep.mubr.bf16.mxu1 %v12007_v46  ;;  %v6102_v20 = vadd.f32 1e-05, %v6094_v60  ;;  %v10893_v11 = vcombine.high %v6328_v59, %v6332_v31  ;;  %v6341_v16 = vld [vmem:[#allocation10 + $0x328] sm:$0xff]  ;;  %v10892_v26 = vcombine.low %v6328_v59, %v6332_v31  ;;  %v6130_v60 = vrot.slane %v11992_v22, %v11817_v45 }
 0x3ca   :  { %9361 = vmatpush1.bf16.msra.mxu0 %v10828_v42  ;;  %v5986_v42 = vrot.slane %v11974_v3, 4  ;;  %v10903_v29 = vcombine.high %v6337_v14, %v6341_v16  ;;  %v6349_v36 = vld [vmem:[#allocation10 + $0x368] sm:$0xff]  ;;  %v6142_v56 = vrot.slane %v11992_v22, %v11825_v48 }
 0x3cb   :  { %9525 = vmatpush1.bf16.msra.mxu1 %v10830_v44  ;;  %9362 = vmatprep.subr.bf16.mxu0 %v10837_v10  ;;  %v10868_v44 = vcombine.low %v6304_v24, %v6308_v35  ;;  %v6105_v10 = vadd.f32 1e-05, %v6097_v43  ;;  %11463 = vrsqrt.f32 %v6102_v20  ;;  %v6348_v24 = vld [vmem:[#allocation10 + $0x360] sm:$0xff]  ;;  %v6345_v35 = vld [vmem:[#allocation10 + $0x348] sm:$0xff]  ;;  %v10902_v43 = vcombine.low %v6337_v14, %v6341_v16 }
 0x3cc   :  { %9526 = vmatprep.subr.bf16.mxu1 %v10839_v50  ;;  %v10877_v50 = vcombine.high %v6312_v4, %v6316_v40  ;;  %v6356_v20 = vld [vmem:[#allocation10 + $0x3a0] sm:$0xff] }
 0x3cd   :  { %11465 = vrsqrt.f32 %v6105_v10 }
 0x3ce   :  { %9363 = vmatpush1.bf16.msra.mxu0 %v10836_v54  ;;  %v5987_v54 = vadd.f32 %v5986_v42, %v11974_v3  ;;  %v6353_v42 = vld [vmem:[#allocation10 + $0x388] sm:$0xff] }
 0x3cf   :  { %9527 = vmatpush1.bf16.msra.mxu1 %v10838_v55  ;;  %9364 = vmatprep.subr.bf16.mxu0 %v10845_v1  ;;  %v10876_v55 = vcombine.low %v6312_v4, %v6316_v40  ;;  %v10885_v1 = vcombine.high %v6320_v21, %v6324_v57  ;;  %v10911_v4 = vcombine.high %v6345_v35, %v6349_v36  ;;  %v6352_v40 = vld [vmem:[#allocation10 + $0x380] sm:$0xff] }
 0x3d0   :  { %9528 = vmatprep.subr.bf16.mxu1 %v10847_v58  ;;  %v10887_v58 = vcombine.high %v6321_v52, %v6325_v53  ;;  %v5988_v8 = vrot.slane %v5987_v54, 2 }
 0x3d2   :  { %9365 = vmatpush1.bf16.msra.mxu0 %v10844_v5  ;;  %v10884_v5 = vcombine.low %v6320_v21, %v6324_v57  ;;  %v5989_v6 = vadd.f32 %v5988_v8, %v5987_v54  ;;  %v10917_v21 = vcombine.high %v6352_v40, %v6356_v20  ;;  %v6361_v54 = vld [vmem:[#allocation10 + $0x3c8] sm:$0xff]  ;;  %v6368_v8 = vld [vmem:[#allocation10 + $0x400] sm:$0xff] }
 0x3d3   :  { %9529 = vmatpush1.bf16.msra.mxu1 %v10846_v7  ;;  %9366 = vmatprep.subr.bf16.mxu0 %v10853_v13  ;;  %v10886_v7 = vcombine.low %v6321_v52, %v6325_v53  ;;  %v10895_v13 = vcombine.high %v6329_v63, %v6333_v49  ;;  %v6364_v53 = vld [vmem:[#allocation10 + $0x3e0] sm:$0xff] }
 0x3d4   :  { %9530 = vmatprep.subr.bf16.mxu1 %v10855_v23  ;;  %v6336_v23 = vld [vmem:[#allocation10 + $0x300] sm:$0xff] }
 0x3d6   :  { %9367 = vmatpush1.bf16.msra.mxu0 %v10852_v27  ;;  %v10894_v27 = vcombine.low %v6329_v63, %v6333_v49 }
 0x3d7   :  { %9531 = vmatpush1.bf16.msra.mxu1 %v10854_v28  ;;  %9368 = vmatprep.subr.bf16.mxu0 %v10861_v30  ;;  %v10901_v28 = vcombine.high %v6336_v23, %v6340_v34  ;;  %v6344_v30 = vld [vmem:[#allocation10 + $0x340] sm:$0xff] }
 0x3d8   :  { %9532 = vmatprep.subr.bf16.mxu1 %v10863_v33  ;;  %v11464_v33 = vpop.eup %11463 }
 0x3d9   :  { %v11466_v37 = vpop.eup %11465 }
 0x3da   :  { %9369 = vmatpush1.bf16.msra.mxu0 %v10860_v18  ;;  %v5990_v18 = vrot.slane %v5989_v6, 1  ;;  %v6121_v41 = vmul.f32 %v11466_v37, %v11990_v51  ;;  %v6360_v51 = vld [vmem:[#allocation10 + $0x3c0] sm:$0xff] }
 0x3db   :  { %9533 = vmatpush1.bf16.msra.mxu1 %v10862_v61  ;;  %9370 = vmatprep.subr.bf16.mxu0 %v10869_v62  ;;  %v10900_v61 = vcombine.low %v6336_v23, %v6340_v34  ;;  %v6118_v62 = vmul.f32 %v11464_v33, %v11987_v17  ;;  %v10908_v17 = vcombine.low %v6344_v30, %v6348_v24  ;;  %v6381_v33 = vld [vmem:[#allocation10 + $0x468] sm:$0xff] }
 0x3dc   :  { %9534 = vmatprep.subr.bf16.mxu1 %v10871_v25  ;;  %v10909_v25 = vcombine.high %v6344_v30, %v6348_v24  ;;  %v5991_v10 = vadd.f32 %v5990_v18, %v5989_v6  ;;  %v6170_v52 = vmul.f32 %v6142_v56, %v6121_v41  ;;  %v10925_v31 = vcombine.high %v6360_v51, %v6364_v53  ;;  %v6377_v30 = vld [vmem:[#allocation10 + $0x448] sm:$0xff] }
 0x3dd   :  { %v10924_v34 = vcombine.low %v6360_v51, %v6364_v53  ;;  %v10943_v18 = vcombine.high %v6377_v30, %v6381_v33  ;;  %v10942_v41 = vcombine.low %v6377_v30, %v6381_v33  ;;  %v6400_v51 = vld [vmem:[#allocation10 + $0x500] sm:$0xff]  ;;  %v6401_v53 = vld [vmem:[#allocation10 + $0x508] sm:$0xff] }
 0x3de   :  { %9371 = vmatpush1.bf16.msra.mxu0 %v10868_v44  ;;  %v6357_v44 = vld [vmem:[#allocation10 + $0x3a8] sm:$0xff] }
 0x3df   :  { %9535 = vmatpush1.bf16.msra.mxu1 %v10870_v32  ;;  %9372 = vmatprep.subr.bf16.mxu0 %v10877_v50  ;;  %v6179_v32 = vrot.slane %v11999_v9, %v11817_v45  ;;  %v10910_v50 = vcombine.low %v6345_v35, %v6349_v36  ;;  %v10919_v57 = vcombine.high %v6353_v42, %v6357_v44 }
 0x3e0   :  { %9536 = vmatprep.subr.bf16.mxu1 %v10879_v47  ;;  %v6167_v47 = vmul.f32 %v6130_v60, %v6118_v62  ;;  %v10918_v59 = vcombine.low %v6353_v42, %v6357_v44  ;;  %v6385_v62 = vld [vmem:[#allocation10 + $0x488] sm:$0xff]  ;;  %v6392_v42 = vld [vmem:[#allocation10 + $0x4c0] sm:$0xff] }
 0x3e1   :  { %v6396_v44 = vld [vmem:[#allocation10 + $0x4e0] sm:$0xff] }
 0x3e2   :  { %9373 = vmatpush1.bf16.msra.mxu0 %v10876_v55  ;;  %v6365_v55 = vld [vmem:[#allocation10 + $0x3e8] sm:$0xff]  ;;  %v6216_v49 = vadd.f32 %v6179_v32, %v6167_v47 }
 0x3e3   :  { %9537 = vmatpush1.bf16.msra.mxu1 %v10878_v38  ;;  %9374 = vmatprep.subr.bf16.mxu0 %v10885_v1  ;;  %v6191_v38 = vrot.slane %v11999_v9, %v11825_v48  ;;  %v6024_v1 = vmul.f32 0.125, %v5991_v10  ;;  %v10927_v63 = vcombine.high %v6361_v54, %v6365_v55  ;;  %v10926_v14 = vcombine.low %v6361_v54, %v6365_v55  ;;  %v6393_v32 = vld [vmem:[#allocation10 + $0x4c8] sm:$0xff] }
 0x3e4   :  { %9538 = vmatprep.subr.bf16.mxu1 %v10887_v58  ;;  %v10916_v58 = vcombine.low %v6352_v40, %v6356_v20  ;;  %v6224_v16 = vmax.f32 %v6216_v49, 0.0  ;;  %v6397_v10 = vld [vmem:[#allocation10 + $0x4e8] sm:$0xff] }
 0x3e5   :  { %v12024_v23 = vsub.f32 %v11974_v3, %v6024_v1  ;;  %v6405_v54 = vld [vmem:[#allocation10 + $0x528] sm:$0xff]  ;;  %v10958_v1 = vcombine.low %v6393_v32, %v6397_v10 }
 0x3e6   :  { %9375 = vmatpush1.bf16.msra.mxu0 %v10884_v5  ;;  %v6372_v5 = vld [vmem:[#allocation10 + $0x420] sm:$0xff]  ;;  %v12028_v35 = vpack.c.bf16 %v6224_v16, %v6224_v16  ;;  %v6409_v49 = vld [vmem:[#allocation10 + $0x548] sm:$0xff] }
 0x3e7   :  { %9539 = vmatpush1.bf16.msra.mxu1 %v10886_v7  ;;  %9376 = vmatprep.subr.bf16.mxu0 %v10893_v11  ;;  %v6369_v7 = vld [vmem:[#allocation10 + $0x408] sm:$0xff]  ;;  %v10933_v6 = vcombine.high %v6368_v8, %v6372_v5  ;;  %v6040_v24 = vmul.f32 %v12024_v23, %v12024_v23  ;;  %v10932_v3 = vcombine.low %v6368_v8, %v6372_v5  ;;  %v6420_v16 = vld [vmem:[#allocation10 + $0x5a0] sm:$0xff] }
 0x3e8   :  { %9540 = vmatprep.subr.bf16.mxu1 %v10895_v13  ;;  %v6373_v11 = vld [vmem:[#allocation10 + $0x428] sm:$0xff]  ;;  %v6219_v13 = vadd.f32 %v6191_v38, %v6170_v52  ;;  %v6404_v52 = vld [vmem:[#allocation10 + $0x520] sm:$0xff]  ;;  %v10956_v38 = vcombine.low %v6392_v42, %v6396_v44 }
 0x3e9   :  { %v10934_v36 = vcombine.low %v6369_v7, %v6373_v11  ;;  %v6413_v8 = vld [vmem:[#allocation10 + $0x568] sm:$0xff] }
 0x3ea   :  { %9377 = vmatpush1.bf16.msra.mxu0 %v10892_v26  ;;  %v10935_v26 = vcombine.high %v6369_v7, %v6373_v11  ;;  %v10964_v7 = vcombine.low %v6400_v51, %v6404_v52  ;;  %v10966_v11 = vcombine.low %v6401_v53, %v6405_v54 }
 0x3eb   :  { %9541 = vmatpush1.bf16.msra.mxu1 %v10894_v27  ;;  %9378 = vmatprep.subr.bf16.mxu0 %v10901_v28  ;;  %v6227_v27 = vmax.f32 %v6219_v13, 0.0  ;;  %v6376_v28 = vld [vmem:[#allocation10 + $0x440] sm:$0xff] }
 0x3ec   :  { %9542 = vmatprep.subr.bf16.mxu1 %v10903_v29  ;;  %v6380_v29 = vld [vmem:[#allocation10 + $0x460] sm:$0xff] }
 0x3ed   :  { %v12030_v37 = vpack.c.bf16 %v6227_v27, %v6227_v27  ;;  %v10941_v60 = vcombine.high %v6376_v28, %v6380_v29  ;;  %v10940_v40 = vcombine.low %v6376_v28, %v6380_v29  ;;  %v10974_v29 = vcombine.low %v6409_v49, %v6413_v8 }
 0x3ee   :  { %9379 = vmatpush1.bf16.msra.mxu0 %v10900_v61  ;;  %v6384_v61 = vld [vmem:[#allocation10 + $0x480] sm:$0xff] }
 0x3ef   :  { %9543 = vmatpush1.bf16.msra.mxu1 %v10902_v43  ;;  %9380 = vmatprep.subr.bf16.mxu0 %v10909_v25  ;;  %v6388_v43 = vld [vmem:[#allocation10 + $0x4a0] sm:$0xff]  ;;  %v6389_v25 = vld [vmem:[#allocation10 + $0x4a8] sm:$0xff] }
 0x3f0   :  { %9544 = vmatprep.subr.bf16.mxu1 %v10911_v4  ;;  %v6058_v4 = vrot.slane %v6040_v24, 4  ;;  %v10949_v56 = vcombine.high %v6384_v61, %v6388_v43  ;;  %v10951_v20 = vcombine.high %v6385_v62, %v6389_v25  ;;  %v10950_v47 = vcombine.low %v6385_v62, %v6389_v25 }
 0x3f2   :  { %9381 = vmatpush1.bf16.msra.mxu0 %v10908_v17  ;;  %v6059_v17 = vadd.f32 %v6058_v4, %v6040_v24  ;;  %v6424_v24 = vld [vmem:[#allocation10 + $0x5c0] sm:$0xff] }
 0x3f3   :  { %9545 = vmatpush1.bf16.msra.mxu1 %v10910_v50  ;;  %9382 = vmatprep.subr.bf16.mxu0 %v10917_v21  ;;  %v10948_v50 = vcombine.low %v6384_v61, %v6388_v43  ;;  %v10957_v21 = vcombine.high %v6392_v42, %v6396_v44  ;;  %v6432_v4 = vld [vmem:[#allocation10 + $0x600] sm:$0xff] }
 0x3f4   :  { %9546 = vmatprep.subr.bf16.mxu1 %v10919_v57  ;;  %v10959_v57 = vcombine.high %v6393_v32, %v6397_v10  ;;  %v6060_v55 = vrot.slane %v6059_v17, 2 }
 0x3f6   :  { %9383 = vmatpush1.bf16.msra.mxu0 %v10916_v58  ;;  %v10965_v58 = vcombine.high %v6400_v51, %v6404_v52  ;;  %v6061_v5 = vadd.f32 %v6060_v55, %v6059_v17  ;;  %v6440_v17 = vld [vmem:[#allocation10 + $0x640] sm:$0xff] }
 0x3f7   :  { %9547 = vmatpush1.bf16.msra.mxu1 %v10918_v59  ;;  %9384 = vmatprep.subr.bf16.mxu0 %v10925_v31  ;;  %v10967_v59 = vcombine.high %v6401_v53, %v6405_v54  ;;  %v6408_v31 = vld [vmem:[#allocation10 + $0x540] sm:$0xff] }
 0x3f8   :  { %9548 = vmatprep.subr.bf16.mxu1 %v10927_v63  ;;  %v6412_v63 = vld [vmem:[#allocation10 + $0x560] sm:$0xff]  ;;  %v6062_v27 = vrot.slane %v6061_v5, 1 }
 0x3f9   :  { %v10973_v13 = vcombine.high %v6408_v31, %v6412_v63  ;;  %v10972_v28 = vcombine.low %v6408_v31, %v6412_v63  ;;  %v6448_v55 = vld [vmem:[#allocation10 + $0x680] sm:$0xff] }
 0x3fa   :  { %9385 = vmatpush1.bf16.msra.mxu0 %v10924_v34  ;;  %v10975_v34 = vcombine.high %v6409_v49, %v6413_v8  ;;  %v6456_v8 = vld [vmem:[#allocation10 + $0x6c0] sm:$0xff] }
 0x3fb   :  { %9549 = vmatpush1.bf16.msra.mxu1 %v10926_v14  ;;  %9395 = vmatprep.subr.bf16.mxu0 %v10933_v6  ;;  %v6416_v14 = vld [vmem:[#allocation10 + $0x580] sm:$0xff]  ;;  %v6417_v6 = vld [vmem:[#allocation10 + $0x588] sm:$0xff] }
 0x3fc   :  { %9559 = vmatprep.subr.bf16.mxu1 %v10935_v26  ;;  %v6421_v26 = vld [vmem:[#allocation10 + $0x5a8] sm:$0xff]  ;;  %v10981_v30 = vcombine.high %v6416_v14, %v6420_v16  ;;  %v10980_v61 = vcombine.low %v6416_v14, %v6420_v16 }
 0x3fd   :  { %9387 = vmatmul.mubr.bf16.vlgmr.msra.gmra.mrb[16].mxu0 %v12028_v35  ;;  %v10983_v33 = vcombine.high %v6417_v6, %v6421_v26  ;;  %v10982_v43 = vcombine.low %v6417_v6, %v6421_v26  ;;  %v6464_v6 = vld [vmem:[#allocation10 + $0x700] sm:$0xff] }
 0x3fe   :  { %9551 = vmatmul.mubr.bf16.vlgmr.msra.gmra.mrb[16].mxu1 %v12028_v35  ;;  %9396 = vmatpush1.bf16.msra.mxu0 %v10932_v3  ;;  %v6428_v3 = vld [vmem:[#allocation10 + $0x5e0] sm:$0xff] }
 0x3ff   :  { %9427 = vmatprep.mubr.bf16.mxu0 %v12030_v37  ;;  %9560 = vmatpush1.bf16.msra.mxu1 %v10934_v36  ;;  %v6425_v36 = vld [vmem:[#allocation10 + $0x5c8] sm:$0xff]  ;;  %v10989_v62 = vcombine.high %v6424_v24, %v6428_v3  ;;  %v10988_v42 = vcombine.low %v6424_v24, %v6428_v3  ;;  %v6468_v26 = vld [vmem:[#allocation10 + $0x720] sm:$0xff] }
 0x400   :  { %9591 = vmatprep.mubr.bf16.mxu1 %v12030_v37  ;;  %9397 = vmatprep.subr.bf16.mxu0 %v10941_v60  ;;  %v6429_v60 = vld [vmem:[#allocation10 + $0x5e8] sm:$0xff] }
 0x401   :  { %9561 = vmatprep.subr.bf16.mxu1 %v10943_v18  ;;  %v6063_v18 = vadd.f32 %v6062_v27, %v6061_v5  ;;  %v10991_v25 = vcombine.high %v6425_v36, %v6429_v60  ;;  %v10990_v44 = vcombine.low %v6425_v36, %v6429_v60  ;;  %v6460_v5 = vld [vmem:[#allocation10 + $0x6e0] sm:$0xff]  ;;  %v6465_v27 = vld [vmem:[#allocation10 + $0x708] sm:$0xff] }
 0x402   :  { %9398 = vmatpush1.bf16.msra.mxu0 %v10940_v40  ;;  %v6436_v40 = vld [vmem:[#allocation10 + $0x620] sm:$0xff]  ;;  %v11021_v14 = vcombine.high %v6456_v8, %v6460_v5 }
 0x403   :  { %9562 = vmatpush1.bf16.msra.mxu1 %v10942_v41  ;;  %9399 = vmatprep.subr.bf16.mxu0 %v10949_v56  ;;  %v6433_v41 = vld [vmem:[#allocation10 + $0x608] sm:$0xff]  ;;  %v10997_v32 = vcombine.high %v6432_v4, %v6436_v40  ;;  %v10996_v51 = vcombine.low %v6432_v4, %v6436_v40  ;;  %v6472_v36 = vld [vmem:[#allocation10 + $0x740] sm:$0xff] }
 0x404   :  { %9563 = vmatprep.subr.bf16.mxu1 %v10951_v20  ;;  %v6437_v56 = vld [vmem:[#allocation10 + $0x628] sm:$0xff]  ;;  %v6096_v20 = vmul.f32 0.125, %v6063_v18  ;;  %v6476_v60 = vld [vmem:[#allocation10 + $0x760] sm:$0xff] }
 0x405   :  { %v10999_v10 = vcombine.high %v6433_v41, %v6437_v56  ;;  %v10998_v52 = vcombine.low %v6433_v41, %v6437_v56  ;;  %v6473_v18 = vld [vmem:[#allocation10 + $0x748] sm:$0xff]  ;;  %v11037_v40 = vcombine.high %v6472_v36, %v6476_v60  ;;  %v6480_v56 = vld [vmem:[#allocation10 + $0x780] sm:$0xff] }
 0x406   :  { %9400 = vmatpush1.bf16.msra.mxu0 %v10948_v50  ;;  %v6444_v50 = vld [vmem:[#allocation10 + $0x660] sm:$0xff] }
 0x407   :  { %9564 = vmatpush1.bf16.msra.mxu1 %v10950_v47  ;;  %9401 = vmatprep.subr.bf16.mxu0 %v10957_v21  ;;  %v6441_v47 = vld [vmem:[#allocation10 + $0x648] sm:$0xff]  ;;  %v11005_v53 = vcombine.high %v6440_v17, %v6444_v50 }
 0x408   :  { %9565 = vmatprep.subr.bf16.mxu1 %v10959_v57  ;;  %v6445_v21 = vld [vmem:[#allocation10 + $0x668] sm:$0xff]  ;;  %v6104_v57 = vadd.f32 1e-05, %v6096_v20  ;;  %v6484_v20 = vld [vmem:[#allocation10 + $0x7a0] sm:$0xff] }
 0x409   :  { %v11007_v54 = vcombine.high %v6441_v47, %v6445_v21  ;;  %v11006_v31 = vcombine.low %v6441_v47, %v6445_v21  ;;  %v6488_v47 = vld [vmem:[#allocation10 + $0x7c0] sm:$0xff] }
 0x40a   :  { %9402 = vmatpush1.bf16.msra.mxu0 %v10956_v38  ;;  %v6452_v38 = vld [vmem:[#allocation10 + $0x6a0] sm:$0xff]  ;;  %11467 = vrsqrt.f32 %v6104_v57  ;;  %v6489_v57 = vld [vmem:[#allocation10 + $0x7c8] sm:$0xff] }
 0x40b   :  { %9566 = vmatpush1.bf16.msra.mxu1 %v10958_v1  ;;  %9403 = vmatprep.subr.bf16.mxu0 %v10965_v58  ;;  %v6449_v1 = vld [vmem:[#allocation10 + $0x688] sm:$0xff]  ;;  %v11013_v63 = vcombine.high %v6448_v55, %v6452_v38  ;;  %v6492_v21 = vld [vmem:[#allocation10 + $0x7e0] sm:$0xff] }
 0x40c   :  { %9567 = vmatprep.subr.bf16.mxu1 %v10967_v59  ;;  %v6453_v58 = vld [vmem:[#allocation10 + $0x6a8] sm:$0xff]  ;;  %v11004_v59 = vcombine.low %v6440_v17, %v6444_v50 }
 0x40d   :  { %v11015_v49 = vcombine.high %v6449_v1, %v6453_v58 }
 0x40e   :  { %9404 = vmatpush1.bf16.msra.mxu0 %v10964_v7  ;;  %v6457_v7 = vld [vmem:[#allocation10 + $0x6c8] sm:$0xff] }
 0x40f   :  { %9568 = vmatpush1.bf16.msra.mxu1 %v10966_v11  ;;  %9405 = vmatprep.subr.bf16.mxu0 %v10973_v13  ;;  %v6461_v11 = vld [vmem:[#allocation10 + $0x6e8] sm:$0xff]  ;;  %v11012_v13 = vcombine.low %v6448_v55, %v6452_v38  ;;  %v6496_v38 = vld [vmem:[#allocation10 + $0x800] sm:$0xff] }
 0x410   :  { %9569 = vmatprep.subr.bf16.mxu1 %v10975_v34  ;;  %v11014_v34 = vcombine.low %v6449_v1, %v6453_v58  ;;  %v11023_v16 = vcombine.high %v6457_v7, %v6461_v11  ;;  %v6500_v1 = vld [vmem:[#allocation10 + $0x820] sm:$0xff]  ;;  %v6497_v58 = vld [vmem:[#allocation10 + $0x808] sm:$0xff] }
 0x412   :  { %9406 = vmatpush1.bf16.msra.mxu0 %v10972_v28  ;;  %v6469_v28 = vld [vmem:[#allocation10 + $0x728] sm:$0xff] }
 0x413   :  { %9570 = vmatpush1.bf16.msra.mxu1 %v10974_v29  ;;  %9407 = vmatprep.subr.bf16.mxu0 %v10981_v30  ;;  %v11020_v29 = vcombine.low %v6456_v8, %v6460_v5  ;;  %v11022_v30 = vcombine.low %v6457_v7, %v6461_v11  ;;  %v11031_v3 = vcombine.high %v6465_v27, %v6469_v28  ;;  %v6504_v7 = vld [vmem:[#allocation10 + $0x840] sm:$0xff] }
 0x414   :  { %9571 = vmatprep.subr.bf16.mxu1 %v10983_v33  ;;  %v11029_v33 = vcombine.high %v6464_v6, %v6468_v26  ;;  %v11468_v24 = vpop.eup %11467  ;;  %v11030_v4 = vcombine.low %v6465_v27, %v6469_v28  ;;  %v11061_v8 = vcombine.high %v6496_v38, %v6500_v1  ;;  %v6508_v11 = vld [vmem:[#allocation10 + $0x860] sm:$0xff] }
 0x415   :  { %v6512_v28 = vld [vmem:[#allocation10 + $0x880] sm:$0xff] }
 0x416   :  { %9408 = vmatpush1.bf16.msra.mxu0 %v10980_v61  ;;  %v6477_v61 = vld [vmem:[#allocation10 + $0x768] sm:$0xff] }
 0x417   :  { %9572 = vmatpush1.bf16.msra.mxu1 %v10982_v43  ;;  %9409 = vmatprep.subr.bf16.mxu0 %v10989_v62  ;;  %v6138_v43 = vrot.slane %v11992_v22, %v11865_v2  ;;  %v11028_v62 = vcombine.low %v6464_v6, %v6468_v26  ;;  %v11039_v41 = vcombine.high %v6473_v18, %v6477_v61 }
 0x418   :  { %9573 = vmatprep.subr.bf16.mxu1 %v10991_v25  ;;  %v6120_v25 = vmul.f32 %v11468_v24, %v12024_v23  ;;  %v11038_v17 = vcombine.low %v6473_v18, %v6477_v61  ;;  %v11045_v23 = vcombine.high %v6480_v56, %v6484_v20  ;;  %v11069_v26 = vcombine.high %v6504_v7, %v6508_v11  ;;  %v6520_v18 = vld [vmem:[#allocation10 + $0x8c0] sm:$0xff] }
 0x419   :  { %v11068_v24 = vcombine.low %v6504_v7, %v6508_v11  ;;  %v6524_v61 = vld [vmem:[#allocation10 + $0x8e0] sm:$0xff] }
 0x41a   :  { %9410 = vmatpush1.bf16.msra.mxu0 %v10988_v42  ;;  %v6481_v42 = vld [vmem:[#allocation10 + $0x788] sm:$0xff]  ;;  %v6169_v22 = vmul.f32 %v6138_v43, %v6120_v25 }
 0x41b   :  { %9574 = vmatpush1.bf16.msra.mxu1 %v10990_v44  ;;  %9411 = vmatprep.subr.bf16.mxu0 %v10997_v32  ;;  %v6485_v44 = vld [vmem:[#allocation10 + $0x7a8] sm:$0xff]  ;;  %v11036_v32 = vcombine.low %v6472_v36, %v6476_v60 }
 0x41c   :  { %9575 = vmatprep.subr.bf16.mxu1 %v10999_v10  ;;  %v6187_v10 = vrot.slane %v11999_v9, %v11865_v2  ;;  %v11047_v50 = vcombine.high %v6481_v42, %v6485_v44  ;;  %v6521_v43 = vld [vmem:[#allocation10 + $0x8c8] sm:$0xff] }
 0x41e   :  { %9412 = vmatpush1.bf16.msra.mxu0 %v10996_v51  ;;  %v6493_v51 = vld [vmem:[#allocation10 + $0x7e8] sm:$0xff]  ;;  %v6218_v55 = vadd.f32 %v6187_v10, %v6169_v22 }
 0x41f   :  { %9576 = vmatpush1.bf16.msra.mxu1 %v10998_v52  ;;  %9413 = vmatprep.subr.bf16.mxu0 %v11005_v53  ;;  %v11044_v52 = vcombine.low %v6480_v56, %v6484_v20  ;;  %v11046_v53 = vcombine.low %v6481_v42, %v6485_v44  ;;  %v11055_v9 = vcombine.high %v6489_v57, %v6493_v51  ;;  %v6528_v56 = vld [vmem:[#allocation10 + $0x900] sm:$0xff]  ;;  %v6529_v42 = vld [vmem:[#allocation10 + $0x908] sm:$0xff] }
 0x420   :  { %9577 = vmatprep.subr.bf16.mxu1 %v11007_v54  ;;  %v11053_v54 = vcombine.high %v6488_v47, %v6492_v21  ;;  %v6532_v20 = vld [vmem:[#allocation10 + $0x920] sm:$0xff]  ;;  %v6533_v44 = vld [vmem:[#allocation10 + $0x928] sm:$0xff] }
 0x421   :  { %v11093_v22 = vcombine.high %v6528_v56, %v6532_v20 }
 0x422   :  { %9414 = vmatpush1.bf16.msra.mxu0 %v11004_v59  ;;  %v6501_v59 = vld [vmem:[#allocation10 + $0x828] sm:$0xff] }
 0x423   :  { %9578 = vmatpush1.bf16.msra.mxu1 %v11006_v31  ;;  %9415 = vmatprep.subr.bf16.mxu0 %v11013_v63  ;;  %v11052_v31 = vcombine.low %v6488_v47, %v6492_v21  ;;  %v11054_v63 = vcombine.low %v6489_v57, %v6493_v51  ;;  %v11063_v5 = vcombine.high %v6497_v58, %v6501_v59  ;;  %v6536_v21 = vld [vmem:[#allocation10 + $0x940] sm:$0xff]  ;;  %v12051_v51 = vld [vmem:[#allocation10 + $0xc28] sm:$0xff] }
 0x424   :  { %9579 = vmatprep.subr.bf16.mxu1 %v11015_v49  ;;  %v6226_v49 = vmax.f32 %v6218_v55, 0.0  ;;  %v11062_v6 = vcombine.low %v6497_v58, %v6501_v59  ;;  %v11095_v47 = vcombine.high %v6529_v42, %v6533_v44  ;;  %v6540_v57 = vld [vmem:[#allocation10 + $0x960] sm:$0xff] }
 0x425   :  { %v6544_v59 = vld [vmem:[#allocation10 + $0x980] sm:$0xff] }
 0x426   :  { %9416 = vmatpush1.bf16.msra.mxu0 %v11012_v13  ;;  %v6505_v13 = vld [vmem:[#allocation10 + $0x848] sm:$0xff] }
 0x427   :  { %9580 = vmatpush1.bf16.msra.mxu1 %v11014_v34  ;;  %9417 = vmatprep.subr.bf16.mxu0 %v11021_v14  ;;  %v6509_v34 = vld [vmem:[#allocation10 + $0x868] sm:$0xff]  ;;  %v11060_v14 = vcombine.low %v6496_v38, %v6500_v1  ;;  %v11094_v38 = vcombine.low %v6529_v42, %v6533_v44  ;;  %v11101_v1 = vcombine.high %v6536_v21, %v6540_v57  ;;  %v6576_v42 = vld [vmem:[#allocation10 + $0xa80] sm:$0xff] }
 0x428   :  { %9581 = vmatprep.subr.bf16.mxu1 %v11023_v16  ;;  %v12041_v16 = vpack.c.bf16 %v6226_v49, %v6226_v49  ;;  %v11071_v27 = vcombine.high %v6505_v13, %v6509_v34  ;;  %v6549_v49 = vld [vmem:[#allocation10 + $0x9a8] sm:$0xff]  ;;  %v6580_v44 = vld [vmem:[#allocation10 + $0xaa0] sm:$0xff] }
 0x42a   :  { %9418 = vmatpush1.bf16.msra.mxu0 %v11020_v29  ;;  %v6516_v29 = vld [vmem:[#allocation10 + $0x8a0] sm:$0xff] }
 0x42b   :  { %9582 = vmatpush1.bf16.msra.mxu1 %v11022_v30  ;;  %9419 = vmatprep.subr.bf16.mxu0 %v11029_v33  ;;  %v6513_v30 = vld [vmem:[#allocation10 + $0x888] sm:$0xff]  ;;  %v11077_v36 = vcombine.high %v6512_v28, %v6516_v29  ;;  %v11076_v25 = vcombine.low %v6512_v28, %v6516_v29 }
 0x42c   :  { %9583 = vmatprep.subr.bf16.mxu1 %v11031_v3  ;;  %v6517_v33 = vld [vmem:[#allocation10 + $0x8a8] sm:$0xff]  ;;  %v11070_v3 = vcombine.low %v6505_v13, %v6509_v34  ;;  %v6552_v13 = vld [vmem:[#allocation10 + $0x9c0] sm:$0xff] }
 0x42d   :  { %v11079_v60 = vcombine.high %v6513_v30, %v6517_v33  ;;  %v6556_v34 = vld [vmem:[#allocation10 + $0x9e0] sm:$0xff] }
 0x42e   :  { %9420 = vmatpush1.bf16.msra.mxu0 %v11028_v62  ;;  %v6525_v62 = vld [vmem:[#allocation10 + $0x8e8] sm:$0xff]  ;;  %v11117_v28 = vcombine.high %v6552_v13, %v6556_v34 }
 0x42f   :  { %9584 = vmatpush1.bf16.msra.mxu1 %v11030_v4  ;;  %9421 = vmatprep.subr.bf16.mxu0 %v11037_v40  ;;  %v11078_v4 = vcombine.low %v6513_v30, %v6517_v33  ;;  %v11085_v40 = vcombine.high %v6520_v18, %v6524_v61  ;;  %v11086_v10 = vcombine.low %v6521_v43, %v6525_v62  ;;  %v6560_v30 = vld [vmem:[#allocation10 + $0xa00] sm:$0xff] }
 0x430   :  { %9585 = vmatprep.subr.bf16.mxu1 %v11039_v41  ;;  %v11087_v41 = vcombine.high %v6521_v43, %v6525_v62  ;;  %v6564_v33 = vld [vmem:[#allocation10 + $0xa20] sm:$0xff] }
 0x431   :  { %v6568_v43 = vld [vmem:[#allocation10 + $0xa40] sm:$0xff] }
 0x432   :  { %9422 = vmatpush1.bf16.msra.mxu0 %v11036_v32  ;;  %v11084_v32 = vcombine.low %v6520_v18, %v6524_v61  ;;  %v11125_v18 = vcombine.high %v6560_v30, %v6564_v33  ;;  %v6572_v62 = vld [vmem:[#allocation10 + $0xa60] sm:$0xff] }
 0x433   :  { %9586 = vmatpush1.bf16.msra.mxu1 %v11038_v17  ;;  %9423 = vmatprep.subr.bf16.mxu0 %v11045_v23  ;;  %v12045_v17 = vld [vmem:[#allocation10 + $0xc00] sm:$0xff] }
 0x434   :  { %9587 = vmatprep.subr.bf16.mxu1 %v11047_v50  ;;  %v12047_v23 = vld [vmem:[#allocation10 + $0xc20] sm:$0xff]  ;;  %v12049_v50 = vld [vmem:[#allocation10 + $0xc08] sm:$0xff] }
 0x435   :  { %v11190_v55 = vcombine.low %v12049_v50, %v12051_v51 }
 0x436   :  { %9424 = vmatpush1.bf16.msra.mxu0 %v11044_v52  ;;  %v6537_v52 = vld [vmem:[#allocation10 + $0x948] sm:$0xff] }
 0x437   :  { %9588 = vmatpush1.bf16.msra.mxu1 %v11046_v53  ;;  %9425 = vmatprep.subr.bf16.mxu0 %v11053_v54  ;;  %v6541_v53 = vld [vmem:[#allocation10 + $0x968] sm:$0xff]  ;;  %v11188_v54 = vcombine.low %v12045_v17, %v12047_v23 }
 0x438   :  { %9589 = vmatprep.subr.bf16.mxu1 %v11055_v9  ;;  %v11092_v9 = vcombine.low %v6528_v56, %v6532_v20  ;;  %v11103_v58 = vcombine.high %v6537_v52, %v6541_v53  ;;  %v11133_v56 = vcombine.high %v6568_v43, %v6572_v62 }
 0x43a   :  { %9426 = vmatpush1.bf16.msra.mxu0 %v11052_v31  ;;  %v6548_v31 = vld [vmem:[#allocation10 + $0x9a0] sm:$0xff] }
 0x43b   :  { %9590 = vmatpush1.bf16.msra.mxu1 %v11054_v63  ;;  %9436 = vmatprep.subr.bf16.mxu0 %v11061_v8  ;;  %v6545_v63 = vld [vmem:[#allocation10 + $0x988] sm:$0xff]  ;;  %v11100_v8 = vcombine.low %v6536_v21, %v6540_v57  ;;  %v11109_v7 = vcombine.high %v6544_v59, %v6548_v31  ;;  %v11141_v21 = vcombine.high %v6576_v42, %v6580_v44 }
 0x43c   :  { %9600 = vmatprep.subr.bf16.mxu1 %v11063_v5  ;;  %v11102_v5 = vcombine.low %v6537_v52, %v6541_v53  ;;  %v11111_v11 = vcombine.high %v6545_v63, %v6549_v49  ;;  %v6584_v52 = vld [vmem:[#allocation10 + $0xac0] sm:$0xff] }
 0x43d   :  { %9428 = vmatmul.mubr.bf16.vlgmr.msra.gmra.mrb[16].mxu0 %v12041_v16  ;;  %v6588_v53 = vld [vmem:[#allocation10 + $0xae0] sm:$0xff] }
 0x43e   :  { %9592 = vmatmul.mubr.bf16.vlgmr.msra.gmra.mrb[16].mxu1 %v12041_v16  ;;  %9437 = vmatpush1.bf16.msra.mxu0 %v11060_v14  ;;  %v6553_v14 = vld [vmem:[#allocation10 + $0x9c8] sm:$0xff] }
 0x43f   :  { %9601 = vmatpush1.bf16.msra.mxu1 %v11062_v6  ;;  %9438 = vmatprep.subr.bf16.mxu0 %v11069_v26  ;;  %v6557_v6 = vld [vmem:[#allocation10 + $0x9e8] sm:$0xff]  ;;  %v11108_v26 = vcombine.low %v6544_v59, %v6548_v31  ;;  %v11149_v59 = vcombine.high %v6584_v52, %v6588_v53 }
 0x440   :  { %9602 = vmatprep.subr.bf16.mxu1 %v11071_v27  ;;  %v11110_v27 = vcombine.low %v6545_v63, %v6549_v49  ;;  %v11119_v29 = vcombine.high %v6553_v14, %v6557_v6  ;;  %v6592_v63 = vld [vmem:[#allocation10 + $0xb00] sm:$0xff] }
 0x441   :  { %v6596_v49 = vld [vmem:[#allocation10 + $0xb20] sm:$0xff] }
 0x442   :  { %9439 = vmatpush1.bf16.msra.mxu0 %v11068_v24  ;;  %v6561_v24 = vld [vmem:[#allocation10 + $0xa08] sm:$0xff] }
 0x443   :  { %9603 = vmatpush1.bf16.msra.mxu1 %v11070_v3  ;;  %9440 = vmatprep.subr.bf16.mxu0 %v11077_v36  ;;  %v6565_v3 = vld [vmem:[#allocation10 + $0xa28] sm:$0xff]  ;;  %v11116_v36 = vcombine.low %v6552_v13, %v6556_v34  ;;  %v11157_v13 = vcombine.high %v6592_v63, %v6596_v49 }
 0x444   :  { %9604 = vmatprep.subr.bf16.mxu1 %v11079_v60  ;;  %v11118_v60 = vcombine.low %v6553_v14, %v6557_v6  ;;  %v11127_v61 = vcombine.high %v6561_v24, %v6565_v3  ;;  %v6600_v14 = vld [vmem:[#allocation10 + $0xb40] sm:$0xff] }
 0x445   :  { %v6604_v6 = vld [vmem:[#allocation10 + $0xb60] sm:$0xff] }
 0x446   :  { %9441 = vmatpush1.bf16.msra.mxu0 %v11076_v25  ;;  %v6569_v25 = vld [vmem:[#allocation10 + $0xa48] sm:$0xff] }
 0x447   :  { %9605 = vmatpush1.bf16.msra.mxu1 %v11078_v4  ;;  %9442 = vmatprep.subr.bf16.mxu0 %v11085_v40  ;;  %v6573_v4 = vld [vmem:[#allocation10 + $0xa68] sm:$0xff]  ;;  %v11124_v40 = vcombine.low %v6560_v30, %v6564_v33  ;;  %v11165_v30 = vcombine.high %v6600_v14, %v6604_v6 }
 0x448   :  { %9606 = vmatprep.subr.bf16.mxu1 %v11087_v41  ;;  %v11126_v41 = vcombine.low %v6561_v24, %v6565_v3  ;;  %v11135_v20 = vcombine.high %v6569_v25, %v6573_v4  ;;  %v6608_v24 = vld [vmem:[#allocation10 + $0xb80] sm:$0xff] }
 0x449   :  { %v6612_v3 = vld [vmem:[#allocation10 + $0xba0] sm:$0xff] }
 0x44a   :  { %9443 = vmatpush1.bf16.msra.mxu0 %v11084_v32  ;;  %v6577_v32 = vld [vmem:[#allocation10 + $0xa88] sm:$0xff] }
 0x44b   :  { %9607 = vmatpush1.bf16.msra.mxu1 %v11086_v10  ;;  %9444 = vmatprep.subr.bf16.mxu0 %v11093_v22  ;;  %v6581_v10 = vld [vmem:[#allocation10 + $0xaa8] sm:$0xff]  ;;  %v11132_v22 = vcombine.low %v6568_v43, %v6572_v62  ;;  %v11173_v43 = vcombine.high %v6608_v24, %v6612_v3 }
 0x44c   :  { %9608 = vmatprep.subr.bf16.mxu1 %v11095_v47  ;;  %v11134_v47 = vcombine.low %v6569_v25, %v6573_v4  ;;  %v11143_v57 = vcombine.high %v6577_v32, %v6581_v10  ;;  %v6616_v25 = vld [vmem:[#allocation10 + $0xbc0] sm:$0xff] }
 0x44d   :  { %v6620_v4 = vld [vmem:[#allocation10 + $0xbe0] sm:$0xff] }
 0x44e   :  { %9445 = vmatpush1.bf16.msra.mxu0 %v11092_v9  ;;  %v6585_v9 = vld [vmem:[#allocation10 + $0xac8] sm:$0xff] }
 0x44f   :  { %9609 = vmatpush1.bf16.msra.mxu1 %v11094_v38  ;;  %9446 = vmatprep.subr.bf16.mxu0 %v11101_v1  ;;  %v6589_v38 = vld [vmem:[#allocation10 + $0xae8] sm:$0xff]  ;;  %v11140_v1 = vcombine.low %v6576_v42, %v6580_v44  ;;  %v11181_v42 = vcombine.high %v6616_v25, %v6620_v4 }
 0x450   :  { %9610 = vmatprep.subr.bf16.mxu1 %v11103_v58  ;;  %v11142_v58 = vcombine.low %v6577_v32, %v6581_v10  ;;  %v11151_v31 = vcombine.high %v6585_v9, %v6589_v38  ;;  %v11180_v32 = vcombine.low %v6616_v25, %v6620_v4 }
 0x452   :  { %9447 = vmatpush1.bf16.msra.mxu0 %v11100_v8  ;;  %v6593_v8 = vld [vmem:[#allocation10 + $0xb08] sm:$0xff] }
 0x453   :  { %9611 = vmatpush1.bf16.msra.mxu1 %v11102_v5  ;;  %9448 = vmatprep.subr.bf16.mxu0 %v11109_v7  ;;  %v6597_v5 = vld [vmem:[#allocation10 + $0xb28] sm:$0xff]  ;;  %v11148_v7 = vcombine.low %v6584_v52, %v6588_v53 }
 0x454   :  { %9612 = vmatprep.subr.bf16.mxu1 %v11111_v11  ;;  %v11150_v11 = vcombine.low %v6585_v9, %v6589_v38  ;;  %v11159_v34 = vcombine.high %v6593_v8, %v6597_v5 }
 0x456   :  { %9449 = vmatpush1.bf16.msra.mxu0 %v11108_v26  ;;  %v6601_v26 = vld [vmem:[#allocation10 + $0xb48] sm:$0xff] }
 0x457   :  { %9613 = vmatpush1.bf16.msra.mxu1 %v11110_v27  ;;  %9450 = vmatprep.subr.bf16.mxu0 %v11117_v28  ;;  %v6605_v27 = vld [vmem:[#allocation10 + $0xb68] sm:$0xff]  ;;  %v11156_v28 = vcombine.low %v6592_v63, %v6596_v49 }
 0x458   :  { %9614 = vmatprep.subr.bf16.mxu1 %v11119_v29  ;;  %v11158_v29 = vcombine.low %v6593_v8, %v6597_v5  ;;  %v11167_v33 = vcombine.high %v6601_v26, %v6605_v27 }
 0x45a   :  { %9451 = vmatpush1.bf16.msra.mxu0 %v11116_v36  ;;  %v6609_v36 = vld [vmem:[#allocation10 + $0xb88] sm:$0xff] }
 0x45b   :  { %9615 = vmatpush1.bf16.msra.mxu1 %v11118_v60  ;;  %9452 = vmatprep.subr.bf16.mxu0 %v11125_v18  ;;  %v6613_v60 = vld [vmem:[#allocation10 + $0xba8] sm:$0xff]  ;;  %v11164_v18 = vcombine.low %v6600_v14, %v6604_v6 }
 0x45c   :  { %9616 = vmatprep.subr.bf16.mxu1 %v11127_v61  ;;  %v11166_v61 = vcombine.low %v6601_v26, %v6605_v27  ;;  %v11175_v62 = vcombine.high %v6609_v36, %v6613_v60 }
 0x45e   :  { %9453 = vmatpush1.bf16.msra.mxu0 %v11124_v40  ;;  %v6617_v40 = vld [vmem:[#allocation10 + $0xbc8] sm:$0xff] }
 0x45f   :  { %9617 = vmatpush1.bf16.msra.mxu1 %v11126_v41  ;;  %9454 = vmatprep.subr.bf16.mxu0 %v11133_v56  ;;  %v6621_v41 = vld [vmem:[#allocation10 + $0xbe8] sm:$0xff]  ;;  %v11172_v56 = vcombine.low %v6608_v24, %v6612_v3 }
 0x460   :  { %9618 = vmatprep.subr.bf16.mxu1 %v11135_v20  ;;  %v11174_v20 = vcombine.low %v6609_v36, %v6613_v60  ;;  %v11183_v44 = vcombine.high %v6617_v40, %v6621_v41  ;;  %v11182_v10 = vcombine.low %v6617_v40, %v6621_v41 }
 0x462   :  { %9455 = vmatpush1.bf16.msra.mxu0 %v11132_v22  ;;  %v11189_v22 = vcombine.high %v12045_v17, %v12047_v23 }
 0x463   :  { %9619 = vmatpush1.bf16.msra.mxu1 %v11134_v47  ;;  %9456 = vmatprep.subr.bf16.mxu0 %v11141_v21  ;;  %v11191_v47 = vcombine.high %v12049_v50, %v12051_v51 }
 0x464   :  { %9620 = vmatprep.subr.bf16.mxu1 %v11143_v57 }
 0x466   :  { %9457 = vmatpush1.bf16.msra.mxu0 %v11140_v1 }
 0x467   :  { %9621 = vmatpush1.bf16.msra.mxu1 %v11142_v58  ;;  %9458 = vmatprep.subr.bf16.mxu0 %v11149_v59 }
 0x468   :  { %9622 = vmatprep.subr.bf16.mxu1 %v11151_v31 }
 0x46a   :  { %9459 = vmatpush1.bf16.msra.mxu0 %v11148_v7 }
 0x46b   :  { %9623 = vmatpush1.bf16.msra.mxu1 %v11150_v11  ;;  %9460 = vmatprep.subr.bf16.mxu0 %v11157_v13 }
 0x46c   :  { %9624 = vmatprep.subr.bf16.mxu1 %v11159_v34 }
 0x46e   :  { %9461 = vmatpush1.bf16.msra.mxu0 %v11156_v28 }
 0x46f   :  { %9625 = vmatpush1.bf16.msra.mxu1 %v11158_v29  ;;  %9462 = vmatprep.subr.bf16.mxu0 %v11165_v30 }
 0x470   :  { %9626 = vmatprep.subr.bf16.mxu1 %v11167_v33 }
 0x472   :  { %9463 = vmatpush1.bf16.msra.mxu0 %v11164_v18 }
 0x473   :  { %9627 = vmatpush1.bf16.msra.mxu1 %v11166_v61  ;;  %9464 = vmatprep.subr.bf16.mxu0 %v11173_v43 }
 0x474   :  { %9628 = vmatprep.subr.bf16.mxu1 %v11175_v62 }
 0x476   :  { %9465 = vmatpush1.bf16.msra.mxu0 %v11172_v56 }
 0x477   :  { %9629 = vmatpush1.bf16.msra.mxu1 %v11174_v20  ;;  %9466 = vmatprep.subr.bf16.mxu0 %v11181_v42 }
 0x478   :  { %9630 = vmatprep.subr.bf16.mxu1 %v11183_v44 }
 0x47a   :  { %9467 = vmatpush1.bf16.msra.mxu0 %v11180_v32 }
 0x47b   :  { %9631 = vmatpush1.bf16.msra.mxu1 %v11182_v10  ;;  %9477 = vmatprep.subr.bf16.mxu0 %v11189_v22 }
 0x47c   :  { %9641 = vmatprep.subr.bf16.mxu1 %v11191_v47 }
 0x490   :  { %v5799_v21 = vpop.f32.mrb[12].mxu0 }
 0x491   :  { %v5998_v57 = vrot.slane %v5799_v21, 4  ;;  %v12061_v52 = vpop.f32.mrb[12].mxu1  ;;  %v5801_v53 = vpop.f32.mrb[13].mxu0 }
 0x492   :  { %v6004_v9 = vrot.slane %v5801_v53, 4  ;;  %v5965_v38 = vpop.f32.mrb[13].mxu1  ;;  %v5803_v1 = vpop.f32.mrb[14].mxu0  ;;  %v6010_v32 = vrot.slane %v12061_v52, 4 }
 0x493   :  { %v5999_v58 = vadd.f32 %v5998_v57, %v5799_v21  ;;  %v6016_v59 = vrot.slane %v5965_v38, 4  ;;  %v5967_v31 = vpop.f32.mrb[14].mxu1  ;;  %v5804_v63 = vpop.f32.mrb[15].mxu0 }
 0x494   :  { %v6005_v49 = vadd.f32 %v6004_v9, %v5801_v53  ;;  %v5968_v8 = vpop.f32.mrb[15].mxu1 }
 0x495   :  { %v6000_v5 = vrot.slane %v5999_v58, 2  ;;  %v6017_v7 = vadd.f32 %v6016_v59, %v5965_v38 }
 0x496   :  { %v6006_v11 = vrot.slane %v6005_v49, 2 }
 0x497   :  { %v6001_v13 = vadd.f32 %v6000_v5, %v5999_v58  ;;  %v6018_v34 = vrot.slane %v6017_v7, 2 }
 0x498   :  { %v6007_v14 = vadd.f32 %v6006_v11, %v6005_v49 }
 0x499   :  { %v6002_v6 = vrot.slane %v6001_v13, 1  ;;  %v6019_v26 = vadd.f32 %v6018_v34, %v6017_v7 }
 0x49a   :  { %v6008_v27 = vrot.slane %v6007_v14, 1 }
 0x49b   :  { %v6003_v28 = vadd.f32 %v6002_v6, %v6001_v13  ;;  %v6020_v29 = vrot.slane %v6019_v26, 1  ;;  %v12065_v6 = vld [vmem:[#allocation8 + $0x2] ss:$4 sm:$0xff] }
 0x49c   :  { %v6009_v30 = vadd.f32 %v6008_v27, %v6007_v14 }
 0x49d   :  { %v6026_v33 = vmul.f32 0.125, %v6003_v28  ;;  %v6021_v24 = vadd.f32 %v6020_v29, %v6019_v26  ;;  %v6146_v26 = vrot.slane %v12065_v6, %v11908_v0 }
 0x49e   :  { %v6027_v3 = vmul.f32 0.125, %v6009_v30  ;;  %v6150_v30 = vrot.slane %v12065_v6, %v11911_v15 }
 0x49f   :  { %v6034_v36 = vsub.f32 %v5799_v21, %v6026_v33  ;;  %v6029_v60 = vmul.f32 0.125, %v6021_v24  ;;  %v12071_v33 = vld [vmem:[#allocation8 + $0x3] ss:$4 sm:$0xff] }
 0x4a0   :  { %v6035_v18 = vsub.f32 %v5801_v53, %v6027_v3  ;;  %v6011_v53 = vadd.f32 %v6010_v32, %v12061_v52  ;;  %v6195_v24 = vrot.slane %v12071_v33, %v11908_v0 }
 0x4a1   :  { %v6042_v61 = vmul.f32 %v6034_v36, %v6034_v36  ;;  %v6037_v43 = vsub.f32 %v5965_v38, %v6029_v60  ;;  %v6158_v60 = vrot.slane %v12065_v6, %v11914_v19 }
 0x4a2   :  { %v6043_v62 = vmul.f32 %v6035_v18, %v6035_v18  ;;  %v6012_v49 = vrot.slane %v6011_v53, 2 }
 0x4a3   :  { %v6070_v25 = vrot.slane %v6042_v61, 4  ;;  %v6045_v4 = vmul.f32 %v6037_v43, %v6037_v43 }
 0x4a4   :  { %v6076_v40 = vrot.slane %v6043_v62, 4  ;;  %v6013_v34 = vadd.f32 %v6012_v49, %v6011_v53  ;;  %v6637_v53 = vld [vmem:[#allocation10 + $0xc68] sm:$0xff] }
 0x4a5   :  { %v6071_v41 = vadd.f32 %v6070_v25, %v6042_v61  ;;  %v6088_v56 = vrot.slane %v6045_v4, 4  ;;  %v6645_v49 = vld [vmem:[#allocation10 + $0xca8] sm:$0xff] }
 0x4a6   :  { %v6077_v20 = vadd.f32 %v6076_v40, %v6043_v62  ;;  %v6014_v14 = vrot.slane %v6013_v34, 1  ;;  %v6199_v40 = vrot.slane %v12071_v33, %v11911_v15 }
 0x4a7   :  { %v6072_v42 = vrot.slane %v6071_v41, 2  ;;  %v6089_v44 = vadd.f32 %v6088_v56, %v6045_v4 }
 0x4a8   :  { %v6078_v10 = vrot.slane %v6077_v20, 2  ;;  %v6015_v27 = vadd.f32 %v6014_v14, %v6013_v34  ;;  %v6648_v14 = vld [vmem:[#allocation10 + $0xcc0] sm:$0xff] }
 0x4a9   :  { %v6073_v22 = vadd.f32 %v6072_v42, %v6071_v41  ;;  %v6090_v47 = vrot.slane %v6089_v44, 2  ;;  %v6207_v41 = vrot.slane %v12071_v33, %v11914_v19 }
 0x4aa   :  { %v6079_v57 = vadd.f32 %v6078_v10, %v6077_v20  ;;  %v6028_v25 = vmul.f32 0.125, %v6015_v27  ;;  %v6649_v27 = vld [vmem:[#allocation10 + $0xcc8] sm:$0xff] }
 0x4ab   :  { %v6074_v21 = vrot.slane %v6073_v22, 1  ;;  %v6091_v9 = vadd.f32 %v6090_v47, %v6089_v44 }
 0x4ac   :  { %v6080_v38 = vrot.slane %v6079_v57, 1  ;;  %v12082_v44 = vsub.f32 %v12061_v52, %v6028_v25 }
 0x4ad   :  { %v6075_v1 = vadd.f32 %v6074_v21, %v6073_v22  ;;  %v6092_v58 = vrot.slane %v6091_v9, 1 }
 0x4ae   :  { %v6081_v59 = vadd.f32 %v6080_v38, %v6079_v57  ;;  %v6632_v57 = vld [vmem:[#allocation10 + $0xc40] sm:$0xff] }
 0x4af   :  { %v6098_v31 = vmul.f32 0.125, %v6075_v1  ;;  %v6093_v63 = vadd.f32 %v6092_v58, %v6091_v9  ;;  %v6633_v9 = vld [vmem:[#allocation10 + $0xc48] sm:$0xff]  ;;  %v6640_v58 = vld [vmem:[#allocation10 + $0xc80] sm:$0xff] }
 0x4b0   :  { %v6099_v8 = vmul.f32 0.125, %v6081_v59  ;;  %v11199_v59 = vcombine.high %v6633_v9, %v6637_v53 }
 0x4b1   :  { %v6106_v5 = vadd.f32 1e-05, %v6098_v31  ;;  %v6101_v7 = vmul.f32 0.125, %v6093_v63  ;;  %v6644_v31 = vld [vmem:[#allocation10 + $0xca0] sm:$0xff]  ;;  %v6641_v63 = vld [vmem:[#allocation10 + $0xc88] sm:$0xff] }
 0x4b2   :  { %v6107_v11 = vadd.f32 1e-05, %v6099_v8  ;;  %v11207_v34 = vcombine.high %v6641_v63, %v6645_v49  ;;  %v11204_v23 = vcombine.low %v6640_v58, %v6644_v31  ;;  %v11206_v50 = vcombine.low %v6641_v63, %v6645_v49  ;;  %v6685_v63 = vld [vmem:[#allocation10 + $0xde8] sm:$0xff] }
 0x4b3   :  { %11469 = vrsqrt.f32 %v6106_v5  ;;  %v6109_v13 = vadd.f32 1e-05, %v6101_v7 }
 0x4b4   :  { %11471 = vrsqrt.f32 %v6107_v11  ;;  %v11198_v11 = vcombine.low %v6633_v9, %v6637_v53 }
 0x4b5   :  { %11473 = vrsqrt.f32 %v6109_v13  ;;  %v11205_v13 = vcombine.high %v6640_v58, %v6644_v31  ;;  %v6681_v31 = vld [vmem:[#allocation10 + $0xdc8] sm:$0xff] }
 0x4bd   :  { %v11470_v28 = vpop.eup %11469 }
 0x4be   :  { %v6122_v29 = vmul.f32 %v11470_v28, %v6034_v36  ;;  %v11472_v3 = vpop.eup %11471  ;;  %v6653_v28 = vld [vmem:[#allocation10 + $0xce8] sm:$0xff] }
 0x4bf   :  { %v11474_v61 = vpop.eup %11473  ;;  %v6123_v4 = vmul.f32 %v11472_v3, %v6035_v18  ;;  %v6636_v18 = vld [vmem:[#allocation10 + $0xc60] sm:$0xff] }
 0x4c0   :  { %v6171_v62 = vmul.f32 %v6146_v26, %v6122_v29  ;;  %v6125_v36 = vmul.f32 %v11474_v61, %v6037_v43  ;;  %v6044_v43 = vmul.f32 %v12082_v44, %v12082_v44  ;;  %v11197_v52 = vcombine.high %v6632_v57, %v6636_v18  ;;  %v6652_v26 = vld [vmem:[#allocation10 + $0xce0] sm:$0xff] }
 0x4c1   :  { %v6172_v56 = vmul.f32 %v6150_v30, %v6123_v4  ;;  %v11196_v7 = vcombine.low %v6632_v57, %v6636_v18  ;;  %v11213_v51 = vcombine.high %v6648_v14, %v6652_v26  ;;  %v6660_v29 = vld [vmem:[#allocation10 + $0xd20] sm:$0xff]  ;;  %v6657_v30 = vld [vmem:[#allocation10 + $0xd08] sm:$0xff]  ;;  %v11214_v61 = vcombine.low %v6649_v27, %v6653_v28 }
 0x4c2   :  { %v6220_v20 = vadd.f32 %v6195_v24, %v6171_v62  ;;  %v6174_v42 = vmul.f32 %v6158_v60, %v6125_v36  ;;  %v6082_v5 = vrot.slane %v6044_v43, 4  ;;  %v6661_v24 = vld [vmem:[#allocation10 + $0xd28] sm:$0xff]  ;;  %v11212_v60 = vcombine.low %v6648_v14, %v6652_v26  ;;  %v6664_v4 = vld [vmem:[#allocation10 + $0xd40] sm:$0xff] }
 0x4c3   :  { %v6221_v32 = vadd.f32 %v6199_v40, %v6172_v56  ;;  %v11223_v25 = vcombine.high %v6657_v30, %v6661_v24  ;;  %v6668_v40 = vld [vmem:[#allocation10 + $0xd60] sm:$0xff]  ;;  %v6665_v36 = vld [vmem:[#allocation10 + $0xd48] sm:$0xff] }
 0x4c4   :  { %v6228_v10 = vmax.f32 %v6220_v20, 0.0  ;;  %v6223_v22 = vadd.f32 %v6207_v41, %v6174_v42  ;;  %v6083_v17 = vadd.f32 %v6082_v5, %v6044_v43  ;;  %v6669_v41 = vld [vmem:[#allocation10 + $0xd68] sm:$0xff]  ;;  %v11222_v42 = vcombine.low %v6657_v30, %v6661_v24  ;;  %v6692_v14 = vld [vmem:[#allocation10 + $0xe20] sm:$0xff] }
 0x4c5   :  { %v6229_v47 = vmax.f32 %v6221_v32, 0.0  ;;  %v11229_v32 = vcombine.high %v6664_v4, %v6668_v40  ;;  %v6673_v57 = vld [vmem:[#allocation10 + $0xd88] sm:$0xff]  ;;  %v11228_v9 = vcombine.low %v6664_v4, %v6668_v40  ;;  %v11230_v53 = vcombine.low %v6665_v36, %v6669_v41  ;;  %v6708_v4 = vld [vmem:[#allocation10 + $0xea0] sm:$0xff] }
 0x4c6   :  { %v6231_v21 = vmax.f32 %v6223_v22, 0.0  ;;  %v12088_v1 = vpack.c.bf16 %v6228_v10, %v6228_v10  ;;  %v6084_v3 = vrot.slane %v6083_v17, 2  ;;  %v11231_v10 = vcombine.high %v6665_v36, %v6669_v41  ;;  %v6672_v22 = vld [vmem:[#allocation10 + $0xd80] sm:$0xff]  ;;  %v6689_v26 = vld [vmem:[#allocation10 + $0xe08] sm:$0xff] }
 0x4c7   :  { %v12086_v38 = vpack.c.bf16 %v6229_v47, %v6229_v47  ;;  %v6676_v47 = vld [vmem:[#allocation10 + $0xda0] sm:$0xff]  ;;  %v6701_v30 = vld [vmem:[#allocation10 + $0xe68] sm:$0xff] }
 0x4c8   :  { %v12094_v8 = vpack.c.bf16 %v6231_v21, %v6231_v21  ;;  %v6085_v56 = vadd.f32 %v6084_v3, %v6083_v17  ;;  %v6677_v21 = vld [vmem:[#allocation10 + $0xda8] sm:$0xff]  ;;  %v11237_v43 = vcombine.high %v6672_v22, %v6676_v47  ;;  %v11236_v5 = vcombine.low %v6672_v22, %v6676_v47 }
 0x4c9   :  { %9468 = vmatprep.mubr.bf16.mxu0 %v12086_v38  ;;  %9632 = vmatprep.mubr.bf16.mxu1 %v12086_v38  ;;  %v11239_v58 = vcombine.high %v6673_v57, %v6677_v21  ;;  %v6705_v40 = vld [vmem:[#allocation10 + $0xe88] sm:$0xff] }
 0x4ca   :  { %9469 = vmatmul.mubr.bf16.vlgmr.msra.gmra.mrb[16].mxu0 %v12088_v1  ;;  %9633 = vmatmul.mubr.bf16.vlgmr.msra.gmra.mrb[16].mxu1 %v12088_v1  ;;  %v6086_v18 = vrot.slane %v6085_v56, 1  ;;  %v6709_v36 = vld [vmem:[#allocation10 + $0xea8] sm:$0xff] }
 0x4cb   :  { %9478 = vmatpush1.bf16.msra.mxu0 %v11188_v54  ;;  %9642 = vmatpush1.bf16.msra.mxu1 %v11190_v55  ;;  %v11215_v54 = vcombine.high %v6649_v27, %v6653_v28  ;;  %v6656_v55 = vld [vmem:[#allocation10 + $0xd00] sm:$0xff]  ;;  %v6693_v27 = vld [vmem:[#allocation10 + $0xe28] sm:$0xff] }
 0x4cc   :  { %9509 = vmatprep.mubr.bf16.mxu0 %v12094_v8  ;;  %9673 = vmatprep.mubr.bf16.mxu1 %v12094_v8  ;;  %v11221_v62 = vcombine.high %v6656_v55, %v6660_v29  ;;  %v11220_v20 = vcombine.low %v6656_v55, %v6660_v29  ;;  %v6087_v49 = vadd.f32 %v6086_v18, %v6085_v56  ;;  %v6700_v55 = vld [vmem:[#allocation10 + $0xe60] sm:$0xff]  ;;  %v6697_v29 = vld [vmem:[#allocation10 + $0xe48] sm:$0xff] }
 0x4cd   :  { %9479 = vmatprep.subr.bf16.mxu0 %v11197_v52  ;;  %9643 = vmatprep.subr.bf16.mxu1 %v11199_v59  ;;  %v6680_v52 = vld [vmem:[#allocation10 + $0xdc0] sm:$0xff]  ;;  %v11262_v56 = vcombine.low %v6697_v29, %v6701_v30  ;;  %v6713_v22 = vld [vmem:[#allocation10 + $0xec8] sm:$0xff] }
 0x4ce   :  { %v6684_v59 = vld [vmem:[#allocation10 + $0xde0] sm:$0xff]  ;;  %v6100_v28 = vmul.f32 0.125, %v6087_v49  ;;  %v6717_v47 = vld [vmem:[#allocation10 + $0xee8] sm:$0xff] }
 0x4cf   :  { %9480 = vmatpush1.bf16.msra.mxu0 %v11196_v7  ;;  %9644 = vmatpush1.bf16.msra.mxu1 %v11198_v11  ;;  %v11238_v7 = vcombine.low %v6673_v57, %v6677_v21  ;;  %v11245_v11 = vcombine.high %v6680_v52, %v6684_v59  ;;  %v11244_v17 = vcombine.low %v6680_v52, %v6684_v59  ;;  %v6725_v52 = vld [vmem:[#allocation10 + $0xf28] sm:$0xff] }
 0x4d0   :  { %9481 = vmatprep.subr.bf16.mxu0 %v11205_v13  ;;  %9645 = vmatprep.subr.bf16.mxu1 %v11207_v34  ;;  %v11247_v13 = vcombine.high %v6681_v31, %v6685_v63  ;;  %v6688_v34 = vld [vmem:[#allocation10 + $0xe00] sm:$0xff]  ;;  %v6108_v24 = vadd.f32 1e-05, %v6100_v28  ;;  %v11270_v21 = vcombine.low %v6705_v40, %v6709_v36 }
 0x4d1   :  { %v11252_v3 = vcombine.low %v6688_v34, %v6692_v14 }
 0x4d2   :  { %11475 = vrsqrt.f32 %v6108_v24 }
 0x4d3   :  { %9482 = vmatpush1.bf16.msra.mxu0 %v11204_v23  ;;  %9646 = vmatpush1.bf16.msra.mxu1 %v11206_v50  ;;  %v11246_v23 = vcombine.low %v6681_v31, %v6685_v63  ;;  %v11253_v50 = vcombine.high %v6688_v34, %v6692_v14  ;;  %v11278_v31 = vcombine.low %v6713_v22, %v6717_v47  ;;  %v6733_v34 = vld [vmem:[#allocation10 + $0xf68] sm:$0xff] }
 0x4d4   :  { %9483 = vmatprep.subr.bf16.mxu0 %v11213_v51  ;;  %9647 = vmatprep.subr.bf16.mxu1 %v11215_v54  ;;  %v11255_v51 = vcombine.high %v6689_v26, %v6693_v27  ;;  %v6696_v54 = vld [vmem:[#allocation10 + $0xe40] sm:$0xff]  ;;  %v6154_v14 = vrot.slane %v12065_v6, %v11949_v39  ;;  %v6203_v6 = vrot.slane %v12071_v33, %v11949_v39  ;;  %v6246_v33 = vld [vmem:[#allocation10 + $0x30] sm:$0xff] }
 0x4d5   :  { %v11260_v41 = vcombine.low %v6696_v54, %v6700_v55 }
 0x4d7   :  { %9484 = vmatpush1.bf16.msra.mxu0 %v11212_v60  ;;  %9648 = vmatpush1.bf16.msra.mxu1 %v11214_v61  ;;  %v11254_v60 = vcombine.low %v6689_v26, %v6693_v27  ;;  %v11261_v61 = vcombine.high %v6696_v54, %v6700_v55  ;;  %v6737_v54 = vld [vmem:[#allocation10 + $0xf88] sm:$0xff] }
 0x4d8   :  { %9485 = vmatprep.subr.bf16.mxu0 %v11221_v62  ;;  %9649 = vmatprep.subr.bf16.mxu1 %v11223_v25  ;;  %v11263_v62 = vcombine.high %v6697_v29, %v6701_v30  ;;  %v6704_v25 = vld [vmem:[#allocation10 + $0xe80] sm:$0xff]  ;;  %v6741_v55 = vld [vmem:[#allocation10 + $0xfa8] sm:$0xff] }
 0x4d9   :  { %v11268_v57 = vcombine.low %v6704_v25, %v6708_v4 }
 0x4db   :  { %9486 = vmatpush1.bf16.msra.mxu0 %v11220_v20  ;;  %9650 = vmatpush1.bf16.msra.mxu1 %v11222_v42  ;;  %v11269_v20 = vcombine.high %v6704_v25, %v6708_v4  ;;  %v11271_v42 = vcombine.high %v6705_v40, %v6709_v36  ;;  %v6749_v25 = vld [vmem:[#allocation10 + $0xfe8] sm:$0xff]  ;;  %v11302_v40 = vcombine.low %v6737_v54, %v6741_v55 }
 0x4dc   :  { %9487 = vmatprep.subr.bf16.mxu0 %v11229_v32  ;;  %9651 = vmatprep.subr.bf16.mxu1 %v11231_v10  ;;  %v6712_v32 = vld [vmem:[#allocation10 + $0xec0] sm:$0xff] }
 0x4dd   :  { %v6716_v10 = vld [vmem:[#allocation10 + $0xee0] sm:$0xff] }
 0x4de   :  { %v11277_v18 = vcombine.high %v6712_v32, %v6716_v10  ;;  %v11276_v59 = vcombine.low %v6712_v32, %v6716_v10  ;;  %v6247_v32 = vld [vmem:[#allocation10 + $0x38] sm:$0xff] }
 0x4df   :  { %9488 = vmatpush1.bf16.msra.mxu0 %v11228_v9  ;;  %9652 = vmatpush1.bf16.msra.mxu1 %v11230_v53  ;;  %v11279_v9 = vcombine.high %v6713_v22, %v6717_v47  ;;  %v6720_v53 = vld [vmem:[#allocation10 + $0xf00] sm:$0xff] }
 0x4e0   :  { %9489 = vmatprep.subr.bf16.mxu0 %v11237_v43  ;;  %9653 = vmatprep.subr.bf16.mxu1 %v11239_v58  ;;  %v6724_v43 = vld [vmem:[#allocation10 + $0xf20] sm:$0xff]  ;;  %v6721_v58 = vld [vmem:[#allocation10 + $0xf08] sm:$0xff] }
 0x4e1   :  { %v11285_v63 = vcombine.high %v6720_v53, %v6724_v43  ;;  %v11287_v49 = vcombine.high %v6721_v58, %v6725_v52  ;;  %v11284_v26 = vcombine.low %v6720_v53, %v6724_v43  ;;  %v11286_v27 = vcombine.low %v6721_v58, %v6725_v52  ;;  %v6251_v53 = vld [vmem:[#allocation10 + $0x58] sm:$0xff] }
 0x4e2   :  { %v6255_v43 = vld [vmem:[#allocation10 + $0x78] sm:$0xff] }
 0x4e3   :  { %9490 = vmatpush1.bf16.msra.mxu0 %v11236_v5  ;;  %9654 = vmatpush1.bf16.msra.mxu1 %v11238_v7  ;;  %v6728_v5 = vld [vmem:[#allocation10 + $0xf40] sm:$0xff]  ;;  %v11476_v7 = vpop.eup %11475 }
 0x4e4   :  { %9491 = vmatprep.subr.bf16.mxu0 %v11245_v11  ;;  %9655 = vmatprep.subr.bf16.mxu1 %v11247_v13  ;;  %v6732_v11 = vld [vmem:[#allocation10 + $0xf60] sm:$0xff]  ;;  %v6729_v13 = vld [vmem:[#allocation10 + $0xf48] sm:$0xff]  ;;  %v6124_v28 = vmul.f32 %v11476_v7, %v12082_v44  ;;  %v11303_v44 = vcombine.high %v6737_v54, %v6741_v55  ;;  %v6259_v7 = vld [vmem:[#allocation10 + $0x98] sm:$0xff] }
 0x4e5   :  { %v11292_v29 = vcombine.low %v6728_v5, %v6732_v11  ;;  %v11294_v30 = vcombine.low %v6729_v13, %v6733_v34 }
 0x4e6   :  { %v6173_v24 = vmul.f32 %v6154_v14, %v6124_v28  ;;  %v6270_v28 = vld [vmem:[#allocation10 + $0xf0] sm:$0xff] }
 0x4e7   :  { %9492 = vmatpush1.bf16.msra.mxu0 %v11244_v17  ;;  %9656 = vmatpush1.bf16.msra.mxu1 %v11246_v23  ;;  %v11293_v17 = vcombine.high %v6728_v5, %v6732_v11  ;;  %v11295_v23 = vcombine.high %v6729_v13, %v6733_v34  ;;  %v6262_v5 = vld [vmem:[#allocation10 + $0xb0] sm:$0xff]  ;;  %v6263_v11 = vld [vmem:[#allocation10 + $0xb8] sm:$0xff]  ;;  %v10818_v34 = vcombine.low %v6251_v53, %v6255_v43 }
 0x4e8   :  { %9493 = vmatprep.subr.bf16.mxu0 %v11253_v50  ;;  %9657 = vmatprep.subr.bf16.mxu1 %v11255_v51  ;;  %v6736_v50 = vld [vmem:[#allocation10 + $0xf80] sm:$0xff] }
 0x4e9   :  { %v6740_v51 = vld [vmem:[#allocation10 + $0xfa0] sm:$0xff] }
 0x4ea   :  { %v11300_v4 = vcombine.low %v6736_v50, %v6740_v51 }
 0x4eb   :  { %9494 = vmatpush1.bf16.msra.mxu0 %v11252_v3  ;;  %9658 = vmatpush1.bf16.msra.mxu1 %v11254_v60  ;;  %v11301_v3 = vcombine.high %v6736_v50, %v6740_v51  ;;  %v6744_v60 = vld [vmem:[#allocation10 + $0xfc0] sm:$0xff]  ;;  %v10826_v51 = vcombine.low %v6259_v7, %v6263_v11 }
 0x4ec   :  { %9495 = vmatprep.subr.bf16.mxu0 %v11261_v61  ;;  %9659 = vmatprep.subr.bf16.mxu1 %v11263_v62  ;;  %v6748_v61 = vld [vmem:[#allocation10 + $0xfe0] sm:$0xff]  ;;  %v6745_v62 = vld [vmem:[#allocation10 + $0xfc8] sm:$0xff] }
 0x4ed   :  { %v11309_v36 = vcombine.high %v6744_v60, %v6748_v61  ;;  %v11308_v10 = vcombine.low %v6744_v60, %v6748_v61  ;;  %v11310_v22 = vcombine.low %v6745_v62, %v6749_v25  ;;  %v6282_v61 = vld [vmem:[#allocation10 + $0x150] sm:$0xff] }
 0x4ef   :  { %9496 = vmatpush1.bf16.msra.mxu0 %v11260_v41  ;;  %9660 = vmatpush1.bf16.msra.mxu1 %v11262_v56  ;;  %v11311_v41 = vcombine.high %v6745_v62, %v6749_v25  ;;  %v6222_v56 = vadd.f32 %v6203_v6, %v6173_v24  ;;  %v6279_v6 = vld [vmem:[#allocation10 + $0x138] sm:$0xff]  ;;  %v6286_v62 = vld [vmem:[#allocation10 + $0x170] sm:$0xff] }
 0x4f0   :  { %9497 = vmatprep.subr.bf16.mxu0 %v11269_v20  ;;  %9661 = vmatprep.subr.bf16.mxu1 %v11271_v42  ;;  %v6242_v20 = vld [vmem:[#allocation10 + $0x10] sm:$0xff]  ;;  %v6243_v42 = vld [vmem:[#allocation10 + $0x18] sm:$0xff] }
 0x4f1   :  { %v6230_v47 = vmax.f32 %v6222_v56, 0.0  ;;  %v10808_v58 = vcombine.low %v6242_v20, %v6246_v33  ;;  %v6283_v25 = vld [vmem:[#allocation10 + $0x158] sm:$0xff] }
 0x4f3   :  { %9498 = vmatpush1.bf16.msra.mxu0 %v11268_v57  ;;  %9662 = vmatpush1.bf16.msra.mxu1 %v11270_v21  ;;  %v10809_v57 = vcombine.high %v6242_v20, %v6246_v33  ;;  %v10811_v21 = vcombine.high %v6243_v42, %v6247_v32  ;;  %v12109_v52 = vpack.c.bf16 %v6230_v47, %v6230_v47  ;;  %v6290_v20 = vld [vmem:[#allocation10 + $0x190] sm:$0xff] }
 0x4f4   :  { %9499 = vmatprep.subr.bf16.mxu0 %v11277_v18  ;;  %9663 = vmatprep.subr.bf16.mxu1 %v11279_v9  ;;  %v6250_v18 = vld [vmem:[#allocation10 + $0x50] sm:$0xff] }
 0x4f5   :  { %v6254_v9 = vld [vmem:[#allocation10 + $0x70] sm:$0xff] }
 0x4f6   :  { %v10816_v13 = vcombine.low %v6250_v18, %v6254_v9  ;;  %v6294_v33 = vld [vmem:[#allocation10 + $0x1b0] sm:$0xff] }
 0x4f7   :  { %9500 = vmatpush1.bf16.msra.mxu0 %v11276_v59  ;;  %9664 = vmatpush1.bf16.msra.mxu1 %v11278_v31  ;;  %v10810_v59 = vcombine.low %v6243_v42, %v6247_v32  ;;  %v10817_v31 = vcombine.high %v6250_v18, %v6254_v9  ;;  %v6291_v42 = vld [vmem:[#allocation10 + $0x198] sm:$0xff]  ;;  %v10857_v47 = vcombine.high %v6290_v20, %v6294_v33  ;;  %v6302_v18 = vld [vmem:[#allocation10 + $0x1f0] sm:$0xff] }
 0x4f8   :  { %9501 = vmatprep.subr.bf16.mxu0 %v11285_v63  ;;  %9665 = vmatprep.subr.bf16.mxu1 %v11287_v49  ;;  %v10819_v63 = vcombine.high %v6251_v53, %v6255_v43  ;;  %v6258_v49 = vld [vmem:[#allocation10 + $0x90] sm:$0xff]  ;;  %v6295_v32 = vld [vmem:[#allocation10 + $0x1b8] sm:$0xff]  ;;  %v10856_v43 = vcombine.low %v6290_v20, %v6294_v33 }
 0x4f9   :  { %v10825_v14 = vcombine.high %v6258_v49, %v6262_v5  ;;  %v10824_v50 = vcombine.low %v6258_v49, %v6262_v5  ;;  %v6299_v9 = vld [vmem:[#allocation10 + $0x1d8] sm:$0xff]  ;;  %v6310_v49 = vld [vmem:[#allocation10 + $0x230] sm:$0xff] }
 0x4fa   :  { %v6303_v53 = vld [vmem:[#allocation10 + $0x1f8] sm:$0xff]  ;;  %v6342_v20 = vld [vmem:[#allocation10 + $0x330] sm:$0xff] }
 0x4fb   :  { %9502 = vmatpush1.bf16.msra.mxu0 %v11284_v26  ;;  %9666 = vmatpush1.bf16.msra.mxu1 %v11286_v27  ;;  %v10827_v26 = vcombine.high %v6259_v7, %v6263_v11  ;;  %v6266_v27 = vld [vmem:[#allocation10 + $0xd0] sm:$0xff]  ;;  %v6307_v5 = vld [vmem:[#allocation10 + $0x218] sm:$0xff] }
 0x4fc   :  { %9503 = vmatprep.subr.bf16.mxu0 %v11293_v17  ;;  %9667 = vmatprep.subr.bf16.mxu1 %v11295_v23  ;;  %v6267_v17 = vld [vmem:[#allocation10 + $0xd8] sm:$0xff]  ;;  %v10833_v54 = vcombine.high %v6266_v27, %v6270_v28  ;;  %v10832_v24 = vcombine.low %v6266_v27, %v6270_v28  ;;  %v6318_v27 = vld [vmem:[#allocation10 + $0x270] sm:$0xff] }
 0x4fd   :  { %v6271_v23 = vld [vmem:[#allocation10 + $0xf8] sm:$0xff] }
 0x4fe   :  { %v10835_v55 = vcombine.high %v6267_v17, %v6271_v23  ;;  %v6311_v7 = vld [vmem:[#allocation10 + $0x238] sm:$0xff] }
 0x4ff   :  { %9504 = vmatpush1.bf16.msra.mxu0 %v11292_v29  ;;  %9668 = vmatpush1.bf16.msra.mxu1 %v11294_v30  ;;  %v6274_v29 = vld [vmem:[#allocation10 + $0x110] sm:$0xff]  ;;  %v6315_v28 = vld [vmem:[#allocation10 + $0x258] sm:$0xff] }
 0x500   :  { %9505 = vmatprep.subr.bf16.mxu0 %v11301_v3  ;;  %9669 = vmatprep.subr.bf16.mxu1 %v11303_v44  ;;  %v6278_v30 = vld [vmem:[#allocation10 + $0x130] sm:$0xff]  ;;  %v10834_v3 = vcombine.low %v6267_v17, %v6271_v23  ;;  %v6319_v17 = vld [vmem:[#allocation10 + $0x278] sm:$0xff] }
 0x501   :  { %v10841_v44 = vcombine.high %v6274_v29, %v6278_v30  ;;  %v6339_v33 = vld [vmem:[#allocation10 + $0x318] sm:$0xff] }
 0x503   :  { %9506 = vmatpush1.bf16.msra.mxu0 %v11300_v4  ;;  %9670 = vmatpush1.bf16.msra.mxu1 %v11302_v40  ;;  %v6287_v4 = vld [vmem:[#allocation10 + $0x178] sm:$0xff]  ;;  %v10840_v40 = vcombine.low %v6274_v29, %v6278_v30  ;;  %v6326_v29 = vld [vmem:[#allocation10 + $0x2b0] sm:$0xff] }
 0x504   :  { %9507 = vmatprep.subr.bf16.mxu0 %v11309_v36  ;;  %9671 = vmatprep.subr.bf16.mxu1 %v11311_v41  ;;  %v10849_v41 = vcombine.high %v6282_v61, %v6286_v62  ;;  %v10851_v56 = vcombine.high %v6283_v25, %v6287_v4  ;;  %v6323_v30 = vld [vmem:[#allocation10 + $0x298] sm:$0xff] }
 0x507   :  { %9508 = vmatpush1.bf16.msra.mxu0 %v11308_v10  ;;  %9672 = vmatpush1.bf16.msra.mxu1 %v11310_v22  ;;  %v10848_v10 = vcombine.low %v6282_v61, %v6286_v62  ;;  %v10850_v22 = vcombine.low %v6283_v25, %v6287_v4  ;;  %v6334_v61 = vld [vmem:[#allocation10 + $0x2f0] sm:$0xff]  ;;  %v6331_v62 = vld [vmem:[#allocation10 + $0x2d8] sm:$0xff] }
 0x508   :  { %9682 = vmatprep.subr.bf16.mxu0 %v10809_v57  ;;  %9846 = vmatprep.subr.bf16.mxu1 %v10811_v21  ;;  %v10859_v57 = vcombine.high %v6291_v42, %v6295_v32  ;;  %v6298_v21 = vld [vmem:[#allocation10 + $0x1d0] sm:$0xff]  ;;  %v6335_v25 = vld [vmem:[#allocation10 + $0x2f8] sm:$0xff] }
 0x509   :  { %v10864_v11 = vcombine.low %v6298_v21, %v6302_v18 }
 0x50a   :  { %9510 = vmatmul.mubr.bf16.vlgmr.msra.gmra.mrb[16].mxu0 %v12109_v52  ;;  %9674 = vmatmul.mubr.bf16.vlgmr.msra.gmra.mrb[16].mxu1 %v12109_v52 }
 0x50b   :  { %9683 = vmatpush1.bf16.msra.mxu0 %v10808_v58  ;;  %9714 = vmatprep.mubr.bf16.mxu0 %v12007_v46  ;;  %v10858_v58 = vcombine.low %v6291_v42, %v6295_v32  ;;  %v6343_v42 = vld [vmem:[#allocation10 + $0x338] sm:$0xff] }
 0x50c   :  { %9847 = vmatpush1.bf16.msra.mxu1 %v10810_v59  ;;  %9878 = vmatprep.mubr.bf16.mxu1 %v12007_v46  ;;  %v6275_v46 = vld [vmem:[#allocation10 + $0x118] sm:$0xff]  ;;  %v10865_v59 = vcombine.high %v6298_v21, %v6302_v18  ;;  %v6350_v21 = vld [vmem:[#allocation10 + $0x370] sm:$0xff] }
 0x50d   :  { %9684 = vmatprep.subr.bf16.mxu0 %v10817_v31  ;;  %9848 = vmatprep.subr.bf16.mxu1 %v10819_v63  ;;  %v10843_v60 = vcombine.high %v6275_v46, %v6279_v6  ;;  %v10842_v36 = vcombine.low %v6275_v46, %v6279_v6  ;;  %v10867_v31 = vcombine.high %v6299_v9, %v6303_v53  ;;  %v6306_v63 = vld [vmem:[#allocation10 + $0x210] sm:$0xff]  ;;  %v6327_v46 = vld [vmem:[#allocation10 + $0x2b8] sm:$0xff] }
 0x50e   :  { %v10872_v23 = vcombine.low %v6306_v63, %v6310_v49  ;;  %v6347_v18 = vld [vmem:[#allocation10 + $0x358] sm:$0xff] }
 0x50f   :  { %9685 = vmatpush1.bf16.msra.mxu0 %v10816_v13  ;;  %v10866_v13 = vcombine.low %v6299_v9, %v6303_v53  ;;  %v6351_v9 = vld [vmem:[#allocation10 + $0x378] sm:$0xff] }
 0x510   :  { %9849 = vmatpush1.bf16.msra.mxu1 %v10818_v34  ;;  %9686 = vmatprep.subr.bf16.mxu0 %v10825_v14  ;;  %v10873_v34 = vcombine.high %v6306_v63, %v6310_v49  ;;  %v10875_v14 = vcombine.high %v6307_v5, %v6311_v7  ;;  %v6358_v63 = vld [vmem:[#allocation10 + $0x3b0] sm:$0xff]  ;;  %v6355_v49 = vld [vmem:[#allocation10 + $0x398] sm:$0xff] }
 0x511   :  { %9850 = vmatprep.subr.bf16.mxu1 %v10827_v26  ;;  %v6314_v26 = vld [vmem:[#allocation10 + $0x250] sm:$0xff] }
 0x512   :  { %v10880_v6 = vcombine.low %v6314_v26, %v6318_v27 }
 0x513   :  { %9687 = vmatpush1.bf16.msra.mxu0 %v10824_v50  ;;  %v10874_v50 = vcombine.low %v6307_v5, %v6311_v7  ;;  %v6359_v5 = vld [vmem:[#allocation10 + $0x3b8] sm:$0xff] }
 0x514   :  { %9851 = vmatpush1.bf16.msra.mxu1 %v10826_v51  ;;  %9688 = vmatprep.subr.bf16.mxu0 %v10833_v54  ;;  %v10881_v51 = vcombine.high %v6314_v26, %v6318_v27  ;;  %v10883_v54 = vcombine.high %v6315_v28, %v6319_v17  ;;  %v6366_v26 = vld [vmem:[#allocation10 + $0x3f0] sm:$0xff]  ;;  %v6363_v27 = vld [vmem:[#allocation10 + $0x3d8] sm:$0xff] }
 0x515   :  { %9852 = vmatprep.subr.bf16.mxu1 %v10835_v55  ;;  %v6322_v55 = vld [vmem:[#allocation10 + $0x290] sm:$0xff] }
 0x516   :  { %v10888_v4 = vcombine.low %v6322_v55, %v6326_v29 }
 0x517   :  { %9689 = vmatpush1.bf16.msra.mxu0 %v10832_v24  ;;  %v10882_v24 = vcombine.low %v6315_v28, %v6319_v17  ;;  %v6367_v28 = vld [vmem:[#allocation10 + $0x3f8] sm:$0xff] }
 0x518   :  { %9853 = vmatpush1.bf16.msra.mxu1 %v10834_v3  ;;  %9690 = vmatprep.subr.bf16.mxu0 %v10841_v44  ;;  %v10889_v3 = vcombine.high %v6322_v55, %v6326_v29  ;;  %v10891_v44 = vcombine.high %v6323_v30, %v6327_v46  ;;  %v6374_v55 = vld [vmem:[#allocation10 + $0x430] sm:$0xff]  ;;  %v6371_v29 = vld [vmem:[#allocation10 + $0x418] sm:$0xff] }
 0x519   :  { %9854 = vmatprep.subr.bf16.mxu1 %v10843_v60  ;;  %v6330_v60 = vld [vmem:[#allocation10 + $0x2d0] sm:$0xff] }
 0x51a   :  { %v10896_v32 = vcombine.low %v6330_v60, %v6334_v61 }
 0x51b   :  { %9691 = vmatpush1.bf16.msra.mxu0 %v10840_v40  ;;  %v10890_v40 = vcombine.low %v6323_v30, %v6327_v46  ;;  %v6375_v30 = vld [vmem:[#allocation10 + $0x438] sm:$0xff] }
 0x51c   :  { %9855 = vmatpush1.bf16.msra.mxu1 %v10842_v36  ;;  %9692 = vmatprep.subr.bf16.mxu0 %v10849_v41  ;;  %v10897_v36 = vcombine.high %v6330_v60, %v6334_v61  ;;  %v10899_v41 = vcombine.high %v6331_v62, %v6335_v25  ;;  %v6382_v60 = vld [vmem:[#allocation10 + $0x470] sm:$0xff] }
 0x51d   :  { %9856 = vmatprep.subr.bf16.mxu1 %v10851_v56  ;;  %v6338_v56 = vld [vmem:[#allocation10 + $0x310] sm:$0xff] }
 0x51e   :  { %v10904_v53 = vcombine.low %v6338_v56, %v6342_v20 }
 0x51f   :  { %9693 = vmatpush1.bf16.msra.mxu0 %v10848_v10  ;;  %v10898_v10 = vcombine.low %v6331_v62, %v6335_v25  ;;  %v6379_v62 = vld [vmem:[#allocation10 + $0x458] sm:$0xff] }
 0x520   :  { %9857 = vmatpush1.bf16.msra.mxu1 %v10850_v22  ;;  %9694 = vmatprep.subr.bf16.mxu0 %v10857_v47  ;;  %v10905_v22 = vcombine.high %v6338_v56, %v6342_v20  ;;  %v10907_v47 = vcombine.high %v6339_v33, %v6343_v42  ;;  %v6383_v25 = vld [vmem:[#allocation10 + $0x478] sm:$0xff] }
 0x521   :  { %9858 = vmatprep.subr.bf16.mxu1 %v10859_v57  ;;  %v6346_v57 = vld [vmem:[#allocation10 + $0x350] sm:$0xff]  ;;  %v10947_v56 = vcombine.high %v6379_v62, %v6383_v25  ;;  %v6387_v20 = vld [vmem:[#allocation10 + $0x498] sm:$0xff] }
 0x522   :  { %v10912_v7 = vcombine.low %v6346_v57, %v6350_v21 }
 0x523   :  { %9695 = vmatpush1.bf16.msra.mxu0 %v10856_v43  ;;  %v10906_v43 = vcombine.low %v6339_v33, %v6343_v42  ;;  %v6391_v33 = vld [vmem:[#allocation10 + $0x4b8] sm:$0xff] }
 0x524   :  { %9859 = vmatpush1.bf16.msra.mxu1 %v10858_v58  ;;  %9696 = vmatprep.subr.bf16.mxu0 %v10865_v59  ;;  %v10913_v58 = vcombine.high %v6346_v57, %v6350_v21  ;;  %v10915_v59 = vcombine.high %v6347_v18, %v6351_v9  ;;  %v6398_v57 = vld [vmem:[#allocation10 + $0x4f0] sm:$0xff]  ;;  %v6395_v21 = vld [vmem:[#allocation10 + $0x4d8] sm:$0xff] }
 0x525   :  { %9860 = vmatprep.subr.bf16.mxu1 %v10867_v31  ;;  %v6354_v31 = vld [vmem:[#allocation10 + $0x390] sm:$0xff] }
 0x526   :  { %v10920_v17 = vcombine.low %v6354_v31, %v6358_v63 }
 0x527   :  { %9697 = vmatpush1.bf16.msra.mxu0 %v10864_v11  ;;  %v10914_v11 = vcombine.low %v6347_v18, %v6351_v9  ;;  %v6399_v18 = vld [vmem:[#allocation10 + $0x4f8] sm:$0xff] }
 0x528   :  { %9861 = vmatpush1.bf16.msra.mxu1 %v10866_v13  ;;  %9698 = vmatprep.subr.bf16.mxu0 %v10873_v34  ;;  %v10921_v13 = vcombine.high %v6354_v31, %v6358_v63  ;;  %v10923_v34 = vcombine.high %v6355_v49, %v6359_v5  ;;  %v6403_v31 = vld [vmem:[#allocation10 + $0x518] sm:$0xff] }
 0x529   :  { %9862 = vmatprep.subr.bf16.mxu1 %v10875_v14  ;;  %v6362_v14 = vld [vmem:[#allocation10 + $0x3d0] sm:$0xff]  ;;  %v6407_v63 = vld [vmem:[#allocation10 + $0x538] sm:$0xff] }
 0x52a   :  { %v10928_v46 = vcombine.low %v6362_v14, %v6366_v26 }
 0x52b   :  { %9699 = vmatpush1.bf16.msra.mxu0 %v10872_v23  ;;  %v10922_v23 = vcombine.low %v6355_v49, %v6359_v5  ;;  %v10962_v49 = vcombine.low %v6395_v21, %v6399_v18 }
 0x52c   :  { %9863 = vmatpush1.bf16.msra.mxu1 %v10874_v50  ;;  %9700 = vmatprep.subr.bf16.mxu0 %v10881_v51  ;;  %v10929_v50 = vcombine.high %v6362_v14, %v6366_v26  ;;  %v10931_v51 = vcombine.high %v6363_v27, %v6367_v28  ;;  %v6415_v14 = vld [vmem:[#allocation10 + $0x578] sm:$0xff] }
 0x52d   :  { %9864 = vmatprep.subr.bf16.mxu1 %v10883_v54  ;;  %v6370_v54 = vld [vmem:[#allocation10 + $0x410] sm:$0xff] }
 0x52e   :  { %v10936_v61 = vcombine.low %v6370_v54, %v6374_v55 }
 0x52f   :  { %9701 = vmatpush1.bf16.msra.mxu0 %v10880_v6  ;;  %v10930_v6 = vcombine.low %v6363_v27, %v6367_v28  ;;  %v10970_v27 = vcombine.low %v6403_v31, %v6407_v63 }
 0x530   :  { %9865 = vmatpush1.bf16.msra.mxu1 %v10882_v24  ;;  %9702 = vmatprep.subr.bf16.mxu0 %v10889_v3  ;;  %v10937_v24 = vcombine.high %v6370_v54, %v6374_v55  ;;  %v10939_v3 = vcombine.high %v6371_v29, %v6375_v30  ;;  %v6423_v54 = vld [vmem:[#allocation10 + $0x5b8] sm:$0xff] }
 0x531   :  { %9866 = vmatprep.subr.bf16.mxu1 %v10891_v44  ;;  %v6378_v44 = vld [vmem:[#allocation10 + $0x450] sm:$0xff] }
 0x532   :  { %v10944_v42 = vcombine.low %v6378_v44, %v6382_v60 }
 0x533   :  { %9703 = vmatpush1.bf16.msra.mxu0 %v10888_v4  ;;  %v10938_v4 = vcombine.low %v6371_v29, %v6375_v30 }
 0x534   :  { %9867 = vmatpush1.bf16.msra.mxu1 %v10890_v40  ;;  %9704 = vmatprep.subr.bf16.mxu0 %v10897_v36  ;;  %v10945_v40 = vcombine.high %v6378_v44, %v6382_v60  ;;  %v6386_v36 = vld [vmem:[#allocation10 + $0x490] sm:$0xff]  ;;  %v6431_v44 = vld [vmem:[#allocation10 + $0x5f8] sm:$0xff] }
 0x535   :  { %9868 = vmatprep.subr.bf16.mxu1 %v10899_v41  ;;  %v6390_v41 = vld [vmem:[#allocation10 + $0x4b0] sm:$0xff] }
 0x536   :  { %v10952_v9 = vcombine.low %v6386_v36, %v6390_v41 }
 0x537   :  { %9705 = vmatpush1.bf16.msra.mxu0 %v10896_v32  ;;  %v10946_v32 = vcombine.low %v6379_v62, %v6383_v25 }
 0x538   :  { %9869 = vmatpush1.bf16.msra.mxu1 %v10898_v10  ;;  %9706 = vmatprep.subr.bf16.mxu0 %v10905_v22  ;;  %v10953_v10 = vcombine.high %v6386_v36, %v6390_v41  ;;  %v10955_v22 = vcombine.high %v6387_v20, %v6391_v33  ;;  %v6435_v36 = vld [vmem:[#allocation10 + $0x618] sm:$0xff] }
 0x539   :  { %9870 = vmatprep.subr.bf16.mxu1 %v10907_v47  ;;  %v6394_v47 = vld [vmem:[#allocation10 + $0x4d0] sm:$0xff]  ;;  %v6439_v41 = vld [vmem:[#allocation10 + $0x638] sm:$0xff] }
 0x53b   :  { %9707 = vmatpush1.bf16.msra.mxu0 %v10904_v53  ;;  %v10961_v53 = vcombine.high %v6394_v47, %v6398_v57 }
 0x53c   :  { %9871 = vmatpush1.bf16.msra.mxu1 %v10906_v43  ;;  %9708 = vmatprep.subr.bf16.mxu0 %v10913_v58  ;;  %v10963_v43 = vcombine.high %v6395_v21, %v6399_v18  ;;  %v6402_v58 = vld [vmem:[#allocation10 + $0x510] sm:$0xff]  ;;  %v11002_v21 = vcombine.low %v6435_v36, %v6439_v41 }
 0x53d   :  { %9872 = vmatprep.subr.bf16.mxu1 %v10915_v59  ;;  %v6406_v59 = vld [vmem:[#allocation10 + $0x530] sm:$0xff] }
 0x53e   :  { %v10969_v5 = vcombine.high %v6402_v58, %v6406_v59  ;;  %v10968_v26 = vcombine.low %v6402_v58, %v6406_v59  ;;  %v6455_v58 = vld [vmem:[#allocation10 + $0x6b8] sm:$0xff] }
 0x53f   :  { %9709 = vmatpush1.bf16.msra.mxu0 %v10912_v7  ;;  %v10971_v7 = vcombine.high %v6403_v31, %v6407_v63 }
 0x540   :  { %9873 = vmatpush1.bf16.msra.mxu1 %v10914_v11  ;;  %9710 = vmatprep.subr.bf16.mxu0 %v10921_v13  ;;  %v6410_v11 = vld [vmem:[#allocation10 + $0x550] sm:$0xff] }
 0x541   :  { %9874 = vmatprep.subr.bf16.mxu1 %v10923_v34  ;;  %v6414_v13 = vld [vmem:[#allocation10 + $0x570] sm:$0xff]  ;;  %v6411_v34 = vld [vmem:[#allocation10 + $0x558] sm:$0xff] }
 0x542   :  { %v10977_v28 = vcombine.high %v6410_v11, %v6414_v13  ;;  %v10976_v55 = vcombine.low %v6410_v11, %v6414_v13  ;;  %v10978_v29 = vcombine.low %v6411_v34, %v6415_v14  ;;  %v6463_v11 = vld [vmem:[#allocation10 + $0x6f8] sm:$0xff] }
 0x543   :  { %9711 = vmatpush1.bf16.msra.mxu0 %v10920_v17  ;;  %v10979_v17 = vcombine.high %v6411_v34, %v6415_v14 }
 0x544   :  { %9875 = vmatpush1.bf16.msra.mxu1 %v10922_v23  ;;  %9712 = vmatprep.subr.bf16.mxu0 %v10929_v50  ;;  %v6418_v23 = vld [vmem:[#allocation10 + $0x590] sm:$0xff] }
 0x545   :  { %9876 = vmatprep.subr.bf16.mxu1 %v10931_v51  ;;  %v6422_v50 = vld [vmem:[#allocation10 + $0x5b0] sm:$0xff]  ;;  %v6419_v51 = vld [vmem:[#allocation10 + $0x598] sm:$0xff] }
 0x546   :  { %v10985_v30 = vcombine.high %v6418_v23, %v6422_v50  ;;  %v10984_v60 = vcombine.low %v6418_v23, %v6422_v50  ;;  %v6471_v23 = vld [vmem:[#allocation10 + $0x738] sm:$0xff] }
 0x547   :  { %9713 = vmatpush1.bf16.msra.mxu0 %v10928_v46  ;;  %v10987_v46 = vcombine.high %v6419_v51, %v6423_v54 }
 0x548   :  { %9877 = vmatpush1.bf16.msra.mxu1 %v10930_v6  ;;  %9723 = vmatprep.subr.bf16.mxu0 %v10937_v24  ;;  %v6426_v6 = vld [vmem:[#allocation10 + $0x5d0] sm:$0xff] }
 0x549   :  { %9887 = vmatprep.subr.bf16.mxu1 %v10939_v3  ;;  %v6430_v24 = vld [vmem:[#allocation10 + $0x5f0] sm:$0xff]  ;;  %v6427_v3 = vld [vmem:[#allocation10 + $0x5d8] sm:$0xff] }
 0x54a   :  { %9715 = vmatmul.mubr.bf16.vlgmr.msra.gmra.mrb[20].mxu0 %v12028_v35  ;;  %v10993_v62 = vcombine.high %v6426_v6, %v6430_v24  ;;  %v10995_v25 = vcombine.high %v6427_v3, %v6431_v44 }
 0x54b   :  { %9879 = vmatmul.mubr.bf16.vlgmr.msra.gmra.mrb[20].mxu1 %v12028_v35  ;;  %9724 = vmatpush1.bf16.msra.mxu0 %v10936_v61  ;;  %v10954_v35 = vcombine.low %v6387_v20, %v6391_v33  ;;  %v10986_v61 = vcombine.low %v6419_v51, %v6423_v54  ;;  %v10994_v20 = vcombine.low %v6427_v3, %v6431_v44 }
 0x54c   :  { %9755 = vmatprep.mubr.bf16.mxu0 %v12030_v37  ;;  %9888 = vmatpush1.bf16.msra.mxu1 %v10938_v4  ;;  %v6434_v4 = vld [vmem:[#allocation10 + $0x610] sm:$0xff] }
 0x54d   :  { %9919 = vmatprep.mubr.bf16.mxu1 %v12030_v37  ;;  %9725 = vmatprep.subr.bf16.mxu0 %v10945_v40  ;;  %v10960_v37 = vcombine.low %v6394_v47, %v6398_v57  ;;  %v6438_v40 = vld [vmem:[#allocation10 + $0x630] sm:$0xff]  ;;  %v6447_v47 = vld [vmem:[#allocation10 + $0x678] sm:$0xff] }
 0x54e   :  { %9889 = vmatprep.subr.bf16.mxu1 %v10947_v56  ;;  %v10992_v56 = vcombine.low %v6426_v6, %v6430_v24  ;;  %v11001_v33 = vcombine.high %v6434_v4, %v6438_v40  ;;  %v11000_v57 = vcombine.low %v6434_v4, %v6438_v40  ;;  %v6479_v6 = vld [vmem:[#allocation10 + $0x778] sm:$0xff] }
 0x54f   :  { %9726 = vmatpush1.bf16.msra.mxu0 %v10944_v42  ;;  %v11003_v42 = vcombine.high %v6435_v36, %v6439_v41  ;;  %v6487_v4 = vld [vmem:[#allocation10 + $0x7b8] sm:$0xff] }
 0x550   :  { %9890 = vmatpush1.bf16.msra.mxu1 %v10946_v32  ;;  %9727 = vmatprep.subr.bf16.mxu0 %v10953_v10  ;;  %v6442_v32 = vld [vmem:[#allocation10 + $0x650] sm:$0xff] }
 0x551   :  { %9891 = vmatprep.subr.bf16.mxu1 %v10955_v22  ;;  %v6446_v10 = vld [vmem:[#allocation10 + $0x670] sm:$0xff]  ;;  %v6443_v22 = vld [vmem:[#allocation10 + $0x658] sm:$0xff] }
 0x552   :  { %v11009_v18 = vcombine.high %v6442_v32, %v6446_v10  ;;  %v11008_v59 = vcombine.low %v6442_v32, %v6446_v10  ;;  %v11010_v31 = vcombine.low %v6443_v22, %v6447_v47  ;;  %v6495_v32 = vld [vmem:[#allocation10 + $0x7f8] sm:$0xff] }
 0x553   :  { %9728 = vmatpush1.bf16.msra.mxu0 %v10952_v9  ;;  %v11011_v9 = vcombine.high %v6443_v22, %v6447_v47 }
 0x554   :  { %9892 = vmatpush1.bf16.msra.mxu1 %v10954_v35  ;;  %9729 = vmatprep.subr.bf16.mxu0 %v10961_v53  ;;  %v6450_v35 = vld [vmem:[#allocation10 + $0x690] sm:$0xff] }
 0x555   :  { %9893 = vmatprep.subr.bf16.mxu1 %v10963_v43  ;;  %v6454_v53 = vld [vmem:[#allocation10 + $0x6b0] sm:$0xff]  ;;  %v6451_v43 = vld [vmem:[#allocation10 + $0x698] sm:$0xff] }
 0x556   :  { %v11017_v63 = vcombine.high %v6450_v35, %v6454_v53  ;;  %v11016_v13 = vcombine.low %v6450_v35, %v6454_v53  ;;  %v11018_v34 = vcombine.low %v6451_v43, %v6455_v58  ;;  %v6503_v35 = vld [vmem:[#allocation10 + $0x838] sm:$0xff] }
 0x557   :  { %9730 = vmatpush1.bf16.msra.mxu0 %v10960_v37  ;;  %v11019_v37 = vcombine.high %v6451_v43, %v6455_v58 }
 0x558   :  { %9894 = vmatpush1.bf16.msra.mxu1 %v10962_v49  ;;  %9731 = vmatprep.subr.bf16.mxu0 %v10969_v5  ;;  %v6458_v49 = vld [vmem:[#allocation10 + $0x6d0] sm:$0xff] }
 0x559   :  { %9895 = vmatprep.subr.bf16.mxu1 %v10971_v7  ;;  %v6462_v5 = vld [vmem:[#allocation10 + $0x6f0] sm:$0xff]  ;;  %v6459_v7 = vld [vmem:[#allocation10 + $0x6d8] sm:$0xff] }
 0x55a   :  { %v11025_v14 = vcombine.high %v6458_v49, %v6462_v5  ;;  %v11024_v50 = vcombine.low %v6458_v49, %v6462_v5  ;;  %v11026_v51 = vcombine.low %v6459_v7, %v6463_v11  ;;  %v6507_v49 = vld [vmem:[#allocation10 + $0x858] sm:$0xff] }
 0x55b   :  { %9732 = vmatpush1.bf16.msra.mxu0 %v10968_v26  ;;  %v11027_v26 = vcombine.high %v6459_v7, %v6463_v11  ;;  %v6511_v5 = vld [vmem:[#allocation10 + $0x878] sm:$0xff] }
 0x55c   :  { %9896 = vmatpush1.bf16.msra.mxu1 %v10970_v27  ;;  %9733 = vmatprep.subr.bf16.mxu0 %v10977_v28  ;;  %v6466_v27 = vld [vmem:[#allocation10 + $0x710] sm:$0xff] }
 0x55d   :  { %9897 = vmatprep.subr.bf16.mxu1 %v10979_v17  ;;  %v6470_v28 = vld [vmem:[#allocation10 + $0x730] sm:$0xff]  ;;  %v6467_v17 = vld [vmem:[#allocation10 + $0x718] sm:$0xff] }
 0x55e   :  { %v11033_v54 = vcombine.high %v6466_v27, %v6470_v28  ;;  %v11032_v24 = vcombine.low %v6466_v27, %v6470_v28  ;;  %v11034_v3 = vcombine.low %v6467_v17, %v6471_v23  ;;  %v6519_v27 = vld [vmem:[#allocation10 + $0x8b8] sm:$0xff] }
 0x55f   :  { %9734 = vmatpush1.bf16.msra.mxu0 %v10976_v55  ;;  %v11035_v55 = vcombine.high %v6467_v17, %v6471_v23  ;;  %v11074_v17 = vcombine.low %v6507_v49, %v6511_v5 }
 0x560   :  { %9898 = vmatpush1.bf16.msra.mxu1 %v10978_v29  ;;  %9735 = vmatprep.subr.bf16.mxu0 %v10985_v30  ;;  %v6474_v29 = vld [vmem:[#allocation10 + $0x750] sm:$0xff] }
 0x561   :  { %9899 = vmatprep.subr.bf16.mxu1 %v10987_v46  ;;  %v6478_v30 = vld [vmem:[#allocation10 + $0x770] sm:$0xff]  ;;  %v6475_v46 = vld [vmem:[#allocation10 + $0x758] sm:$0xff] }
 0x562   :  { %v11041_v44 = vcombine.high %v6474_v29, %v6478_v30  ;;  %v11040_v40 = vcombine.low %v6474_v29, %v6478_v30  ;;  %v11042_v36 = vcombine.low %v6475_v46, %v6479_v6  ;;  %v6527_v29 = vld [vmem:[#allocation10 + $0x8f8] sm:$0xff] }
 0x563   :  { %9736 = vmatpush1.bf16.msra.mxu0 %v10984_v60  ;;  %v11043_v60 = vcombine.high %v6475_v46, %v6479_v6 }
 0x564   :  { %9900 = vmatpush1.bf16.msra.mxu1 %v10986_v61  ;;  %9737 = vmatprep.subr.bf16.mxu0 %v10993_v62  ;;  %v6482_v61 = vld [vmem:[#allocation10 + $0x790] sm:$0xff] }
 0x565   :  { %9901 = vmatprep.subr.bf16.mxu1 %v10995_v25  ;;  %v6486_v62 = vld [vmem:[#allocation10 + $0x7b0] sm:$0xff]  ;;  %v6483_v25 = vld [vmem:[#allocation10 + $0x798] sm:$0xff] }
 0x566   :  { %v11049_v41 = vcombine.high %v6482_v61, %v6486_v62  ;;  %v11048_v10 = vcombine.low %v6482_v61, %v6486_v62  ;;  %v11050_v22 = vcombine.low %v6483_v25, %v6487_v4 }
 0x567   :  { %9738 = vmatpush1.bf16.msra.mxu0 %v10992_v56  ;;  %v11051_v56 = vcombine.high %v6483_v25, %v6487_v4  ;;  %v6538_v4 = vld [vmem:[#allocation10 + $0x950] sm:$0xff] }
 0x568   :  { %9902 = vmatpush1.bf16.msra.mxu1 %v10994_v20  ;;  %9739 = vmatprep.subr.bf16.mxu0 %v11001_v33  ;;  %v6490_v20 = vld [vmem:[#allocation10 + $0x7d0] sm:$0xff] }
 0x569   :  { %9903 = vmatprep.subr.bf16.mxu1 %v11003_v42  ;;  %v6494_v33 = vld [vmem:[#allocation10 + $0x7f0] sm:$0xff]  ;;  %v6491_v42 = vld [vmem:[#allocation10 + $0x7d8] sm:$0xff] }
 0x56a   :  { %v11057_v47 = vcombine.high %v6490_v20, %v6494_v33  ;;  %v11056_v53 = vcombine.low %v6490_v20, %v6494_v33  ;;  %v11058_v43 = vcombine.low %v6491_v42, %v6495_v32 }
 0x56b   :  { %9740 = vmatpush1.bf16.msra.mxu0 %v11000_v57  ;;  %v11059_v57 = vcombine.high %v6491_v42, %v6495_v32  ;;  %v6546_v32 = vld [vmem:[#allocation10 + $0x990] sm:$0xff] }
 0x56c   :  { %9904 = vmatpush1.bf16.msra.mxu1 %v11002_v21  ;;  %9741 = vmatprep.subr.bf16.mxu0 %v11009_v18  ;;  %v6498_v21 = vld [vmem:[#allocation10 + $0x810] sm:$0xff] }
 0x56d   :  { %9905 = vmatprep.subr.bf16.mxu1 %v11011_v9  ;;  %v6502_v18 = vld [vmem:[#allocation10 + $0x830] sm:$0xff]  ;;  %v6499_v9 = vld [vmem:[#allocation10 + $0x818] sm:$0xff] }
 0x56e   :  { %v11065_v58 = vcombine.high %v6498_v21, %v6502_v18  ;;  %v11066_v7 = vcombine.low %v6499_v9, %v6503_v35 }
 0x56f   :  { %9742 = vmatpush1.bf16.msra.mxu0 %v11008_v59  ;;  %v11067_v59 = vcombine.high %v6499_v9, %v6503_v35  ;;  %v6554_v35 = vld [vmem:[#allocation10 + $0x9d0] sm:$0xff] }
 0x570   :  { %9906 = vmatpush1.bf16.msra.mxu1 %v11010_v31  ;;  %9743 = vmatprep.subr.bf16.mxu0 %v11017_v63  ;;  %v6506_v31 = vld [vmem:[#allocation10 + $0x850] sm:$0xff] }
 0x571   :  { %9907 = vmatprep.subr.bf16.mxu1 %v11019_v37  ;;  %v6510_v63 = vld [vmem:[#allocation10 + $0x870] sm:$0xff]  ;;  %v11064_v37 = vcombine.low %v6498_v21, %v6502_v18 }
 0x572   :  { %v11073_v11 = vcombine.high %v6506_v31, %v6510_v63  ;;  %v11072_v28 = vcombine.low %v6506_v31, %v6510_v63 }
 0x573   :  { %9744 = vmatpush1.bf16.msra.mxu0 %v11016_v13  ;;  %v6514_v13 = vld [vmem:[#allocation10 + $0x890] sm:$0xff] }
 0x574   :  { %9908 = vmatpush1.bf16.msra.mxu1 %v11018_v34  ;;  %9745 = vmatprep.subr.bf16.mxu0 %v11025_v14  ;;  %v6518_v34 = vld [vmem:[#allocation10 + $0x8b0] sm:$0xff]  ;;  %v11075_v14 = vcombine.high %v6507_v49, %v6511_v5 }
 0x575   :  { %9909 = vmatprep.subr.bf16.mxu1 %v11027_v26  ;;  %v6515_v26 = vld [vmem:[#allocation10 + $0x898] sm:$0xff]  ;;  %v11081_v23 = vcombine.high %v6514_v13, %v6518_v34  ;;  %v11080_v30 = vcombine.low %v6514_v13, %v6518_v34  ;;  %v6562_v49 = vld [vmem:[#allocation10 + $0xa10] sm:$0xff] }
 0x576   :  { %v6566_v5 = vld [vmem:[#allocation10 + $0xa30] sm:$0xff] }
 0x577   :  { %9746 = vmatpush1.bf16.msra.mxu0 %v11024_v50  ;;  %v11083_v50 = vcombine.high %v6515_v26, %v6519_v27 }
 0x578   :  { %9910 = vmatpush1.bf16.msra.mxu1 %v11026_v51  ;;  %9747 = vmatprep.subr.bf16.mxu0 %v11033_v54  ;;  %v6522_v51 = vld [vmem:[#allocation10 + $0x8d0] sm:$0xff] }
 0x579   :  { %9911 = vmatprep.subr.bf16.mxu1 %v11035_v55  ;;  %v6526_v54 = vld [vmem:[#allocation10 + $0x8f0] sm:$0xff]  ;;  %v6523_v55 = vld [vmem:[#allocation10 + $0x8d8] sm:$0xff] }
 0x57a   :  { %v11089_v46 = vcombine.high %v6522_v51, %v6526_v54  ;;  %v11091_v6 = vcombine.high %v6523_v55, %v6527_v29  ;;  %v11090_v61 = vcombine.low %v6523_v55, %v6527_v29  ;;  %v6578_v29 = vld [vmem:[#allocation10 + $0xa90] sm:$0xff] }
 0x57b   :  { %9748 = vmatpush1.bf16.msra.mxu0 %v11032_v24  ;;  %v6530_v24 = vld [vmem:[#allocation10 + $0x910] sm:$0xff] }
 0x57c   :  { %9912 = vmatpush1.bf16.msra.mxu1 %v11034_v3  ;;  %9749 = vmatprep.subr.bf16.mxu0 %v11041_v44  ;;  %v6534_v3 = vld [vmem:[#allocation10 + $0x930] sm:$0xff]  ;;  %v6531_v44 = vld [vmem:[#allocation10 + $0x918] sm:$0xff] }
 0x57d   :  { %9913 = vmatprep.subr.bf16.mxu1 %v11043_v60  ;;  %v6535_v60 = vld [vmem:[#allocation10 + $0x938] sm:$0xff]  ;;  %v11097_v62 = vcombine.high %v6530_v24, %v6534_v3 }
 0x57e   :  { %v11099_v25 = vcombine.high %v6531_v44, %v6535_v60  ;;  %v11098_v20 = vcombine.low %v6531_v44, %v6535_v60  ;;  %v6586_v60 = vld [vmem:[#allocation10 + $0xad0] sm:$0xff] }
 0x57f   :  { %9750 = vmatpush1.bf16.msra.mxu0 %v11040_v40  ;;  %v6542_v40 = vld [vmem:[#allocation10 + $0x970] sm:$0xff] }
 0x580   :  { %9914 = vmatpush1.bf16.msra.mxu1 %v11042_v36  ;;  %9751 = vmatprep.subr.bf16.mxu0 %v11049_v41  ;;  %v6539_v36 = vld [vmem:[#allocation10 + $0x958] sm:$0xff]  ;;  %v11105_v33 = vcombine.high %v6538_v4, %v6542_v40 }
 0x581   :  { %9915 = vmatprep.subr.bf16.mxu1 %v11051_v56  ;;  %v6543_v41 = vld [vmem:[#allocation10 + $0x978] sm:$0xff]  ;;  %v11096_v56 = vcombine.low %v6530_v24, %v6534_v3 }
 0x582   :  { %v11107_v42 = vcombine.high %v6539_v36, %v6543_v41  ;;  %v11106_v21 = vcombine.low %v6539_v36, %v6543_v41  ;;  %v6594_v41 = vld [vmem:[#allocation10 + $0xb10] sm:$0xff] }
 0x583   :  { %9752 = vmatpush1.bf16.msra.mxu0 %v11048_v10  ;;  %v6550_v10 = vld [vmem:[#allocation10 + $0x9b0] sm:$0xff] }
 0x584   :  { %9916 = vmatpush1.bf16.msra.mxu1 %v11050_v22  ;;  %9753 = vmatprep.subr.bf16.mxu0 %v11057_v47  ;;  %v6547_v22 = vld [vmem:[#allocation10 + $0x998] sm:$0xff]  ;;  %v11113_v18 = vcombine.high %v6546_v32, %v6550_v10 }
 0x585   :  { %9917 = vmatprep.subr.bf16.mxu1 %v11059_v57  ;;  %v6551_v47 = vld [vmem:[#allocation10 + $0x9b8] sm:$0xff]  ;;  %v11104_v57 = vcombine.low %v6538_v4, %v6542_v40 }
 0x586   :  { %v11115_v9 = vcombine.high %v6547_v22, %v6551_v47  ;;  %v11114_v31 = vcombine.low %v6547_v22, %v6551_v47  ;;  %v6602_v47 = vld [vmem:[#allocation10 + $0xb50] sm:$0xff] }
 0x587   :  { %9754 = vmatpush1.bf16.msra.mxu0 %v11056_v53  ;;  %v6558_v53 = vld [vmem:[#allocation10 + $0x9f0] sm:$0xff] }
 0x588   :  { %9918 = vmatpush1.bf16.msra.mxu1 %v11058_v43  ;;  %9764 = vmatprep.subr.bf16.mxu0 %v11065_v58  ;;  %v6555_v43 = vld [vmem:[#allocation10 + $0x9d8] sm:$0xff]  ;;  %v11121_v63 = vcombine.high %v6554_v35, %v6558_v53  ;;  %v11120_v13 = vcombine.low %v6554_v35, %v6558_v53 }
 0x589   :  { %9928 = vmatprep.subr.bf16.mxu1 %v11067_v59  ;;  %v6559_v58 = vld [vmem:[#allocation10 + $0x9f8] sm:$0xff]  ;;  %v11112_v59 = vcombine.low %v6546_v32, %v6550_v10 }
 0x58a   :  { %9756 = vmatmul.mubr.bf16.vlgmr.msra.gmra.mrb[20].mxu0 %v12041_v16  ;;  %v11122_v34 = vcombine.low %v6555_v43, %v6559_v58 }
 0x58b   :  { %9920 = vmatmul.mubr.bf16.vlgmr.msra.gmra.mrb[20].mxu1 %v12041_v16  ;;  %9765 = vmatpush1.bf16.msra.mxu0 %v11064_v37  ;;  %v11082_v16 = vcombine.low %v6515_v26, %v6519_v27  ;;  %v11123_v37 = vcombine.high %v6555_v43, %v6559_v58  ;;  %v6570_v27 = vld [vmem:[#allocation10 + $0xa50] sm:$0xff] }
 0x58c   :  { %9796 = vmatprep.mubr.bf16.mxu0 %v12086_v38  ;;  %9929 = vmatpush1.bf16.msra.mxu1 %v11066_v7  ;;  %v6563_v7 = vld [vmem:[#allocation10 + $0xa18] sm:$0xff]  ;;  %v6610_v58 = vld [vmem:[#allocation10 + $0xb90] sm:$0xff] }
 0x58d   :  { %9960 = vmatprep.mubr.bf16.mxu1 %v12086_v38  ;;  %9766 = vmatprep.subr.bf16.mxu0 %v11073_v11  ;;  %v11088_v38 = vcombine.low %v6522_v51, %v6526_v54  ;;  %v6567_v11 = vld [vmem:[#allocation10 + $0xa38] sm:$0xff] }
 0x58e   :  { %9930 = vmatprep.subr.bf16.mxu1 %v11075_v14  ;;  %v11129_v14 = vcombine.high %v6562_v49, %v6566_v5  ;;  %v11131_v26 = vcombine.high %v6563_v7, %v6567_v11  ;;  %v11130_v51 = vcombine.low %v6563_v7, %v6567_v11  ;;  %v6618_v11 = vld [vmem:[#allocation10 + $0xbd0] sm:$0xff] }
 0x58f   :  { %9767 = vmatpush1.bf16.msra.mxu0 %v11072_v28  ;;  %v6574_v28 = vld [vmem:[#allocation10 + $0xa70] sm:$0xff] }
 0x590   :  { %9931 = vmatpush1.bf16.msra.mxu1 %v11074_v17  ;;  %9768 = vmatprep.subr.bf16.mxu0 %v11081_v23  ;;  %v6571_v17 = vld [vmem:[#allocation10 + $0xa58] sm:$0xff]  ;;  %v11137_v54 = vcombine.high %v6570_v27, %v6574_v28 }
 0x591   :  { %9932 = vmatprep.subr.bf16.mxu1 %v11083_v50  ;;  %v6575_v23 = vld [vmem:[#allocation10 + $0xa78] sm:$0xff]  ;;  %v11128_v50 = vcombine.low %v6562_v49, %v6566_v5 }
 0x592   :  { %v11139_v55 = vcombine.high %v6571_v17, %v6575_v23  ;;  %v11138_v24 = vcombine.low %v6571_v17, %v6575_v23  ;;  %v6626_v23 = vld [vmem:[#allocation10 + $0xc10] sm:$0xff] }
 0x593   :  { %9769 = vmatpush1.bf16.msra.mxu0 %v11080_v30  ;;  %v6582_v30 = vld [vmem:[#allocation10 + $0xab0] sm:$0xff] }
 0x594   :  { %9933 = vmatpush1.bf16.msra.mxu1 %v11082_v16  ;;  %9770 = vmatprep.subr.bf16.mxu0 %v11089_v46  ;;  %v6579_v16 = vld [vmem:[#allocation10 + $0xa98] sm:$0xff]  ;;  %v11145_v3 = vcombine.high %v6578_v29, %v6582_v30 }
 0x595   :  { %9934 = vmatprep.subr.bf16.mxu1 %v11091_v6  ;;  %v6583_v46 = vld [vmem:[#allocation10 + $0xab8] sm:$0xff]  ;;  %v11136_v6 = vcombine.low %v6570_v27, %v6574_v28 }
 0x596   :  { %v11147_v44 = vcombine.high %v6579_v16, %v6583_v46  ;;  %v11146_v4 = vcombine.low %v6579_v16, %v6583_v46  ;;  %v6634_v46 = vld [vmem:[#allocation10 + $0xc50] sm:$0xff] }
 0x597   :  { %9771 = vmatpush1.bf16.msra.mxu0 %v11088_v38  ;;  %v6590_v38 = vld [vmem:[#allocation10 + $0xaf0] sm:$0xff] }
 0x598   :  { %9935 = vmatpush1.bf16.msra.mxu1 %v11090_v61  ;;  %9772 = vmatprep.subr.bf16.mxu0 %v11097_v62  ;;  %v6587_v61 = vld [vmem:[#allocation10 + $0xad8] sm:$0xff]  ;;  %v11153_v40 = vcombine.high %v6586_v60, %v6590_v38 }
 0x599   :  { %9936 = vmatprep.subr.bf16.mxu1 %v11099_v25  ;;  %v6591_v62 = vld [vmem:[#allocation10 + $0xaf8] sm:$0xff]  ;;  %v11144_v25 = vcombine.low %v6578_v29, %v6582_v30 }
 0x59a   :  { %v11155_v36 = vcombine.high %v6587_v61, %v6591_v62  ;;  %v11154_v32 = vcombine.low %v6587_v61, %v6591_v62  ;;  %v6642_v61 = vld [vmem:[#allocation10 + $0xc90] sm:$0xff] }
 0x59b   :  { %9773 = vmatpush1.bf16.msra.mxu0 %v11096_v56  ;;  %v6598_v56 = vld [vmem:[#allocation10 + $0xb30] sm:$0xff] }
 0x59c   :  { %9937 = vmatpush1.bf16.msra.mxu1 %v11098_v20  ;;  %9774 = vmatprep.subr.bf16.mxu0 %v11105_v33  ;;  %v6595_v20 = vld [vmem:[#allocation10 + $0xb18] sm:$0xff]  ;;  %v11161_v10 = vcombine.high %v6594_v41, %v6598_v56  ;;  %v6646_v62 = vld [vmem:[#allocation10 + $0xcb0] sm:$0xff] }
 0x59d   :  { %9938 = vmatprep.subr.bf16.mxu1 %v11107_v42  ;;  %v6599_v33 = vld [vmem:[#allocation10 + $0xb38] sm:$0xff]  ;;  %v11152_v42 = vcombine.low %v6586_v60, %v6590_v38 }
 0x59e   :  { %v11163_v22 = vcombine.high %v6595_v20, %v6599_v33  ;;  %v11162_v35 = vcombine.low %v6595_v20, %v6599_v33  ;;  %v6650_v33 = vld [vmem:[#allocation10 + $0xcd0] sm:$0xff] }
 0x59f   :  { %9775 = vmatpush1.bf16.msra.mxu0 %v11104_v57  ;;  %v6606_v57 = vld [vmem:[#allocation10 + $0xb70] sm:$0xff] }
 0x5a0   :  { %9939 = vmatpush1.bf16.msra.mxu1 %v11106_v21  ;;  %9776 = vmatprep.subr.bf16.mxu0 %v11113_v18  ;;  %v6603_v21 = vld [vmem:[#allocation10 + $0xb58] sm:$0xff]  ;;  %v11169_v53 = vcombine.high %v6602_v47, %v6606_v57 }
 0x5a1   :  { %9940 = vmatprep.subr.bf16.mxu1 %v11115_v9  ;;  %v6607_v18 = vld [vmem:[#allocation10 + $0xb78] sm:$0xff]  ;;  %v11160_v9 = vcombine.low %v6594_v41, %v6598_v56  ;;  %v11209_v56 = vcombine.high %v6642_v61, %v6646_v62 }
 0x5a2   :  { %v11171_v43 = vcombine.high %v6603_v21, %v6607_v18  ;;  %v11170_v49 = vcombine.low %v6603_v21, %v6607_v18  ;;  %v6658_v21 = vld [vmem:[#allocation10 + $0xd10] sm:$0xff] }
 0x5a3   :  { %9777 = vmatpush1.bf16.msra.mxu0 %v11112_v59  ;;  %v6614_v59 = vld [vmem:[#allocation10 + $0xbb0] sm:$0xff] }
 0x5a4   :  { %9941 = vmatpush1.bf16.msra.mxu1 %v11114_v31  ;;  %9778 = vmatprep.subr.bf16.mxu0 %v11121_v63  ;;  %v6611_v31 = vld [vmem:[#allocation10 + $0xb98] sm:$0xff]  ;;  %v11177_v5 = vcombine.high %v6610_v58, %v6614_v59  ;;  %v6662_v18 = vld [vmem:[#allocation10 + $0xd30] sm:$0xff] }
 0x5a5   :  { %9942 = vmatprep.subr.bf16.mxu1 %v11123_v37  ;;  %v6615_v63 = vld [vmem:[#allocation10 + $0xbb8] sm:$0xff]  ;;  %v11168_v37 = vcombine.low %v6602_v47, %v6606_v57 }
 0x5a6   :  { %v11179_v7 = vcombine.high %v6611_v31, %v6615_v63  ;;  %v11178_v27 = vcombine.low %v6611_v31, %v6615_v63  ;;  %v6670_v31 = vld [vmem:[#allocation10 + $0xd70] sm:$0xff]  ;;  %v6667_v63 = vld [vmem:[#allocation10 + $0xd58] sm:$0xff] }
 0x5a7   :  { %9779 = vmatpush1.bf16.msra.mxu0 %v11120_v13  ;;  %v6622_v13 = vld [vmem:[#allocation10 + $0xbf0] sm:$0xff] }
 0x5a8   :  { %9943 = vmatpush1.bf16.msra.mxu1 %v11122_v34  ;;  %9780 = vmatprep.subr.bf16.mxu0 %v11129_v14  ;;  %v6619_v34 = vld [vmem:[#allocation10 + $0xbd8] sm:$0xff]  ;;  %v11185_v28 = vcombine.high %v6618_v11, %v6622_v13 }
 0x5a9   :  { %9944 = vmatprep.subr.bf16.mxu1 %v11131_v26  ;;  %v6623_v14 = vld [vmem:[#allocation10 + $0xbf8] sm:$0xff]  ;;  %v11176_v26 = vcombine.low %v6610_v58, %v6614_v59  ;;  %v6666_v59 = vld [vmem:[#allocation10 + $0xd50] sm:$0xff] }
 0x5aa   :  { %v11187_v17 = vcombine.high %v6619_v34, %v6623_v14  ;;  %v11186_v29 = vcombine.low %v6619_v34, %v6623_v14  ;;  %v6674_v34 = vld [vmem:[#allocation10 + $0xd90] sm:$0xff] }
 0x5ab   :  { %9781 = vmatpush1.bf16.msra.mxu0 %v11128_v50  ;;  %v6630_v50 = vld [vmem:[#allocation10 + $0xc30] sm:$0xff] }
 0x5ac   :  { %9945 = vmatpush1.bf16.msra.mxu1 %v11130_v51  ;;  %9782 = vmatprep.subr.bf16.mxu0 %v11137_v54  ;;  %v6627_v51 = vld [vmem:[#allocation10 + $0xc18] sm:$0xff]  ;;  %v11193_v30 = vcombine.high %v6626_v23, %v6630_v50  ;;  %v6678_v14 = vld [vmem:[#allocation10 + $0xdb0] sm:$0xff] }
 0x5ad   :  { %9946 = vmatprep.subr.bf16.mxu1 %v11139_v55  ;;  %v6631_v54 = vld [vmem:[#allocation10 + $0xc38] sm:$0xff]  ;;  %v11184_v55 = vcombine.low %v6618_v11, %v6622_v13  ;;  %v11233_v11 = vcombine.high %v6666_v59, %v6670_v31 }
 0x5ae   :  { %v11195_v16 = vcombine.high %v6627_v51, %v6631_v54  ;;  %v11194_v60 = vcombine.low %v6627_v51, %v6631_v54  ;;  %v11232_v51 = vcombine.low %v6666_v59, %v6670_v31  ;;  %v6707_v59 = vld [vmem:[#allocation10 + $0xe98] sm:$0xff] }
 0x5af   :  { %9783 = vmatpush1.bf16.msra.mxu0 %v11136_v6  ;;  %v6638_v6 = vld [vmem:[#allocation10 + $0xc70] sm:$0xff]  ;;  %v6711_v31 = vld [vmem:[#allocation10 + $0xeb8] sm:$0xff] }
 0x5b0   :  { %9947 = vmatpush1.bf16.msra.mxu1 %v11138_v24  ;;  %9784 = vmatprep.subr.bf16.mxu0 %v11145_v3  ;;  %v11192_v24 = vcombine.low %v6626_v23, %v6630_v50  ;;  %v6635_v3 = vld [vmem:[#allocation10 + $0xc58] sm:$0xff]  ;;  %v11201_v38 = vcombine.high %v6634_v46, %v6638_v6 }
 0x5b1   :  { %9948 = vmatprep.subr.bf16.mxu1 %v11147_v44  ;;  %v6639_v44 = vld [vmem:[#allocation10 + $0xc78] sm:$0xff] }
 0x5b2   :  { %v11202_v41 = vcombine.low %v6635_v3, %v6639_v44 }
 0x5b3   :  { %9785 = vmatpush1.bf16.msra.mxu0 %v11144_v25  ;;  %v11203_v25 = vcombine.high %v6635_v3, %v6639_v44  ;;  %v6683_v44 = vld [vmem:[#allocation10 + $0xdd8] sm:$0xff] }
 0x5b4   :  { %9949 = vmatpush1.bf16.msra.mxu1 %v11146_v4  ;;  %9786 = vmatprep.subr.bf16.mxu0 %v11153_v40  ;;  %v6643_v4 = vld [vmem:[#allocation10 + $0xc98] sm:$0xff] }
 0x5b5   :  { %9950 = vmatprep.subr.bf16.mxu1 %v11155_v36  ;;  %v6647_v40 = vld [vmem:[#allocation10 + $0xcb8] sm:$0xff]  ;;  %v11200_v36 = vcombine.low %v6634_v46, %v6638_v6 }
 0x5b6   :  { %v11211_v20 = vcombine.high %v6643_v4, %v6647_v40 }
 0x5b7   :  { %9787 = vmatpush1.bf16.msra.mxu0 %v11152_v42  ;;  %v6654_v42 = vld [vmem:[#allocation10 + $0xcf0] sm:$0xff] }
 0x5b8   :  { %9951 = vmatpush1.bf16.msra.mxu1 %v11154_v32  ;;  %9788 = vmatprep.subr.bf16.mxu0 %v11161_v10  ;;  %v6651_v32 = vld [vmem:[#allocation10 + $0xcd8] sm:$0xff]  ;;  %v11217_v47 = vcombine.high %v6650_v33, %v6654_v42 }
 0x5b9   :  { %9952 = vmatprep.subr.bf16.mxu1 %v11163_v22  ;;  %v6655_v10 = vld [vmem:[#allocation10 + $0xcf8] sm:$0xff]  ;;  %v11208_v22 = vcombine.low %v6642_v61, %v6646_v62  ;;  %v11240_v62 = vcombine.low %v6674_v34, %v6678_v14 }
 0x5ba   :  { %v11219_v57 = vcombine.high %v6651_v32, %v6655_v10 }
 0x5bb   :  { %9789 = vmatpush1.bf16.msra.mxu0 %v11160_v9  ;;  %v6659_v9 = vld [vmem:[#allocation10 + $0xd18] sm:$0xff] }
 0x5bc   :  { %9953 = vmatpush1.bf16.msra.mxu1 %v11162_v35  ;;  %9790 = vmatprep.subr.bf16.mxu0 %v11169_v53  ;;  %v6663_v35 = vld [vmem:[#allocation10 + $0xd38] sm:$0xff]  ;;  %v11218_v53 = vcombine.low %v6651_v32, %v6655_v10 }
 0x5bd   :  { %9954 = vmatprep.subr.bf16.mxu1 %v11171_v43  ;;  %v11225_v43 = vcombine.high %v6658_v21, %v6662_v18  ;;  %v11227_v58 = vcombine.high %v6659_v9, %v6663_v35 }
 0x5bf   :  { %9791 = vmatpush1.bf16.msra.mxu0 %v11168_v37  ;;  %v6671_v37 = vld [vmem:[#allocation10 + $0xd78] sm:$0xff] }
 0x5c0   :  { %9955 = vmatpush1.bf16.msra.mxu1 %v11170_v49  ;;  %9792 = vmatprep.subr.bf16.mxu0 %v11177_v5  ;;  %v11224_v49 = vcombine.low %v6658_v21, %v6662_v18  ;;  %v12127_v5 = vld [vmem:[#allocation11] sm:$0xff]  ;;  %v11235_v13 = vcombine.high %v6667_v63, %v6671_v37  ;;  %v11234_v54 = vcombine.low %v6667_v63, %v6671_v37  ;;  %v6699_v21 = vld [vmem:[#allocation10 + $0xe58] sm:$0xff] }
 0x5c1   :  { %9956 = vmatprep.subr.bf16.mxu1 %v11179_v7  ;;  %v11226_v7 = vcombine.low %v6659_v9, %v6663_v35  ;;  %v6761_v23 = vrot.slane %v12127_v5, %v11822_v12  ;;  %v6769_v50 = vrot.slane %v12127_v5, %v11825_v48  ;;  %v6687_v12 = vld [vmem:[#allocation10 + $0xdf8] sm:$0xff] }
 0x5c2   :  { %v11250_v10 = vcombine.low %v6683_v44, %v6687_v12  ;;  %v6703_v18 = vld [vmem:[#allocation10 + $0xe78] sm:$0xff] }
 0x5c3   :  { %9793 = vmatpush1.bf16.msra.mxu0 %v11176_v26  ;;  %v6757_v26 = vrot.slane %v12127_v5, %v11817_v45  ;;  %v11266_v37 = vcombine.low %v6699_v21, %v6703_v18 }
 0x5c4   :  { %9957 = vmatpush1.bf16.msra.mxu1 %v11178_v27  ;;  %9794 = vmatprep.subr.bf16.mxu0 %v11185_v28  ;;  %v6765_v27 = vrot.slane %v12127_v5, %v11865_v2  ;;  %v6675_v28 = vld [vmem:[#allocation10 + $0xd98] sm:$0xff]  ;;  %v6686_v2 = vld [vmem:[#allocation10 + $0xdf0] sm:$0xff] }
 0x5c5   :  { %9958 = vmatprep.subr.bf16.mxu1 %v11187_v17  ;;  %v6679_v17 = vld [vmem:[#allocation10 + $0xdb8] sm:$0xff] }
 0x5c6   :  { %v11243_v45 = vcombine.high %v6675_v28, %v6679_v17 }
 0x5c7   :  { %9795 = vmatpush1.bf16.msra.mxu0 %v11184_v55  ;;  %v11241_v55 = vcombine.high %v6674_v34, %v6678_v14  ;;  %v6715_v34 = vld [vmem:[#allocation10 + $0xed8] sm:$0xff] }
 0x5c8   :  { %9959 = vmatpush1.bf16.msra.mxu1 %v11186_v29  ;;  %9805 = vmatprep.subr.bf16.mxu0 %v11193_v30  ;;  %v6719_v14 = vld [vmem:[#allocation10 + $0xef8] sm:$0xff] }
 0x5c9   :  { %9969 = vmatprep.subr.bf16.mxu1 %v11195_v16  ;;  %v6682_v16 = vld [vmem:[#allocation10 + $0xdd0] sm:$0xff] }
 0x5ca   :  { %9797 = vmatmul.mubr.bf16.vlgmr.msra.gmra.mrb[20].mxu0 %v12088_v1  ;;  %v11248_v32 = vcombine.low %v6682_v16, %v6686_v2 }
 0x5cb   :  { %9961 = vmatmul.mubr.bf16.vlgmr.msra.gmra.mrb[20].mxu1 %v12088_v1  ;;  %9806 = vmatpush1.bf16.msra.mxu0 %v11192_v24  ;;  %v11210_v1 = vcombine.low %v6643_v4, %v6647_v40  ;;  %v11242_v40 = vcombine.low %v6675_v28, %v6679_v17  ;;  %v11283_v17 = vcombine.high %v6715_v34, %v6719_v14 }
 0x5cc   :  { %9837 = vmatprep.mubr.bf16.mxu0 %v12094_v8  ;;  %9970 = vmatpush1.bf16.msra.mxu1 %v11194_v60 }
 0x5cd   :  { %10001 = vmatprep.mubr.bf16.mxu1 %v12094_v8  ;;  %9807 = vmatprep.subr.bf16.mxu0 %v11201_v38  ;;  %v11216_v8 = vcombine.low %v6650_v33, %v6654_v42  ;;  %v6691_v33 = vld [vmem:[#allocation10 + $0xe18] sm:$0xff] }
 0x5ce   :  { %9971 = vmatprep.subr.bf16.mxu1 %v11203_v25  ;;  %v6695_v42 = vld [vmem:[#allocation10 + $0xe38] sm:$0xff] }
 0x5cf   :  { %9808 = vmatpush1.bf16.msra.mxu0 %v11200_v36  ;;  %v11249_v36 = vcombine.high %v6682_v16, %v6686_v2  ;;  %v11258_v35 = vcombine.low %v6691_v33, %v6695_v42  ;;  %v6730_v16 = vld [vmem:[#allocation10 + $0xf50] sm:$0xff] }
 0x5d0   :  { %9972 = vmatpush1.bf16.msra.mxu1 %v11202_v41  ;;  %9809 = vmatprep.subr.bf16.mxu0 %v11209_v56  ;;  %v11251_v41 = vcombine.high %v6683_v44, %v6687_v12  ;;  %v6690_v56 = vld [vmem:[#allocation10 + $0xe10] sm:$0xff] }
 0x5d1   :  { %9973 = vmatprep.subr.bf16.mxu1 %v11211_v20  ;;  %v6694_v20 = vld [vmem:[#allocation10 + $0xe30] sm:$0xff] }
 0x5d2   :  { %v11256_v9 = vcombine.low %v6690_v56, %v6694_v20  ;;  %v6734_v2 = vld [vmem:[#allocation10 + $0xf70] sm:$0xff] }
 0x5d3   :  { %9810 = vmatpush1.bf16.msra.mxu0 %v11208_v22  ;;  %v11257_v22 = vcombine.high %v6690_v56, %v6694_v20  ;;  %v11297_v44 = vcombine.high %v6730_v16, %v6734_v2  ;;  %v6747_v56 = vld [vmem:[#allocation10 + $0xfd8] sm:$0xff] }
 0x5d4   :  { %9974 = vmatpush1.bf16.msra.mxu1 %v11210_v1  ;;  %9811 = vmatprep.subr.bf16.mxu0 %v11217_v47  ;;  %v11259_v1 = vcombine.high %v6691_v33, %v6695_v42  ;;  %v6698_v47 = vld [vmem:[#allocation10 + $0xe50] sm:$0xff]  ;;  %v6751_v20 = vld [vmem:[#allocation10 + $0xff8] sm:$0xff] }
 0x5d5   :  { %9975 = vmatprep.subr.bf16.mxu1 %v11219_v57  ;;  %v6702_v57 = vld [vmem:[#allocation10 + $0xe70] sm:$0xff] }
 0x5d6   :  { %v11264_v63 = vcombine.low %v6698_v47, %v6702_v57 }
 0x5d7   :  { %9812 = vmatpush1.bf16.msra.mxu0 %v11216_v8  ;;  %v11265_v8 = vcombine.high %v6698_v47, %v6702_v57  ;;  %v6773_v47 = vrot.slane %v12127_v5, %v11908_v0  ;;  %v6781_v57 = vrot.slane %v12127_v5, %v11949_v39 }
 0x5d8   :  { %9976 = vmatpush1.bf16.msra.mxu1 %v11218_v53  ;;  %9813 = vmatprep.subr.bf16.mxu0 %v11225_v43  ;;  %v11267_v53 = vcombine.high %v6699_v21, %v6703_v18  ;;  %v6706_v43 = vld [vmem:[#allocation10 + $0xe90] sm:$0xff]  ;;  %v6777_v21 = vrot.slane %v12127_v5, %v11911_v15  ;;  %v6785_v18 = vrot.slane %v12127_v5, %v11914_v19 }
 0x5d9   :  { %9977 = vmatprep.subr.bf16.mxu1 %v11227_v58  ;;  %v6710_v58 = vld [vmem:[#allocation10 + $0xeb0] sm:$0xff] }
 0x5db   :  { %9814 = vmatpush1.bf16.msra.mxu0 %v11224_v49  ;;  %v11273_v49 = vcombine.high %v6706_v43, %v6710_v58 }
 0x5dc   :  { %9978 = vmatpush1.bf16.msra.mxu1 %v11226_v7  ;;  %9815 = vmatprep.subr.bf16.mxu0 %v11233_v11  ;;  %v11275_v7 = vcombine.high %v6707_v59, %v6711_v31  ;;  %v6714_v11 = vld [vmem:[#allocation10 + $0xed0] sm:$0xff] }
 0x5dd   :  { %v9511_v29 = vpop.f32.mrb[16].mxu0  ;;  %v9675_v30 = vpop.f32.mrb[16].mxu1  ;;  %9979 = vmatprep.subr.bf16.mxu1 %v11235_v13  ;;  %v6718_v13 = vld [vmem:[#allocation10 + $0xef0] sm:$0xff] }
 0x5de   :  { %v11316_v46 = vadd.f32 %v9511_v29, %v6757_v26  ;;  %v11318_v6 = vadd.f32 %v9675_v30, %v6765_v27  ;;  %v9513_v24 = vpop.f32.mrb[17].mxu0  ;;  %v9677_v3 = vpop.f32.mrb[17].mxu1  ;;  %v11272_v26 = vcombine.low %v6706_v43, %v6710_v58  ;;  %v11274_v27 = vcombine.low %v6707_v59, %v6711_v31 }
 0x5df   :  { %v11317_v60 = vadd.f32 %v9513_v24, %v6761_v23  ;;  %v11319_v38 = vadd.f32 %v9677_v3, %v6769_v50  ;;  %v9515_v48 = vpop.f32.mrb[18].mxu0  ;;  %v9679_v61 = vpop.f32.mrb[18].mxu1  ;;  %9816 = vmatpush1.bf16.msra.mxu0 %v11232_v51  ;;  %v11281_v28 = vcombine.high %v6714_v11, %v6718_v13  ;;  %v6722_v23 = vld [vmem:[#allocation10 + $0xf10] sm:$0xff]  ;;  %v6723_v51 = vld [vmem:[#allocation10 + $0xf18] sm:$0xff]  ;;  %v11282_v29 = vcombine.low %v6715_v34, %v6719_v14 }
 0x5e0   :  { %10010 = vst [vmem:[#allocation13] sm:$0xff] %v11316_v46  ;;  %10012 = vst [vmem:[#allocation13 + $0x10] sm:$0xff] %v11318_v6  ;;  %9980 = vmatpush1.bf16.msra.mxu1 %v11234_v54  ;;  %v9516_v25 = vpop.f32.mrb[19].mxu0  ;;  %v9680_v4 = vpop.f32.mrb[19].mxu1  ;;  %9817 = vmatprep.subr.bf16.mxu0 %v11241_v55  ;;  %v6726_v50 = vld [vmem:[#allocation10 + $0xf30] sm:$0xff]  ;;  %v6727_v54 = vld [vmem:[#allocation10 + $0xf38] sm:$0xff]  ;;  %v11280_v55 = vcombine.low %v6714_v11, %v6718_v13 }
 0x5e1   :  { %10011 = vst [vmem:[#allocation13 + $0x8] sm:$0xff] %v11317_v60  ;;  %10013 = vst [vmem:[#allocation13 + $0x18] sm:$0xff] %v11319_v38  ;;  %9981 = vmatprep.subr.bf16.mxu1 %v11243_v45  ;;  %v11289_v30 = vcombine.high %v6722_v23, %v6726_v50  ;;  %v11291_v45 = vcombine.high %v6723_v51, %v6727_v54  ;;  %v6731_v46 = vld [vmem:[#allocation10 + $0xf58] sm:$0xff]  ;;  %v11288_v24 = vcombine.low %v6722_v23, %v6726_v50  ;;  %v6738_v60 = vld [vmem:[#allocation10 + $0xf90] sm:$0xff] }
 0x5e2   :  { %v6735_v6 = vld [vmem:[#allocation10 + $0xf78] sm:$0xff]  ;;  %v11290_v3 = vcombine.low %v6723_v51, %v6727_v54  ;;  %v6742_v38 = vld [vmem:[#allocation10 + $0xfb0] sm:$0xff] }
 0x5e3   :  { %9818 = vmatpush1.bf16.msra.mxu0 %v11240_v62  ;;  %v11299_v12 = vcombine.high %v6731_v46, %v6735_v6  ;;  %v6739_v48 = vld [vmem:[#allocation10 + $0xf98] sm:$0xff]  ;;  %v11296_v62 = vcombine.low %v6730_v16, %v6734_v2  ;;  %v11298_v25 = vcombine.low %v6731_v46, %v6735_v6  ;;  %v11305_v4 = vcombine.high %v6738_v60, %v6742_v38 }
 0x5e4   :  { %9982 = vmatpush1.bf16.msra.mxu1 %v11242_v40  ;;  %9819 = vmatprep.subr.bf16.mxu0 %v11249_v36  ;;  %v6743_v61 = vld [vmem:[#allocation10 + $0xfb8] sm:$0xff]  ;;  %v6746_v36 = vld [vmem:[#allocation10 + $0xfd0] sm:$0xff]  ;;  %v11304_v33 = vcombine.low %v6738_v60, %v6742_v38 }
 0x5e5   :  { %9983 = vmatprep.subr.bf16.mxu1 %v11251_v41  ;;  %v11307_v40 = vcombine.high %v6739_v48, %v6743_v61  ;;  %v6750_v41 = vld [vmem:[#allocation10 + $0xff0] sm:$0xff]  ;;  %v11306_v42 = vcombine.low %v6739_v48, %v6743_v61 }
 0x5e7   :  { %9820 = vmatpush1.bf16.msra.mxu0 %v11248_v32  ;;  %v11313_v32 = vcombine.high %v6746_v36, %v6750_v41 }
 0x5e8   :  { %9984 = vmatpush1.bf16.msra.mxu1 %v11250_v10  ;;  %9821 = vmatprep.subr.bf16.mxu0 %v11257_v22  ;;  %v11315_v10 = vcombine.high %v6747_v56, %v6751_v20  ;;  %v11312_v22 = vcombine.low %v6746_v36, %v6750_v41 }
 0x5e9   :  { %9985 = vmatprep.subr.bf16.mxu1 %v11259_v1  ;;  %v11314_v1 = vcombine.low %v6747_v56, %v6751_v20 }
 0x5eb   :  { %9822 = vmatpush1.bf16.msra.mxu0 %v11256_v9 }
 0x5ec   :  { %9986 = vmatpush1.bf16.msra.mxu1 %v11258_v35  ;;  %9823 = vmatprep.subr.bf16.mxu0 %v11265_v8 }
 0x5ed   :  { %9987 = vmatprep.subr.bf16.mxu1 %v11267_v53 }
 0x5ef   :  { %9824 = vmatpush1.bf16.msra.mxu0 %v11264_v63 }
 0x5f0   :  { %9988 = vmatpush1.bf16.msra.mxu1 %v11266_v37  ;;  %9825 = vmatprep.subr.bf16.mxu0 %v11273_v49 }
 0x5f1   :  { %9989 = vmatprep.subr.bf16.mxu1 %v11275_v7 }
 0x5f3   :  { %9826 = vmatpush1.bf16.msra.mxu0 %v11272_v26 }
 0x5f4   :  { %9990 = vmatpush1.bf16.msra.mxu1 %v11274_v27  ;;  %9827 = vmatprep.subr.bf16.mxu0 %v11281_v28 }
 0x5f5   :  { %9991 = vmatprep.subr.bf16.mxu1 %v11283_v17 }
 0x5f7   :  { %9828 = vmatpush1.bf16.msra.mxu0 %v11280_v55 }
 0x5f8   :  { %9992 = vmatpush1.bf16.msra.mxu1 %v11282_v29  ;;  %9829 = vmatprep.subr.bf16.mxu0 %v11289_v30 }
 0x5f9   :  { %9993 = vmatprep.subr.bf16.mxu1 %v11291_v45 }
 0x5fb   :  { %9830 = vmatpush1.bf16.msra.mxu0 %v11288_v24 }
 0x5fc   :  { %9994 = vmatpush1.bf16.msra.mxu1 %v11290_v3  ;;  %9831 = vmatprep.subr.bf16.mxu0 %v11297_v44 }
 0x5fd   :  { %9995 = vmatprep.subr.bf16.mxu1 %v11299_v12 }
 0x5ff   :  { %9832 = vmatpush1.bf16.msra.mxu0 %v11296_v62 }
 0x600   :  { %9996 = vmatpush1.bf16.msra.mxu1 %v11298_v25  ;;  %9833 = vmatprep.subr.bf16.mxu0 %v11305_v4 }
 0x601   :  { %9997 = vmatprep.subr.bf16.mxu1 %v11307_v40 }
 0x603   :  { %9834 = vmatpush1.bf16.msra.mxu0 %v11304_v33 }
 0x604   :  { %9998 = vmatpush1.bf16.msra.mxu1 %v11306_v42  ;;  %9835 = vmatprep.subr.bf16.mxu0 %v11313_v32 }
 0x605   :  { %9999 = vmatprep.subr.bf16.mxu1 %v11315_v10 }
 0x607   :  { %9836 = vmatpush1.bf16.msra.mxu0 %v11312_v22 }
 0x608   :  { %10000 = vmatpush1.bf16.msra.mxu1 %v11314_v1 }
 0x60a   :  { %9838 = vmatmul.mubr.bf16.vlgmr.msra.gmra.mrb[20].mxu0 %v12109_v52 }
 0x60b   :  { %10002 = vmatmul.mubr.bf16.vlgmr.msra.gmra.mrb[20].mxu1 %v12109_v52 }
 0x6dd   :  { %v9839_v9 = vpop.f32.mrb[20].mxu0 }
 0x6de   :  { %v11320_v35 = vadd.f32 %v9839_v9, %v6773_v47  ;;  %v10003_v8 = vpop.f32.mrb[20].mxu1  ;;  %v9841_v53 = vpop.f32.mrb[21].mxu0 }
 0x6df   :  { %v11322_v43 = vadd.f32 %v10003_v8, %v6781_v57  ;;  %v11321_v52 = vadd.f32 %v9841_v53, %v6777_v21  ;;  %v10005_v58 = vpop.f32.mrb[21].mxu1  ;;  %v9843_v59 = vpop.f32.mrb[22].mxu0 }
 0x6e0   :  { %10014 = vst [vmem:[#allocation13 + $0x20] sm:$0xff] %v11320_v35  ;;  %v11323_v0 = vadd.f32 %v10005_v58, %v6785_v18  ;;  %v10007_v31 = vpop.f32.mrb[22].mxu1  ;;  %v9844_v39 = vpop.f32.mrb[23].mxu0 }
 0x6e1   :  { %10016 = vst [vmem:[#allocation13 + $0x30] sm:$0xff] %v11322_v43  ;;  %10015 = vst [vmem:[#allocation13 + $0x28] sm:$0xff] %v11321_v52  ;;  %v10008_v15 = vpop.f32.mrb[23].mxu1 }
 0x6e2   :  { %10017 = vst [vmem:[#allocation13 + $0x38] sm:$0xff] %v11323_v0 }
 0x6e3   :  { %11624 = shalt.err (!%p11621_p10)
}
 0x6e4   :  { %s11625_s0 = scalar_lea.hbm %s12165_s6, 1024 }
 0x6e5   :  { %p11626_p11 = scmp.ne.s32.totalorder %s12165_s6, %s11625_s0  ;;  %p11629_p12 = scmp.lt.u32.totalorder %s11625_s0, %s12165_s6 }
 0x6e7   :  { %p11631_p13 = pnand %p11629_p12, %p11626_p11 }
 0x6e9   :  { %11634 = shalt.err (!%p11631_p13)
}
 0x6ea   :  { %10027 = dma.vmem_to_hbm [thread:$0]  %s10025_s8, 1024, %s12165_s6, [#allocation4]  }
 0x6eb   :  { %11643 = dma.done.wait [#allocation4], 1024  }
 0x6ec   :  { %11644 = vsyncadd [#allocation4], 4294966272 }
 0x6ed   :  { %10031 = vsyncpa [#allocation3], 1 }
 0x6ee   :  { %10032 = vsyncpa [#allocation6], 1 }
 0x6ef   :  { %10033 = vsyncpa [#allocation9], 1 }
 0x6f0   :  { %10034 = vsyncpa [#allocation12], 1 }
 0x6f1   :  { %10035 = vsyncpa [#allocation4], 1 }

</bundles_post_ra>
